<compile_context>
chip_gen: v5e
topology: v5e:2x2
jax: 0.10.0
libtpu: 0.0.40
codegen_flags: <defaults>
</compile_context>

<pallas_src>
import functools

import jax
import jax.numpy as jnp
from jax import lax
from jax.experimental import pallas as pl
from jax.experimental.pallas import tpu as pltpu


def _self_attention_kernel(q_ref, k_ref, v_ref,
                           wq_ref, bq_ref,
                           wk_ref, bk_ref,
                           wv_ref, bv_ref,
                           wo_ref, bo_ref,
                           o_ref,
                           qs_ref, m_ref, l_ref, acc_ref,
                           *, inv_scale: float, head_dim: int,
                           heads_per_block: int):
    hblk = pl.program_id(2)
    kv = pl.program_id(3)
    n_kv = pl.num_programs(3)
    d = head_dim
    hb = heads_per_block
    bf16 = jnp.bfloat16

    # --- per-(b, q_tile, head_block) init: Q projection (scale folded in)
    #     + online-softmax state.
    @pl.when(kv == 0)
    def _init():
        q = q_ref[0]                                              # (Tq, H) bf16
        qp = jnp.dot(q, wq_ref[...], preferred_element_type=jnp.float32)
        qp = (qp + bq_ref[...]) * inv_scale                       # (Tq, hb*d) f32
        qs_ref[...] = qp.astype(qs_ref.dtype)
        m_ref[...] = jnp.full_like(m_ref, -jnp.inf)
        l_ref[...] = jnp.zeros_like(l_ref)
        acc_ref[...] = jnp.zeros_like(acc_ref)

    # --- K/V projections for this KV tile: full hb*d-wide MXU output.
    k_t = k_ref[0]                                                # (Tkv, H) bf16
    v_t = v_ref[0]
    kp = (jnp.dot(k_t, wk_ref[...], preferred_element_type=jnp.float32)
          + bk_ref[...]).astype(bf16)                             # (Tkv, hb*d)
    vp = (jnp.dot(v_t, wv_ref[...], preferred_element_type=jnp.float32)
          + bv_ref[...]).astype(bf16)

    # --- online softmax update per packed head (static slices at d=128 lanes).
    for hh in range(hb):
        sl = slice(hh * d, (hh + 1) * d)
        s = lax.dot_general(qs_ref[:, sl], kp[:, sl],
                            dimension_numbers=(((1,), (1,)), ((), ())),
                            preferred_element_type=jnp.float32)   # (Tq, Tkv)
        m_prev = m_ref[hh]                                        # (Tq, 1)
        m_new = jnp.maximum(m_prev, jnp.max(s, axis=-1, keepdims=True))
        alpha = jnp.exp(m_prev - m_new)
        p = jnp.exp(s - m_new)
        l_ref[hh] = alpha * l_ref[hh] + jnp.sum(p, axis=-1, keepdims=True)
        acc_ref[hh] = alpha * acc_ref[hh] + jnp.dot(
            p.astype(bf16), vp[:, sl], preferred_element_type=jnp.float32)
        m_ref[hh] = m_new

    # --- finalize this head block: normalize, project, accumulate into the
    #     resident f32 output block (no separate oacc scratch).
    @pl.when(kv == n_kv - 1)
    def _finalize():
        contrib = None
        for hh in range(hb):
            ctx = acc_ref[hh] * pl.reciprocal(l_ref[hh], approx=True)   # (Tq, d)
            piece = jnp.dot(ctx.astype(bf16), wo_ref[hh * d:(hh + 1) * d, :],
                            preferred_element_type=jnp.float32)          # (Tq, H)
            contrib = piece if contrib is None else contrib + piece

        @pl.when(hblk == 0)
        def _():
            o_ref[0] = jnp.broadcast_to(bo_ref[...], o_ref.shape[1:])

        o_ref[0] = o_ref[0] + contrib


def _pick_block(total: int, target: int) -> int:
    """Largest divisor of `total` that is <= target and a multiple of 16,
    falling back to the full extent."""
    if total <= target:
        return total
    for t in range(target, 15, -1):
        if total % t == 0 and t % 16 == 0:
            return t
    return total


def self_attention_pallas(query, key, value, params, n_heads, *,
                          q_block=None, kv_block=None, heads_per_block=None,
                          vmem_limit_bytes=None):
    """query/key/value: (B, S, H). params: (in,out) weights + (1,H) biases."""
    B, S, H = query.shape
    assert key.shape == (B, S, H) and value.shape == (B, S, H)
    assert H % n_heads == 0
    d = H // n_heads
    # Per-head weight column slices must be lane-dense on the last dim.
    assert n_heads == 1 or d % 128 == 0, "head_dim must be a multiple of 128"

    # Pack 2 heads per grid step when d == 128 so projections / P@V fill the
    # 256-wide MXU on v6e/v7x (and halve per-head K/V re-fetch).
    if heads_per_block is None:
        heads_per_block = 2 if (n_heads % 2 == 0 and d == 128) else 1
    hb = heads_per_block
    assert n_heads % hb == 0
    n_hblk = n_heads // hb

    try:
        vmem_cap = int(pltpu.get_tpu_info().vmem_capacity_bytes)
    except Exception:  # pragma: no cover - conservative fallback
        vmem_cap = 64 * 1024 * 1024

    if q_block is None:
        q_block = _pick_block(S, 512)
    if kv_block is None:
        kv_block = _pick_block(S, 1024 if vmem_cap >= (100 << 20) else 512)
    assert S % q_block == 0 and (q_block == S or q_block % 16 == 0)
    assert S % kv_block == 0 and (kv_block == S or kv_block % 16 == 0)
    n_q = S // q_block
    n_kv = S // kv_block
    inv_scale = 1.0 / (float(d) ** 0.5)

    # VMEM budget: double-buffered input/output blocks + scratch + headroom,
    # clamped to 90% of the device's physical VMEM.
    def _estimate():
        b = 2 * q_block * H * 2                 # Q block (bf16, 2 buffers)
        b += 2 * 2 * kv_block * H * 2           # K, V blocks
        b += 2 * 3 * H * hb * d * 2             # wq/wk/wv slices
        b += 2 * hb * d * H * 2                 # wo slice
        b += 2 * 5 * H * 4                      # biases (generous)
        b += 2 * q_block * H * 4                # output block (f32)
        b += q_block * hb * d * 2               # qs scratch
        b += 2 * hb * q_block * 128 * 4         # m, l (lane-padded)
        b += hb * q_block * d * 4               # acc
        return b
    if vmem_limit_bytes is None:
        vmem_limit_bytes = int(min(max(_estimate() + (16 << 20), 32 << 20),
                                   int(vmem_cap * 0.9)))

    bf16 = jnp.bfloat16
    q_b, k_b, v_b = query.astype(bf16), key.astype(bf16), value.astype(bf16)
    wq, wk = params["wq"].astype(bf16), params["wk"].astype(bf16)
    wv, wo = params["wv"].astype(bf16), params["wo"].astype(bf16)
    bq = params["bq"].astype(jnp.float32)
    bk = params["bk"].astype(jnp.float32)
    bv = params["bv"].astype(jnp.float32)
    bo = params["bo"].astype(jnp.float32)

    kernel = functools.partial(_self_attention_kernel, inv_scale=inv_scale,
                               head_dim=d, heads_per_block=hb)

    q_spec = pl.BlockSpec((1, q_block, H), lambda b, q, h, k: (b, q, 0))
    kv_spec = pl.BlockSpec((1, kv_block, H), lambda b, q, h, k: (b, k, 0))
    w_in_spec = pl.BlockSpec((H, hb * d), lambda b, q, h, k: (0, h))   # column slice
    b_in_spec = pl.BlockSpec((1, hb * d), lambda b, q, h, k: (0, h))
    w_out_spec = pl.BlockSpec((hb * d, H), lambda b, q, h, k: (h, 0))  # row slice
    b_out_spec = pl.BlockSpec((1, H), lambda b, q, h, k: (0, 0))
    out_spec = pl.BlockSpec((1, q_block, H), lambda b, q, h, k: (b, q, 0))

    out_f32 = pl.pallas_call(
        kernel,
        out_shape=jax.ShapeDtypeStruct((B, S, H), jnp.float32),
        grid_spec=pltpu.PrefetchScalarGridSpec(
            num_scalar_prefetch=0,
            grid=(B, n_q, n_hblk, n_kv),
            in_specs=[q_spec, kv_spec, kv_spec,
                      w_in_spec, b_in_spec,      # w_q
                      w_in_spec, b_in_spec,      # w_k
                      w_in_spec, b_in_spec,      # w_v
                      w_out_spec, b_out_spec],   # fc
            out_specs=out_spec,
            scratch_shapes=[
                pltpu.VMEM((q_block, hb * d), jnp.bfloat16),  # scaled Q projection
                pltpu.VMEM((hb, q_block, 1), jnp.float32),    # running max
                pltpu.VMEM((hb, q_block, 1), jnp.float32),    # running denominator
                pltpu.VMEM((hb, q_block, d), jnp.float32),    # per-head context acc
            ]),
        compiler_params=pltpu.CompilerParams(
            dimension_semantics=("parallel", "parallel", "arbitrary", "arbitrary"),
            vmem_limit_bytes=vmem_limit_bytes),
    )(q_b, k_b, v_b, wq, bq, wk, bk, wv, bv, wo, bo)

    return out_f32.astype(query.dtype)


def _reference(query, key, value, params, n_heads):
    """Pure-JAX f32 reference mirroring the PyTorch forward (mask=None, eval dropout)."""
    B, S, H = query.shape
    d = H // n_heads
    scale = jnp.sqrt(jnp.float32(d))

    def proj(x, w, b):
        return jnp.einsum('bsh,ho->bso', x, w) + b[0]

    Q = proj(query, params["wq"], params["bq"]).reshape(B, S, n_heads, d).transpose(0, 2, 1, 3)
    K = proj(key,   params["wk"], params["bk"]).reshape(B, S, n_heads, d).transpose(0, 2, 1, 3)
    V = proj(value, params["wv"], params["bv"]).reshape(B, S, n_heads, d).transpose(0, 2, 1, 3)
    energy = jnp.einsum('bhqd,bhkd->bhqk', Q, K) / scale
    attn = jax.nn.softmax(energy, axis=-1)
    x = jnp.einsum('bhqk,bhkd->bhqd', attn, V).transpose(0, 2, 1, 3).reshape(B, S, H)
    return jnp.einsum('bsh,ho->bso', x, params["wo"]) + params["bo"][0]


if __name__ == "__main__":
    # head_dim = 128 -> 2-heads-per-step MXU packing; q_block = kv_block = 128
    # gives 2 Q tiles, 2 KV tiles and 2 head blocks so Q-tiling, the online
    # softmax and the cross-head accumulation into o_ref are all exercised.
    B, S, H, N_HEADS = 2, 256, 512, 4
    Q_BLOCK, KV_BLOCK = 128, 128

    key0 = jax.random.PRNGKey(0)
    keys = jax.random.split(key0, 12)

    # Deterministic parameter init (Linear weights stored pre-transposed: (in, out)).
    def lin_init(kw, kb, fan_in, fan_out):
        bound = 1.0 / (fan_in ** 0.5)
        w = jax.random.uniform(kw, (fan_in, fan_out), jnp.float32, -bound, bound)
        b = jax.random.uniform(kb, (1, fan_out), jnp.float32, -bound, bound)
        return w, b

    wq, bq = lin_init(keys[0], keys[1], H, H)
    wk, bk = lin_init(keys[2], keys[3], H, H)
    wv, bv = lin_init(keys[4], keys[5], H, H)
    wo, bo = lin_init(keys[6], keys[7], H, H)
    params = dict(wq=wq, bq=bq, wk=wk, bk=bk, wv=wv, bv=bv, wo=wo, bo=bo)

    query = jax.random.normal(keys[8], (B, S, H), jnp.float32)
    key_t = jax.random.normal(keys[9], (B, S, H), jnp.float32)
    value = jax.random.normal(keys[10], (B, S, H), jnp.float32)

    out = self_attention_pallas(query, key_t, value, params, N_HEADS,
                                q_block=Q_BLOCK, kv_block=KV_BLOCK)
    out = jax.block_until_ready(out)

    ref = _reference(query, key_t, value, params, N_HEADS)
    assert out.shape == (B, S, H)
    # bf16 MXU operands + approximate reciprocal -> compare against f32 reference
    # with a bf16-appropriate tolerance.
    assert jnp.allclose(out, ref, atol=2e-2, rtol=2e-2), "mismatch vs reference"

    print("KERNEL_OK")
</pallas_src>

<mosaic_0001>
module attributes {stable_mosaic.version = 11 : i64} {
  func.func @_self_attention_kernel(%arg0: i32, %arg1: i32, %arg2: i32, %arg3: i32, %arg4: memref<1x128x512xbf16, #tpu.memory_space<vmem>>, %arg5: memref<1x128x512xbf16, #tpu.memory_space<vmem>>, %arg6: memref<1x128x512xbf16, #tpu.memory_space<vmem>>, %arg7: memref<512x256xbf16, #tpu.memory_space<vmem>>, %arg8: memref<1x256xf32, #tpu.memory_space<vmem>>, %arg9: memref<512x256xbf16, #tpu.memory_space<vmem>>, %arg10: memref<1x256xf32, #tpu.memory_space<vmem>>, %arg11: memref<512x256xbf16, #tpu.memory_space<vmem>>, %arg12: memref<1x256xf32, #tpu.memory_space<vmem>>, %arg13: memref<256x512xbf16, #tpu.memory_space<vmem>>, %arg14: memref<1x512xf32, #tpu.memory_space<vmem>>, %arg15: memref<1x128x512xf32, #tpu.memory_space<vmem>>, %arg16: memref<128x256xbf16, #tpu.memory_space<vmem>>, %arg17: memref<2x128x1xf32, #tpu.memory_space<vmem>>, %arg18: memref<2x128x1xf32, #tpu.memory_space<vmem>>, %arg19: memref<2x128x128xf32, #tpu.memory_space<vmem>>) attributes {dimension_semantics = [#tpu.dimension_semantics<parallel>, #tpu.dimension_semantics<parallel>, #tpu.dimension_semantics<arbitrary>, #tpu.dimension_semantics<arbitrary>], iteration_bounds = array<i64: 2, 2, 2, 2>, scalar_prefetch = 0 : i64, scratch_operands = 4 : i64, tpu.core_type = #tpu.core_type<tc>, window_params = [{transform_indices = @transform_0, window_bounds = array<i64: 1, 128, 512>}, {transform_indices = @transform_1, window_bounds = array<i64: 1, 128, 512>}, {transform_indices = @transform_2, window_bounds = array<i64: 1, 128, 512>}, {transform_indices = @transform_3, window_bounds = array<i64: 512, 256>}, {transform_indices = @transform_4, window_bounds = array<i64: 1, 256>}, {transform_indices = @transform_5, window_bounds = array<i64: 512, 256>}, {transform_indices = @transform_6, window_bounds = array<i64: 1, 256>}, {transform_indices = @transform_7, window_bounds = array<i64: 512, 256>}, {transform_indices = @transform_8, window_bounds = array<i64: 1, 256>}, {transform_indices = @transform_9, window_bounds = array<i64: 256, 512>}, {pipeline_mode = #tpu.pipeline_mode<synchronous>, transform_indices = @transform_10, window_bounds = array<i64: 1, 512>}, {transform_indices = @transform_11, window_bounds = array<i64: 1, 128, 512>}]} {
    %c0_i32 = arith.constant 0 : i32
    %0 = arith.cmpi eq, %arg3, %c0_i32 : i32
    %1 = arith.extui %0 : i1 to i32
    %c0_i32_0 = arith.constant 0 : i32
    %2 = arith.cmpi ne, %1, %c0_i32_0 : i32
    scf.if %2 {
      %c0_62 = arith.constant 0 : index
      %c0_63 = arith.constant 0 : index
      %c0_64 = arith.constant 0 : index
      %94 = vector.load %arg4[%c0_62, %c0_63, %c0_64] : memref<1x128x512xbf16, #tpu.memory_space<vmem>>, vector<1x128x512xbf16>
      %95 = vector.shape_cast %94 : vector<1x128x512xbf16> to vector<128x512xbf16>
      %c0_65 = arith.constant 0 : index
      %c0_66 = arith.constant 0 : index
      %96 = vector.load %arg7[%c0_65, %c0_66] : memref<512x256xbf16, #tpu.memory_space<vmem>>, vector<512x256xbf16>
      %cst_67 = arith.constant dense<0.000000e+00> : vector<128x256xf32>
      %97 = tpu.matmul %95, %96, %cst_67 {dimension_numbers = #tpu.dot_dimension_numbers<[1], [0], [0], [1], [0, 0, 1, 1], [], []>} : vector<128x512xbf16>, vector<512x256xbf16>, vector<128x256xf32> -> vector<128x256xf32>
      %c0_68 = arith.constant 0 : index
      %c0_69 = arith.constant 0 : index
      %98 = vector.load %arg8[%c0_68, %c0_69] : memref<1x256xf32, #tpu.memory_space<vmem>>, vector<1x256xf32>
      %99 = vector.broadcast %98 : vector<1x256xf32> to vector<128x256xf32>
      %100 = arith.addf %97, %99 : vector<128x256xf32>
      %cst_70 = arith.constant 0.0883883461 : f32
      %101 = vector.broadcast %cst_70 : f32 to vector<128x256xf32>
      %102 = arith.mulf %100, %101 : vector<128x256xf32>
      %103 = arith.truncf %102 : vector<128x256xf32> to vector<128x256xbf16>
      %c0_71 = arith.constant 0 : index
      %c0_72 = arith.constant 0 : index
      %104 = vector.load %arg16[%c0_71, %c0_72] : memref<128x256xbf16, #tpu.memory_space<vmem>>, vector<128x256xbf16>
      tpu.vector_store %arg16[%c0_71, %c0_72], %103 {strides = array<i32>} : memref<128x256xbf16, #tpu.memory_space<vmem>>, vector<128x256xbf16>,
      %cst_73 = arith.constant 0xFF800000 : f32
      %105 = vector.broadcast %cst_73 : f32 to vector<2x128x1xf32>
      %c0_74 = arith.constant 0 : index
      %c0_75 = arith.constant 0 : index
      %c0_76 = arith.constant 0 : index
      %106 = vector.load %arg17[%c0_74, %c0_75, %c0_76] : memref<2x128x1xf32, #tpu.memory_space<vmem>>, vector<2x128x1xf32>
      tpu.vector_store %arg17[%c0_74, %c0_75, %c0_76], %105 {strides = array<i32>} : memref<2x128x1xf32, #tpu.memory_space<vmem>>, vector<2x128x1xf32>,
      %cst_77 = arith.constant 0.000000e+00 : f32
      %107 = vector.broadcast %cst_77 : f32 to vector<2x128x1xf32>
      %c0_78 = arith.constant 0 : index
      %c0_79 = arith.constant 0 : index
      %c0_80 = arith.constant 0 : index
      %108 = vector.load %arg18[%c0_78, %c0_79, %c0_80] : memref<2x128x1xf32, #tpu.memory_space<vmem>>, vector<2x128x1xf32>
      tpu.vector_store %arg18[%c0_78, %c0_79, %c0_80], %107 {strides = array<i32>} : memref<2x128x1xf32, #tpu.memory_space<vmem>>, vector<2x128x1xf32>,
      %cst_81 = arith.constant 0.000000e+00 : f32
      %109 = vector.broadcast %cst_81 : f32 to vector<2x128x128xf32>
      %c0_82 = arith.constant 0 : index
      %c0_83 = arith.constant 0 : index
      %c0_84 = arith.constant 0 : index
      %110 = vector.load %arg19[%c0_82, %c0_83, %c0_84] : memref<2x128x128xf32, #tpu.memory_space<vmem>>, vector<2x128x128xf32>
      tpu.vector_store %arg19[%c0_82, %c0_83, %c0_84], %109 {strides = array<i32>} : memref<2x128x128xf32, #tpu.memory_space<vmem>>, vector<2x128x128xf32>,
    } else {
    }
    %c0 = arith.constant 0 : index
    %c0_1 = arith.constant 0 : index
    %c0_2 = arith.constant 0 : index
    %3 = vector.load %arg5[%c0, %c0_1, %c0_2] : memref<1x128x512xbf16, #tpu.memory_space<vmem>>, vector<1x128x512xbf16>
    %4 = vector.shape_cast %3 : vector<1x128x512xbf16> to vector<128x512xbf16>
    %c0_3 = arith.constant 0 : index
    %c0_4 = arith.constant 0 : index
    %c0_5 = arith.constant 0 : index
    %5 = vector.load %arg6[%c0_3, %c0_4, %c0_5] : memref<1x128x512xbf16, #tpu.memory_space<vmem>>, vector<1x128x512xbf16>
    %6 = vector.shape_cast %5 : vector<1x128x512xbf16> to vector<128x512xbf16>
    %c0_6 = arith.constant 0 : index
    %c0_7 = arith.constant 0 : index
    %7 = vector.load %arg9[%c0_6, %c0_7] : memref<512x256xbf16, #tpu.memory_space<vmem>>, vector<512x256xbf16>
    %cst = arith.constant dense<0.000000e+00> : vector<128x256xf32>
    %8 = tpu.matmul %4, %7, %cst {dimension_numbers = #tpu.dot_dimension_numbers<[1], [0], [0], [1], [0, 0, 1, 1], [], []>} : vector<128x512xbf16>, vector<512x256xbf16>, vector<128x256xf32> -> vector<128x256xf32>
    %c0_8 = arith.constant 0 : index
    %c0_9 = arith.constant 0 : index
    %9 = vector.load %arg10[%c0_8, %c0_9] : memref<1x256xf32, #tpu.memory_space<vmem>>, vector<1x256xf32>
    %10 = vector.broadcast %9 : vector<1x256xf32> to vector<128x256xf32>
    %11 = arith.addf %8, %10 : vector<128x256xf32>
    %12 = arith.truncf %11 : vector<128x256xf32> to vector<128x256xbf16>
    %c0_10 = arith.constant 0 : index
    %c0_11 = arith.constant 0 : index
    %13 = vector.load %arg11[%c0_10, %c0_11] : memref<512x256xbf16, #tpu.memory_space<vmem>>, vector<512x256xbf16>
    %cst_12 = arith.constant dense<0.000000e+00> : vector<128x256xf32>
    %14 = tpu.matmul %6, %13, %cst_12 {dimension_numbers = #tpu.dot_dimension_numbers<[1], [0], [0], [1], [0, 0, 1, 1], [], []>} : vector<128x512xbf16>, vector<512x256xbf16>, vector<128x256xf32> -> vector<128x256xf32>
    %c0_13 = arith.constant 0 : index
    %c0_14 = arith.constant 0 : index
    %15 = vector.load %arg12[%c0_13, %c0_14] : memref<1x256xf32, #tpu.memory_space<vmem>>, vector<1x256xf32>
    %16 = vector.broadcast %15 : vector<1x256xf32> to vector<128x256xf32>
    %17 = arith.addf %14, %16 : vector<128x256xf32>
    %18 = arith.truncf %17 : vector<128x256xf32> to vector<128x256xbf16>
    %c0_15 = arith.constant 0 : index
    %c0_16 = arith.constant 0 : index
    %19 = vector.load %arg16[%c0_15, %c0_16] : memref<128x256xbf16, #tpu.memory_space<vmem>>, vector<128x128xbf16>
    %20 = vector.extract_strided_slice %12 {offsets = [0, 0], sizes = [128, 128], strides = [1, 1]} : vector<128x256xbf16> to vector<128x128xbf16>
    %cst_17 = arith.constant dense<0.000000e+00> : vector<128x128xf32>
    %21 = tpu.matmul %19, %20, %cst_17 {dimension_numbers = #tpu.dot_dimension_numbers<[1], [1], [0], [0], [0, 0, 1, 0], [], []>} : vector<128x128xbf16>, vector<128x128xbf16>, vector<128x128xf32> -> vector<128x128xf32>
    %c0_18 = arith.constant 0 : index
    %c0_19 = arith.constant 0 : index
    %c0_20 = arith.constant 0 : index
    %22 = vector.load %arg17[%c0_18, %c0_19, %c0_20] : memref<2x128x1xf32, #tpu.memory_space<vmem>>, vector<1x128x1xf32>
    %23 = vector.shape_cast %22 : vector<1x128x1xf32> to vector<128x1xf32>
    %cst_21 = arith.constant dense<0xFF800000> : vector<128xf32>
    %24 = vector.multi_reduction <maximumf>, %21, %cst_21 [1] : vector<128x128xf32> to vector<128xf32>
    %25 = vector.shape_cast %24 : vector<128xf32> to vector<128x1xf32>
    %26 = arith.maximumf %23, %25 : vector<128x1xf32>
    %27 = arith.subf %23, %26 : vector<128x1xf32>
    %28 = math.exp %27 : vector<128x1xf32>
    %29 = vector.broadcast %26 : vector<128x1xf32> to vector<128x128xf32>
    %30 = arith.subf %21, %29 : vector<128x128xf32>
    %31 = math.exp %30 : vector<128x128xf32>
    %c0_22 = arith.constant 0 : index
    %c0_23 = arith.constant 0 : index
    %c0_24 = arith.constant 0 : index
    %32 = vector.load %arg18[%c0_22, %c0_23, %c0_24] : memref<2x128x1xf32, #tpu.memory_space<vmem>>, vector<1x128x1xf32>
    %33 = vector.shape_cast %32 : vector<1x128x1xf32> to vector<128x1xf32>
    %34 = arith.mulf %28, %33 : vector<128x1xf32>
    %cst_25 = arith.constant dense<0.000000e+00> : vector<128xf32>
    %35 = vector.multi_reduction <add>, %31, %cst_25 [1] : vector<128x128xf32> to vector<128xf32>
    %36 = vector.shape_cast %35 : vector<128xf32> to vector<128x1xf32>
    %37 = arith.addf %34, %36 : vector<128x1xf32>
    %c0_26 = arith.constant 0 : index
    %c0_27 = arith.constant 0 : index
    %c0_28 = arith.constant 0 : index
    %38 = vector.load %arg18[%c0_26, %c0_27, %c0_28] : memref<2x128x1xf32, #tpu.memory_space<vmem>>, vector<1x128x1xf32>
    %39 = vector.shape_cast %38 : vector<1x128x1xf32> to vector<128x1xf32>
    %40 = vector.shape_cast %37 : vector<128x1xf32> to vector<1x128x1xf32>
    tpu.vector_store %arg18[%c0_26, %c0_27, %c0_28], %40 {strides = array<i32>} : memref<2x128x1xf32, #tpu.memory_space<vmem>>, vector<1x128x1xf32>,
    %c0_29 = arith.constant 0 : index
    %c0_30 = arith.constant 0 : index
    %c0_31 = arith.constant 0 : index
    %41 = vector.load %arg19[%c0_29, %c0_30, %c0_31] : memref<2x128x128xf32, #tpu.memory_space<vmem>>, vector<1x128x128xf32>
    %42 = vector.shape_cast %41 : vector<1x128x128xf32> to vector<128x128xf32>
    %43 = vector.broadcast %28 : vector<128x1xf32> to vector<128x128xf32>
    %44 = arith.mulf %43, %42 : vector<128x128xf32>
    %45 = arith.truncf %31 : vector<128x128xf32> to vector<128x128xbf16>
    %46 = vector.extract_strided_slice %18 {offsets = [0, 0], sizes = [128, 128], strides = [1, 1]} : vector<128x256xbf16> to vector<128x128xbf16>
    %cst_32 = arith.constant dense<0.000000e+00> : vector<128x128xf32>
    %47 = tpu.matmul %45, %46, %cst_32 {dimension_numbers = #tpu.dot_dimension_numbers<[1], [0], [0], [1], [0, 0, 1, 1], [], []>} : vector<128x128xbf16>, vector<128x128xbf16>, vector<128x128xf32> -> vector<128x128xf32>
    %48 = arith.addf %44, %47 : vector<128x128xf32>
    %c0_33 = arith.constant 0 : index
    %c0_34 = arith.constant 0 : index
    %c0_35 = arith.constant 0 : index
    %49 = vector.load %arg19[%c0_33, %c0_34, %c0_35] : memref<2x128x128xf32, #tpu.memory_space<vmem>>, vector<1x128x128xf32>
    %50 = vector.shape_cast %49 : vector<1x128x128xf32> to vector<128x128xf32>
    %51 = vector.shape_cast %48 : vector<128x128xf32> to vector<1x128x128xf32>
    tpu.vector_store %arg19[%c0_33, %c0_34, %c0_35], %51 {strides = array<i32>} : memref<2x128x128xf32, #tpu.memory_space<vmem>>, vector<1x128x128xf32>,
    %c0_36 = arith.constant 0 : index
    %c0_37 = arith.constant 0 : index
    %c0_38 = arith.constant 0 : index
    %52 = vector.load %arg17[%c0_36, %c0_37, %c0_38] : memref<2x128x1xf32, #tpu.memory_space<vmem>>, vector<1x128x1xf32>
    %53 = vector.shape_cast %52 : vector<1x128x1xf32> to vector<128x1xf32>
    %54 = vector.shape_cast %26 : vector<128x1xf32> to vector<1x128x1xf32>
    tpu.vector_store %arg17[%c0_36, %c0_37, %c0_38], %54 {strides = array<i32>} : memref<2x128x1xf32, #tpu.memory_space<vmem>>, vector<1x128x1xf32>,
    %c0_39 = arith.constant 0 : index
    %c128 = arith.constant 128 : index
    %55 = vector.load %arg16[%c0_39, %c128] : memref<128x256xbf16, #tpu.memory_space<vmem>>, vector<128x128xbf16>
    %56 = vector.extract_strided_slice %12 {offsets = [0, 128], sizes = [128, 128], strides = [1, 1]} : vector<128x256xbf16> to vector<128x128xbf16>
    %cst_40 = arith.constant dense<0.000000e+00> : vector<128x128xf32>
    %57 = tpu.matmul %55, %56, %cst_40 {dimension_numbers = #tpu.dot_dimension_numbers<[1], [1], [0], [0], [0, 0, 1, 0], [], []>} : vector<128x128xbf16>, vector<128x128xbf16>, vector<128x128xf32> -> vector<128x128xf32>
    %c1 = arith.constant 1 : index
    %c0_41 = arith.constant 0 : index
    %c0_42 = arith.constant 0 : index
    %58 = vector.load %arg17[%c1, %c0_41, %c0_42] : memref<2x128x1xf32, #tpu.memory_space<vmem>>, vector<1x128x1xf32>
    %59 = vector.shape_cast %58 : vector<1x128x1xf32> to vector<128x1xf32>
    %cst_43 = arith.constant dense<0xFF800000> : vector<128xf32>
    %60 = vector.multi_reduction <maximumf>, %57, %cst_43 [1] : vector<128x128xf32> to vector<128xf32>
    %61 = vector.shape_cast %60 : vector<128xf32> to vector<128x1xf32>
    %62 = arith.maximumf %59, %61 : vector<128x1xf32>
    %63 = arith.subf %59, %62 : vector<128x1xf32>
    %64 = math.exp %63 : vector<128x1xf32>
    %65 = vector.broadcast %62 : vector<128x1xf32> to vector<128x128xf32>
    %66 = arith.subf %57, %65 : vector<128x128xf32>
    %67 = math.exp %66 : vector<128x128xf32>
    %c1_44 = arith.constant 1 : index
    %c0_45 = arith.constant 0 : index
    %c0_46 = arith.constant 0 : index
    %68 = vector.load %arg18[%c1_44, %c0_45, %c0_46] : memref<2x128x1xf32, #tpu.memory_space<vmem>>, vector<1x128x1xf32>
    %69 = vector.shape_cast %68 : vector<1x128x1xf32> to vector<128x1xf32>
    %70 = arith.mulf %64, %69 : vector<128x1xf32>
    %cst_47 = arith.constant dense<0.000000e+00> : vector<128xf32>
    %71 = vector.multi_reduction <add>, %67, %cst_47 [1] : vector<128x128xf32> to vector<128xf32>
    %72 = vector.shape_cast %71 : vector<128xf32> to vector<128x1xf32>
    %73 = arith.addf %70, %72 : vector<128x1xf32>
    %c1_48 = arith.constant 1 : index
    %c0_49 = arith.constant 0 : index
    %c0_50 = arith.constant 0 : index
    %74 = vector.load %arg18[%c1_48, %c0_49, %c0_50] : memref<2x128x1xf32, #tpu.memory_space<vmem>>, vector<1x128x1xf32>
    %75 = vector.shape_cast %74 : vector<1x128x1xf32> to vector<128x1xf32>
    %76 = vector.shape_cast %73 : vector<128x1xf32> to vector<1x128x1xf32>
    tpu.vector_store %arg18[%c1_48, %c0_49, %c0_50], %76 {strides = array<i32>} : memref<2x128x1xf32, #tpu.memory_space<vmem>>, vector<1x128x1xf32>,
    %c1_51 = arith.constant 1 : index
    %c0_52 = arith.constant 0 : index
    %c0_53 = arith.constant 0 : index
    %77 = vector.load %arg19[%c1_51, %c0_52, %c0_53] : memref<2x128x128xf32, #tpu.memory_space<vmem>>, vector<1x128x128xf32>
    %78 = vector.shape_cast %77 : vector<1x128x128xf32> to vector<128x128xf32>
    %79 = vector.broadcast %64 : vector<128x1xf32> to vector<128x128xf32>
    %80 = arith.mulf %79, %78 : vector<128x128xf32>
    %81 = arith.truncf %67 : vector<128x128xf32> to vector<128x128xbf16>
    %82 = vector.extract_strided_slice %18 {offsets = [0, 128], sizes = [128, 128], strides = [1, 1]} : vector<128x256xbf16> to vector<128x128xbf16>
    %cst_54 = arith.constant dense<0.000000e+00> : vector<128x128xf32>
    %83 = tpu.matmul %81, %82, %cst_54 {dimension_numbers = #tpu.dot_dimension_numbers<[1], [0], [0], [1], [0, 0, 1, 1], [], []>} : vector<128x128xbf16>, vector<128x128xbf16>, vector<128x128xf32> -> vector<128x128xf32>
    %84 = arith.addf %80, %83 : vector<128x128xf32>
    %c1_55 = arith.constant 1 : index
    %c0_56 = arith.constant 0 : index
    %c0_57 = arith.constant 0 : index
    %85 = vector.load %arg19[%c1_55, %c0_56, %c0_57] : memref<2x128x128xf32, #tpu.memory_space<vmem>>, vector<1x128x128xf32>
    %86 = vector.shape_cast %85 : vector<1x128x128xf32> to vector<128x128xf32>
    %87 = vector.shape_cast %84 : vector<128x128xf32> to vector<1x128x128xf32>
    tpu.vector_store %arg19[%c1_55, %c0_56, %c0_57], %87 {strides = array<i32>} : memref<2x128x128xf32, #tpu.memory_space<vmem>>, vector<1x128x128xf32>,
    %c1_58 = arith.constant 1 : index
    %c0_59 = arith.constant 0 : index
    %c0_60 = arith.constant 0 : index
    %88 = vector.load %arg17[%c1_58, %c0_59, %c0_60] : memref<2x128x1xf32, #tpu.memory_space<vmem>>, vector<1x128x1xf32>
    %89 = vector.shape_cast %88 : vector<1x128x1xf32> to vector<128x1xf32>
    %90 = vector.shape_cast %62 : vector<128x1xf32> to vector<1x128x1xf32>
    tpu.vector_store %arg17[%c1_58, %c0_59, %c0_60], %90 {strides = array<i32>} : memref<2x128x1xf32, #tpu.memory_space<vmem>>, vector<1x128x1xf32>,
    %c1_i32 = arith.constant 1 : i32
    %91 = arith.cmpi eq, %arg3, %c1_i32 : i32
    %92 = arith.extui %91 : i1 to i32
    %c0_i32_61 = arith.constant 0 : i32
    %93 = arith.cmpi ne, %92, %c0_i32_61 : i32
    scf.if %93 {
      %c0_62 = arith.constant 0 : index
      %c0_63 = arith.constant 0 : index
      %c0_64 = arith.constant 0 : index
      %94 = vector.load %arg19[%c0_62, %c0_63, %c0_64] : memref<2x128x128xf32, #tpu.memory_space<vmem>>, vector<1x128x128xf32>
      %95 = vector.shape_cast %94 : vector<1x128x128xf32> to vector<128x128xf32>
      %c0_65 = arith.constant 0 : index
      %c0_66 = arith.constant 0 : index
      %c0_67 = arith.constant 0 : index
      %96 = vector.load %arg18[%c0_65, %c0_66, %c0_67] : memref<2x128x1xf32, #tpu.memory_space<vmem>>, vector<1x128x1xf32>
      %97 = vector.shape_cast %96 : vector<1x128x1xf32> to vector<128x1xf32>
      %98 = tpu.reciprocal %97 {approx = true} : vector<128x1xf32> -> vector<128x1xf32>
      %99 = vector.broadcast %98 : vector<128x1xf32> to vector<128x128xf32>
      %100 = arith.mulf %95, %99 : vector<128x128xf32>
      %101 = arith.truncf %100 : vector<128x128xf32> to vector<128x128xbf16>
      %c0_68 = arith.constant 0 : index
      %c0_69 = arith.constant 0 : index
      %102 = vector.load %arg13[%c0_68, %c0_69] : memref<256x512xbf16, #tpu.memory_space<vmem>>, vector<128x512xbf16>
      %cst_70 = arith.constant dense<0.000000e+00> : vector<128x512xf32>
      %103 = tpu.matmul %101, %102, %cst_70 {dimension_numbers = #tpu.dot_dimension_numbers<[1], [0], [0], [1], [0, 0, 1, 1], [], []>} : vector<128x128xbf16>, vector<128x512xbf16>, vector<128x512xf32> -> vector<128x512xf32>
      %c1_71 = arith.constant 1 : index
      %c0_72 = arith.constant 0 : index
      %c0_73 = arith.constant 0 : index
      %104 = vector.load %arg19[%c1_71, %c0_72, %c0_73] : memref<2x128x128xf32, #tpu.memory_space<vmem>>, vector<1x128x128xf32>
      %105 = vector.shape_cast %104 : vector<1x128x128xf32> to vector<128x128xf32>
      %c1_74 = arith.constant 1 : index
      %c0_75 = arith.constant 0 : index
      %c0_76 = arith.constant 0 : index
      %106 = vector.load %arg18[%c1_74, %c0_75, %c0_76] : memref<2x128x1xf32, #tpu.memory_space<vmem>>, vector<1x128x1xf32>
      %107 = vector.shape_cast %106 : vector<1x128x1xf32> to vector<128x1xf32>
      %108 = tpu.reciprocal %107 {approx = true} : vector<128x1xf32> -> vector<128x1xf32>
      %109 = vector.broadcast %108 : vector<128x1xf32> to vector<128x128xf32>
      %110 = arith.mulf %105, %109 : vector<128x128xf32>
      %111 = arith.truncf %110 : vector<128x128xf32> to vector<128x128xbf16>
      %c128_77 = arith.constant 128 : index
      %c0_78 = arith.constant 0 : index
      %112 = vector.load %arg13[%c128_77, %c0_78] : memref<256x512xbf16, #tpu.memory_space<vmem>>, vector<128x512xbf16>
      %cst_79 = arith.constant dense<0.000000e+00> : vector<128x512xf32>
      %113 = tpu.matmul %111, %112, %cst_79 {dimension_numbers = #tpu.dot_dimension_numbers<[1], [0], [0], [1], [0, 0, 1, 1], [], []>} : vector<128x128xbf16>, vector<128x512xbf16>, vector<128x512xf32> -> vector<128x512xf32>
      %114 = arith.addf %103, %113 : vector<128x512xf32>
      %c0_i32_80 = arith.constant 0 : i32
      %115 = arith.cmpi eq, %arg2, %c0_i32_80 : i32
      %116 = arith.extui %115 : i1 to i32
      %c0_i32_81 = arith.constant 0 : i32
      %117 = arith.cmpi ne, %116, %c0_i32_81 : i32
      scf.if %117 {
        %c0_88 = arith.constant 0 : index
        %c0_89 = arith.constant 0 : index
        %124 = vector.load %arg14[%c0_88, %c0_89] : memref<1x512xf32, #tpu.memory_space<vmem>>, vector<1x512xf32>
        %125 = vector.shape_cast %124 : vector<1x512xf32> to vector<1x512xf32>
        %126 = vector.broadcast %125 : vector<1x512xf32> to vector<128x512xf32>
        %c0_90 = arith.constant 0 : index
        %c0_91 = arith.constant 0 : index
        %c0_92 = arith.constant 0 : index
        %127 = vector.load %arg15[%c0_90, %c0_91, %c0_92] : memref<1x128x512xf32, #tpu.memory_space<vmem>>, vector<1x128x512xf32>
        %128 = vector.shape_cast %127 : vector<1x128x512xf32> to vector<128x512xf32>
        %129 = vector.shape_cast %126 : vector<128x512xf32> to vector<1x128x512xf32>
        tpu.vector_store %arg15[%c0_90, %c0_91, %c0_92], %129 {strides = array<i32>} : memref<1x128x512xf32, #tpu.memory_space<vmem>>, vector<1x128x512xf32>,
      } else {
      }
      %c0_82 = arith.constant 0 : index
      %c0_83 = arith.constant 0 : index
      %c0_84 = arith.constant 0 : index
      %118 = vector.load %arg15[%c0_82, %c0_83, %c0_84] : memref<1x128x512xf32, #tpu.memory_space<vmem>>, vector<1x128x512xf32>
      %119 = vector.shape_cast %118 : vector<1x128x512xf32> to vector<128x512xf32>
      %120 = arith.addf %119, %114 : vector<128x512xf32>
      %c0_85 = arith.constant 0 : index
      %c0_86 = arith.constant 0 : index
      %c0_87 = arith.constant 0 : index
      %121 = vector.load %arg15[%c0_85, %c0_86, %c0_87] : memref<1x128x512xf32, #tpu.memory_space<vmem>>, vector<1x128x512xf32>
      %122 = vector.shape_cast %121 : vector<1x128x512xf32> to vector<128x512xf32>
      %123 = vector.shape_cast %120 : vector<128x512xf32> to vector<1x128x512xf32>
      tpu.vector_store %arg15[%c0_85, %c0_86, %c0_87], %123 {strides = array<i32>} : memref<1x128x512xf32, #tpu.memory_space<vmem>>, vector<1x128x512xf32>,
    } else {
    }
    return
  }
  func.func @transform_0(%arg0: i32, %arg1: i32, %arg2: i32, %arg3: i32) -> (i32, i32, i32) {
    %c0_i32 = arith.constant 0 : i32
    %c0_i32_0 = arith.constant 0 : i32
    return %arg0, %arg1, %c0_i32 : i32, i32, i32
  }
  func.func @transform_1(%arg0: i32, %arg1: i32, %arg2: i32, %arg3: i32) -> (i32, i32, i32) {
    %c0_i32 = arith.constant 0 : i32
    %c0_i32_0 = arith.constant 0 : i32
    return %arg0, %arg3, %c0_i32 : i32, i32, i32
  }
  func.func @transform_2(%arg0: i32, %arg1: i32, %arg2: i32, %arg3: i32) -> (i32, i32, i32) {
    %c0_i32 = arith.constant 0 : i32
    %c0_i32_0 = arith.constant 0 : i32
    return %arg0, %arg3, %c0_i32 : i32, i32, i32
  }
  func.func @transform_3(%arg0: i32, %arg1: i32, %arg2: i32, %arg3: i32) -> (i32, i32) {
    %c0_i32 = arith.constant 0 : i32
    %c0_i32_0 = arith.constant 0 : i32
    return %c0_i32, %arg2 : i32, i32
  }
  func.func @transform_4(%arg0: i32, %arg1: i32, %arg2: i32, %arg3: i32) -> (i32, i32) {
    %c0_i32 = arith.constant 0 : i32
    %c0_i32_0 = arith.constant 0 : i32
    return %c0_i32, %arg2 : i32, i32
  }
  func.func @transform_5(%arg0: i32, %arg1: i32, %arg2: i32, %arg3: i32) -> (i32, i32) {
    %c0_i32 = arith.constant 0 : i32
    %c0_i32_0 = arith.constant 0 : i32
    return %c0_i32, %arg2 : i32, i32
  }
  func.func @transform_6(%arg0: i32, %arg1: i32, %arg2: i32, %arg3: i32) -> (i32, i32) {
    %c0_i32 = arith.constant 0 : i32
    %c0_i32_0 = arith.constant 0 : i32
    return %c0_i32, %arg2 : i32, i32
  }
  func.func @transform_7(%arg0: i32, %arg1: i32, %arg2: i32, %arg3: i32) -> (i32, i32) {
    %c0_i32 = arith.constant 0 : i32
    %c0_i32_0 = arith.constant 0 : i32
    return %c0_i32, %arg2 : i32, i32
  }
  func.func @transform_8(%arg0: i32, %arg1: i32, %arg2: i32, %arg3: i32) -> (i32, i32) {
    %c0_i32 = arith.constant 0 : i32
    %c0_i32_0 = arith.constant 0 : i32
    return %c0_i32, %arg2 : i32, i32
  }
  func.func @transform_9(%arg0: i32, %arg1: i32, %arg2: i32, %arg3: i32) -> (i32, i32) {
    %c0_i32 = arith.constant 0 : i32
    %c0_i32_0 = arith.constant 0 : i32
    return %arg2, %c0_i32 : i32, i32
  }
  func.func @transform_10(%arg0: i32, %arg1: i32, %arg2: i32, %arg3: i32) -> (i32, i32) {
    %c0_i32 = arith.constant 0 : i32
    %c0_i32_0 = arith.constant 0 : i32
    %c0_i32_1 = arith.constant 0 : i32
    return %c0_i32, %c0_i32_0 : i32, i32
  }
  func.func @transform_11(%arg0: i32, %arg1: i32, %arg2: i32, %arg3: i32) -> (i32, i32, i32) {
    %c0_i32 = arith.constant 0 : i32
    %c0_i32_0 = arith.constant 0 : i32
    return %arg0, %arg1, %c0_i32 : i32, i32, i32
  }
}

</mosaic_0001>

<bundles_post_ra>
// kernel: tpu_custom_call.1
= control target key start
LH: loop header
LB: loop body
LE: loop exit
PB: predicated region body
PF: predicated region fallthrough
CT: control target
= control target key end

     0   :  { %s13358_s0 = inlined_call_operand.hbm [shape: bf16[2,256,512], index: 0, kind: input, shape index: {}]   ;;  %s13359_s1 = inlined_call_operand.hbm [shape: bf16[2,256,512], index: 1, kind: input, shape index: {}]   ;;  %s13360_s2 = inlined_call_operand.hbm [shape: bf16[2,256,512], index: 2, kind: input, shape index: {}]   ;;  %s13361_s3 = inlined_call_operand.hbm [shape: bf16[512,512], index: 3, kind: input, shape index: {}]   ;;  %s13362_s4 = inlined_call_operand.hbm [shape: f32[1,512], index: 4, kind: input, shape index: {}]   ;;  %s13363_s5 = inlined_call_operand.hbm [shape: bf16[512,512], index: 5, kind: input, shape index: {}]   ;;  %s13364_s6 = inlined_call_operand.vmem [shape: f32[1,512], index: 6, kind: input, shape index: {}]   ;;  %s13365_s7 = inlined_call_operand.hbm [shape: bf16[512,512], index: 7, kind: input, shape index: {}]   ;;  %s13366_s8 = inlined_call_operand.hbm [shape: f32[1,512], index: 8, kind: input, shape index: {}]   ;;  %s13367_s9 = inlined_call_operand.hbm [shape: bf16[512,512], index: 9, kind: input, shape index: {}]   ;;  %s13368_s10 = inlined_call_operand.vmem [shape: f32[1,512], index: 10, kind: input, shape index: {}]   ;;  %s13369_s11 = inlined_call_operand.hbm [shape: f32[2,256,512], index: 11, kind: output, shape index: {}]  }
   0x1   :  { %13461 = sst [smem:[#allocation109_spill]] %s13358_s0 }
   0x2   :  { %13462 = sst [smem:[#allocation110_spill]] %s13359_s1 }
   0x3   :  { %13463 = sst [smem:[#allocation111_spill]] %s13360_s2 }
   0x4   :  { %13464 = sst [smem:[#allocation112_spill]] %s13361_s3 }
   0x5   :  { %13465 = sst [smem:[#allocation113_spill]] %s13362_s4 }
   0x6   :  { %13466 = sst [smem:[#allocation114_spill]] %s13363_s5 }
   0x7   :  { %13467 = sst [smem:[#allocation115_spill]] %s13364_s6 }
   0x8   :  { %13468 = sst [smem:[#allocation116_spill]] %s13365_s7 }
   0x9   :  { %13469 = sst [smem:[#allocation117_spill]] %s13366_s8 }
   0xa   :  { %13470 = sst [smem:[#allocation118_spill]] %s13367_s9 }
   0xb   :  { %13471 = sst [smem:[#allocation119_spill]] %s13368_s10 }
   0xc   :  { %13472 = sst [smem:[#allocation120_spill]] %s13369_s11 }
   0xd   :  { %16 = vsyncpa [#allocation7], 0 }
   0xe   :  { %18 = vsyncpa [#allocation7 + $0x1], 0 }
   0xf   :  { %19 = vsyncpa [#allocation10], 0 }
  0x10   :  { %21 = vsyncpa [#allocation10 + $0x1], 0 }
  0x11   :  { %22 = vsyncpa [#allocation13], 0 }
  0x12   :  { %24 = vsyncpa [#allocation13 + $0x1], 0 }
  0x13   :  { %25 = vsyncpa [#allocation16], 0 }
  0x14   :  { %27 = vsyncpa [#allocation16 + $0x1], 0 }
  0x15   :  { %28 = vsyncpa [#allocation19], 0 }
  0x16   :  { %30 = vsyncpa [#allocation19 + $0x1], 0 }
  0x17   :  { %31 = vsyncpa [#allocation8], 0 }
  0x18   :  { %33 = vsyncpa [#allocation8 + $0x1], 0  ;;  %s9924_s17 = smov 0   ;;  %s9926_s18 = smov 0  }
  0x19   :  { %s9928_s19 = smov 0   ;;  %s9930_s20 = smov 0  }
  0x1a   :  { %s9932_s21 = smov 0   ;;  %s9934_s22 = smov 0  }
  0x1b   :  { %s9936_s23 = smov 0   ;;  %s9938_s24 = smov 0  }
  0x1c   :  { %s9940_s25 = smov 0   ;;  %s9942_s26 = smov 0  }
  0x1d   :  { %s9944_s27 = smov 0   ;;  %s9946_s28 = smov 0  }
  0x1e   :  { %s9948_s29 = smov 0   ;;  %s9950_s30 = smov 0  }
  0x1f   :  { %s9952_s12 = smov 0   ;;  %s9954_s13 = smov 0  }
  0x20   :  { %s9956_s14 = smov 0   ;;  %s9958_s15 = smov 0  }
  0x21 LB: > { %13473 = sst [smem:[#allocation28_spill]] %s9788_s18  ;;  %s10015_s16 = sadd.s32 4294967295, %s9852_s15   ;;  %s9852_s15 = sphi %s9958_s15, %s39_s15   ;;  %s9848_s14 = sphi %s9956_s14, %s13748_s14   ;;  %s9844_s13 = sphi %s9954_s13, %s13747_s13   ;;  %s9840_s12 = sphi %s9952_s12, %s13746_s12   ;;  %s9836_s30 = sphi %s9950_s30, %s13734_s30   ;;  %s9832_s29 = sphi %s9948_s29, %s13745_s29   ;;  %s9828_s28 = sphi %s9946_s28, %s13744_s28   ;;  %s9824_s27 = sphi %s9944_s27, %s13743_s27   ;;  %s9820_s26 = sphi %s9942_s26, %s13733_s26   ;;  %s9816_s25 = sphi %s9940_s25, %s13742_s25   ;;  %s9812_s24 = sphi %s9938_s24, %s13741_s24   ;;  %s9808_s23 = sphi %s9936_s23, %s13731_s23   ;;  %s9804_s22 = sphi %s9934_s22, %s13740_s22   ;;  %s9800_s21 = sphi %s9932_s21, %s13739_s21   ;;  %s9796_s20 = sphi %s9930_s20, %s13730_s20   ;;  %s9792_s19 = sphi %s9928_s19, %s13729_s19   ;;  %s9788_s18 = sphi %s9926_s18, %s13728_s18   ;;  %s9784_s17 = sphi %s9924_s17, %s13727_s17  }
  0x22   : > { %13474 = sst [smem:[#allocation29_spill]] %s9792_s19  ;;  %s54_s11 = sadd.s32 1, %s9836_s30 }
  0x23   : > { %13475 = sst [smem:[#allocation30_spill]] %s9800_s21  ;;  %p55_p0 = scmp.ge.s32.totalorder %s54_s11, 2 }
  0x24   : > { %13476 = sst [smem:[#allocation31_spill]] %s9808_s23  ;;  %p82_p1 = scmp.eq.s32.totalorder %s9852_s15, 0 }
  0x25   : > { %13477 = sst [smem:[#allocation32_spill]] %s9812_s24  ;;  %s13750_s11 = smov (%p55_p0, %s54_s11), 0 }
  0x26   : > { %13478 = sst [smem:[#allocation33_spill]] %s9820_s26  ;;  %p88_p2 = scmp.eq.s32.totalorder %s10015_s16, 0 }
  0x27   : > { %13479 = sst [smem:[#allocation34_spill]] %s9824_s27  ;;  %p109_p3 = scmp.ne.s32.totalorder %s9804_s22, %s9800_s21 }
  0x28   : > { %13480 = sst [smem:[#allocation35_spill]] %s9828_s28  ;;  %p115_p4 = scmp.ne.s32.totalorder %s9800_s21, %s9796_s20 }
  0x29   : > { %13481 = sst [smem:[#allocation36_spill]] %s9832_s29  ;;  %s57_s29 = sadd.s32 1, %s9840_s12 }
  0x2a   : > { %13482 = sst [smem:[#allocation37_spill]] %s9836_s30  ;;  %s13752_s29 = smov (!%p55_p0, %s57_s29), %s9840_s12 }
  0x2b   : > { %13483 = sst [smem:[#allocation38_spill]] %s10015_s16  ;;  %p10036_p5 = por %p109_p3, %p82_p1 }
  0x2c   : > { %13484 = sst [smem:[#allocation39_spill]] %s13750_s11  ;;  %p13393_p6 = scmp.lt.s32.totalorder %s9852_s15, 16 }
  0x2d   : > { %p10043_p7 = por %p115_p4, %p88_p2  ;;  %s13376_s27 = sshll.u32 %s9848_s14, 7 }
  0x2e   : > { %s10049_s9 = sand.u32 1, %s9852_s15   ;;  %s428_s26 = sand.u32 1, %s9804_s22  }
  0x2f   : > { %s13486_s28 = scalar_select %p10043_p7, 1, 0 }
  0x30   : > { %s7084_s10 = sshll.u32 %s428_s26, 8  ;;  %s8606_s20 = sshll.u32 %s9836_s30, 6 }
  0x31   : > { %13487 = sst [smem:[#allocation40_spill]] %s13486_s28  ;;  %s436_s21 = sadd.s32 %s8606_s20, %s13376_s27 }
  0x32   : > { %s430_s7 = scalar_lea.vmem [#allocation9], %s7084_s10  ;;  %s7088_s11 = sshll.u32 %s436_s21, 2 }
  0x33   : > { %s441_s0 = sshll.u32 %s430_s7, 4  ;;  %s13488_s1 = sld [smem:[#allocation110_spill]]  ;;  %s442_s0 = int_to_ptr.vmem [resolvable:$true] %s441_s0 }
  0x34   : > { %p10062_p8 = pnand %p13393_p6, %p10036_p5  ;;  %s13378_s7 = scalar_lea.sflag [#allocation10], %s10049_s9 }
  0x35   : > { %s13382_s21 = smov 256   ;;  %s13379_s8 = smov 16  }
  0x36   : > { %s13489_s4 = scalar_select %p10062_p8, 1, 0 }
  0x37   : > { %s13491_s2 = sld [smem:[#allocation111_spill]]  ;;  %s455_s20 = scalar_lea.vmem [#allocation11], %s7084_s10 }
  0x38   : > { %13490 = sst [smem:[#allocation41_spill]] %s13489_s4  ;;  %s10077_s27 = sshll.u32 %s455_s20, 4 }
  0x39   : > { %s438_s28 = scalar_lea.hbm %s13488_s1, %s7088_s11  ;;  %13492 = sst [smem:[#allocation42_spill]] %s10077_s27 }
  0x3a   : > { %s439_s26 = sshll.u32 %s438_s28, 4  ;;  %p7111_p9 = scmp.ge.s32.totalorder %s9852_s15, 1  ;;  %s440_s26 = int_to_ptr.hbm [resolvable:$true] %s439_s26 }
  0x3b   : > { %9008 = dma.hbm_to_vmem [thread:$0]  (!%p10062_p8), %s440_s26, 4096, %s442_s0, %s13378_s7, %s13382_s21, %s13382_s21, %s13379_s8  }
  0x3c   : > { %p609_p10 = scmp.lt.s32.totalorder %s9852_s15, 17  ;;  %p163_p12 = scmp.ne.s32.totalorder %s9792_s19, %s9788_s18 }
  0x3d   : > { %s463_s28 = scalar_lea.hbm %s13491_s2, %s7088_s11  ;;  %p169_p13 = scmp.ne.s32.totalorder %s9788_s18, %s9784_s17 }
  0x3e   : > { %s464_s1 = sshll.u32 %s463_s28, 4  ;;  %p10084_p11 = pnand %p7111_p9, %p609_p10  ;;  %s10080_s1 = int_to_ptr.hbm [resolvable:$true] %s464_s1 }
  0x3f   : > { %p165_p0 = por %p163_p12, %p82_p1  ;;  %s478_s10 = sand.u32 1, %s9792_s19  }
  0x40   : > { %s13493_s4 = scalar_select %p10084_p11, 1, 0 }
  0x41   : > { %p10098_p3 = por %p169_p13, %p88_p2  ;;  %s10102_s26 = sshll.u32 %s478_s10, 9 }
  0x42   : > { %13494 = sst [smem:[#allocation43_spill]] %s13493_s4  ;;  %s10105_s6 = sshll.u32 %s9840_s12, 3 }
  0x43   : > { %s13495_s11 = scalar_select %p10098_p3, 1, 0 }
  0x44   : > { %13497 = sst [smem:[#allocation45_spill]] %s10102_s26  ;;  %s480_s20 = scalar_lea.vmem [#allocation12], %s10102_s26 }
  0x45   : > { %13496 = sst [smem:[#allocation44_spill]] %s13495_s11  ;;  %s488_s7 = sshll.u32 %s480_s20, 4  ;;  %s489_s7 = int_to_ptr.vmem [resolvable:$true] %s488_s7 }
  0x46   : > { %s13498_s3 = sld [smem:[#allocation112_spill]]  ;;  %p10114_p4 = pnand %p13393_p6, %p165_p0 }
  0x47   : > { %s13388_s0 = scalar_lea.sflag [#allocation13], %s10049_s9  ;;  %s13392_s21 = smov 128  }
  0x48   : > { %s13396_s23 = smov 8   ;;  %s13500_s28 = smov 256  }
  0x49   : > { %s13501_s5 = sld [smem:[#allocation114_spill]]  ;;  %s521_s11 = scalar_lea.vmem [#allocation15], %s10102_s26 }
  0x4a   : > { %s529_s18 = sshll.u32 %s521_s11, 4  ;;  %s13391_s4 = scalar_lea.sflag [#allocation16], %s10049_s9  ;;  %s530_s18 = int_to_ptr.vmem [resolvable:$true] %s529_s18 }
  0x4b   : > { %s13503_s26 = sld [smem:[#allocation117_spill]]  ;;  %p59_p5 = scmp.ge.s32.totalorder %s13752_s29, 2 }
  0x4c   : > { %s485_s17 = scalar_lea.hbm %s13498_s3, %s10105_s6  ;;  %p13394_p9 = scmp.ne.s32.totalorder %s9816_s25, %s9812_s24 }
  0x4d   : > { %s486_s8 = sshll.u32 %s485_s17, 4  ;;  %s13502_s17 = sld [smem:[#allocation113_spill]]  ;;  %s487_s8 = int_to_ptr.hbm [resolvable:$true] %s486_s8 }
  0x4e   : > { %9014 = dma.hbm_to_vmem [thread:$0]  (!%p10114_p4), %s487_s8, 8192, %s489_s7, %s13388_s0, %s13500_s28, %s13392_s21, %s13396_s23  }
  0x4f   : > { %s526_s2 = scalar_lea.hbm %s13501_s5, %s10105_s6  ;;  %s7098_s7 = sshll.u32 %s9840_s12, 1 }
  0x50   : > { %s527_s3 = sshll.u32 %s526_s2, 4  ;;  %s10139_s2 = sshll.u32 %s478_s10, 1  ;;  %s528_s3 = int_to_ptr.hbm [resolvable:$true] %s527_s3 }
  0x51   : > { %9020 = dma.hbm_to_vmem [thread:$0]  (!%p10114_p4), %s528_s3, 8192, %s530_s18, %s13391_s4, %s13500_s28, %s13392_s21, %s13396_s23  }
  0x52   : > { %s577_s3 = scalar_lea.hbm %s13503_s26, %s7098_s7  ;;  %s13504_s18 = sld [smem:[#allocation31_spill]] }
  0x53   : > { %s10145_s20 = scalar_lea.hbm %s13502_s17, %s7098_s7  ;;  %s573_s10 = scalar_lea.vmem [#allocation18], %s10139_s2 }
  0x54   : > { %s581_s4 = sshll.u32 %s573_s10, 4  ;;  %s579_s21 = sshll.u32 %s577_s3, 4  ;;  %s582_s4 = int_to_ptr.vmem [resolvable:$true] %s581_s4  ;;  %s580_s21 = int_to_ptr.hbm [resolvable:$true] %s579_s21 }
  0x55   : > { %s13395_s8 = scalar_lea.sflag [#allocation19], %s10049_s9  ;;  %s7076_s5 = sadd.s32 4294967294, %s9852_s15  }
  0x56   : > { %9026 = dma.hbm_to_vmem [thread:$0]  (!%p10114_p4), %s580_s21, 32, %s582_s4, %s13395_s8  }
  0x57   : > { %s61_s0 = sadd.s32 1, %s9844_s13  ;;  %s74_s26 = sadd.s32 1, %s9816_s25 }
  0x58   : > { %s13754_s29 = smov (%p59_p5, %s13752_s29), 0  ;;  %s13756_s0 = smov (!%p59_p5, %s61_s0), %s9844_s13 }
  0x59   : > { %13505 = sst [smem:[#allocation46_spill]] %s13754_s29  ;;  %p10171_p10 = por %p82_p1, %p13394_p9 }
  0x5a   : > { %p13397_p12 = scmp.ne.s32.totalorder %s9812_s24, %s13504_s18  ;;  %p63_p13 = scmp.ge.s32.totalorder %s13756_s0, 2 }
  0x5b   : > { %s153_s21 = ssub.s32 %s9840_s12, %s13754_s29  ;;  %s13507_s7 = sld [smem:[#allocation39_spill]] }
  0x5c   : > { %p10184_p0 = por %p88_p2, %p13397_p12  ;;  %p154_p5 = scmp.eq.s32.totalorder %s153_s21, 0 }
  0x5d   : > { %s13758_s0 = smov (%p63_p13, %s13756_s0), 0  ;;  %s13511_s17 = sadd.s32 1, %s9848_s14 }
  0x5e   : > { %s13508_s11 = scalar_select %p10184_p0, 1, 0 }
  0x5f   : > { %13510 = sst [smem:[#allocation48_spill]] %s13758_s0  ;;  %s13760_s17 = smov (!%p63_p13, %s13511_s17), %s9848_s14 }
  0x60   : > { %13509 = sst [smem:[#allocation47_spill]] %s13508_s11  ;;  %s70_s3 = ssub.s32 %s9844_s13, %s13758_s0 }
  0x61   : > { %p372_p1 = scmp.eq.s32.totalorder %s10015_s16, 15  ;;  %p67_p6 = scmp.ge.s32.totalorder %s13760_s17, 2 }
  0x62   : > { %p378_p9 = scmp.eq.s32.totalorder %s7076_s5, 15  ;;  %s13512_s10 = sadd.s32 1, %s9792_s19 }
  0x63   : > { %s10199_s8 = scalar_select %p154_p5, %s9792_s19, %s13512_s10  }
  0x64   : > { %s13762_s17 = smov (%p67_p6, %s13760_s17), 0  ;;  %p13516_p2 = scmp.ne.s32.totalorder %s9816_s25, %s9812_s24 }
  0x65   : > { %13513 = sst [smem:[#allocation49_spill]] %s10199_s8  ;;  %s13515_s23 = smov %s13762_s17 }
  0x66   : > { %13514 = sst [smem:[#allocation50_spill]] %s13762_s17  ;;  %p10206_p12 = por %p372_p1, %p13516_p2 }
  0x67   : > { %p13519_p13 = scmp.ne.s32.totalorder %s9812_s24, %s13504_s18  ;;  %s69_s29 = ssub.s32 %s9848_s14, %s13515_s23 }
  0x68   : > { %s13517_s21 = scalar_select %p10206_p12, 1, 0 }
  0x69   : > { %p10213_p3 = por %p378_p9, %p13519_p13  ;;  %s401_s5 = sand.u32 1, %s9816_s25  }
  0x6a   : > { %13518 = sst [smem:[#allocation51_spill]] %s13517_s21  ;;  %s71_s16 = sor.u32 %s70_s3, %s69_s29 }
  0x6b   : > { %s13520_s0 = scalar_select %p10213_p3, 1, 0 }
  0x6c   : > { %s13522_s10 = ssub.s32 %s9836_s30, %s13507_s7  ;;  %p72_p6 = scmp.eq.s32.totalorder %s71_s16, 0 }
  0x6d   : > { %13521 = sst [smem:[#allocation52_spill]] %s13520_s0  ;;  %s99_s8 = sor.u32 %s13522_s10, %s69_s29 }
  0x6e   : > { %p100_p5 = scmp.eq.s32.totalorder %s99_s8, 0  ;;  %s7079_s17 = sshll.u32 %s401_s5, 8 }
  0x6f   : > { %s13524_s11 = sld [smem:[#allocation42_spill]]  ;;  %s13526_s21 = sadd.s32 1, %s9804_s22 }
  0x70   : > { %s10224_s18 = scalar_select %p72_p6, %s9816_s25, %s74_s26  }
  0x71   : > { %s10229_s24 = scalar_select %p100_p5, %s9804_s22, %s13526_s21  }
  0x72   : > { %13525 = sst [smem:[#allocation53_spill]] %s10224_s18  ;;  %s8605_s23 = sshll.u32 %s9844_s13, 6 }
  0x73   : > { %s13527_s0 = sshll.u32 %s9848_s14, 7  ;;  %s405_s3 = scalar_lea.vmem [#allocation6], %s7079_s17 }
  0x74   : > { %s411_s28 = sadd.s32 %s8605_s23, %s13527_s0  ;;  %s416_s29 = sshll.u32 %s405_s3, 4  ;;  %s417_s29 = int_to_ptr.vmem [resolvable:$true] %s416_s29 }
  0x75   : > { %s7083_s16 = sshll.u32 %s411_s28, 2  ;;  %s13528_s8 = sld [smem:[#allocation45_spill]] }
  0x76   : > { %s13529_s30 = sld [smem:[#allocation109_spill]]  ;;  %p13530_p9 = scmp.lt.s32.totalorder %s9852_s15, 16 }
  0x77   : > { %s508_s18 = sshll.u32 %s10145_s20, 4  ;;  %s402_s23 = scalar_lea.sflag [#allocation7], %s401_s5  ;;  %s509_s18 = int_to_ptr.hbm [resolvable:$true] %s508_s18 }
  0x78   : > { %p9003_p1 = pnand %p13530_p9, %p10171_p10  ;;  %s13531_s0 = smov 16  }
  0x79   : > { %s13532_s17 = smov 256   ;;  %s13534_s28 = int_to_ptr.vmem [resolvable:$true] %s13524_s11 }
  0x7a   : > { %s502_s4 = scalar_lea.vmem [#allocation14], %s10139_s2  ;;  %s13535_s3 = scalar_lea.sflag [#allocation13], %s10049_s9 }
  0x7b   : > { %s510_s20 = sshll.u32 %s502_s4, 4  ;;  %s13536_s7 = sld [smem:[#allocation116_spill]]  ;;  %s511_s20 = int_to_ptr.vmem [resolvable:$true] %s510_s20 }
  0x7c   : > { %s413_s26 = scalar_lea.hbm %s13529_s30, %s7083_s16  ;;  %s13533_s30 = scalar_lea.sflag [#allocation10], %s10049_s9 }
  0x7d   : > { %s414_s21 = sshll.u32 %s413_s26, 4  ;;  %s551_s19 = scalar_lea.vmem [#allocation17], %s13528_s8  ;;  %s415_s21 = int_to_ptr.hbm [resolvable:$true] %s414_s21 }
  0x7e   : > { %9005 = dma.hbm_to_vmem [thread:$0]  (!%p9003_p1), %s415_s21, 4096, %s417_s29, %s402_s23, %s13532_s17, %s13532_s17, %s13531_s0  }
  0x7f   : > { %9011 = dma.hbm_to_vmem [thread:$0]  (!%p10062_p8), %s10080_s1, 4096, %s13534_s28, %s13533_s30, %s13532_s17, %s13532_s17, %s13531_s0  }
  0x80   : > { %9017 = dma.hbm_to_vmem [thread:$0]  (!%p10114_p4), %s509_s18, 32, %s511_s20, %s13535_s3  }
  0x81   : > { %s556_s29 = scalar_lea.hbm %s13536_s7, %s10105_s6  ;;  %s559_s10 = sshll.u32 %s551_s19, 4  ;;  %s560_s10 = int_to_ptr.vmem [resolvable:$true] %s559_s10 }
  0x82   : > { %s557_s26 = sshll.u32 %s556_s29, 4  ;;  %s13537_s1 = smov 8   ;;  %s558_s26 = int_to_ptr.hbm [resolvable:$true] %s557_s26 }
  0x83   : > { %s13538_s11 = smov 128   ;;  %s13539_s2 = scalar_lea.sflag [#allocation16], %s10049_s9 }
  0x84   : > { %9023 = dma.hbm_to_vmem [thread:$0]  (!%p10114_p4), %s558_s26, 8192, %s560_s10, %s13539_s2, %s13532_s17, %s13538_s11, %s13537_s1  }
  0x85   : > { %s8612_s21 = sshll.u32 %s9840_s12, 9  ;;  %s592_s23 = scalar_lea.vmem [#allocation20], %s13528_s8 }
  0x86   : > { %s601_s30 = sshll.u32 %s592_s23, 4  ;;  %s13540_s4 = sld [smem:[#allocation118_spill]]  ;;  %s602_s30 = int_to_ptr.vmem [resolvable:$true] %s601_s30 }
  0x87   : > { %s13541_s3 = scalar_lea.sflag [#allocation19], %s10049_s9 }
  0x8a   : > { %613 = sbr.rel (%p10084_p11) target bundleno = 2651 (0xa5b), region = 64 }
  0x8c   : > { %s598_s20 = scalar_lea.hbm %s13540_s4, %s8612_s21 }
  0x8d   : > { %s599_s6 = sshll.u32 %s598_s20, 4  ;;  %s600_s6 = int_to_ptr.hbm [resolvable:$true] %s599_s6 }
  0x8e   : > { %9029 = dma.hbm_to_vmem [thread:$0]  (!%p10114_p4), %s600_s6, 8192, %s602_s30, %s13541_s3, %s13532_s17, %s13532_s17, %s13531_s0  }
  0x8f   : > { %s13543_s16 = sld [smem:[#allocation32_spill]] }
  0x95   : > { %s10287_s8 = sand.u32 1, %s13543_s16  }
  0x96   : > { %s7112_s29 = sshll.u32 %s10287_s8, 8  ;;  %s616_s19 = scalar_lea.sflag [#allocation7], %s10287_s8 }
  0x97   : > { %s10291_s10 = scalar_lea.vmem [#allocation6], %s7112_s29 }
  0x98   : > { %9759 = dma.done.wait (%p10184_p0), %s616_s19, 4096  }
  0x99   : > { %9761 = vsyncadd (%p10184_p0), %s616_s19, 4294963200  ;;  %s13545_s9 = sld [smem:[#allocation38_spill]] }
  0x9a   : > { %s13546_s27 = sld [smem:[#allocation30_spill]] }
  0x9f   : > { %s625_s17 = sand.u32 1, %s13545_s9  }
  0xa0   : > { %s627_s26 = sand.u32 1, %s13546_s27   ;;  %s626_s11 = scalar_lea.sflag [#allocation10], %s625_s17 }
  0xa1   : > { %s7113_s1 = sshll.u32 %s627_s26, 8 }
  0xa2   : > { %s10299_s2 = scalar_lea.vmem [#allocation9], %s7113_s1 }
  0xa3   : > { %9763 = dma.done.wait (%p10043_p7), %s626_s11, 8192  }
  0xa4   : > { %9765 = vsyncadd (%p10043_p7), %s626_s11, 4294959104  ;;  %s13548_s21 = sld [smem:[#allocation28_spill]]  ;;  %s10306_s18 = scalar_lea.vmem [#allocation11], %s7113_s1 }
  0xa5   : > { %s13549_s23 = sld [smem:[#allocation44_spill]]  ;;  %s646_s4 = scalar_lea.sflag [#allocation13], %s625_s17 }
  0xaa   : > { %s647_s30 = sand.u32 1, %s13548_s21  }
  0xab   : > { %s7115_s28 = sshll.u32 %s647_s30, 9  ;;  %p13550_p8 = scmp.ne.s32.totalorder %s13549_s23, 0 }
  0xac   : > { %s10308_s20 = scalar_lea.vmem [#allocation12], %s7115_s28 }
  0xad   : > { %9767 = dma.done.wait (%p13550_p8), %s646_s4, 8224  }
  0xae   : > { %9769 = vsyncadd (%p13550_p8), %s646_s4, 4294959072  ;;  %s10314_s6 = sshll.u32 %s647_s30, 1  ;;  %s666_s5 = scalar_lea.sflag [#allocation16], %s625_s17 }
  0xaf   : > { %s659_s3 = scalar_lea.vmem [#allocation14], %s10314_s6  ;;  %s10317_s16 = scalar_lea.vmem [#allocation15], %s7115_s28 }
  0xb0   : > { %9771 = dma.done.wait (%p13550_p8), %s666_s5, 16384  }
  0xb1   : > { %9773 = vsyncadd (%p13550_p8), %s666_s5, 4294950912  ;;  %s10323_s7 = scalar_lea.vmem [#allocation17], %s7115_s28  ;;  %s686_s29 = scalar_lea.sflag [#allocation19], %s625_s17 }
  0xb2   : > { %s689_s19 = scalar_lea.vmem [#allocation18], %s10314_s6 }
  0xb3   : > { %9775 = dma.done.wait (%p13550_p8), %s686_s29, 8224  }
  0xb4   : > { %9777 = vsyncadd (%p13550_p8), %s686_s29, 4294959072  ;;  %s13551_s9 = sld [smem:[#allocation34_spill]]  ;;  %s7121_s27 = sshll.u32 %s10287_s8, 9 }
  0xb5   : > { %s13552_s11 = sld [smem:[#allocation115_spill]]  ;;  %s10338_s30 = scalar_lea.vmem [#allocation20], %s7115_s28 }
  0xb6   : > { %s10340_s17 = scalar_lea.vmem [#allocation21], %s7121_s27  ;;  %s13553_s4 = sld [smem:[#allocation33_spill]] }
  0xba   : > { %s7122_s0 = sshll.u32 %s13551_s9, 1 }
  0xbb   : > { %p790_p7 = scmp.lt.s32.totalorder %s7122_s0, 3 }
  0xbc   : > { %p7123_p11 = scmp.ne.s32.totalorder %s13553_s4, 0 }
  0xbd   : > { %s13764_s0 = smov (!%p790_p7, %s7122_s0), 3 }
  0xbe   : > { %s792_s21 = scalar_lea.vmem %s13552_s11, %s13764_s0  ;;  %801 = sbr.rel (%p7123_p11) target bundleno = 655 (0x28f), region = 104 }
  0xc3   : > { %v7310_v0 = vld [vmem:[%s10308_s20 + $0x70] sm:$0xf]  ;;  %v8660_v1 = vld [vmem:[%s10308_s20 + $0x74] sm:$0xf0]  ;;  %v7302_v11 = vld [vmem:[%s10308_s20 + $0x60] sm:$0xf] }
  0xc4   : > { %v7374_v2 = vld [vmem:[%s10308_s20 + $0xf0] sm:$0xf]  ;;  %v7311_v3 = vor.u32 %v8660_v1, %v7310_v0  ;;  %v8676_v4 = vld [vmem:[%s10308_s20 + $0xf4] sm:$0xf0]  ;;  %v8658_v13 = vld [vmem:[%s10308_s20 + $0x64] sm:$0xf0] }
  0xc5   : > { %v7438_v5 = vld [vmem:[%s10308_s20 + $0x170] sm:$0xf]  ;;  %v8692_v6 = vld [vmem:[%s10308_s20 + $0x174] sm:$0xf0]  ;;  %v7375_v7 = vor.u32 %v8676_v4, %v7374_v2  ;;  %v7366_v14 = vld [vmem:[%s10308_s20 + $0xe0] sm:$0xf]  ;;  %v7303_v16 = vor.u32 %v8658_v13, %v7302_v11 }
  0xc6   : > { %v7439_v8 = vor.u32 %v8692_v6, %v7438_v5  ;;  %v7502_v9 = vld [vmem:[%s10308_s20 + $0x1f0] sm:$0xf]  ;;  %v8708_v10 = vld [vmem:[%s10308_s20 + $0x1f4] sm:$0xf0]  ;;  %1384 = vmatpush.bf16.msra.mxu0 %v7311_v3  ;;  %v8674_v15 = vld [vmem:[%s10308_s20 + $0xe4] sm:$0xf0] }
  0xc7   : > { %v7503_v12 = vor.u32 %v8708_v10, %v7502_v9  ;;  %1433 = vmatpush.bf16.msra.mxu1 %v7375_v7  ;;  %v7367_v17 = vor.u32 %v8674_v15, %v7366_v14  ;;  %v7430_v18 = vld [vmem:[%s10308_s20 + $0x160] sm:$0xf]  ;;  %v8690_v19 = vld [vmem:[%s10308_s20 + $0x164] sm:$0xf0]  ;;  %v7294_v23 = vld [vmem:[%s10308_s20 + $0x50] sm:$0xf] }
  0xc8   : > { %1482 = vmatpush.bf16.msra.mxu2 %v7439_v8  ;;  %v7494_v20 = vld [vmem:[%s10308_s20 + $0x1e0] sm:$0xf]  ;;  %v7431_v21 = vor.u32 %v8690_v19, %v7430_v18  ;;  %v8706_v22 = vld [vmem:[%s10308_s20 + $0x1e4] sm:$0xf0]  ;;  %v8656_v24 = vld [vmem:[%s10308_s20 + $0x54] sm:$0xf0] }
  0xc9   : > { %1531 = vmatpush.bf16.msra.mxu3 %v7503_v12  ;;  %v7495_v25 = vor.u32 %v8706_v22, %v7494_v20  ;;  %v7358_v26 = vld [vmem:[%s10308_s20 + $0xd0] sm:$0xf]  ;;  %v8672_v27 = vld [vmem:[%s10308_s20 + $0xd4] sm:$0xf0]  ;;  %v7295_v29 = vor.u32 %v8656_v24, %v7294_v23  ;;  %v7286_v35 = vld [vmem:[%s10308_s20 + $0x40] sm:$0xf] }
  0xca   : > { %v7422_v28 = vld [vmem:[%s10308_s20 + $0x150] sm:$0xf]  ;;  %1385 = vmatpush.bf16.msra.mxu0 %v7303_v16  ;;  %v8688_v30 = vld [vmem:[%s10308_s20 + $0x154] sm:$0xf0]  ;;  %v7359_v33 = vor.u32 %v8672_v27, %v7358_v26  ;;  %v8654_v36 = vld [vmem:[%s10308_s20 + $0x44] sm:$0xf0] }
  0xcb   : > { %v7486_v31 = vld [vmem:[%s10308_s20 + $0x1d0] sm:$0xf]  ;;  %v8704_v32 = vld [vmem:[%s10308_s20 + $0x1d4] sm:$0xf0]  ;;  %1434 = vmatpush.bf16.msra.mxu1 %v7367_v17  ;;  %v7423_v34 = vor.u32 %v8688_v30, %v7422_v28  ;;  %v7350_v37 = vld [vmem:[%s10308_s20 + $0xc0] sm:$0xf]  ;;  %v7287_v44 = vor.u32 %v8654_v36, %v7286_v35 }
  0xcc   : > { %1483 = vmatpush.bf16.msra.mxu2 %v7431_v21  ;;  %v7487_v38 = vor.u32 %v8704_v32, %v7486_v31  ;;  %v8670_v39 = vld [vmem:[%s10308_s20 + $0xc4] sm:$0xf0]  ;;  %v7414_v40 = vld [vmem:[%s10308_s20 + $0x140] sm:$0xf]  ;;  %v7278_v47 = vld [vmem:[%s10308_s20 + $0x30] sm:$0xf] }
  0xcd   : > { %1532 = vmatpush.bf16.msra.mxu3 %v7495_v25  ;;  %v8686_v41 = vld [vmem:[%s10308_s20 + $0x144] sm:$0xf0]  ;;  %v7478_v42 = vld [vmem:[%s10308_s20 + $0x1c0] sm:$0xf]  ;;  %v7351_v45 = vor.u32 %v8670_v39, %v7350_v37  ;;  %v8652_v48 = vld [vmem:[%s10308_s20 + $0x34] sm:$0xf0] }
  0xce   : > { %v8702_v43 = vld [vmem:[%s10308_s20 + $0x1c4] sm:$0xf0]  ;;  %1386 = vmatpush.bf16.msra.mxu0 %v7295_v29  ;;  %v7415_v46 = vor.u32 %v8686_v41, %v7414_v40  ;;  %v7342_v49 = vld [vmem:[%s10308_s20 + $0xb0] sm:$0xf]  ;;  %v8668_v51 = vld [vmem:[%s10308_s20 + $0xb4] sm:$0xf0]  ;;  %v7279_v56 = vor.u32 %v8652_v48, %v7278_v47 }
  0xcf   : > { %1435 = vmatpush.bf16.msra.mxu1 %v7359_v33  ;;  %v7479_v50 = vor.u32 %v8702_v43, %v7478_v42  ;;  %v7406_v52 = vld [vmem:[%s10308_s20 + $0x130] sm:$0xf]  ;;  %v8684_v53 = vld [vmem:[%s10308_s20 + $0x134] sm:$0xf0]  ;;  %v7343_v57 = vor.u32 %v8668_v51, %v7342_v49  ;;  %v7270_v59 = vld [vmem:[%s10308_s20 + $0x20] sm:$0xf] }
  0xd0   : > { %1484 = vmatpush.bf16.msra.mxu2 %v7423_v34  ;;  %v7470_v54 = vld [vmem:[%s10308_s20 + $0x1b0] sm:$0xf]  ;;  %v8700_v55 = vld [vmem:[%s10308_s20 + $0x1b4] sm:$0xf0]  ;;  %v7407_v58 = vor.u32 %v8684_v53, %v7406_v52  ;;  %v8650_v60 = vld [vmem:[%s10308_s20 + $0x24] sm:$0xf0] }
  0xd1   : > { %1533 = vmatpush.bf16.msra.mxu3 %v7487_v38  ;;  %v7334_v61 = vld [vmem:[%s10308_s20 + $0xa0] sm:$0xf]  ;;  %v7471_v62 = vor.u32 %v8700_v55, %v7470_v54  ;;  %v8666_v63 = vld [vmem:[%s10308_s20 + $0xa4] sm:$0xf0]  ;;  %v7271_v4 = vor.u32 %v8650_v60, %v7270_v59  ;;  %v7262_v7 = vld [vmem:[%s10308_s20 + $0x10] sm:$0xf] }
  0xd2   : > { %1387 = vmatpush.bf16.msra.mxu0 %v7287_v44  ;;  %v7398_v0 = vld [vmem:[%s10308_s20 + $0x120] sm:$0xf]  ;;  %v8682_v1 = vld [vmem:[%s10308_s20 + $0x124] sm:$0xf0]  ;;  %v7335_v5 = vor.u32 %v8666_v63, %v7334_v61  ;;  %v8648_v8 = vld [vmem:[%s10308_s20 + $0x14] sm:$0xf0] }
  0xd3   : > { %1436 = vmatpush.bf16.msra.mxu1 %v7351_v45  ;;  %v7462_v2 = vld [vmem:[%s10308_s20 + $0x1a0] sm:$0xf]  ;;  %v8698_v3 = vld [vmem:[%s10308_s20 + $0x1a4] sm:$0xf0]  ;;  %v7399_v6 = vor.u32 %v8682_v1, %v7398_v0  ;;  %v7326_v9 = vld [vmem:[%s10308_s20 + $0x90] sm:$0xf]  ;;  %v7263_v17 = vor.u32 %v8648_v8, %v7262_v7 }
  0xd4   : > { %1485 = vmatpush.bf16.msra.mxu2 %v7415_v46  ;;  %v7463_v10 = vor.u32 %v8698_v3, %v7462_v2  ;;  %v8664_v11 = vld [vmem:[%s10308_s20 + $0x94] sm:$0xf0]  ;;  %v7390_v12 = vld [vmem:[%s10308_s20 + $0x110] sm:$0xf]  ;;  %v7254_v16 = vld [vmem:[%s10308_s20] sm:$0xf] }
  0xd5   : > { %1534 = vmatpush.bf16.msra.mxu3 %v7479_v50  ;;  %v8680_v13 = vld [vmem:[%s10308_s20 + $0x114] sm:$0xf0]  ;;  %v7454_v14 = vld [vmem:[%s10308_s20 + $0x190] sm:$0xf]  ;;  %v8646_v18 = vld [vmem:[%s10308_s20 + $0x4] sm:$0xf0]  ;;  %v7327_v21 = vor.u32 %v8664_v11, %v7326_v9 }
  0xd6   : > { %1388 = vmatpush.bf16.msra.mxu0 %v7279_v56  ;;  %v8696_v15 = vld [vmem:[%s10308_s20 + $0x194] sm:$0xf0]  ;;  %v7318_v19 = vld [vmem:[%s10308_s20 + $0x80] sm:$0xf]  ;;  %v8662_v20 = vld [vmem:[%s10308_s20 + $0x84] sm:$0xf0]  ;;  %v7391_v22 = vor.u32 %v8680_v13, %v7390_v12  ;;  %v7255_v34 = vor.u32 %v8646_v18, %v7254_v16 }
  0xd7   : > { %1437 = vmatpush.bf16.msra.mxu1 %v7343_v57  ;;  %v7382_v23 = vld [vmem:[%s10308_s20 + $0x100] sm:$0xf]  ;;  %v8678_v24 = vld [vmem:[%s10308_s20 + $0x104] sm:$0xf0]  ;;  %v7455_v26 = vor.u32 %v8696_v15, %v7454_v14  ;;  %v8615_v29 = vld [vmem:[%s10291_s10 + $0xc] sm:$0xf0]  ;;  %v7319_v38 = vor.u32 %v8662_v20, %v7318_v19 }
  0xd8   : > { %1486 = vmatpush.bf16.msra.mxu2 %v7407_v58  ;;  %v7446_v25 = vld [vmem:[%s10308_s20 + $0x180] sm:$0xf]  ;;  %v8694_v27 = vld [vmem:[%s10308_s20 + $0x184] sm:$0xf0]  ;;  %v8613_v30 = vld [vmem:[%s10291_s10 + $0x4] sm:$0xf]  ;;  %v7383_v39 = vor.u32 %v8678_v24, %v7382_v23 }
  0xd9   : > { %1535 = vmatpush.bf16.msra.mxu3 %v7471_v62  ;;  %v7126_v28 = vld [vmem:[%s10291_s10] sm:$0xf]  ;;  %v7128_v31 = vld [vmem:[%s10291_s10 + $0x10] sm:$0xf0]  ;;  %v7440_v33 = vld [vmem:[%s10308_s20 + $0x178] sm:$0xf0]  ;;  %v7447_v43 = vor.u32 %v8694_v27, %v7446_v25 }
  0xda   : > { %1389 = vmatpush.bf16.msra.mxu0 %v7271_v4  ;;  %v8691_v32 = vld [vmem:[%s10308_s20 + $0x174] sm:$0xf]  ;;  %v7134_v35 = vld [vmem:[%s10291_s10 + $0x8] sm:$0xf]  ;;  %v7504_v37 = vld [vmem:[%s10308_s20 + $0x1f8] sm:$0xf0]  ;;  %v10422_v48 = vor.u32 %v8615_v29, %v7126_v28  ;;  %v10427_v53 = vor.u32 %v8613_v30, %v7128_v31 }
  0xdb   : > { %1438 = vmatpush.bf16.msra.mxu1 %v7335_v5  ;;  %v8707_v36 = vld [vmem:[%s10308_s20 + $0x1f4] sm:$0xf]  ;;  %v8616_v40 = vld [vmem:[%s10291_s10 + $0x14] sm:$0xf0]  ;;  %v8614_v41 = vld [vmem:[%s10291_s10 + $0xc] sm:$0xf]  ;;  %v7443_v44 = vor.u32 %v8691_v32, %v7440_v33 }
  0xdc   : > { %1487 = vmatpush.bf16.msra.mxu2 %v7399_v6  ;;  %v7136_v42 = vld [vmem:[%s10291_s10 + $0x18] sm:$0xf0]  ;;  %v8659_v45 = vld [vmem:[%s10308_s20 + $0x74] sm:$0xf]  ;;  %v7507_v49 = vor.u32 %v8707_v36, %v7504_v37  ;;  %v8689_v51 = vld [vmem:[%s10308_s20 + $0x164] sm:$0xf]  ;;  %v10429_v54 = vor.u32 %v8616_v40, %v7134_v35 }
  0xdd   : > { %1536 = vmatpush.bf16.msra.mxu3 %v7463_v10  ;;  %v7312_v46 = vld [vmem:[%s10308_s20 + $0x78] sm:$0xf0]  ;;  %v8675_v47 = vld [vmem:[%s10308_s20 + $0xf4] sm:$0xf]  ;;  %v7432_v52 = vld [vmem:[%s10308_s20 + $0x168] sm:$0xf0]  ;;  %v10433_v57 = vor.u32 %v8614_v41, %v7136_v42 }
  0xde   : > { %1390 = vmatpush.bf16.msra.mxu0 %v7263_v17  ;;  %v7376_v50 = vld [vmem:[%s10308_s20 + $0xf8] sm:$0xf0]  ;;  %v8705_v55 = vld [vmem:[%s10308_s20 + $0x1e4] sm:$0xf]  ;;  %v7496_v56 = vld [vmem:[%s10308_s20 + $0x1e8] sm:$0xf0]  ;;  %v7315_v58 = vor.u32 %v8659_v45, %v7312_v46  ;;  %v7435_v60 = vor.u32 %v8689_v51, %v7432_v52 }
  0xdf   : > { %1439 = vmatpush.bf16.msra.mxu1 %v7327_v21  ;;  %v7379_v59 = vor.u32 %v8675_v47, %v7376_v50  ;;  %v8657_v61 = vld [vmem:[%s10308_s20 + $0x64] sm:$0xf]  ;;  %v7304_v62 = vld [vmem:[%s10308_s20 + $0x68] sm:$0xf0]  ;;  %v7499_v63 = vor.u32 %v8705_v55, %v7496_v56  ;;  %v8687_v3 = vld [vmem:[%s10308_s20 + $0x154] sm:$0xf] }
  0xe0   : > { %1488 = vmatpush.bf16.msra.mxu2 %v7391_v22  ;;  %v8673_v0 = vld [vmem:[%s10308_s20 + $0xe4] sm:$0xf]  ;;  %v7368_v1 = vld [vmem:[%s10308_s20 + $0xe8] sm:$0xf0]  ;;  %v7307_v2 = vor.u32 %v8657_v61, %v7304_v62  ;;  %v7424_v4 = vld [vmem:[%s10308_s20 + $0x158] sm:$0xf0] }
  0xe1   : > { %1537 = vmatpush.bf16.msra.mxu3 %v7455_v26  ;;  %v8655_v5 = vld [vmem:[%s10308_s20 + $0x54] sm:$0xf]  ;;  %v7371_v6 = vor.u32 %v8673_v0, %v7368_v1  ;;  %v7427_v7 = vor.u32 %v8687_v3, %v7424_v4  ;;  %v7296_v8 = vld [vmem:[%s10308_s20 + $0x58] sm:$0xf0]  ;;  %v7142_v16 = vld [vmem:[%s10291_s10 + $0x20] sm:$0xf] }
  0xe2   : > { %1391 = vmatpush.bf16.msra.mxu0 %v7255_v34  ;;  %v8703_v9 = vld [vmem:[%s10308_s20 + $0x1d4] sm:$0xf]  ;;  %v7488_v10 = vld [vmem:[%s10308_s20 + $0x1d8] sm:$0xf0]  ;;  %v7299_v14 = vor.u32 %v8655_v5, %v7296_v8  ;;  %v8619_v17 = vld [vmem:[%s10291_s10 + $0x2c] sm:$0xf0] }
  0xe3   : > { %1440 = vmatpush.bf16.msra.mxu1 %v7319_v38  ;;  %v7491_v11 = vor.u32 %v8703_v9, %v7488_v10  ;;  %v8671_v12 = vld [vmem:[%s10308_s20 + $0xd4] sm:$0xf]  ;;  %v7360_v13 = vld [vmem:[%s10308_s20 + $0xd8] sm:$0xf0]  ;;  %v8617_v18 = vld [vmem:[%s10291_s10 + $0x24] sm:$0xf]  ;;  %v10459_v24 = vor.u32 %v8619_v17, %v7142_v16 }
  0xe4   : > { %1489 = vmatpush.bf16.msra.mxu2 %v7383_v39  ;;  %v7363_v15 = vor.u32 %v8671_v12, %v7360_v13  ;;  %v7144_v19 = vld [vmem:[%s10291_s10 + $0x30] sm:$0xf0]  ;;  %v7150_v20 = vld [vmem:[%s10291_s10 + $0x28] sm:$0xf]  ;;  %v8620_v21 = vld [vmem:[%s10291_s10 + $0x34] sm:$0xf0] }
  0xe5   : > { %1538 = vmatpush.bf16.msra.mxu3 %v7447_v43  ;;  %1392 = vmatmul.bf16.vlgmr.msra.gmra.mxu0 %v10422_v48  ;;  %v8618_v22 = vld [vmem:[%s10291_s10 + $0x2c] sm:$0xf]  ;;  %v7152_v23 = vld [vmem:[%s10291_s10 + $0x38] sm:$0xf0]  ;;  %v10461_v25 = vor.u32 %v8617_v18, %v7144_v19  ;;  %v10463_v26 = vor.u32 %v8620_v21, %v7150_v20  ;;  %v8685_v28 = vld [vmem:[%s10308_s20 + $0x144] sm:$0xf] }
  0xe6   : > { %1441 = vmatmul.bf16.vlgmr.msra.gmra.mxu1 %v10427_v53  ;;  %1580 = vmatpush.bf16.msrb.mxu0 %v7315_v58  ;;  %v10465_v27 = vor.u32 %v8618_v22, %v7152_v23  ;;  %v7416_v29 = vld [vmem:[%s10308_s20 + $0x148] sm:$0xf0]  ;;  %v8653_v30 = vld [vmem:[%s10308_s20 + $0x44] sm:$0xf]  ;;  %v7158_v40 = vld [vmem:[%s10291_s10 + $0x40] sm:$0xf] }
  0xe7   : > { %1490 = vmatmul.bf16.vlgmr.msra.gmra.mxu2 %v10429_v54  ;;  %1629 = vmatpush.bf16.msrb.mxu1 %v7379_v59  ;;  %v7419_v31 = vor.u32 %v8685_v28, %v7416_v29  ;;  %v7288_v32 = vld [vmem:[%s10308_s20 + $0x48] sm:$0xf0]  ;;  %v8701_v33 = vld [vmem:[%s10308_s20 + $0x1c4] sm:$0xf]  ;;  %v8623_v41 = vld [vmem:[%s10291_s10 + $0x4c] sm:$0xf0] }
  0xe8   : > { %1678 = vmatpush.bf16.msrb.mxu2 %v7443_v44  ;;  %1539 = vmatmul.bf16.vlgmr.msra.gmra.mxu3 %v10433_v57  ;;  %v7480_v34 = vld [vmem:[%s10308_s20 + $0x1c8] sm:$0xf0]  ;;  %v7291_v35 = vor.u32 %v8653_v30, %v7288_v32  ;;  %v8669_v37 = vld [vmem:[%s10308_s20 + $0xc4] sm:$0xf]  ;;  %v7160_v43 = vld [vmem:[%s10291_s10 + $0x50] sm:$0xf0] }
  0xe9   : > { %1727 = vmatpush.bf16.msrb.mxu3 %v7507_v49  ;;  %v7483_v36 = vor.u32 %v8701_v33, %v7480_v34  ;;  %v7352_v38 = vld [vmem:[%s10308_s20 + $0xc8] sm:$0xf0]  ;;  %v8621_v42 = vld [vmem:[%s10291_s10 + $0x44] sm:$0xf]  ;;  %v7166_v44 = vld [vmem:[%s10291_s10 + $0x48] sm:$0xf]  ;;  %v10487_v49 = vor.u32 %v8623_v41, %v7158_v40 }
  0xea   : > { %1581 = vmatpush.bf16.msrb.mxu0 %v7307_v2  ;;  %v7355_v39 = vor.u32 %v8669_v37, %v7352_v38  ;;  %v8624_v45 = vld [vmem:[%s10291_s10 + $0x54] sm:$0xf0]  ;;  %v8622_v46 = vld [vmem:[%s10291_s10 + $0x4c] sm:$0xf]  ;;  %v7168_v47 = vld [vmem:[%s10291_s10 + $0x58] sm:$0xf0]  ;;  %v10489_v50 = vor.u32 %v8621_v42, %v7160_v43 }
  0xeb   : > { %1630 = vmatpush.bf16.msrb.mxu1 %v7371_v6  ;;  %v10491_v51 = vor.u32 %v8624_v45, %v7166_v44  ;;  %v10493_v52 = vor.u32 %v8622_v46, %v7168_v47  ;;  %v8683_v55 = vld [vmem:[%s10308_s20 + $0x134] sm:$0xf]  ;;  %v7408_v56 = vld [vmem:[%s10308_s20 + $0x138] sm:$0xf0]  ;;  %v7174_v4 = vld [vmem:[%s10291_s10 + $0x60] sm:$0xf] }
  0xec   : > { %1679 = vmatpush.bf16.msrb.mxu2 %v7435_v60  ;;  %v8651_v58 = vld [vmem:[%s10308_s20 + $0x34] sm:$0xf]  ;;  %v7411_v59 = vor.u32 %v8683_v55, %v7408_v56  ;;  %v7280_v60 = vld [vmem:[%s10308_s20 + $0x38] sm:$0xf0]  ;;  %v8627_v5 = vld [vmem:[%s10291_s10 + $0x6c] sm:$0xf0] }
  0xed   : > { %1728 = vmatpush.bf16.msrb.mxu3 %v7499_v63  ;;  %v8699_v61 = vld [vmem:[%s10308_s20 + $0x1b4] sm:$0xf]  ;;  %v7472_v62 = vld [vmem:[%s10308_s20 + $0x1b8] sm:$0xf0]  ;;  %v7283_v63 = vor.u32 %v8651_v58, %v7280_v60  ;;  %v8625_v6 = vld [vmem:[%s10291_s10 + $0x64] sm:$0xf]  ;;  %v10515_v12 = vor.u32 %v8627_v5, %v7174_v4 }
  0xee   : > { %1582 = vmatpush.bf16.msrb.mxu0 %v7299_v14  ;;  %v7475_v0 = vor.u32 %v8699_v61, %v7472_v62  ;;  %v8667_v1 = vld [vmem:[%s10308_s20 + $0xb4] sm:$0xf]  ;;  %v7344_v2 = vld [vmem:[%s10308_s20 + $0xb8] sm:$0xf0]  ;;  %v7182_v8 = vld [vmem:[%s10291_s10 + $0x68] sm:$0xf] }
  0xef   : > { %1631 = vmatpush.bf16.msrb.mxu1 %v7363_v15  ;;  %v7347_v3 = vor.u32 %v8667_v1, %v7344_v2  ;;  %v8628_v9 = vld [vmem:[%s10291_s10 + $0x74] sm:$0xf0]  ;;  %v8626_v10 = vld [vmem:[%s10291_s10 + $0x6c] sm:$0xf]  ;;  %v8681_v16 = vld [vmem:[%s10308_s20 + $0x124] sm:$0xf] }
  0xf0   : > { %1680 = vmatpush.bf16.msrb.mxu2 %v7427_v7  ;;  %v7176_v7 = vld [vmem:[%s10291_s10 + $0x70] sm:$0xf0]  ;;  %v10519_v14 = vor.u32 %v8628_v9, %v7182_v8  ;;  %v7400_v17 = vld [vmem:[%s10308_s20 + $0x128] sm:$0xf0]  ;;  %v8649_v18 = vld [vmem:[%s10308_s20 + $0x24] sm:$0xf] }
  0xf1   : > { %1729 = vmatpush.bf16.msrb.mxu3 %v7491_v11  ;;  %v7184_v11 = vld [vmem:[%s10291_s10 + $0x78] sm:$0xf0]  ;;  %v10517_v13 = vor.u32 %v8625_v6, %v7176_v7  ;;  %v7403_v19 = vor.u32 %v8681_v16, %v7400_v17  ;;  %v7272_v20 = vld [vmem:[%s10308_s20 + $0x28] sm:$0xf0]  ;;  %v8697_v21 = vld [vmem:[%s10308_s20 + $0x1a4] sm:$0xf] }
  0xf2   : > { %1583 = vmatpush.bf16.msrb.mxu0 %v7291_v35  ;;  %v10521_v15 = vor.u32 %v8626_v10, %v7184_v11  ;;  %v7464_v22 = vld [vmem:[%s10308_s20 + $0x1a8] sm:$0xf0]  ;;  %v7275_v23 = vor.u32 %v8649_v18, %v7272_v20  ;;  %v8665_v29 = vld [vmem:[%s10308_s20 + $0xa4] sm:$0xf]  ;;  %v7190_v32 = vld [vmem:[%s10291_s10 + $0x80] sm:$0xf] }
  0xf3   : > { %1632 = vmatpush.bf16.msrb.mxu1 %v7355_v39  ;;  %v7467_v28 = vor.u32 %v8697_v21, %v7464_v22  ;;  %v7336_v30 = vld [vmem:[%s10308_s20 + $0xa8] sm:$0xf0]  ;;  %v8631_v33 = vld [vmem:[%s10291_s10 + $0x8c] sm:$0xf0]  ;;  %v8629_v34 = vld [vmem:[%s10291_s10 + $0x84] sm:$0xf] }
  0xf4   : > { %1681 = vmatpush.bf16.msrb.mxu2 %v7419_v31  ;;  %v7339_v31 = vor.u32 %v8665_v29, %v7336_v30  ;;  %v7192_v35 = vld [vmem:[%s10291_s10 + $0x90] sm:$0xf0]  ;;  %v8632_v37 = vld [vmem:[%s10291_s10 + $0x94] sm:$0xf0]  ;;  %v8630_v38 = vld [vmem:[%s10291_s10 + $0x8c] sm:$0xf]  ;;  %v10543_v40 = vor.u32 %v8631_v33, %v7190_v32 }
  0xf5   : > { %1397 = vmatmul.bf16.gmra.mxu0 %v10459_v24  ;;  %1730 = vmatpush.bf16.msrb.mxu3 %v7483_v36  ;;  %v7198_v36 = vld [vmem:[%s10291_s10 + $0x88] sm:$0xf]  ;;  %v7200_v39 = vld [vmem:[%s10291_s10 + $0x98] sm:$0xf0]  ;;  %v10545_v41 = vor.u32 %v8629_v34, %v7192_v35  ;;  %v8679_v44 = vld [vmem:[%s10308_s20 + $0x114] sm:$0xf] }
  0xf6   : > { %1446 = vmatmul.bf16.gmra.mxu1 %v10461_v25  ;;  %1584 = vmatpush.bf16.msrb.mxu0 %v7283_v63  ;;  %v10547_v42 = vor.u32 %v8632_v37, %v7198_v36  ;;  %v10549_v43 = vor.u32 %v8630_v38, %v7200_v39  ;;  %v7392_v45 = vld [vmem:[%s10308_s20 + $0x118] sm:$0xf0]  ;;  %v8647_v46 = vld [vmem:[%s10308_s20 + $0x14] sm:$0xf]  ;;  %v8635_v1 = vld [vmem:[%s10291_s10 + $0xac] sm:$0xf0] }
  0xf7   : > { %1495 = vmatmul.bf16.gmra.mxu2 %v10463_v26  ;;  %1633 = vmatpush.bf16.msrb.mxu1 %v7347_v3  ;;  %v7395_v47 = vor.u32 %v8679_v44, %v7392_v45  ;;  %v7264_v55 = vld [vmem:[%s10308_s20 + $0x18] sm:$0xf0]  ;;  %v8695_v56 = vld [vmem:[%s10308_s20 + $0x194] sm:$0xf]  ;;  %v8633_v2 = vld [vmem:[%s10291_s10 + $0xa4] sm:$0xf] }
  0xf8   : > { %1544 = vmatmul.bf16.gmra.mxu3 %v10465_v27  ;;  %1682 = vmatpush.bf16.msrb.mxu2 %v7411_v59  ;;  %v7456_v58 = vld [vmem:[%s10308_s20 + $0x198] sm:$0xf0]  ;;  %v7267_v59 = vor.u32 %v8647_v46, %v7264_v55  ;;  %v8663_v61 = vld [vmem:[%s10308_s20 + $0x94] sm:$0xf]  ;;  %v7214_v4 = vld [vmem:[%s10291_s10 + $0xa8] sm:$0xf] }
  0xf9   : > { %1731 = vmatpush.bf16.msrb.mxu3 %v7475_v0  ;;  %v7459_v60 = vor.u32 %v8695_v56, %v7456_v58  ;;  %v7328_v62 = vld [vmem:[%s10308_s20 + $0x98] sm:$0xf0]  ;;  %v7206_v0 = vld [vmem:[%s10291_s10 + $0xa0] sm:$0xf]  ;;  %v7208_v3 = vld [vmem:[%s10291_s10 + $0xb0] sm:$0xf0] }
  0xfa   : > { %1585 = vmatpush.bf16.msrb.mxu0 %v7275_v23  ;;  %v7331_v63 = vor.u32 %v8663_v61, %v7328_v62  ;;  %v8636_v5 = vld [vmem:[%s10291_s10 + $0xb4] sm:$0xf0]  ;;  %v8634_v6 = vld [vmem:[%s10291_s10 + $0xac] sm:$0xf]  ;;  %v7216_v7 = vld [vmem:[%s10291_s10 + $0xb8] sm:$0xf0]  ;;  %v10571_v8 = vor.u32 %v8635_v1, %v7206_v0  ;;  %v10573_v9 = vor.u32 %v8633_v2, %v7208_v3 }
  0xfb   : > { %1634 = vmatpush.bf16.msrb.mxu1 %v7339_v31  ;;  %v10575_v10 = vor.u32 %v8636_v5, %v7214_v4  ;;  %v10577_v11 = vor.u32 %v8634_v6, %v7216_v7  ;;  %v8677_v16 = vld [vmem:[%s10308_s20 + $0x104] sm:$0xf]  ;;  %v7384_v17 = vld [vmem:[%s10308_s20 + $0x108] sm:$0xf0]  ;;  %v7222_v32 = vld [vmem:[%s10291_s10 + $0xc0] sm:$0xf] }
  0xfc   : > { %1683 = vmatpush.bf16.msrb.mxu2 %v7403_v19  ;;  %v8645_v18 = vld [vmem:[%s10308_s20 + $0x4] sm:$0xf]  ;;  %v7387_v19 = vor.u32 %v8677_v16, %v7384_v17  ;;  %v7256_v20 = vld [vmem:[%s10308_s20 + $0x8] sm:$0xf0]  ;;  %v8639_v33 = vld [vmem:[%s10291_s10 + $0xcc] sm:$0xf0] }
  0xfd   : > { %1732 = vmatpush.bf16.msrb.mxu3 %v7467_v28  ;;  %v8693_v21 = vld [vmem:[%s10308_s20 + $0x184] sm:$0xf]  ;;  %v7448_v22 = vld [vmem:[%s10308_s20 + $0x188] sm:$0xf0]  ;;  %v7259_v23 = vor.u32 %v8645_v18, %v7256_v20  ;;  %v7224_v35 = vld [vmem:[%s10291_s10 + $0xd0] sm:$0xf0]  ;;  %v10599_v44 = vor.u32 %v8639_v33, %v7222_v32 }
  0xfe   : > { %1586 = vmatpush.bf16.msrb.mxu0 %v7267_v59  ;;  %v7451_v28 = vor.u32 %v8693_v21, %v7448_v22  ;;  %v8661_v29 = vld [vmem:[%s10308_s20 + $0x84] sm:$0xf]  ;;  %v7320_v30 = vld [vmem:[%s10308_s20 + $0x88] sm:$0xf0]  ;;  %v7230_v36 = vld [vmem:[%s10291_s10 + $0xc8] sm:$0xf] }
  0xff   : > { %1635 = vmatpush.bf16.msrb.mxu1 %v7331_v63  ;;  %v7323_v31 = vor.u32 %v8661_v29, %v7320_v30  ;;  %v8637_v34 = vld [vmem:[%s10291_s10 + $0xc4] sm:$0xf]  ;;  %v8640_v37 = vld [vmem:[%s10291_s10 + $0xd4] sm:$0xf0]  ;;  %v8638_v38 = vld [vmem:[%s10291_s10 + $0xcc] sm:$0xf] }
 0x100   : > { %1684 = vmatpush.bf16.msrb.mxu2 %v7395_v47  ;;  %v7232_v39 = vld [vmem:[%s10291_s10 + $0xd8] sm:$0xf0]  ;;  %v10601_v45 = vor.u32 %v8637_v34, %v7224_v35  ;;  %v10603_v46 = vor.u32 %v8640_v37, %v7230_v36  ;;  %v7238_v55 = vld [vmem:[%s10291_s10 + $0xe0] sm:$0xf]  ;;  %v8643_v56 = vld [vmem:[%s10291_s10 + $0xec] sm:$0xf0] }
 0x101   : > { %1733 = vmatpush.bf16.msrb.mxu3 %v7459_v60  ;;  %v10605_v47 = vor.u32 %v8638_v38, %v7232_v39  ;;  %v8641_v58 = vld [vmem:[%s10291_s10 + $0xe4] sm:$0xf]  ;;  %v7240_v59 = vld [vmem:[%s10291_s10 + $0xf0] sm:$0xf0]  ;;  %v7246_v60 = vld [vmem:[%s10291_s10 + $0xe8] sm:$0xf]  ;;  %v10619_v0 = vor.u32 %v8643_v56, %v7238_v55 }
 0x102   : > { %1587 = vmatpush.bf16.msrb.mxu0 %v7259_v23  ;;  %v8644_v61 = vld [vmem:[%s10291_s10 + $0xf4] sm:$0xf0]  ;;  %v8642_v62 = vld [vmem:[%s10291_s10 + $0xec] sm:$0xf]  ;;  %v7248_v63 = vld [vmem:[%s10291_s10 + $0xf8] sm:$0xf0]  ;;  %v10621_v1 = vor.u32 %v8641_v58, %v7240_v59 }
 0x103   : > { %1636 = vmatpush.bf16.msrb.mxu1 %v7323_v31  ;;  %v10623_v2 = vor.u32 %v8644_v61, %v7246_v60  ;;  %v10625_v3 = vor.u32 %v8642_v62, %v7248_v63  ;;  %v10633_v4 = vld [vmem:[%s659_s3] sm:$0x3]  ;;  %vm1840_vm0 = vcmask 7168  }
 0x104   : > { %1685 = vmatpush.bf16.msrb.mxu2 %v7387_v19  ;;  %v10636_v5 = vperm.slane %v10633_v4, 0 }
 0x105   : > { %1402 = vmatmul.bf16.gmra.mxu0 %v10487_v49  ;;  %1734 = vmatpush.bf16.msrb.mxu3 %v7451_v28 }
 0x106   : > { %1451 = vmatmul.bf16.gmra.mxu1 %v10489_v50 }
 0x107   : > { %1500 = vmatmul.bf16.gmra.mxu2 %v10491_v51 }
 0x108   : > { %1549 = vmatmul.bf16.gmra.mxu3 %v10493_v52 }
 0x115   : > { %1407 = vmatmul.bf16.gmra.mxu0 %v10515_v12 }
 0x116   : > { %1456 = vmatmul.bf16.gmra.mxu1 %v10517_v13 }
 0x117   : > { %1505 = vmatmul.bf16.gmra.mxu2 %v10519_v14 }
 0x118   : > { %1554 = vmatmul.bf16.gmra.mxu3 %v10521_v15 }
 0x125   : > { %1412 = vmatmul.bf16.gmra.mxu0 %v10543_v40 }
 0x126   : > { %1461 = vmatmul.bf16.gmra.mxu1 %v10545_v41 }
 0x127   : > { %1510 = vmatmul.bf16.gmra.mxu2 %v10547_v42 }
 0x128   : > { %1559 = vmatmul.bf16.gmra.mxu3 %v10549_v43 }
 0x135   : > { %1417 = vmatmul.bf16.gmra.mxu0 %v10571_v8 }
 0x136   : > { %1466 = vmatmul.bf16.gmra.mxu1 %v10573_v9 }
 0x137   : > { %1515 = vmatmul.bf16.gmra.mxu2 %v10575_v10 }
 0x138   : > { %1564 = vmatmul.bf16.gmra.mxu3 %v10577_v11 }
 0x145   : > { %1422 = vmatmul.bf16.gmra.mxu0 %v10599_v44 }
 0x146   : > { %1471 = vmatmul.bf16.gmra.mxu1 %v10601_v45 }
 0x147   : > { %1520 = vmatmul.bf16.gmra.mxu2 %v10603_v46 }
 0x148   : > { %1569 = vmatmul.bf16.gmra.mxu3 %v10605_v47 }
 0x155   : > { %1427 = vmatmul.bf16.gmra.mxu0 %v10619_v0 }
 0x156   : > { %1476 = vmatmul.bf16.gmra.mxu1 %v10621_v1 }
 0x157   : > { %1525 = vmatmul.bf16.gmra.mxu2 %v10623_v2 }
 0x158   : > { %1574 = vmatmul.bf16.gmra.mxu3 %v10625_v3 }
 0x162   : > { %v1393_v6 = vpop.f32.mrf.mxu0 }
 0x163   : > { %v1394_v7 = vadd.f32 %v1393_v6, %v10636_v5  ;;  %v1442_v16 = vpop.f32.mrf.mxu1 }
 0x165   : > { %v1443_v17 = vadd.f32 %v1442_v16, %v1394_v7  ;;  %1588 = vmatmul.bf16.vlgmr.msrb.gmra.mxu0 %v10422_v48 }
 0x166   : > { %1637 = vmatmul.bf16.vlgmr.msrb.gmra.mxu1 %v10427_v53 }
 0x167   : > { %1686 = vmatmul.bf16.vlgmr.msrb.gmra.mxu2 %v10429_v54 }
 0x168   : > { %1735 = vmatmul.bf16.vlgmr.msrb.gmra.mxu3 %v10433_v57 }
 0x16a   : > { %v1491_v18 = vpop.f32.mrf.mxu2  ;;  %v1395_v21 = vpop.f32.mrf.mxu0 }
 0x16b   : > { %v1492_v19 = vadd.f32 %v1491_v18, %v1443_v17  ;;  %v1540_v20 = vpop.f32.mrf.mxu3  ;;  %v1396_v22 = vadd.f32 %v1395_v21, %v10636_v5  ;;  %v1444_v23 = vpop.f32.mrf.mxu1 }
 0x16d   : > { %v10644_v28 = vadd.f32 %v1540_v20, %v1492_v19  ;;  %v1445_v29 = vadd.f32 %v1444_v23, %v1396_v22 }
 0x172   : > { %v1493_v30 = vpop.f32.mrf.mxu2  ;;  %v1398_v48 = vpop.f32.mrf.mxu0 }
 0x173   : > { %v1494_v31 = vadd.f32 %v1493_v30, %v1445_v29  ;;  %v1542_v32 = vpop.f32.mrf.mxu3  ;;  %v1399_v53 = vadd.f32 %v1398_v48, %v10636_v5  ;;  %v1447_v33 = vpop.f32.mrf.mxu1 }
 0x175   : > { %v10647_v54 = vadd.f32 %v1542_v32, %v1494_v31  ;;  %v1448_v57 = vadd.f32 %v1447_v33, %v1399_v53  ;;  %1593 = vmatmul.bf16.gmra.mxu0 %v10459_v24 }
 0x176   : > { %1642 = vmatmul.bf16.gmra.mxu1 %v10461_v25 }
 0x177   : > { %1691 = vmatmul.bf16.gmra.mxu2 %v10463_v26 }
 0x178   : > { %1740 = vmatmul.bf16.gmra.mxu3 %v10465_v27 }
 0x17a   : > { %v1496_v34 = vpop.f32.mrf.mxu2  ;;  %v1400_v37 = vpop.f32.mrf.mxu0 }
 0x17b   : > { %v1497_v35 = vadd.f32 %v1496_v34, %v1448_v57  ;;  %v1545_v36 = vpop.f32.mrf.mxu3  ;;  %v1401_v38 = vadd.f32 %v1400_v37, %v10636_v5  ;;  %v1449_v39 = vpop.f32.mrf.mxu1 }
 0x17d   : > { %v10654_v55 = vadd.f32 %v1545_v36, %v1497_v35  ;;  %v1450_v56 = vadd.f32 %v1449_v39, %v1401_v38 }
 0x182   : > { %v1498_v58 = vpop.f32.mrf.mxu2  ;;  %v1403_v24 = vpop.f32.mrf.mxu0 }
 0x183   : > { %v1499_v59 = vadd.f32 %v1498_v58, %v1450_v56  ;;  %v1547_v60 = vpop.f32.mrf.mxu3  ;;  %v1404_v25 = vadd.f32 %v1403_v24, %v10636_v5  ;;  %v1452_v61 = vpop.f32.mrf.mxu1 }
 0x185   : > { %v10657_v26 = vadd.f32 %v1547_v60, %v1499_v59  ;;  %v1453_v27 = vadd.f32 %v1452_v61, %v1404_v25  ;;  %1598 = vmatmul.bf16.gmra.mxu0 %v10487_v49 }
 0x186   : > { %1647 = vmatmul.bf16.gmra.mxu1 %v10489_v50 }
 0x187   : > { %1696 = vmatmul.bf16.gmra.mxu2 %v10491_v51 }
 0x188   : > { %1745 = vmatmul.bf16.gmra.mxu3 %v10493_v52 }
 0x18a   : > { %v1501_v62 = vpop.f32.mrf.mxu2  ;;  %v1405_v7 = vpop.f32.mrf.mxu0 }
 0x18b   : > { %v1502_v63 = vadd.f32 %v1501_v62, %v1453_v27  ;;  %v1550_v6 = vpop.f32.mrf.mxu3  ;;  %v1406_v16 = vadd.f32 %v1405_v7, %v10636_v5  ;;  %v1454_v17 = vpop.f32.mrf.mxu1 }
 0x18d   : > { %v10664_v18 = vadd.f32 %v1550_v6, %v1502_v63  ;;  %v1455_v19 = vadd.f32 %v1454_v17, %v1406_v16 }
 0x192   : > { %v1503_v20 = vpop.f32.mrf.mxu2  ;;  %v1408_v49 = vpop.f32.mrf.mxu0 }
 0x193   : > { %v1504_v21 = vadd.f32 %v1503_v20, %v1455_v19  ;;  %v1552_v22 = vpop.f32.mrf.mxu3  ;;  %v1409_v50 = vadd.f32 %v1408_v49, %v10636_v5  ;;  %v1457_v23 = vpop.f32.mrf.mxu1 }
 0x195   : > { %v10667_v51 = vadd.f32 %v1552_v22, %v1504_v21  ;;  %v1458_v52 = vadd.f32 %v1457_v23, %v1409_v50  ;;  %1603 = vmatmul.bf16.gmra.mxu0 %v10515_v12 }
 0x196   : > { %1652 = vmatmul.bf16.gmra.mxu1 %v10517_v13 }
 0x197   : > { %1701 = vmatmul.bf16.gmra.mxu2 %v10519_v14 }
 0x198   : > { %1750 = vmatmul.bf16.gmra.mxu3 %v10521_v15 }
 0x19a   : > { %v1506_v29 = vpop.f32.mrf.mxu2  ;;  %v1410_v32 = vpop.f32.mrf.mxu0 }
 0x19b   : > { %v1507_v30 = vadd.f32 %v1506_v29, %v1458_v52  ;;  %v1555_v31 = vpop.f32.mrf.mxu3  ;;  %v1411_v48 = vadd.f32 %v1410_v32, %v10636_v5  ;;  %v1459_v53 = vpop.f32.mrf.mxu1 }
 0x19d   : > { %v10674_v33 = vadd.f32 %v1555_v31, %v1507_v30  ;;  %v1460_v57 = vadd.f32 %v1459_v53, %v1411_v48 }
 0x1a2   : > { %v1508_v34 = vpop.f32.mrf.mxu2  ;;  %v1413_v12 = vpop.f32.mrf.mxu0 }
 0x1a3   : > { %v1509_v35 = vadd.f32 %v1508_v34, %v1460_v57  ;;  %v1557_v36 = vpop.f32.mrf.mxu3  ;;  %v1414_v13 = vadd.f32 %v1413_v12, %v10636_v5  ;;  %v1462_v37 = vpop.f32.mrf.mxu1 }
 0x1a5   : > { %v10677_v14 = vadd.f32 %v1557_v36, %v1509_v35  ;;  %v1463_v15 = vadd.f32 %v1462_v37, %v1414_v13  ;;  %1608 = vmatmul.bf16.gmra.mxu0 %v10543_v40 }
 0x1a6   : > { %1657 = vmatmul.bf16.gmra.mxu1 %v10545_v41 }
 0x1a7   : > { %1706 = vmatmul.bf16.gmra.mxu2 %v10547_v42 }
 0x1a8   : > { %1755 = vmatmul.bf16.gmra.mxu3 %v10549_v43 }
 0x1aa   : > { %v1511_v38 = vpop.f32.mrf.mxu2  ;;  %v1415_v58 = vpop.f32.mrf.mxu0 }
 0x1ab   : > { %v1512_v39 = vadd.f32 %v1511_v38, %v1463_v15  ;;  %v1560_v56 = vpop.f32.mrf.mxu3  ;;  %v1416_v59 = vadd.f32 %v1415_v58, %v10636_v5  ;;  %v1464_v60 = vpop.f32.mrf.mxu1 }
 0x1ad   : > { %v10684_v24 = vadd.f32 %v1560_v56, %v1512_v39  ;;  %v1465_v25 = vadd.f32 %v1464_v60, %v1416_v59 }
 0x1b2   : > { %v1513_v61 = vpop.f32.mrf.mxu2  ;;  %v1418_v40 = vpop.f32.mrf.mxu0 }
 0x1b3   : > { %v1514_v27 = vadd.f32 %v1513_v61, %v1465_v25  ;;  %v1562_v62 = vpop.f32.mrf.mxu3  ;;  %v1419_v41 = vadd.f32 %v1418_v40, %v10636_v5  ;;  %v1467_v63 = vpop.f32.mrf.mxu1  ;;  %v10717_v25 = vperm.slane %v10633_v4, 1  ;;  %v1776_v4 = vmul.f32 0.088388346, %v10644_v28 }
 0x1b5   : > { %v10687_v42 = vadd.f32 %v1562_v62, %v1514_v27  ;;  %v1468_v43 = vadd.f32 %v1467_v63, %v1419_v41  ;;  %1613 = vmatmul.bf16.gmra.mxu0 %v10571_v8 }
 0x1b6   : > { %1662 = vmatmul.bf16.gmra.mxu1 %v10573_v9 }
 0x1b7   : > { %1711 = vmatmul.bf16.gmra.mxu2 %v10575_v10 }
 0x1b8   : > { %1760 = vmatmul.bf16.gmra.mxu3 %v10577_v11 }
 0x1ba   : > { %v1516_v6 = vpop.f32.mrf.mxu2  ;;  %v1420_v17 = vpop.f32.mrf.mxu0 }
 0x1bb   : > { %v1517_v7 = vadd.f32 %v1516_v6, %v1468_v43  ;;  %v1565_v16 = vpop.f32.mrf.mxu3  ;;  %v1421_v19 = vadd.f32 %v1420_v17, %v10636_v5  ;;  %v1469_v20 = vpop.f32.mrf.mxu1 }
 0x1bd   : > { %v10694_v21 = vadd.f32 %v1565_v16, %v1517_v7  ;;  %v1470_v22 = vadd.f32 %v1469_v20, %v1421_v19 }
 0x1c2   : > { %v1518_v49 = vpop.f32.mrf.mxu2  ;;  %v1423_v8 = vpop.f32.mrf.mxu0 }
 0x1c3   : > { %v1519_v50 = vadd.f32 %v1518_v49, %v1470_v22  ;;  %v1567_v23 = vpop.f32.mrf.mxu3  ;;  %v1424_v9 = vadd.f32 %v1423_v8, %v10636_v5  ;;  %v1472_v52 = vpop.f32.mrf.mxu1 }
 0x1c5   : > { %v10697_v10 = vadd.f32 %v1567_v23, %v1519_v50  ;;  %v1473_v11 = vadd.f32 %v1472_v52, %v1424_v9  ;;  %1618 = vmatmul.bf16.gmra.mxu0 %v10599_v44 }
 0x1c6   : > { %1667 = vmatmul.bf16.gmra.mxu1 %v10601_v45 }
 0x1c7   : > { %1716 = vmatmul.bf16.gmra.mxu2 %v10603_v46 }
 0x1c8   : > { %1765 = vmatmul.bf16.gmra.mxu3 %v10605_v47 }
 0x1ca   : > { %v1521_v29 = vpop.f32.mrf.mxu2  ;;  %v1425_v32 = vpop.f32.mrf.mxu0 }
 0x1cb   : > { %v1522_v30 = vadd.f32 %v1521_v29, %v1473_v11  ;;  %v1570_v31 = vpop.f32.mrf.mxu3  ;;  %v1426_v48 = vadd.f32 %v1425_v32, %v10636_v5  ;;  %v1474_v53 = vpop.f32.mrf.mxu1  ;;  %v1778_v11 = vmul.f32 0.088388346, %v10647_v54 }
 0x1cd   : > { %v10704_v57 = vadd.f32 %v1570_v31, %v1522_v30  ;;  %v1475_v34 = vadd.f32 %v1474_v53, %v1426_v48 }
 0x1d2   : > { %v1523_v35 = vpop.f32.mrf.mxu2  ;;  %v1428_v44 = vpop.f32.mrf.mxu0 }
 0x1d3   : > { %v1524_v36 = vadd.f32 %v1523_v35, %v1475_v34  ;;  %v1572_v12 = vpop.f32.mrf.mxu3  ;;  %v1429_v45 = vadd.f32 %v1428_v44, %v10636_v5  ;;  %v1477_v13 = vpop.f32.mrf.mxu1 }
 0x1d5   : > { %v10707_v46 = vadd.f32 %v1572_v12, %v1524_v36  ;;  %v1478_v47 = vadd.f32 %v1477_v13, %v1429_v45  ;;  %1623 = vmatmul.bf16.gmra.mxu0 %v10619_v0  ;;  %v1780_v12 = vmul.f32 0.088388346, %v10654_v55 }
 0x1d6   : > { %1672 = vmatmul.bf16.gmra.mxu1 %v10621_v1 }
 0x1d7   : > { %1721 = vmatmul.bf16.gmra.mxu2 %v10623_v2 }
 0x1d8   : > { %1770 = vmatmul.bf16.gmra.mxu3 %v10625_v3 }
 0x1da   : > { %v1526_v37 = vpop.f32.mrf.mxu2  ;;  %v1430_v39 = vpop.f32.mrf.mxu0 }
 0x1db   : > { %v1527_v15 = vadd.f32 %v1526_v37, %v1478_v47  ;;  %v1575_v38 = vpop.f32.mrf.mxu3  ;;  %v1431_v56 = vadd.f32 %v1430_v39, %v10636_v5  ;;  %v1479_v58 = vpop.f32.mrf.mxu1 }
 0x1dd   : > { %v10714_v59 = vadd.f32 %v1575_v38, %v1527_v15  ;;  %v1480_v60 = vadd.f32 %v1479_v58, %v1431_v56  ;;  %v1782_v58 = vmul.f32 0.088388346, %v10657_v26 }
 0x1e2   : > { %v1528_v0 = vpop.f32.mrf.mxu2  ;;  %v1589_v27 = vpop.f32.mrf.mxu0 }
 0x1e3   : > { %v1529_v61 = vadd.f32 %v1528_v0, %v1480_v60  ;;  %v1577_v1 = vpop.f32.mrf.mxu3  ;;  %v1590_v2 = vadd.f32 %v1589_v27, %v10717_v25  ;;  %v1638_v3 = vpop.f32.mrf.mxu1 }
 0x1e5   : > { %v10720_v62 = vadd.f32 %v1577_v1, %v1529_v61  ;;  %v1639_v40 = vadd.f32 %v1638_v3, %v1590_v2 }
 0x1ea   : > { %v1687_v41 = vpop.f32.mrf.mxu2  ;;  %v1591_v43 = vpop.f32.mrf.mxu0 }
 0x1eb   : > { %v1688_v63 = vadd.f32 %v1687_v41, %v1639_v40  ;;  %v1736_v5 = vpop.f32.mrf.mxu3  ;;  %v1640_v6 = vpop.f32.mrf.mxu1  ;;  %v1592_v16 = vadd.f32 %v1591_v43, %v10717_v25 }
 0x1ed   : > { %v1737_v7 = vadd.f32 %v1736_v5, %v1688_v63  ;;  %v1641_v20 = vadd.f32 %v1640_v6, %v1592_v16  ;;  %v1784_v63 = vmul.f32 0.088388346, %v10664_v18 }
 0x1ef   : > { %v1777_v17 = vmul.f32 0.088388346, %v1737_v7 }
 0x1f1   : > { %v1808_v19 = vpack.c.bf16 %v1777_v17, %v1776_v4 }
 0x1f2   : > { %v1689_v22 = vpop.f32.mrf.mxu2  ;;  %v1594_v23 = vpop.f32.mrf.mxu0 }
 0x1f3   : > { %1824 = vst [vmem:[#allocation2] sm:$0xff] %v1808_v19  ;;  %v1690_v49 = vadd.f32 %v1689_v22, %v1641_v20  ;;  %v1738_v50 = vpop.f32.mrf.mxu3  ;;  %v1595_v8 = vadd.f32 %v1594_v23, %v10717_v25  ;;  %v1643_v9 = vpop.f32.mrf.mxu1  ;;  %v1786_v22 = vmul.f32 0.088388346, %v10667_v51 }
 0x1f5   : > { %v1739_v52 = vadd.f32 %v1738_v50, %v1690_v49  ;;  %v1644_v30 = vadd.f32 %v1643_v9, %v1595_v8 }
 0x1f7   : > { %v1779_v29 = vmul.f32 0.088388346, %v1739_v52 }
 0x1f9   : > { %v1809_v31 = vpack.c.bf16 %v1779_v29, %v1778_v11 }
 0x1fa   : > { %v1692_v32 = vpop.f32.mrf.mxu2  ;;  %v1596_v53 = vpop.f32.mrf.mxu0 }
 0x1fb   : > { %1825 = vst [vmem:[#allocation2 + $0x8] sm:$0xff] %v1809_v31  ;;  %v1693_v28 = vadd.f32 %v1692_v32, %v1644_v30  ;;  %v1741_v48 = vpop.f32.mrf.mxu3  ;;  %v1645_v34 = vpop.f32.mrf.mxu1  ;;  %v1597_v36 = vadd.f32 %v1596_v53, %v10717_v25  ;;  %v1788_v31 = vmul.f32 0.088388346, %v10674_v33 }
 0x1fd   : > { %v1742_v35 = vadd.f32 %v1741_v48, %v1693_v28  ;;  %v1646_v13 = vadd.f32 %v1645_v34, %v1597_v36 }
 0x1ff   : > { %v1781_v44 = vmul.f32 0.088388346, %v1742_v35 }
 0x201   : > { %v1810_v45 = vpack.c.bf16 %v1781_v44, %v1780_v12 }
 0x202   : > { %v1694_v47 = vpop.f32.mrf.mxu2  ;;  %v1599_v15 = vpop.f32.mrf.mxu0 }
 0x203   : > { %1826 = vst [vmem:[#allocation2 + $0x10] sm:$0xff] %v1810_v45  ;;  %v1695_v54 = vadd.f32 %v1694_v47, %v1646_v13  ;;  %v1743_v37 = vpop.f32.mrf.mxu3  ;;  %v1600_v38 = vadd.f32 %v1599_v15, %v10717_v25  ;;  %v1648_v39 = vpop.f32.mrf.mxu1  ;;  %v1790_v45 = vmul.f32 0.088388346, %v10677_v14 }
 0x205   : > { %v1744_v56 = vadd.f32 %v1743_v37, %v1695_v54  ;;  %v1649_v0 = vadd.f32 %v1648_v39, %v1600_v38 }
 0x207   : > { %v1783_v60 = vmul.f32 0.088388346, %v1744_v56 }
 0x209   : > { %v1811_v61 = vpack.c.bf16 %v1783_v60, %v1782_v58  ;;  %v1792_v60 = vmul.f32 0.088388346, %v10684_v24 }
 0x20a   : > { %v1697_v1 = vpop.f32.mrf.mxu2  ;;  %v1601_v2 = vpop.f32.mrf.mxu0 }
 0x20b   : > { %1827 = vst [vmem:[#allocation2 + $0x18] sm:$0xff] %v1811_v61  ;;  %v1698_v55 = vadd.f32 %v1697_v1, %v1649_v0  ;;  %v1746_v27 = vpop.f32.mrf.mxu3  ;;  %v1650_v3 = vpop.f32.mrf.mxu1  ;;  %v1602_v41 = vadd.f32 %v1601_v2, %v10717_v25 }
 0x20d   : > { %v1747_v40 = vadd.f32 %v1746_v27, %v1698_v55  ;;  %v1651_v6 = vadd.f32 %v1650_v3, %v1602_v41 }
 0x20f   : > { %v1785_v5 = vmul.f32 0.088388346, %v1747_v40 }
 0x211   : > { %v1812_v43 = vpack.c.bf16 %v1785_v5, %v1784_v63  ;;  %v1794_v63 = vmul.f32 0.088388346, %v10687_v42 }
 0x212   : > { %v1699_v7 = vpop.f32.mrf.mxu2  ;;  %v1604_v4 = vpop.f32.mrf.mxu0 }
 0x213   : > { %1828 = vst [vmem:[#allocation2 + $0x20] sm:$0xff] %v1812_v43  ;;  %v1700_v26 = vadd.f32 %v1699_v7, %v1651_v6  ;;  %v1748_v16 = vpop.f32.mrf.mxu3  ;;  %v1605_v17 = vadd.f32 %v1604_v4, %v10717_v25  ;;  %v1653_v19 = vpop.f32.mrf.mxu1 }
 0x215   : > { %v1749_v20 = vadd.f32 %v1748_v16, %v1700_v26  ;;  %v1654_v50 = vadd.f32 %v1653_v19, %v1605_v17 }
 0x217   : > { %v1787_v49 = vmul.f32 0.088388346, %v1749_v20  ;;  %v1796_v20 = vmul.f32 0.088388346, %v10694_v21 }
 0x219   : > { %v1813_v23 = vpack.c.bf16 %v1787_v49, %v1786_v22 }
 0x21a   : > { %v1702_v8 = vpop.f32.mrf.mxu2  ;;  %v1606_v52 = vpop.f32.mrf.mxu0 }
 0x21b   : > { %1829 = vst [vmem:[#allocation2 + $0x28] sm:$0xff] %v1813_v23  ;;  %v1703_v18 = vadd.f32 %v1702_v8, %v1654_v50  ;;  %v1751_v9 = vpop.f32.mrf.mxu3  ;;  %v1655_v11 = vpop.f32.mrf.mxu1  ;;  %v1607_v30 = vadd.f32 %v1606_v52, %v10717_v25 }
 0x21d   : > { %v1752_v29 = vadd.f32 %v1751_v9, %v1703_v18  ;;  %v1656_v48 = vadd.f32 %v1655_v11, %v1607_v30 }
 0x21f   : > { %v1789_v32 = vmul.f32 0.088388346, %v1752_v29  ;;  %v1798_v29 = vmul.f32 0.088388346, %v10697_v10  ;;  %v1800_v10 = vmul.f32 0.088388346, %v10704_v57 }
 0x221   : > { %v1814_v28 = vpack.c.bf16 %v1789_v32, %v1788_v31 }
 0x222   : > { %v1704_v53 = vpop.f32.mrf.mxu2  ;;  %v1609_v35 = vpop.f32.mrf.mxu0 }
 0x223   : > { %1830 = vst [vmem:[#allocation2 + $0x30] sm:$0xff] %v1814_v28  ;;  %v1705_v51 = vadd.f32 %v1704_v53, %v1656_v48  ;;  %v1753_v34 = vpop.f32.mrf.mxu3  ;;  %v1610_v36 = vadd.f32 %v1609_v35, %v10717_v25  ;;  %v1658_v12 = vpop.f32.mrf.mxu1 }
 0x225   : > { %v1754_v44 = vadd.f32 %v1753_v34, %v1705_v51  ;;  %v1659_v47 = vadd.f32 %v1658_v12, %v1610_v36  ;;  %v9858_v34 = vmov -inf  }
 0x226   : > { %1841 = vst.msk [vmem:[#allocation3] sm:$0xff] %vm1840_vm0, %v9858_v34 }
 0x227   : > { %v1791_v13 = vmul.f32 0.088388346, %v1754_v44  ;;  %1842 = vst.msk [vmem:[#allocation3 + $0x8] sm:$0xff] %vm1840_vm0, %v9858_v34 }
 0x228   : > { %1843 = vst.msk [vmem:[#allocation3 + $0x10] sm:$0xff] %vm1840_vm0, %v9858_v34 }
 0x229   : > { %v1815_v54 = vpack.c.bf16 %v1791_v13, %v1790_v45  ;;  %1844 = vst.msk [vmem:[#allocation3 + $0x18] sm:$0xff] %vm1840_vm0, %v9858_v34 }
 0x22a   : > { %v1707_v37 = vpop.f32.mrf.mxu2  ;;  %v1611_v38 = vpop.f32.mrf.mxu0  ;;  %1845 = vst.msk [vmem:[#allocation3 + $0x20] sm:$0xff] %vm1840_vm0, %v9858_v34 }
 0x22b   : > { %1831 = vst [vmem:[#allocation2 + $0x38] sm:$0xff] %v1815_v54  ;;  %v1708_v33 = vadd.f32 %v1707_v37, %v1659_v47  ;;  %v1756_v15 = vpop.f32.mrf.mxu3  ;;  %v1660_v39 = vpop.f32.mrf.mxu1  ;;  %v1612_v58 = vadd.f32 %v1611_v38, %v10717_v25  ;;  %v1802_v38 = vmul.f32 0.088388346, %v10707_v46 }
 0x22c   : > { %1846 = vst.msk [vmem:[#allocation3 + $0x28] sm:$0xff] %vm1840_vm0, %v9858_v34 }
 0x22d   : > { %v1757_v56 = vadd.f32 %v1756_v15, %v1708_v33  ;;  %v1661_v1 = vadd.f32 %v1660_v39, %v1612_v58  ;;  %1847 = vst.msk [vmem:[#allocation3 + $0x30] sm:$0xff] %vm1840_vm0, %v9858_v34 }
 0x22e   : > { %1848 = vst.msk [vmem:[#allocation3 + $0x38] sm:$0xff] %vm1840_vm0, %v9858_v34 }
 0x22f   : > { %v1793_v0 = vmul.f32 0.088388346, %v1757_v56  ;;  %1849 = vst.msk [vmem:[#allocation3 + $0x40] sm:$0xff] %vm1840_vm0, %v9858_v34 }
 0x230   : > { %1850 = vst.msk [vmem:[#allocation3 + $0x48] sm:$0xff] %vm1840_vm0, %v9858_v34 }
 0x231   : > { %v1816_v61 = vpack.c.bf16 %v1793_v0, %v1792_v60  ;;  %1851 = vst.msk [vmem:[#allocation3 + $0x50] sm:$0xff] %vm1840_vm0, %v9858_v34 }
 0x232   : > { %v1709_v55 = vpop.f32.mrf.mxu2  ;;  %v1614_v2 = vpop.f32.mrf.mxu0  ;;  %1852 = vst.msk [vmem:[#allocation3 + $0x58] sm:$0xff] %vm1840_vm0, %v9858_v34 }
 0x233   : > { %1832 = vst [vmem:[#allocation2 + $0x40] sm:$0xff] %v1816_v61  ;;  %v1710_v14 = vadd.f32 %v1709_v55, %v1661_v1  ;;  %v1758_v27 = vpop.f32.mrf.mxu3  ;;  %v1615_v3 = vadd.f32 %v1614_v2, %v10717_v25  ;;  %v1663_v40 = vpop.f32.mrf.mxu1 }
 0x234   : > { %1853 = vst.msk [vmem:[#allocation3 + $0x60] sm:$0xff] %vm1840_vm0, %v9858_v34 }
 0x235   : > { %v1759_v41 = vadd.f32 %v1758_v27, %v1710_v14  ;;  %v1664_v43 = vadd.f32 %v1663_v40, %v1615_v3  ;;  %1854 = vst.msk [vmem:[#allocation3 + $0x68] sm:$0xff] %vm1840_vm0, %v9858_v34  ;;  %v1804_v14 = vmul.f32 0.088388346, %v10714_v59 }
 0x236   : > { %1855 = vst.msk [vmem:[#allocation3 + $0x70] sm:$0xff] %vm1840_vm0, %v9858_v34 }
 0x237   : > { %v1795_v5 = vmul.f32 0.088388346, %v1759_v41  ;;  %1856 = vst.msk [vmem:[#allocation3 + $0x78] sm:$0xff] %vm1840_vm0, %v9858_v34 }
 0x238   : > { %1857 = vst.msk [vmem:[#allocation3 + $0x80] sm:$0xff] %vm1840_vm0, %v9858_v34 }
 0x239   : > { %v1817_v6 = vpack.c.bf16 %v1795_v5, %v1794_v63  ;;  %1858 = vst.msk [vmem:[#allocation3 + $0x88] sm:$0xff] %vm1840_vm0, %v9858_v34  ;;  %v1806_v5 = vmul.f32 0.088388346, %v10720_v62  ;;  %v9859_v62 = vmov 0.0  }
 0x23a   : > { %v1712_v7 = vpop.f32.mrf.mxu2  ;;  %v1616_v16 = vpop.f32.mrf.mxu0  ;;  %1859 = vst.msk [vmem:[#allocation3 + $0x90] sm:$0xff] %vm1840_vm0, %v9858_v34 }
 0x23b   : > { %1833 = vst [vmem:[#allocation2 + $0x48] sm:$0xff] %v1817_v6  ;;  %v1713_v24 = vadd.f32 %v1712_v7, %v1664_v43  ;;  %v1761_v26 = vpop.f32.mrf.mxu3  ;;  %v1665_v4 = vpop.f32.mrf.mxu1  ;;  %v1617_v19 = vadd.f32 %v1616_v16, %v10717_v25 }
 0x23c   : > { %1860 = vst.msk [vmem:[#allocation3 + $0x98] sm:$0xff] %vm1840_vm0, %v9858_v34 }
 0x23d   : > { %v1762_v17 = vadd.f32 %v1761_v26, %v1713_v24  ;;  %v1666_v50 = vadd.f32 %v1665_v4, %v1617_v19  ;;  %1861 = vst.msk [vmem:[#allocation3 + $0xa0] sm:$0xff] %vm1840_vm0, %v9858_v34 }
 0x23e   : > { %1862 = vst.msk [vmem:[#allocation3 + $0xa8] sm:$0xff] %vm1840_vm0, %v9858_v34 }
 0x23f   : > { %v1797_v22 = vmul.f32 0.088388346, %v1762_v17  ;;  %1863 = vst.msk [vmem:[#allocation3 + $0xb0] sm:$0xff] %vm1840_vm0, %v9858_v34 }
 0x240   : > { %1864 = vst.msk [vmem:[#allocation3 + $0xb8] sm:$0xff] %vm1840_vm0, %v9858_v34 }
 0x241   : > { %v1818_v49 = vpack.c.bf16 %v1797_v22, %v1796_v20  ;;  %1865 = vst.msk [vmem:[#allocation3 + $0xc0] sm:$0xff] %vm1840_vm0, %v9858_v34 }
 0x242   : > { %v1714_v23 = vpop.f32.mrf.mxu2  ;;  %v1619_v18 = vpop.f32.mrf.mxu0  ;;  %1866 = vst.msk [vmem:[#allocation3 + $0xc8] sm:$0xff] %vm1840_vm0, %v9858_v34 }
 0x243   : > { %1834 = vst [vmem:[#allocation2 + $0x50] sm:$0xff] %v1818_v49  ;;  %v1715_v42 = vadd.f32 %v1714_v23, %v1666_v50  ;;  %v1763_v8 = vpop.f32.mrf.mxu3  ;;  %v1620_v9 = vadd.f32 %v1619_v18, %v10717_v25  ;;  %v1668_v52 = vpop.f32.mrf.mxu1 }
 0x244   : > { %1867 = vst.msk [vmem:[#allocation3 + $0xd0] sm:$0xff] %vm1840_vm0, %v9858_v34 }
 0x245   : > { %v1764_v11 = vadd.f32 %v1763_v8, %v1715_v42  ;;  %v1669_v31 = vadd.f32 %v1668_v52, %v1620_v9  ;;  %1868 = vst.msk [vmem:[#allocation3 + $0xd8] sm:$0xff] %vm1840_vm0, %v9858_v34 }
 0x246   : > { %1869 = vst.msk [vmem:[#allocation3 + $0xe0] sm:$0xff] %vm1840_vm0, %v9858_v34 }
 0x247   : > { %v1799_v30 = vmul.f32 0.088388346, %v1764_v11  ;;  %1870 = vst.msk [vmem:[#allocation3 + $0xe8] sm:$0xff] %vm1840_vm0, %v9858_v34 }
 0x248   : > { %1871 = vst.msk [vmem:[#allocation3 + $0xf0] sm:$0xff] %vm1840_vm0, %v9858_v34 }
 0x249   : > { %v1819_v32 = vpack.c.bf16 %v1799_v30, %v1798_v29  ;;  %1872 = vst.msk [vmem:[#allocation3 + $0xf8] sm:$0xff] %vm1840_vm0, %v9858_v34 }
 0x24a   : > { %v1717_v28 = vpop.f32.mrf.mxu2  ;;  %v1621_v53 = vpop.f32.mrf.mxu0  ;;  %1873 = vst.msk [vmem:[#allocation4] sm:$0xff] %vm1840_vm0, %v9859_v62 }
 0x24b   : > { %1835 = vst [vmem:[#allocation2 + $0x58] sm:$0xff] %v1819_v32  ;;  %v1718_v21 = vadd.f32 %v1717_v28, %v1669_v31  ;;  %v1766_v48 = vpop.f32.mrf.mxu3  ;;  %v1670_v51 = vpop.f32.mrf.mxu1  ;;  %v1622_v36 = vadd.f32 %v1621_v53, %v10717_v25 }
 0x24c   : > { %1874 = vst.msk [vmem:[#allocation4 + $0x8] sm:$0xff] %vm1840_vm0, %v9859_v62 }
 0x24d   : > { %v1767_v35 = vadd.f32 %v1766_v48, %v1718_v21  ;;  %v1671_v45 = vadd.f32 %v1670_v51, %v1622_v36  ;;  %1875 = vst.msk [vmem:[#allocation4 + $0x10] sm:$0xff] %vm1840_vm0, %v9859_v62 }
 0x24e   : > { %1876 = vst.msk [vmem:[#allocation4 + $0x18] sm:$0xff] %vm1840_vm0, %v9859_v62 }
 0x24f   : > { %v1801_v12 = vmul.f32 0.088388346, %v1767_v35  ;;  %1877 = vst.msk [vmem:[#allocation4 + $0x20] sm:$0xff] %vm1840_vm0, %v9859_v62 }
 0x250   : > { %1878 = vst.msk [vmem:[#allocation4 + $0x28] sm:$0xff] %vm1840_vm0, %v9859_v62 }
 0x251   : > { %v1820_v44 = vpack.c.bf16 %v1801_v12, %v1800_v10  ;;  %1879 = vst.msk [vmem:[#allocation4 + $0x30] sm:$0xff] %vm1840_vm0, %v9859_v62 }
 0x252   : > { %v1719_v13 = vpop.f32.mrf.mxu2  ;;  %v1624_v57 = vpop.f32.mrf.mxu0  ;;  %1880 = vst.msk [vmem:[#allocation4 + $0x38] sm:$0xff] %vm1840_vm0, %v9859_v62 }
 0x253   : > { %1836 = vst [vmem:[#allocation2 + $0x60] sm:$0xff] %v1820_v44  ;;  %v1720_v47 = vadd.f32 %v1719_v13, %v1671_v45  ;;  %v1768_v54 = vpop.f32.mrf.mxu3  ;;  %v1625_v37 = vadd.f32 %v1624_v57, %v10717_v25  ;;  %v1673_v15 = vpop.f32.mrf.mxu1 }
 0x254   : > { %1881 = vst.msk [vmem:[#allocation4 + $0x40] sm:$0xff] %vm1840_vm0, %v9859_v62 }
 0x255   : > { %v1769_v33 = vadd.f32 %v1768_v54, %v1720_v47  ;;  %v1674_v56 = vadd.f32 %v1673_v15, %v1625_v37  ;;  %1882 = vst.msk [vmem:[#allocation4 + $0x48] sm:$0xff] %vm1840_vm0, %v9859_v62 }
 0x256   : > { %1883 = vst.msk [vmem:[#allocation4 + $0x50] sm:$0xff] %vm1840_vm0, %v9859_v62 }
 0x257   : > { %v1803_v39 = vmul.f32 0.088388346, %v1769_v33  ;;  %1884 = vst.msk [vmem:[#allocation4 + $0x58] sm:$0xff] %vm1840_vm0, %v9859_v62 }
 0x258   : > { %1885 = vst.msk [vmem:[#allocation4 + $0x60] sm:$0xff] %vm1840_vm0, %v9859_v62 }
 0x259   : > { %v1821_v58 = vpack.c.bf16 %v1803_v39, %v1802_v38  ;;  %1886 = vst.msk [vmem:[#allocation4 + $0x68] sm:$0xff] %vm1840_vm0, %v9859_v62 }
 0x25a   : > { %v1722_v60 = vpop.f32.mrf.mxu2  ;;  %v1626_v46 = vpop.f32.mrf.mxu0  ;;  %1887 = vst.msk [vmem:[#allocation4 + $0x70] sm:$0xff] %vm1840_vm0, %v9859_v62 }
 0x25b   : > { %1837 = vst [vmem:[#allocation2 + $0x68] sm:$0xff] %v1821_v58  ;;  %v1723_v0 = vadd.f32 %v1722_v60, %v1674_v56  ;;  %v1771_v61 = vpop.f32.mrf.mxu3  ;;  %v1627_v55 = vadd.f32 %v1626_v46, %v10717_v25  ;;  %v1675_v2 = vpop.f32.mrf.mxu1 }
 0x25c   : > { %1888 = vst.msk [vmem:[#allocation4 + $0x78] sm:$0xff] %vm1840_vm0, %v9859_v62 }
 0x25d   : > { %v1772_v1 = vadd.f32 %v1771_v61, %v1723_v0  ;;  %v1676_v40 = vadd.f32 %v1675_v2, %v1627_v55  ;;  %1889 = vst.msk [vmem:[#allocation4 + $0x80] sm:$0xff] %vm1840_vm0, %v9859_v62 }
 0x25e   : > { %1890 = vst.msk [vmem:[#allocation4 + $0x88] sm:$0xff] %vm1840_vm0, %v9859_v62 }
 0x25f   : > { %v1805_v27 = vmul.f32 0.088388346, %v1772_v1  ;;  %1891 = vst.msk [vmem:[#allocation4 + $0x90] sm:$0xff] %vm1840_vm0, %v9859_v62 }
 0x260   : > { %1892 = vst.msk [vmem:[#allocation4 + $0x98] sm:$0xff] %vm1840_vm0, %v9859_v62 }
 0x261   : > { %v1822_v3 = vpack.c.bf16 %v1805_v27, %v1804_v14  ;;  %1893 = vst.msk [vmem:[#allocation4 + $0xa0] sm:$0xff] %vm1840_vm0, %v9859_v62 }
 0x262   : > { %v1724_v25 = vpop.f32.mrf.mxu2  ;;  %1894 = vst.msk [vmem:[#allocation4 + $0xa8] sm:$0xff] %vm1840_vm0, %v9859_v62 }
 0x263   : > { %1838 = vst [vmem:[#allocation2 + $0x70] sm:$0xff] %v1822_v3  ;;  %v1725_v41 = vadd.f32 %v1724_v25, %v1676_v40  ;;  %v1773_v59 = vpop.f32.mrf.mxu3 }
 0x264   : > { %1895 = vst.msk [vmem:[#allocation4 + $0xb0] sm:$0xff] %vm1840_vm0, %v9859_v62 }
 0x265   : > { %v1774_v63 = vadd.f32 %v1773_v59, %v1725_v41  ;;  %1896 = vst.msk [vmem:[#allocation4 + $0xb8] sm:$0xff] %vm1840_vm0, %v9859_v62 }
 0x266   : > { %1897 = vst.msk [vmem:[#allocation4 + $0xc0] sm:$0xff] %vm1840_vm0, %v9859_v62 }
 0x267   : > { %v1807_v43 = vmul.f32 0.088388346, %v1774_v63  ;;  %1898 = vst.msk [vmem:[#allocation4 + $0xc8] sm:$0xff] %vm1840_vm0, %v9859_v62 }
 0x268   : > { %1899 = vst.msk [vmem:[#allocation4 + $0xd0] sm:$0xff] %vm1840_vm0, %v9859_v62 }
 0x269   : > { %v1823_v6 = vpack.c.bf16 %v1807_v43, %v1806_v5  ;;  %1900 = vst.msk [vmem:[#allocation4 + $0xd8] sm:$0xff] %vm1840_vm0, %v9859_v62 }
 0x26a   : > { %1901 = vst.msk [vmem:[#allocation4 + $0xe0] sm:$0xff] %vm1840_vm0, %v9859_v62 }
 0x26b   : > { %1839 = vst [vmem:[#allocation2 + $0x78] sm:$0xff] %v1823_v6 }
 0x26c   : > { %1902 = vst.msk [vmem:[#allocation4 + $0xe8] sm:$0xff] %vm1840_vm0, %v9859_v62 }
 0x26d   : > { %1903 = vst.msk [vmem:[#allocation4 + $0xf0] sm:$0xff] %vm1840_vm0, %v9859_v62 }
 0x26e   : > { %1904 = vst.msk [vmem:[#allocation4 + $0xf8] sm:$0xff] %vm1840_vm0, %v9859_v62 }
 0x26f   : > { %1905 = vst [vmem:[#allocation5 + $0xb0] sm:$0xff] %v9859_v62 }
 0x270   : > { %1906 = vst [vmem:[#allocation5] sm:$0xff] %v9859_v62 }
 0x271   : > { %1907 = vst [vmem:[#allocation5 + $0xd8] sm:$0xff] %v9859_v62 }
 0x272   : > { %1908 = vst [vmem:[#allocation5 + $0x18] sm:$0xff] %v9859_v62 }
 0x273   : > { %1909 = vst [vmem:[#allocation5 + $0x50] sm:$0xff] %v9859_v62 }
 0x274   : > { %1910 = vst [vmem:[#allocation5 + $0x68] sm:$0xff] %v9859_v62 }
 0x275   : > { %1911 = vst [vmem:[#allocation5 + $0x30] sm:$0xff] %v9859_v62 }
 0x276   : > { %1912 = vst [vmem:[#allocation5 + $0x48] sm:$0xff] %v9859_v62 }
 0x277   : > { %1913 = vst [vmem:[#allocation5 + $0x80] sm:$0xff] %v9859_v62 }
 0x278   : > { %1914 = vst [vmem:[#allocation5 + $0x88] sm:$0xff] %v9859_v62 }
 0x279   : > { %1915 = vst [vmem:[#allocation5 + $0xe8] sm:$0xff] %v9859_v62 }
 0x27a   : > { %1916 = vst [vmem:[#allocation5 + $0xb8] sm:$0xff] %v9859_v62 }
 0x27b   : > { %1917 = vst [vmem:[#allocation5 + $0x60] sm:$0xff] %v9859_v62 }
 0x27c   : > { %1918 = vst [vmem:[#allocation5 + $0xf0] sm:$0xff] %v9859_v62 }
 0x27d   : > { %1919 = vst [vmem:[#allocation5 + $0x8] sm:$0xff] %v9859_v62 }
 0x27e   : > { %1920 = vst [vmem:[#allocation5 + $0x78] sm:$0xff] %v9859_v62 }
 0x27f   : > { %1921 = vst [vmem:[#allocation5 + $0x38] sm:$0xff] %v9859_v62 }
 0x280   : > { %1922 = vst [vmem:[#allocation5 + $0x58] sm:$0xff] %v9859_v62 }
 0x281   : > { %1923 = vst [vmem:[#allocation5 + $0x40] sm:$0xff] %v9859_v62 }
 0x282   : > { %1924 = vst [vmem:[#allocation5 + $0xc8] sm:$0xff] %v9859_v62 }
 0x283   : > { %1925 = vst [vmem:[#allocation5 + $0xe0] sm:$0xff] %v9859_v62 }
 0x284   : > { %1926 = vst [vmem:[#allocation5 + $0x90] sm:$0xff] %v9859_v62 }
 0x285   : > { %1927 = vst [vmem:[#allocation5 + $0x70] sm:$0xff] %v9859_v62 }
 0x286   : > { %1928 = vst [vmem:[#allocation5 + $0xc0] sm:$0xff] %v9859_v62 }
 0x287   : > { %1929 = vst [vmem:[#allocation5 + $0xa8] sm:$0xff] %v9859_v62 }
 0x288   : > { %1930 = vst [vmem:[#allocation5 + $0xd0] sm:$0xff] %v9859_v62 }
 0x289   : > { %1931 = vst [vmem:[#allocation5 + $0x10] sm:$0xff] %v9859_v62 }
 0x28a   : > { %1932 = vst [vmem:[#allocation5 + $0x28] sm:$0xff] %v9859_v62 }
 0x28b   : > { %1933 = vst [vmem:[#allocation5 + $0xa0] sm:$0xff] %v9859_v62 }
 0x28c   : > { %1934 = vst [vmem:[#allocation5 + $0xf8] sm:$0xff] %v9859_v62 }
 0x28d   : > { %1935 = vst [vmem:[#allocation5 + $0x20] sm:$0xff] %v9859_v62 }
 0x28e   : > { %1936 = vst [vmem:[#allocation5 + $0x98] sm:$0xff] %v9859_v62 }
 0x28f PF: > { %v7694_v7 = vld [vmem:[%s10317_s16 + $0x70] sm:$0xf]  ;;  %v8788_v24 = vld [vmem:[%s10317_s16 + $0x74] sm:$0xf0]  ;;  %v7686_v23 = vld [vmem:[%s10317_s16 + $0x60] sm:$0xf] }
 0x290   : > { %v7758_v26 = vld [vmem:[%s10317_s16 + $0xf0] sm:$0xf]  ;;  %v7695_v16 = vor.u32 %v8788_v24, %v7694_v7  ;;  %v8804_v4 = vld [vmem:[%s10317_s16 + $0xf4] sm:$0xf0]  ;;  %v8786_v8 = vld [vmem:[%s10317_s16 + $0x64] sm:$0xf0] }
 0x291   : > { %v7822_v17 = vld [vmem:[%s10317_s16 + $0x170] sm:$0xf]  ;;  %v8820_v19 = vld [vmem:[%s10317_s16 + $0x174] sm:$0xf0]  ;;  %v7759_v20 = vor.u32 %v8804_v4, %v7758_v26  ;;  %v7750_v18 = vld [vmem:[%s10317_s16 + $0xe0] sm:$0xf]  ;;  %v7687_v52 = vor.u32 %v8786_v8, %v7686_v23 }
 0x292   : > { %v7823_v22 = vor.u32 %v8820_v19, %v7822_v17  ;;  %v7886_v49 = vld [vmem:[%s10317_s16 + $0x1f0] sm:$0xf]  ;;  %v8836_v50 = vld [vmem:[%s10317_s16 + $0x1f4] sm:$0xf0]  ;;  %2551 = vmatpush.bf16.msra.mxu0 %v7695_v16  ;;  %v8802_v9 = vld [vmem:[%s10317_s16 + $0xe4] sm:$0xf0] }
 0x293   : > { %v7887_v42 = vor.u32 %v8836_v50, %v7886_v49  ;;  %2600 = vmatpush.bf16.msra.mxu1 %v7759_v20  ;;  %v7751_v11 = vor.u32 %v8802_v9, %v7750_v18  ;;  %v7814_v29 = vld [vmem:[%s10317_s16 + $0x160] sm:$0xf]  ;;  %v8818_v30 = vld [vmem:[%s10317_s16 + $0x164] sm:$0xf0]  ;;  %v7678_v21 = vld [vmem:[%s10317_s16 + $0x50] sm:$0xf] }
 0x294   : > { %2649 = vmatpush.bf16.msra.mxu2 %v7823_v22  ;;  %v7878_v31 = vld [vmem:[%s10317_s16 + $0x1e0] sm:$0xf]  ;;  %v7815_v32 = vor.u32 %v8818_v30, %v7814_v29  ;;  %v8834_v28 = vld [vmem:[%s10317_s16 + $0x1e4] sm:$0xf0]  ;;  %v8784_v48 = vld [vmem:[%s10317_s16 + $0x54] sm:$0xf0] }
 0x295   : > { %2698 = vmatpush.bf16.msra.mxu3 %v7887_v42  ;;  %v7879_v53 = vor.u32 %v8834_v28, %v7878_v31  ;;  %v7742_v51 = vld [vmem:[%s10317_s16 + $0xd0] sm:$0xf]  ;;  %v8800_v34 = vld [vmem:[%s10317_s16 + $0xd4] sm:$0xf0]  ;;  %v7679_v36 = vor.u32 %v8784_v48, %v7678_v21  ;;  %v7670_v47 = vld [vmem:[%s10317_s16 + $0x40] sm:$0xf] }
 0x296   : > { %v7806_v35 = vld [vmem:[%s10317_s16 + $0x150] sm:$0xf]  ;;  %2552 = vmatpush.bf16.msra.mxu0 %v7687_v52  ;;  %v8816_v10 = vld [vmem:[%s10317_s16 + $0x154] sm:$0xf0]  ;;  %v7743_v45 = vor.u32 %v8800_v34, %v7742_v51  ;;  %v8782_v54 = vld [vmem:[%s10317_s16 + $0x44] sm:$0xf0] }
 0x297   : > { %v7870_v12 = vld [vmem:[%s10317_s16 + $0x1d0] sm:$0xf]  ;;  %v8832_v44 = vld [vmem:[%s10317_s16 + $0x1d4] sm:$0xf0]  ;;  %2601 = vmatpush.bf16.msra.mxu1 %v7751_v11  ;;  %v7807_v13 = vor.u32 %v8816_v10, %v7806_v35  ;;  %v7734_v57 = vld [vmem:[%s10317_s16 + $0xc0] sm:$0xf]  ;;  %v7671_v58 = vor.u32 %v8782_v54, %v7670_v47 }
 0x298   : > { %2650 = vmatpush.bf16.msra.mxu2 %v7815_v32  ;;  %v7871_v37 = vor.u32 %v8832_v44, %v7870_v12  ;;  %v8798_v33 = vld [vmem:[%s10317_s16 + $0xc4] sm:$0xf0]  ;;  %v7798_v15 = vld [vmem:[%s10317_s16 + $0x140] sm:$0xf]  ;;  %v7662_v61 = vld [vmem:[%s10317_s16 + $0x30] sm:$0xf] }
 0x299   : > { %2699 = vmatpush.bf16.msra.mxu3 %v7879_v53  ;;  %v8814_v38 = vld [vmem:[%s10317_s16 + $0x144] sm:$0xf0]  ;;  %v7862_v39 = vld [vmem:[%s10317_s16 + $0x1c0] sm:$0xf]  ;;  %v7735_v60 = vor.u32 %v8798_v33, %v7734_v57  ;;  %v8780_v46 = vld [vmem:[%s10317_s16 + $0x34] sm:$0xf0] }
 0x29a   : > { %v8830_v56 = vld [vmem:[%s10317_s16 + $0x1c4] sm:$0xf0]  ;;  %2553 = vmatpush.bf16.msra.mxu0 %v7679_v36  ;;  %v7799_v0 = vor.u32 %v8814_v38, %v7798_v15  ;;  %v7726_v1 = vld [vmem:[%s10317_s16 + $0xb0] sm:$0xf]  ;;  %v8796_v14 = vld [vmem:[%s10317_s16 + $0xb4] sm:$0xf0]  ;;  %v7663_v25 = vor.u32 %v8780_v46, %v7662_v61 }
 0x29b   : > { %2602 = vmatpush.bf16.msra.mxu1 %v7743_v45  ;;  %v7863_v55 = vor.u32 %v8830_v56, %v7862_v39  ;;  %v7790_v27 = vld [vmem:[%s10317_s16 + $0x130] sm:$0xf]  ;;  %v8812_v2 = vld [vmem:[%s10317_s16 + $0x134] sm:$0xf0]  ;;  %v7727_v41 = vor.u32 %v8796_v14, %v7726_v1  ;;  %v7654_v63 = vld [vmem:[%s10317_s16 + $0x20] sm:$0xf] }
 0x29c   : > { %2651 = vmatpush.bf16.msra.mxu2 %v7807_v13  ;;  %v7854_v3 = vld [vmem:[%s10317_s16 + $0x1b0] sm:$0xf]  ;;  %v8828_v40 = vld [vmem:[%s10317_s16 + $0x1b4] sm:$0xf0]  ;;  %v7791_v59 = vor.u32 %v8812_v2, %v7790_v27  ;;  %v8778_v5 = vld [vmem:[%s10317_s16 + $0x24] sm:$0xf0] }
 0x29d   : > { %2700 = vmatpush.bf16.msra.mxu3 %v7871_v37  ;;  %v7718_v43 = vld [vmem:[%s10317_s16 + $0xa0] sm:$0xf]  ;;  %v7855_v6 = vor.u32 %v8828_v40, %v7854_v3  ;;  %v8794_v62 = vld [vmem:[%s10317_s16 + $0xa4] sm:$0xf0]  ;;  %v7655_v4 = vor.u32 %v8778_v5, %v7654_v63  ;;  %v7646_v20 = vld [vmem:[%s10317_s16 + $0x10] sm:$0xf] }
 0x29e   : > { %2554 = vmatpush.bf16.msra.mxu0 %v7671_v58  ;;  %v7782_v7 = vld [vmem:[%s10317_s16 + $0x120] sm:$0xf]  ;;  %v8810_v24 = vld [vmem:[%s10317_s16 + $0x124] sm:$0xf0]  ;;  %v7719_v17 = vor.u32 %v8794_v62, %v7718_v43  ;;  %v8776_v22 = vld [vmem:[%s10317_s16 + $0x14] sm:$0xf0] }
 0x29f   : > { %2603 = vmatpush.bf16.msra.mxu1 %v7735_v60  ;;  %v7846_v26 = vld [vmem:[%s10317_s16 + $0x1a0] sm:$0xf]  ;;  %v8826_v16 = vld [vmem:[%s10317_s16 + $0x1a4] sm:$0xf0]  ;;  %v7783_v19 = vor.u32 %v8810_v24, %v7782_v7  ;;  %v7710_v49 = vld [vmem:[%s10317_s16 + $0x90] sm:$0xf]  ;;  %v7647_v52 = vor.u32 %v8776_v22, %v7646_v20 }
 0x2a0   : > { %2652 = vmatpush.bf16.msra.mxu2 %v7799_v0  ;;  %v7847_v50 = vor.u32 %v8826_v16, %v7846_v26  ;;  %v8792_v23 = vld [vmem:[%s10317_s16 + $0x94] sm:$0xf0]  ;;  %v7774_v42 = vld [vmem:[%s10317_s16 + $0x110] sm:$0xf]  ;;  %v7638_v11 = vld [vmem:[%s10317_s16] sm:$0xf] }
 0x2a1   : > { %2701 = vmatpush.bf16.msra.mxu3 %v7863_v55  ;;  %v8808_v8 = vld [vmem:[%s10317_s16 + $0x114] sm:$0xf0]  ;;  %v7838_v18 = vld [vmem:[%s10317_s16 + $0x190] sm:$0xf]  ;;  %v8774_v29 = vld [vmem:[%s10317_s16 + $0x4] sm:$0xf0]  ;;  %v7711_v31 = vor.u32 %v8792_v23, %v7710_v49 }
 0x2a2   : > { %2555 = vmatpush.bf16.msra.mxu0 %v7663_v25  ;;  %v8824_v9 = vld [vmem:[%s10317_s16 + $0x194] sm:$0xf0]  ;;  %v7702_v30 = vld [vmem:[%s10317_s16 + $0x80] sm:$0xf]  ;;  %v7775_v32 = vor.u32 %v8808_v8, %v7774_v42  ;;  %v8790_v28 = vld [vmem:[%s10317_s16 + $0x84] sm:$0xf0]  ;;  %v7639_v44 = vor.u32 %v8774_v29, %v7638_v11 }
 0x2a3   : > { %2604 = vmatpush.bf16.msra.mxu1 %v7727_v41  ;;  %v7766_v21 = vld [vmem:[%s10317_s16 + $0x100] sm:$0xf]  ;;  %v8806_v48 = vld [vmem:[%s10317_s16 + $0x104] sm:$0xf0]  ;;  %v7839_v53 = vor.u32 %v8824_v9, %v7838_v18  ;;  %v7510_v35 = vld [vmem:[%s10299_s2] sm:$0xf]  ;;  %v7703_v54 = vor.u32 %v8790_v28, %v7702_v30 }
 0x2a4   : > { %2653 = vmatpush.bf16.msra.mxu2 %v7791_v59  ;;  %v7830_v51 = vld [vmem:[%s10317_s16 + $0x180] sm:$0xf]  ;;  %v8822_v34 = vld [vmem:[%s10317_s16 + $0x184] sm:$0xf0]  ;;  %v8711_v36 = vld [vmem:[%s10299_s2 + $0xc] sm:$0xf0]  ;;  %v7767_v57 = vor.u32 %v8806_v48, %v7766_v21 }
 0x2a5   : > { %2702 = vmatpush.bf16.msra.mxu3 %v7855_v6  ;;  %v8787_v10 = vld [vmem:[%s10317_s16 + $0x74] sm:$0xf]  ;;  %v7696_v12 = vld [vmem:[%s10317_s16 + $0x78] sm:$0xf0]  ;;  %v8709_v45 = vld [vmem:[%s10299_s2 + $0x4] sm:$0xf]  ;;  %v7831_v38 = vor.u32 %v8822_v34, %v7830_v51  ;;  %v10989_v60 = vor.u32 %v8711_v36, %v7510_v35 }
 0x2a6   : > { %2556 = vmatpush.bf16.msra.mxu0 %v7655_v4  ;;  %v8819_v13 = vld [vmem:[%s10317_s16 + $0x174] sm:$0xf]  ;;  %v7824_v47 = vld [vmem:[%s10317_s16 + $0x178] sm:$0xf0]  ;;  %v7512_v37 = vld [vmem:[%s10299_s2 + $0x10] sm:$0xf0]  ;;  %v7699_v58 = vor.u32 %v8787_v10, %v7696_v12 }
 0x2a7   : > { %2605 = vmatpush.bf16.msra.mxu1 %v7719_v17  ;;  %v7518_v33 = vld [vmem:[%s10299_s2 + $0x8] sm:$0xf]  ;;  %v8712_v15 = vld [vmem:[%s10299_s2 + $0x14] sm:$0xf0]  ;;  %v8710_v39 = vld [vmem:[%s10299_s2 + $0xc] sm:$0xf]  ;;  %v7827_v0 = vor.u32 %v8819_v13, %v7824_v47  ;;  %v10993_v1 = vor.u32 %v8709_v45, %v7512_v37 }
 0x2a8   : > { %2654 = vmatpush.bf16.msra.mxu2 %v7783_v19  ;;  %v7520_v56 = vld [vmem:[%s10299_s2 + $0x18] sm:$0xf0]  ;;  %v8785_v61 = vld [vmem:[%s10317_s16 + $0x64] sm:$0xf]  ;;  %v7688_v46 = vld [vmem:[%s10317_s16 + $0x68] sm:$0xf0]  ;;  %v10995_v55 = vor.u32 %v8712_v15, %v7518_v33 }
 0x2a9   : > { %2703 = vmatpush.bf16.msra.mxu3 %v7847_v50  ;;  %v8817_v14 = vld [vmem:[%s10317_s16 + $0x164] sm:$0xf]  ;;  %v7816_v27 = vld [vmem:[%s10317_s16 + $0x168] sm:$0xf0]  ;;  %v10999_v2 = vor.u32 %v8710_v39, %v7520_v56  ;;  %v7691_v3 = vor.u32 %v8785_v61, %v7688_v46  ;;  %v8783_v25 = vld [vmem:[%s10317_s16 + $0x54] sm:$0xf] }
 0x2aa   : > { %2557 = vmatpush.bf16.msra.mxu0 %v7647_v52  ;;  %v7819_v40 = vor.u32 %v8817_v14, %v7816_v27  ;;  %v7680_v41 = vld [vmem:[%s10317_s16 + $0x58] sm:$0xf0]  ;;  %v8815_v59 = vld [vmem:[%s10317_s16 + $0x154] sm:$0xf]  ;;  %v8715_v62 = vld [vmem:[%s10299_s2 + $0x2c] sm:$0xf0] }
 0x2ab   : > { %2606 = vmatpush.bf16.msra.mxu1 %v7711_v31  ;;  %v7683_v63 = vor.u32 %v8783_v25, %v7680_v41  ;;  %v7808_v5 = vld [vmem:[%s10317_s16 + $0x158] sm:$0xf0]  ;;  %v8713_v7 = vld [vmem:[%s10299_s2 + $0x24] sm:$0xf]  ;;  %v7528_v24 = vld [vmem:[%s10299_s2 + $0x30] sm:$0xf0] }
 0x2ac   : > { %2655 = vmatpush.bf16.msra.mxu2 %v7775_v32  ;;  %v7811_v43 = vor.u32 %v8815_v59, %v7808_v5  ;;  %v7526_v6 = vld [vmem:[%s10299_s2 + $0x20] sm:$0xf]  ;;  %v7534_v26 = vld [vmem:[%s10299_s2 + $0x28] sm:$0xf]  ;;  %v8716_v16 = vld [vmem:[%s10299_s2 + $0x34] sm:$0xf0]  ;;  %v11019_v20 = vor.u32 %v8713_v7, %v7528_v24 }
 0x2ad   : > { %2704 = vmatpush.bf16.msra.mxu3 %v7839_v53  ;;  %v8714_v4 = vld [vmem:[%s10299_s2 + $0x2c] sm:$0xf]  ;;  %v7536_v17 = vld [vmem:[%s10299_s2 + $0x38] sm:$0xf0]  ;;  %v11017_v19 = vor.u32 %v8715_v62, %v7526_v6  ;;  %v11021_v22 = vor.u32 %v8716_v16, %v7534_v26  ;;  %v8781_v50 = vld [vmem:[%s10317_s16 + $0x44] sm:$0xf] }
 0x2ae   : > { %2558 = vmatpush.bf16.msra.mxu0 %v7639_v44  ;;  %v11023_v49 = vor.u32 %v8714_v4, %v7536_v17  ;;  %v7672_v23 = vld [vmem:[%s10317_s16 + $0x48] sm:$0xf0]  ;;  %v8813_v42 = vld [vmem:[%s10317_s16 + $0x144] sm:$0xf]  ;;  %v7542_v52 = vld [vmem:[%s10299_s2 + $0x40] sm:$0xf] }
 0x2af   : > { %2607 = vmatpush.bf16.msra.mxu1 %v7703_v54  ;;  %v7675_v8 = vor.u32 %v8781_v50, %v7672_v23  ;;  %v7800_v18 = vld [vmem:[%s10317_s16 + $0x148] sm:$0xf0]  ;;  %v7550_v29 = vld [vmem:[%s10299_s2 + $0x48] sm:$0xf]  ;;  %v8717_v30 = vld [vmem:[%s10299_s2 + $0x44] sm:$0xf] }
 0x2b0   : > { %2656 = vmatpush.bf16.msra.mxu2 %v7767_v57  ;;  %v7803_v9 = vor.u32 %v8813_v42, %v7800_v18  ;;  %v8719_v11 = vld [vmem:[%s10299_s2 + $0x4c] sm:$0xf0]  ;;  %v7544_v31 = vld [vmem:[%s10299_s2 + $0x50] sm:$0xf0]  ;;  %v8720_v32 = vld [vmem:[%s10299_s2 + $0x54] sm:$0xf0] }
 0x2b1   : > { %2705 = vmatpush.bf16.msra.mxu3 %v7831_v38  ;;  %2559 = vmatmul.bf16.vlgmr.msra.gmra.mxu0 %v10989_v60  ;;  %v8718_v28 = vld [vmem:[%s10299_s2 + $0x4c] sm:$0xf]  ;;  %v7552_v21 = vld [vmem:[%s10299_s2 + $0x58] sm:$0xf0]  ;;  %v11041_v48 = vor.u32 %v8719_v11, %v7542_v52  ;;  %v11043_v53 = vor.u32 %v8717_v30, %v7544_v31  ;;  %v11045_v51 = vor.u32 %v8720_v32, %v7550_v29  ;;  %v8835_v35 = vld [vmem:[%s10317_s16 + $0x1f4] sm:$0xf] }
 0x2b2   : > { %2747 = vmatpush.bf16.msrb.mxu0 %v7699_v58  ;;  %2608 = vmatmul.bf16.vlgmr.msra.gmra.mxu1 %v10993_v1  ;;  %v11047_v34 = vor.u32 %v8718_v28, %v7552_v21  ;;  %v7888_v36 = vld [vmem:[%s10317_s16 + $0x1f8] sm:$0xf0]  ;;  %v8803_v10 = vld [vmem:[%s10317_s16 + $0xf4] sm:$0xf]  ;;  %v8723_v38 = vld [vmem:[%s10299_s2 + $0x6c] sm:$0xf0] }
 0x2b3   : > { %2657 = vmatmul.bf16.vlgmr.msra.gmra.mxu2 %v10995_v55  ;;  %v7891_v12 = vor.u32 %v8835_v35, %v7888_v36  ;;  %v7760_v44 = vld [vmem:[%s10317_s16 + $0xf8] sm:$0xf0]  ;;  %v8779_v45 = vld [vmem:[%s10317_s16 + $0x34] sm:$0xf]  ;;  %v7566_v39 = vld [vmem:[%s10299_s2 + $0x68] sm:$0xf] }
 0x2b4   : > { %2845 = vmatpush.bf16.msrb.mxu2 %v7827_v0  ;;  %2706 = vmatmul.bf16.vlgmr.msra.gmra.mxu3 %v10999_v2  ;;  %v7664_v13 = vld [vmem:[%s10317_s16 + $0x38] sm:$0xf0]  ;;  %v7763_v47 = vor.u32 %v8803_v10, %v7760_v44  ;;  %v8811_v57 = vld [vmem:[%s10317_s16 + $0x134] sm:$0xf]  ;;  %v8721_v56 = vld [vmem:[%s10299_s2 + $0x64] sm:$0xf] }
 0x2b5   : > { %v7667_v54 = vor.u32 %v8779_v45, %v7664_v13  ;;  %v7792_v37 = vld [vmem:[%s10317_s16 + $0x138] sm:$0xf0]  ;;  %2894 = vmatpush.bf16.msrb.mxu3 %v7891_v12  ;;  %v7560_v58 = vld [vmem:[%s10299_s2 + $0x70] sm:$0xf0]  ;;  %v8724_v0 = vld [vmem:[%s10299_s2 + $0x74] sm:$0xf0] }
 0x2b6   : > { %2748 = vmatpush.bf16.msrb.mxu0 %v7691_v3  ;;  %v7795_v33 = vor.u32 %v8811_v57, %v7792_v37  ;;  %2796 = vmatpush.bf16.msrb.mxu1 %v7763_v47  ;;  %v7558_v15 = vld [vmem:[%s10299_s2 + $0x60] sm:$0xf]  ;;  %v8722_v61 = vld [vmem:[%s10299_s2 + $0x6c] sm:$0xf]  ;;  %v7568_v46 = vld [vmem:[%s10299_s2 + $0x78] sm:$0xf0]  ;;  %v11071_v27 = vor.u32 %v8721_v56, %v7560_v58  ;;  %v11073_v3 = vor.u32 %v8724_v0, %v7566_v39 }
 0x2b7   : > { %v11069_v14 = vor.u32 %v8723_v38, %v7558_v15  ;;  %v8833_v25 = vld [vmem:[%s10317_s16 + $0x1e4] sm:$0xf]  ;;  %v7880_v41 = vld [vmem:[%s10317_s16 + $0x1e8] sm:$0xf0]  ;;  %v7574_v4 = vld [vmem:[%s10299_s2 + $0x80] sm:$0xf] }
 0x2b8   : > { %2846 = vmatpush.bf16.msrb.mxu2 %v7819_v40  ;;  %v11075_v40 = vor.u32 %v8722_v61, %v7568_v46  ;;  %v8801_v59 = vld [vmem:[%s10317_s16 + $0xe4] sm:$0xf]  ;;  %v7752_v5 = vld [vmem:[%s10317_s16 + $0xe8] sm:$0xf0]  ;;  %v8725_v23 = vld [vmem:[%s10299_s2 + $0x84] sm:$0xf] }
 0x2b9   : > { %v7656_v6 = vld [vmem:[%s10317_s16 + $0x28] sm:$0xf0]  ;;  %v7755_v62 = vor.u32 %v8801_v59, %v7752_v5  ;;  %v8809_v24 = vld [vmem:[%s10317_s16 + $0x124] sm:$0xf]  ;;  %v7576_v42 = vld [vmem:[%s10299_s2 + $0x90] sm:$0xf0] }
 0x2ba   : > { %2749 = vmatpush.bf16.msrb.mxu0 %v7683_v63  ;;  %v7883_v63 = vor.u32 %v8833_v25, %v7880_v41  ;;  %v7784_v26 = vld [vmem:[%s10317_s16 + $0x128] sm:$0xf0]  ;;  %v7582_v50 = vld [vmem:[%s10299_s2 + $0x88] sm:$0xf]  ;;  %v8726_v18 = vld [vmem:[%s10299_s2 + $0x8c] sm:$0xf]  ;;  %v11099_v11 = vor.u32 %v8725_v23, %v7576_v42 }
 0x2bb   : > { %v7787_v16 = vor.u32 %v8809_v24, %v7784_v26  ;;  %2797 = vmatpush.bf16.msrb.mxu1 %v7755_v62  ;;  %v8727_v17 = vld [vmem:[%s10299_s2 + $0x8c] sm:$0xf0]  ;;  %v8831_v31 = vld [vmem:[%s10317_s16 + $0x1d4] sm:$0xf]  ;;  %v7872_v32 = vld [vmem:[%s10317_s16 + $0x1d8] sm:$0xf0] }
 0x2bc   : > { %2847 = vmatpush.bf16.msrb.mxu2 %v7811_v43  ;;  %v8777_v43 = vld [vmem:[%s10317_s16 + $0x24] sm:$0xf]  ;;  %2895 = vmatpush.bf16.msrb.mxu3 %v7883_v63  ;;  %v11097_v52 = vor.u32 %v8727_v17, %v7574_v4  ;;  %v8799_v28 = vld [vmem:[%s10317_s16 + $0xd4] sm:$0xf]  ;;  %v7875_v21 = vor.u32 %v8831_v31, %v7872_v32  ;;  %v7744_v35 = vld [vmem:[%s10317_s16 + $0xd8] sm:$0xf0] }
 0x2bd   : > { %v7659_v7 = vor.u32 %v8777_v43, %v7656_v6  ;;  %v8775_v36 = vld [vmem:[%s10317_s16 + $0x14] sm:$0xf]  ;;  %v7648_v10 = vld [vmem:[%s10317_s16 + $0x18] sm:$0xf0]  ;;  %v7747_v12 = vor.u32 %v8799_v28, %v7744_v35  ;;  %v8797_v45 = vld [vmem:[%s10317_s16 + $0xc4] sm:$0xf] }
 0x2be   : > { %2750 = vmatpush.bf16.msrb.mxu0 %v7675_v8  ;;  %v8728_v8 = vld [vmem:[%s10299_s2 + $0x94] sm:$0xf0]  ;;  %v7651_v44 = vor.u32 %v8775_v36, %v7648_v10  ;;  %v7736_v13 = vld [vmem:[%s10317_s16 + $0xc8] sm:$0xf0]  ;;  %v8829_v47 = vld [vmem:[%s10317_s16 + $0x1c4] sm:$0xf] }
 0x2bf   : > { %v11101_v29 = vor.u32 %v8728_v8, %v7582_v50  ;;  %v8807_v57 = vld [vmem:[%s10317_s16 + $0x114] sm:$0xf]  ;;  %v7776_v37 = vld [vmem:[%s10317_s16 + $0x118] sm:$0xf0]  ;;  %2798 = vmatpush.bf16.msrb.mxu1 %v7747_v12  ;;  %v8731_v56 = vld [vmem:[%s10299_s2 + $0xac] sm:$0xf0] }
 0x2c0   : > { %2848 = vmatpush.bf16.msrb.mxu2 %v7803_v9  ;;  %v7584_v9 = vld [vmem:[%s10299_s2 + $0x98] sm:$0xf0]  ;;  %2896 = vmatpush.bf16.msrb.mxu3 %v7875_v21  ;;  %v7779_v38 = vor.u32 %v8807_v57, %v7776_v37  ;;  %v7590_v39 = vld [vmem:[%s10299_s2 + $0xa0] sm:$0xf]  ;;  %v7598_v58 = vld [vmem:[%s10299_s2 + $0xa8] sm:$0xf] }
 0x2c1   : > { %2564 = vmatmul.bf16.gmra.mxu0 %v11017_v19  ;;  %v11103_v30 = vor.u32 %v8726_v18, %v7584_v9  ;;  %v8729_v0 = vld [vmem:[%s10299_s2 + $0xa4] sm:$0xf]  ;;  %v7592_v61 = vld [vmem:[%s10299_s2 + $0xb0] sm:$0xf0]  ;;  %v8732_v46 = vld [vmem:[%s10299_s2 + $0xb4] sm:$0xf0]  ;;  %v11129_v59 = vor.u32 %v8731_v56, %v7590_v39 }
 0x2c2   : > { %2613 = vmatmul.bf16.gmra.mxu1 %v11019_v20  ;;  %2751 = vmatpush.bf16.msrb.mxu0 %v7667_v54  ;;  %v7864_v54 = vld [vmem:[%s10317_s16 + $0x1c8] sm:$0xf0]  ;;  %v8730_v25 = vld [vmem:[%s10299_s2 + $0xac] sm:$0xf]  ;;  %v7600_v41 = vld [vmem:[%s10299_s2 + $0xb8] sm:$0xf0]  ;;  %v11131_v63 = vor.u32 %v8729_v0, %v7592_v61  ;;  %v11133_v5 = vor.u32 %v8732_v46, %v7598_v58 }
 0x2c3   : > { %2662 = vmatmul.bf16.gmra.mxu2 %v11021_v22  ;;  %v7867_v15 = vor.u32 %v8829_v47, %v7864_v54  ;;  %v11135_v43 = vor.u32 %v8730_v25, %v7600_v41  ;;  %v8795_v6 = vld [vmem:[%s10317_s16 + $0xb4] sm:$0xf]  ;;  %v7728_v62 = vld [vmem:[%s10317_s16 + $0xb8] sm:$0xf0]  ;;  %v7720_v17 = vld [vmem:[%s10317_s16 + $0xa8] sm:$0xf0] }
 0x2c4   : > { %2711 = vmatmul.bf16.gmra.mxu3 %v11023_v49  ;;  %2849 = vmatpush.bf16.msrb.mxu2 %v7795_v33  ;;  %v7739_v33 = vor.u32 %v8797_v45, %v7736_v13  ;;  %v8827_v24 = vld [vmem:[%s10317_s16 + $0x1b4] sm:$0xf]  ;;  %v7856_v26 = vld [vmem:[%s10317_s16 + $0x1b8] sm:$0xf0]  ;;  %v8825_v50 = vld [vmem:[%s10317_s16 + $0x1a4] sm:$0xf] }
 0x2c5   : > { %2897 = vmatpush.bf16.msrb.mxu3 %v7867_v15  ;;  %v7859_v4 = vor.u32 %v8827_v24, %v7856_v26  ;;  %v7848_v23 = vld [vmem:[%s10317_s16 + $0x1a8] sm:$0xf0]  ;;  %v8773_v8 = vld [vmem:[%s10317_s16 + $0x4] sm:$0xf]  ;;  %v8791_v32 = vld [vmem:[%s10317_s16 + $0x94] sm:$0xf] }
 0x2c6   : > { %2752 = vmatpush.bf16.msrb.mxu0 %v7659_v7  ;;  %2799 = vmatpush.bf16.msrb.mxu1 %v7739_v33  ;;  %v7731_v7 = vor.u32 %v8795_v6, %v7728_v62  ;;  %v7640_v18 = vld [vmem:[%s10317_s16 + $0x8] sm:$0xf0]  ;;  %v7851_v9 = vor.u32 %v8825_v50, %v7848_v23  ;;  %v7712_v28 = vld [vmem:[%s10317_s16 + $0x98] sm:$0xf0]  ;;  %v8823_v21 = vld [vmem:[%s10317_s16 + $0x194] sm:$0xf] }
 0x2c7   : > { %v7643_v31 = vor.u32 %v8773_v8, %v7640_v18  ;;  %v7840_v35 = vld [vmem:[%s10317_s16 + $0x198] sm:$0xf0]  ;;  %v7715_v10 = vor.u32 %v8791_v32, %v7712_v28  ;;  %v8735_v12 = vld [vmem:[%s10299_s2 + $0xcc] sm:$0xf0]  ;;  %v8736_v45 = vld [vmem:[%s10299_s2 + $0xd4] sm:$0xf0] }
 0x2c8   : > { %2850 = vmatpush.bf16.msrb.mxu2 %v7787_v16  ;;  %v8793_v16 = vld [vmem:[%s10317_s16 + $0xa4] sm:$0xf]  ;;  %v7606_v36 = vld [vmem:[%s10299_s2 + $0xc0] sm:$0xf]  ;;  %v7843_v13 = vor.u32 %v8823_v21, %v7840_v35  ;;  %v8733_v47 = vld [vmem:[%s10299_s2 + $0xc4] sm:$0xf] }
 0x2c9   : > { %v7723_v42 = vor.u32 %v8793_v16, %v7720_v17  ;;  %2898 = vmatpush.bf16.msrb.mxu3 %v7859_v4  ;;  %v7608_v54 = vld [vmem:[%s10299_s2 + $0xd0] sm:$0xf0]  ;;  %v8734_v57 = vld [vmem:[%s10299_s2 + $0xcc] sm:$0xf]  ;;  %v7616_v37 = vld [vmem:[%s10299_s2 + $0xd8] sm:$0xf0] }
 0x2ca   : > { %2753 = vmatpush.bf16.msrb.mxu0 %v7651_v44  ;;  %2800 = vmatpush.bf16.msrb.mxu1 %v7731_v7  ;;  %v7614_v44 = vld [vmem:[%s10299_s2 + $0xc8] sm:$0xf]  ;;  %v7768_v15 = vld [vmem:[%s10317_s16 + $0x108] sm:$0xf0]  ;;  %v11167_v56 = vor.u32 %v8733_v47, %v7608_v54  ;;  %v11174_v25 = vor.u32 %v8734_v57, %v7616_v37  ;;  %v8078_v7 = vld [vmem:[%s10323_s7 + $0x70] sm:$0xf] }
 0x2cb   : > { %v8805_v33 = vld [vmem:[%s10317_s16 + $0x104] sm:$0xf]  ;;  %v11169_v58 = vor.u32 %v8736_v45, %v7614_v44  ;;  %v7704_v61 = vld [vmem:[%s10317_s16 + $0x88] sm:$0xf0]  ;;  %v8852_v24 = vld [vmem:[%s10323_s7 + $0x74] sm:$0xf0] }
 0x2cc   : > { %2851 = vmatpush.bf16.msrb.mxu2 %v7779_v38  ;;  %v11165_v38 = vor.u32 %v8735_v12, %v7606_v36  ;;  %v7771_v39 = vor.u32 %v8805_v33, %v7768_v15  ;;  %v8789_v0 = vld [vmem:[%s10317_s16 + $0x84] sm:$0xf]  ;;  %v7832_v6 = vld [vmem:[%s10317_s16 + $0x188] sm:$0xf0]  ;;  %v7622_v26 = vld [vmem:[%s10299_s2 + $0xe0] sm:$0xf]  ;;  %v8079_v17 = vor.u32 %v8852_v24, %v8078_v7 }
 0x2cd   : > { %2899 = vmatpush.bf16.msrb.mxu3 %v7851_v9  ;;  %v8821_v46 = vld [vmem:[%s10317_s16 + $0x184] sm:$0xf]  ;;  %v7707_v41 = vor.u32 %v8789_v0, %v7704_v61  ;;  %v8739_v16 = vld [vmem:[%s10299_s2 + $0xec] sm:$0xf0]  ;;  %v8737_v50 = vld [vmem:[%s10299_s2 + $0xe4] sm:$0xf] }
 0x2ce   : > { %2754 = vmatpush.bf16.msrb.mxu0 %v7643_v31  ;;  %2801 = vmatpush.bf16.msrb.mxu1 %v7723_v42  ;;  %v7835_v62 = vor.u32 %v8821_v46, %v7832_v6  ;;  %v7630_v4 = vld [vmem:[%s10299_s2 + $0xe8] sm:$0xf]  ;;  %v7624_v23 = vld [vmem:[%s10299_s2 + $0xf0] sm:$0xf0]  ;;  %v8740_v42 = vld [vmem:[%s10299_s2 + $0xf4] sm:$0xf0]  ;;  %v11191_v9 = vor.u32 %v8739_v16, %v7622_v26 }
 0x2cf   : > { %v8738_v8 = vld [vmem:[%s10299_s2 + $0xec] sm:$0xf]  ;;  %v7632_v18 = vld [vmem:[%s10299_s2 + $0xf8] sm:$0xf0]  ;;  %v11193_v31 = vor.u32 %v8737_v50, %v7624_v23  ;;  %v11195_v32 = vor.u32 %v8740_v42, %v7630_v4  ;;  %v8206_v21 = vld [vmem:[%s10323_s7 + $0x170] sm:$0xf] }
 0x2d0   : > { %2852 = vmatpush.bf16.msrb.mxu2 %v7771_v39  ;;  %v11197_v28 = vor.u32 %v8738_v8, %v7632_v18  ;;  %v8884_v35 = vld [vmem:[%s10323_s7 + $0x174] sm:$0xf0]  ;;  %v8070_v12 = vld [vmem:[%s10323_s7 + $0x60] sm:$0xf]  ;;  %v8850_v44 = vld [vmem:[%s10323_s7 + $0x64] sm:$0xf0] }
 0x2d1   : > { %2569 = vmatmul.bf16.gmra.mxu0 %v11041_v48  ;;  %2900 = vmatpush.bf16.msrb.mxu3 %v7843_v13  ;;  %v8207_v36 = vor.u32 %v8884_v35, %v8206_v21  ;;  %v8071_v45 = vor.u32 %v8850_v44, %v8070_v12  ;;  %v8198_v33 = vld [vmem:[%s10323_s7 + $0x160] sm:$0xf]  ;;  %v8882_v15 = vld [vmem:[%s10323_s7 + $0x164] sm:$0xf0]  ;;  %v8062_v24 = vld [vmem:[%s10323_s7 + $0x50] sm:$0xf] }
 0x2d2   : > { %2618 = vmatmul.bf16.gmra.mxu1 %v11043_v53  ;;  %3509 = vmatpush.bf16.msra.mxu0 %v8079_v17  ;;  %v8199_v39 = vor.u32 %v8882_v15, %v8198_v33  ;;  %v8190_v8 = vld [vmem:[%s10323_s7 + $0x150] sm:$0xf]  ;;  %v8880_v18 = vld [vmem:[%s10323_s7 + $0x154] sm:$0xf0]  ;;  %vm4398_vm1 = vcmask 7168   ;;  %s13668_s28 = sld [smem:[#allocation33_spill]] }
 0x2d3   : > { %2667 = vmatmul.bf16.gmra.mxu2 %v11045_v51  ;;  %2802 = vmatpush.bf16.msrb.mxu1 %v7715_v10  ;;  %v11210_v10 = vld [vmem:[%s792_s21] sm:$0x3]  ;;  %v8191_v21 = vor.u32 %v8880_v18, %v8190_v8 }
 0x2d4   : > { %2716 = vmatmul.bf16.gmra.mxu3 %v11047_v34  ;;  %3607 = vmatpush.bf16.msra.mxu2 %v8207_v36  ;;  %v11215_v13 = vperm.slane %v11210_v10, 0 }
 0x2d5   : > { %2901 = vmatpush.bf16.msrb.mxu3 %v7835_v62 }
 0x2d6   : > { %3510 = vmatpush.bf16.msra.mxu0 %v8071_v45 }
 0x2d7   : > { %2803 = vmatpush.bf16.msrb.mxu1 %v7707_v41 }
 0x2d8   : > { %3608 = vmatpush.bf16.msra.mxu2 %v8199_v39  ;;  %p8340_p4 = scmp.ne.s32.totalorder %s13668_s28, 1 }
 0x2dc   : > { %3609 = vmatpush.bf16.msra.mxu2 %v8191_v21 }
 0x2e1   : > { %2574 = vmatmul.bf16.gmra.mxu0 %v11069_v14 }
 0x2e2   : > { %2623 = vmatmul.bf16.gmra.mxu1 %v11071_v27 }
 0x2e3   : > { %2672 = vmatmul.bf16.gmra.mxu2 %v11073_v3 }
 0x2e4   : > { %2721 = vmatmul.bf16.gmra.mxu3 %v11075_v40 }
 0x2f1   : > { %2579 = vmatmul.bf16.gmra.mxu0 %v11097_v52 }
 0x2f2   : > { %2628 = vmatmul.bf16.gmra.mxu1 %v11099_v11 }
 0x2f3   : > { %2677 = vmatmul.bf16.gmra.mxu2 %v11101_v29 }
 0x2f4   : > { %2726 = vmatmul.bf16.gmra.mxu3 %v11103_v30 }
 0x301   : > { %2584 = vmatmul.bf16.gmra.mxu0 %v11129_v59 }
 0x302   : > { %2633 = vmatmul.bf16.gmra.mxu1 %v11131_v63 }
 0x303   : > { %2682 = vmatmul.bf16.gmra.mxu2 %v11133_v5 }
 0x304   : > { %2731 = vmatmul.bf16.gmra.mxu3 %v11135_v43 }
 0x311   : > { %2589 = vmatmul.bf16.gmra.mxu0 %v11165_v38 }
 0x312   : > { %2638 = vmatmul.bf16.gmra.mxu1 %v11167_v56 }
 0x313   : > { %2687 = vmatmul.bf16.gmra.mxu2 %v11169_v58 }
 0x314   : > { %2736 = vmatmul.bf16.gmra.mxu3 %v11174_v25 }
 0x321   : > { %2594 = vmatmul.bf16.gmra.mxu0 %v11191_v9 }
 0x322   : > { %2643 = vmatmul.bf16.gmra.mxu1 %v11193_v31 }
 0x323   : > { %2692 = vmatmul.bf16.gmra.mxu2 %v11195_v32 }
 0x324   : > { %2741 = vmatmul.bf16.gmra.mxu3 %v11197_v28 }
 0x32e   : > { %v2560_v47 = vpop.f32.mrf.mxu0 }
 0x32f   : > { %v2561_v54 = vadd.f32 %v2560_v47, %v11215_v13  ;;  %v2609_v57 = vpop.f32.mrf.mxu1 }
 0x331   : > { %v2610_v37 = vadd.f32 %v2609_v57, %v2561_v54  ;;  %2755 = vmatmul.bf16.vlgmr.msrb.gmra.mxu0 %v10989_v60  ;;  %v8054_v57 = vld [vmem:[%s10323_s7 + $0x40] sm:$0xf] }
 0x332   : > { %2804 = vmatmul.bf16.vlgmr.msrb.gmra.mxu1 %v10993_v1  ;;  %v8848_v1 = vld [vmem:[%s10323_s7 + $0x54] sm:$0xf0] }
 0x333   : > { %2853 = vmatmul.bf16.vlgmr.msrb.gmra.mxu2 %v10995_v55  ;;  %v8063_v26 = vor.u32 %v8848_v1, %v8062_v24 }
 0x334   : > { %2902 = vmatmul.bf16.vlgmr.msrb.gmra.mxu3 %v10999_v2 }
 0x335   : > { %3511 = vmatpush.bf16.msra.mxu0 %v8063_v26 }
 0x336   : > { %v2658_v0 = vpop.f32.mrf.mxu2  ;;  %v2562_v41 = vpop.f32.mrf.mxu0 }
 0x337   : > { %v2659_v61 = vadd.f32 %v2658_v0, %v2610_v37  ;;  %v2707_v46 = vpop.f32.mrf.mxu3  ;;  %v2563_v6 = vadd.f32 %v2562_v41, %v11215_v13  ;;  %v2611_v62 = vpop.f32.mrf.mxu1  ;;  %v8182_v41 = vld [vmem:[%s10323_s7 + $0x140] sm:$0xf] }
 0x339   : > { %v11225_v60 = vadd.f32 %v2707_v46, %v2659_v61  ;;  %v2612_v7 = vadd.f32 %v2611_v62, %v2563_v6  ;;  %v8878_v6 = vld [vmem:[%s10323_s7 + $0x144] sm:$0xf0] }
 0x33a   : > { %v8183_v62 = vor.u32 %v8878_v6, %v8182_v41 }
 0x33c   : > { %3610 = vmatpush.bf16.msra.mxu2 %v8183_v62  ;;  %v8166_v62 = vld [vmem:[%s10323_s7 + $0x120] sm:$0xf] }
 0x33e   : > { %v2660_v55 = vpop.f32.mrf.mxu2  ;;  %v2565_v4 = vpop.f32.mrf.mxu0 }
 0x33f   : > { %v2661_v16 = vadd.f32 %v2660_v55, %v2612_v7  ;;  %v2709_v2 = vpop.f32.mrf.mxu3  ;;  %v2566_v17 = vadd.f32 %v2565_v4, %v11215_v13  ;;  %v2614_v50 = vpop.f32.mrf.mxu1  ;;  %v8046_v4 = vld [vmem:[%s10323_s7 + $0x30] sm:$0xf] }
 0x341   : > { %v11230_v23 = vadd.f32 %v2709_v2, %v2661_v16  ;;  %v2615_v42 = vadd.f32 %v2614_v50, %v2566_v17  ;;  %2760 = vmatmul.bf16.gmra.mxu0 %v11017_v19 }
 0x342   : > { %2809 = vmatmul.bf16.gmra.mxu1 %v11019_v20  ;;  %v8846_v20 = vld [vmem:[%s10323_s7 + $0x44] sm:$0xf0] }
 0x343   : > { %2858 = vmatmul.bf16.gmra.mxu2 %v11021_v22  ;;  %v8055_v37 = vor.u32 %v8846_v20, %v8054_v57 }
 0x344   : > { %2907 = vmatmul.bf16.gmra.mxu3 %v11023_v49 }
 0x345   : > { %3512 = vmatpush.bf16.msra.mxu0 %v8055_v37 }
 0x346   : > { %v2663_v35 = vpop.f32.mrf.mxu2  ;;  %v2567_v44 = vpop.f32.mrf.mxu0 }
 0x347   : > { %v2664_v36 = vadd.f32 %v2663_v35, %v2615_v42  ;;  %v2712_v12 = vpop.f32.mrf.mxu3  ;;  %v2568_v45 = vadd.f32 %v2567_v44, %v11215_v13  ;;  %v2616_v47 = vpop.f32.mrf.mxu1 }
 0x349   : > { %v11239_v19 = vadd.f32 %v2712_v12, %v2664_v36  ;;  %v2617_v54 = vadd.f32 %v2616_v47, %v2568_v45  ;;  %v8174_v36 = vld [vmem:[%s10323_s7 + $0x130] sm:$0xf]  ;;  %v8876_v12 = vld [vmem:[%s10323_s7 + $0x134] sm:$0xf0] }
 0x34a   : > { %v8175_v44 = vor.u32 %v8876_v12, %v8174_v36  ;;  %v8030_v12 = vld [vmem:[%s10323_s7 + $0x10] sm:$0xf] }
 0x34c   : > { %3611 = vmatpush.bf16.msra.mxu2 %v8175_v44  ;;  %v8840_v44 = vld [vmem:[%s10323_s7 + $0x14] sm:$0xf0] }
 0x34e   : > { %v2665_v22 = vpop.f32.mrf.mxu2  ;;  %v2570_v15 = vpop.f32.mrf.mxu0 }
 0x34f   : > { %v2666_v33 = vadd.f32 %v2665_v22, %v2617_v54  ;;  %v2714_v49 = vpop.f32.mrf.mxu3  ;;  %v2571_v39 = vadd.f32 %v2570_v15, %v11215_v13  ;;  %v2619_v0 = vpop.f32.mrf.mxu1 }
 0x351   : > { %v11244_v61 = vadd.f32 %v2714_v49, %v2666_v33  ;;  %v2620_v46 = vadd.f32 %v2619_v0, %v2571_v39  ;;  %2765 = vmatmul.bf16.gmra.mxu0 %v11041_v48  ;;  %v8038_v33 = vld [vmem:[%s10323_s7 + $0x20] sm:$0xf] }
 0x352   : > { %2814 = vmatmul.bf16.gmra.mxu1 %v11043_v53  ;;  %v8844_v53 = vld [vmem:[%s10323_s7 + $0x34] sm:$0xf0] }
 0x353   : > { %2863 = vmatmul.bf16.gmra.mxu2 %v11045_v51  ;;  %v8047_v17 = vor.u32 %v8844_v53, %v8046_v4 }
 0x354   : > { %2912 = vmatmul.bf16.gmra.mxu3 %v11047_v34 }
 0x355   : > { %3513 = vmatpush.bf16.msra.mxu0 %v8047_v17  ;;  %v8134_v17 = vld [vmem:[%s10323_s7 + $0xe0] sm:$0xf] }
 0x356   : > { %v2668_v7 = vpop.f32.mrf.mxu2  ;;  %v2572_v26 = vpop.f32.mrf.mxu0 }
 0x357   : > { %v2669_v24 = vadd.f32 %v2668_v7, %v2620_v46  ;;  %v2717_v1 = vpop.f32.mrf.mxu3  ;;  %v2573_v55 = vadd.f32 %v2572_v26, %v11215_v13  ;;  %v2621_v16 = vpop.f32.mrf.mxu1  ;;  %v8874_v7 = vld [vmem:[%s10323_s7 + $0x124] sm:$0xf0]  ;;  %v8868_v26 = vld [vmem:[%s10323_s7 + $0xf4] sm:$0xf0] }
 0x359   : > { %v11253_v48 = vadd.f32 %v2717_v1, %v2669_v24  ;;  %v2622_v2 = vadd.f32 %v2621_v16, %v2573_v55  ;;  %v8167_v24 = vor.u32 %v8874_v7, %v8166_v62  ;;  %v8142_v1 = vld [vmem:[%s10323_s7 + $0xf0] sm:$0xf]  ;;  %v8894_v62 = vld [vmem:[%s10323_s7 + $0x1c4] sm:$0xf0] }
 0x35a   : > { %v8270_v55 = vld [vmem:[%s10323_s7 + $0x1f0] sm:$0xf]  ;;  %v8143_v16 = vor.u32 %v8868_v26, %v8142_v1 }
 0x35b   : > { %3612 = vmatpush.bf16.msra.mxu2 %v8167_v24  ;;  %v8158_v26 = vld [vmem:[%s10323_s7 + $0x110] sm:$0xf] }
 0x35c   : > { %3558 = vmatpush.bf16.msra.mxu1 %v8143_v16 }
 0x35e   : > { %v2670_v51 = vpop.f32.mrf.mxu2  ;;  %v2575_v42 = vpop.f32.mrf.mxu0 }
 0x35f   : > { %v2671_v50 = vadd.f32 %v2670_v51, %v2622_v2  ;;  %v2719_v34 = vpop.f32.mrf.mxu3  ;;  %v2576_v8 = vadd.f32 %v2575_v42, %v11215_v13  ;;  %v2624_v18 = vpop.f32.mrf.mxu1  ;;  %v8900_v2 = vld [vmem:[%s10323_s7 + $0x1f4] sm:$0xf0]  ;;  %v8866_v51 = vld [vmem:[%s10323_s7 + $0xe4] sm:$0xf0] }
 0x360   : > { %v8135_v42 = vor.u32 %v8866_v51, %v8134_v17  ;;  %v8102_v51 = vld [vmem:[%s10323_s7 + $0xa0] sm:$0xf] }
 0x361   : > { %v11258_v21 = vadd.f32 %v2719_v34, %v2671_v50  ;;  %v2625_v35 = vadd.f32 %v2624_v18, %v2576_v8  ;;  %2770 = vmatmul.bf16.gmra.mxu0 %v11069_v14  ;;  %v8262_v50 = vld [vmem:[%s10323_s7 + $0x1e0] sm:$0xf]  ;;  %v8898_v8 = vld [vmem:[%s10323_s7 + $0x1e4] sm:$0xf0] }
 0x362   : > { %2819 = vmatmul.bf16.gmra.mxu1 %v11071_v27  ;;  %v8842_v27 = vld [vmem:[%s10323_s7 + $0x24] sm:$0xf0] }
 0x363   : > { %2868 = vmatmul.bf16.gmra.mxu2 %v11073_v3  ;;  %v8039_v49 = vor.u32 %v8842_v27, %v8038_v33  ;;  %3559 = vmatpush.bf16.msra.mxu1 %v8135_v42 }
 0x364   : > { %2917 = vmatmul.bf16.gmra.mxu3 %v11075_v40 }
 0x365   : > { %3514 = vmatpush.bf16.msra.mxu0 %v8039_v49 }
 0x366   : > { %v2673_v45 = vpop.f32.mrf.mxu2  ;;  %v2577_v57 = vpop.f32.mrf.mxu0 }
 0x367   : > { %v2674_v47 = vadd.f32 %v2673_v45, %v2625_v35  ;;  %v2722_v54 = vpop.f32.mrf.mxu3  ;;  %v2578_v20 = vadd.f32 %v2577_v57, %v11215_v13  ;;  %v2626_v37 = vpop.f32.mrf.mxu1  ;;  %v8263_v35 = vor.u32 %v8898_v8, %v8262_v50  ;;  %v8031_v45 = vor.u32 %v8840_v44, %v8030_v12  ;;  %v8254_v57 = vld [vmem:[%s10323_s7 + $0x1d0] sm:$0xf]  ;;  %v8858_v50 = vld [vmem:[%s10323_s7 + $0xa4] sm:$0xf0]  ;;  %v8022_v44 = vld [vmem:[%s10323_s7] sm:$0xf] }
 0x368   : > { %v8103_v42 = vor.u32 %v8858_v50, %v8102_v51  ;;  %v8890_v8 = vld [vmem:[%s10323_s7 + $0x1a4] sm:$0xf0]  ;;  %v8851_v51 = vld [vmem:[%s10323_s7 + $0x74] sm:$0xf] }
 0x369   : > { %v11267_v14 = vadd.f32 %v2722_v54, %v2674_v47  ;;  %v2627_v22 = vadd.f32 %v2626_v37, %v2578_v20  ;;  %v8126_v47 = vld [vmem:[%s10323_s7 + $0xd0] sm:$0xf]  ;;  %v8864_v54 = vld [vmem:[%s10323_s7 + $0xd4] sm:$0xf0]  ;;  %3515 = vmatpush.bf16.msra.mxu0 %v8031_v45  ;;  %v8838_v45 = vld [vmem:[%s10323_s7 + $0x4] sm:$0xf0] }
 0x36a   : > { %v8127_v20 = vor.u32 %v8864_v54, %v8126_v47  ;;  %v8896_v37 = vld [vmem:[%s10323_s7 + $0x1d4] sm:$0xf0]  ;;  %v8023_v47 = vor.u32 %v8838_v45, %v8022_v44  ;;  %v8094_v54 = vld [vmem:[%s10323_s7 + $0x90] sm:$0xf] }
 0x36c   : > { %3560 = vmatpush.bf16.msra.mxu1 %v8127_v20  ;;  %v8222_v20 = vld [vmem:[%s10323_s7 + $0x190] sm:$0xf] }
 0x36d   : > { %3516 = vmatpush.bf16.msra.mxu0 %v8023_v47 }
 0x36e   : > { %v2675_v3 = vpop.f32.mrf.mxu2  ;;  %v2580_v39 = vpop.f32.mrf.mxu0 }
 0x36f   : > { %v2676_v40 = vadd.f32 %v2675_v3, %v2627_v22  ;;  %v2724_v15 = vpop.f32.mrf.mxu3  ;;  %v2581_v0 = vadd.f32 %v2580_v39, %v11215_v13  ;;  %v2629_v46 = vpop.f32.mrf.mxu1  ;;  %v8255_v22 = vor.u32 %v8896_v37, %v8254_v57  ;;  %v8246_v39 = vld [vmem:[%s10323_s7 + $0x1c0] sm:$0xf]  ;;  %v8856_v57 = vld [vmem:[%s10323_s7 + $0x94] sm:$0xf0] }
 0x370   : > { %v8247_v24 = vor.u32 %v8894_v62, %v8246_v39  ;;  %v8095_v37 = vor.u32 %v8856_v57, %v8094_v54 }
 0x371   : > { %v11272_v41 = vadd.f32 %v2724_v15, %v2676_v40  ;;  %v2630_v6 = vadd.f32 %v2629_v46, %v2581_v0  ;;  %2775 = vmatmul.bf16.gmra.mxu0 %v11097_v52  ;;  %v8271_v52 = vor.u32 %v8900_v2, %v8270_v55  ;;  %v8118_v40 = vld [vmem:[%s10323_s7 + $0xc0] sm:$0xf]  ;;  %v8862_v15 = vld [vmem:[%s10323_s7 + $0xc4] sm:$0xf0]  ;;  %v8872_v55 = vld [vmem:[%s10323_s7 + $0x114] sm:$0xf0] }
 0x372   : > { %2824 = vmatmul.bf16.gmra.mxu1 %v11099_v11  ;;  %v8159_v16 = vor.u32 %v8872_v55, %v8158_v26  ;;  %v8110_v2 = vld [vmem:[%s10323_s7 + $0xb0] sm:$0xf]  ;;  %v8214_v26 = vld [vmem:[%s10323_s7 + $0x180] sm:$0xf]  ;;  %v8886_v55 = vld [vmem:[%s10323_s7 + $0x184] sm:$0xf0] }
 0x373   : > { %2873 = vmatmul.bf16.gmra.mxu2 %v11101_v29  ;;  %3656 = vmatpush.bf16.msra.mxu3 %v8271_v52  ;;  %v8860_v52 = vld [vmem:[%s10323_s7 + $0xb4] sm:$0xf0] }
 0x374   : > { %2922 = vmatmul.bf16.gmra.mxu3 %v11103_v30  ;;  %3613 = vmatpush.bf16.msra.mxu2 %v8159_v16 }
 0x376   : > { %v2678_v4 = vpop.f32.mrf.mxu2  ;;  %v2582_v53 = vpop.f32.mrf.mxu0 }
 0x377   : > { %v2679_v11 = vadd.f32 %v2678_v4, %v2630_v6  ;;  %v2727_v29 = vpop.f32.mrf.mxu3  ;;  %v2583_v30 = vadd.f32 %v2582_v53, %v11215_v13  ;;  %v2631_v34 = vpop.f32.mrf.mxu1  ;;  %3657 = vmatpush.bf16.msra.mxu3 %v8263_v35  ;;  %v8119_v6 = vor.u32 %v8862_v15, %v8118_v40  ;;  %v8238_v4 = vld [vmem:[%s10323_s7 + $0x1b0] sm:$0xf] }
 0x379   : > { %v11289_v18 = vadd.f32 %v2727_v29, %v2679_v11  ;;  %v2632_v36 = vadd.f32 %v2631_v34, %v2583_v30  ;;  %3561 = vmatpush.bf16.msra.mxu1 %v8119_v6  ;;  %v8111_v11 = vor.u32 %v8860_v52, %v8110_v2  ;;  %v8892_v29 = vld [vmem:[%s10323_s7 + $0x1b4] sm:$0xf0]  ;;  %v8230_v30 = vld [vmem:[%s10323_s7 + $0x1a0] sm:$0xf]  ;;  %v8854_v6 = vld [vmem:[%s10323_s7 + $0x84] sm:$0xf0]  ;;  %v8215_v2 = vor.u32 %v8886_v55, %v8214_v26 }
 0x37b   : > { %3658 = vmatpush.bf16.msra.mxu3 %v8255_v22  ;;  %v8888_v22 = vld [vmem:[%s10323_s7 + $0x194] sm:$0xf0] }
 0x37d   : > { %3562 = vmatpush.bf16.msra.mxu1 %v8111_v11 }
 0x37e   : > { %v2680_v33 = vpop.f32.mrf.mxu2  ;;  %v2585_v3 = vpop.f32.mrf.mxu0 }
 0x37f   : > { %v2681_v27 = vadd.f32 %v2680_v33, %v2632_v36  ;;  %v2729_v49 = vpop.f32.mrf.mxu3  ;;  %v2586_v0 = vadd.f32 %v2585_v3, %v11215_v13  ;;  %v2634_v46 = vpop.f32.mrf.mxu1  ;;  %3659 = vmatpush.bf16.msra.mxu3 %v8247_v24  ;;  %v8231_v36 = vor.u32 %v8890_v8, %v8230_v30  ;;  %v8223_v33 = vor.u32 %v8888_v22, %v8222_v20  ;;  %v8743_v22 = vld [vmem:[%s10306_s18 + $0xc] sm:$0xf0] }
 0x380   : > { %v11358_v20 = vperm.slane %v11210_v10, 1 }
 0x381   : > { %v11302_v7 = vadd.f32 %v2729_v49, %v2681_v27  ;;  %v2635_v1 = vadd.f32 %v2634_v46, %v2586_v0  ;;  %2780 = vmatmul.bf16.gmra.mxu0 %v11129_v59  ;;  %v8239_v59 = vor.u32 %v8892_v29, %v8238_v4  ;;  %3563 = vmatpush.bf16.msra.mxu1 %v8103_v42  ;;  %v8150_v27 = vld [vmem:[%s10323_s7 + $0x100] sm:$0xf]  ;;  %v8870_v49 = vld [vmem:[%s10323_s7 + $0x104] sm:$0xf0] }
 0x382   : > { %2829 = vmatmul.bf16.gmra.mxu1 %v11131_v63  ;;  %v8151_v40 = vor.u32 %v8870_v49, %v8150_v27  ;;  %v8086_v46 = vld [vmem:[%s10323_s7 + $0x80] sm:$0xf]  ;;  %v8744_v27 = vld [vmem:[%s10306_s18 + $0x14] sm:$0xf0] }
 0x383   : > { %2878 = vmatmul.bf16.gmra.mxu2 %v11133_v5  ;;  %3660 = vmatpush.bf16.msra.mxu3 %v8239_v59  ;;  %v8741_v49 = vld [vmem:[%s10306_s18 + $0x4] sm:$0xf] }
 0x384   : > { %2927 = vmatmul.bf16.gmra.mxu3 %v11135_v43  ;;  %3614 = vmatpush.bf16.msra.mxu2 %v8151_v40  ;;  %v8742_v40 = vld [vmem:[%s10306_s18 + $0xc] sm:$0xf] }
 0x385   : > { %3564 = vmatpush.bf16.msra.mxu1 %v8095_v37  ;;  %v7894_v37 = vld [vmem:[%s10306_s18] sm:$0xf] }
 0x386   : > { %v2683_v53 = vpop.f32.mrf.mxu2  ;;  %v2587_v17 = vpop.f32.mrf.mxu0 }
 0x387   : > { %v2684_v63 = vadd.f32 %v2683_v53, %v2635_v1  ;;  %v2732_v5 = vpop.f32.mrf.mxu3  ;;  %v2588_v43 = vadd.f32 %v2587_v17, %v11215_v13  ;;  %v2636_v34 = vpop.f32.mrf.mxu1  ;;  %3661 = vmatpush.bf16.msra.mxu3 %v8231_v36  ;;  %v8087_v1 = vor.u32 %v8854_v6, %v8086_v46  ;;  %v8883_v36 = vld [vmem:[%s10323_s7 + $0x174] sm:$0xf] }
 0x389   : > { %v11319_v35 = vadd.f32 %v2732_v5, %v2684_v63  ;;  %v2637_v12 = vadd.f32 %v2636_v34, %v2588_v43  ;;  %3565 = vmatpush.bf16.msra.mxu1 %v8087_v1 }
 0x38b   : > { %3662 = vmatpush.bf16.msra.mxu3 %v8223_v33  ;;  %v7902_v33 = vld [vmem:[%s10306_s18 + $0x8] sm:$0xf] }
 0x38c   : > { %v11372_v1 = vor.u32 %v8744_v27, %v7902_v33 }
 0x38e   : > { %v2685_v3 = vpop.f32.mrf.mxu2  ;;  %v2590_v0 = vpop.f32.mrf.mxu0 }
 0x38f   : > { %v2686_v15 = vadd.f32 %v2685_v3, %v2637_v12  ;;  %v2734_v39 = vpop.f32.mrf.mxu3  ;;  %v2591_v62 = vadd.f32 %v2590_v0, %v11215_v13  ;;  %v2639_v24 = vpop.f32.mrf.mxu1  ;;  %3663 = vmatpush.bf16.msra.mxu3 %v8215_v2  ;;  %v8208_v12 = vld [vmem:[%s10323_s7 + $0x178] sm:$0xf0]  ;;  %v7896_v3 = vld [vmem:[%s10306_s18 + $0x10] sm:$0xf0]  ;;  %v8072_v0 = vld [vmem:[%s10323_s7 + $0x68] sm:$0xf0] }
 0x390   : > { %v8211_v45 = vor.u32 %v8883_v36, %v8208_v12  ;;  %v11374_v26 = vor.u32 %v8741_v49, %v7896_v3  ;;  %v8748_v36 = vld [vmem:[%s10306_s18 + $0x34] sm:$0xf0]  ;;  %v8745_v12 = vld [vmem:[%s10306_s18 + $0x24] sm:$0xf] }
 0x391   : > { %v11334_v16 = vadd.f32 %v2734_v39, %v2686_v15  ;;  %v2640_v52 = vadd.f32 %v2639_v24, %v2591_v62  ;;  %2785 = vmatmul.bf16.gmra.mxu0 %v11165_v38  ;;  %v8080_v38 = vld [vmem:[%s10323_s7 + $0x78] sm:$0xf0]  ;;  %v7904_v15 = vld [vmem:[%s10306_s18 + $0x18] sm:$0xf0]  ;;  %v8849_v39 = vld [vmem:[%s10323_s7 + $0x64] sm:$0xf] }
 0x392   : > { %2834 = vmatmul.bf16.gmra.mxu1 %v11167_v56  ;;  %v8083_v50 = vor.u32 %v8851_v51, %v8080_v38  ;;  %3803 = vmatpush.bf16.msrb.mxu2 %v8211_v45  ;;  %v8075_v6 = vor.u32 %v8849_v39, %v8072_v0  ;;  %v8746_v45 = vld [vmem:[%s10306_s18 + $0x2c] sm:$0xf] }
 0x393   : > { %2883 = vmatmul.bf16.gmra.mxu2 %v11169_v58 }
 0x394   : > { %2932 = vmatmul.bf16.gmra.mxu3 %v11174_v25  ;;  %3705 = vmatpush.bf16.msrb.mxu0 %v8083_v50 }
 0x396   : > { %v2688_v4 = vpop.f32.mrf.mxu2  ;;  %v2592_v59 = vpop.f32.mrf.mxu0 }
 0x397   : > { %v2689_v11 = vadd.f32 %v2688_v4, %v2640_v52  ;;  %v2737_v29 = vpop.f32.mrf.mxu3  ;;  %v2593_v53 = vadd.f32 %v2592_v59, %v11215_v13  ;;  %v2641_v63 = vpop.f32.mrf.mxu1  ;;  %v11377_v52 = vor.u32 %v8742_v40, %v7904_v15  ;;  %v8200_v59 = vld [vmem:[%s10323_s7 + $0x168] sm:$0xf0] }
 0x398   : > { %3706 = vmatpush.bf16.msrb.mxu0 %v8075_v6 }
 0x399   : > { %v11341_v5 = vadd.f32 %v2737_v29, %v2689_v11  ;;  %v2642_v17 = vadd.f32 %v2641_v63, %v2593_v53  ;;  %v8881_v29 = vld [vmem:[%s10323_s7 + $0x164] sm:$0xf] }
 0x39a   : > { %v8203_v63 = vor.u32 %v8881_v29, %v8200_v59 }
 0x39c   : > { %3804 = vmatpush.bf16.msrb.mxu2 %v8203_v63 }
 0x39e   : > { %v2690_v56 = vpop.f32.mrf.mxu2  ;;  %v2595_v25 = vpop.f32.mrf.mxu0 }
 0x39f   : > { %v2691_v58 = vadd.f32 %v2690_v56, %v2642_v17  ;;  %v2739_v30 = vpop.f32.mrf.mxu3  ;;  %v2596_v43 = vadd.f32 %v2595_v25, %v11215_v13  ;;  %v2644_v34 = vpop.f32.mrf.mxu1  ;;  %v7910_v25 = vld [vmem:[%s10306_s18 + $0x20] sm:$0xf] }
 0x3a1   : > { %v11346_v42 = vadd.f32 %v2739_v30, %v2691_v58  ;;  %v2645_v8 = vadd.f32 %v2644_v34, %v2596_v43  ;;  %2790 = vmatmul.bf16.gmra.mxu0 %v11191_v9  ;;  %v8747_v34 = vld [vmem:[%s10306_s18 + $0x2c] sm:$0xf0] }
 0x3a2   : > { %2839 = vmatmul.bf16.gmra.mxu1 %v11193_v31 }
 0x3a3   : > { %2888 = vmatmul.bf16.gmra.mxu2 %v11195_v32 }
 0x3a4   : > { %2937 = vmatmul.bf16.gmra.mxu3 %v11197_v28 }
 0x3a6   : > { %v2693_v44 = vpop.f32.mrf.mxu2  ;;  %v2597_v31 = vpop.f32.mrf.mxu0 }
 0x3a7   : > { %v2694_v47 = vadd.f32 %v2693_v44, %v2645_v8  ;;  %v2742_v9 = vpop.f32.mrf.mxu3  ;;  %v2598_v32 = vadd.f32 %v2597_v31, %v11215_v13  ;;  %v2646_v54 = vpop.f32.mrf.mxu1  ;;  %v11370_v13 = vor.u32 %v8743_v22, %v7894_v37  ;;  %v7918_v8 = vld [vmem:[%s10306_s18 + $0x28] sm:$0xf]  ;;  %v7912_v44 = vld [vmem:[%s10306_s18 + $0x30] sm:$0xf0]  ;;  %v8064_v31 = vld [vmem:[%s10323_s7 + $0x58] sm:$0xf0] }
 0x3a8   : > { %v11401_v27 = vor.u32 %v8748_v36, %v7918_v8  ;;  %v11403_v49 = vor.u32 %v8745_v12, %v7912_v44  ;;  %v7928_v8 = vld [vmem:[%s10306_s18 + $0x50] sm:$0xf0]  ;;  %v8750_v36 = vld [vmem:[%s10306_s18 + $0x4c] sm:$0xf]  ;;  %v7936_v12 = vld [vmem:[%s10306_s18 + $0x58] sm:$0xf0] }
 0x3a9   : > { %v11355_v28 = vadd.f32 %v2742_v9, %v2694_v47  ;;  %v2647_v57 = vadd.f32 %v2646_v54, %v2598_v32  ;;  %v7920_v47 = vld [vmem:[%s10306_s18 + $0x38] sm:$0xf0]  ;;  %v8847_v9 = vld [vmem:[%s10323_s7 + $0x54] sm:$0xf]  ;;  %v11399_v54 = vor.u32 %v8747_v34, %v7910_v25  ;;  %v7934_v25 = vld [vmem:[%s10306_s18 + $0x48] sm:$0xf] }
 0x3aa   : > { %v11406_v40 = vor.u32 %v8746_v45, %v7920_v47  ;;  %v8749_v34 = vld [vmem:[%s10306_s18 + $0x44] sm:$0xf]  ;;  %v8845_v44 = vld [vmem:[%s10323_s7 + $0x44] sm:$0xf]  ;;  %v8056_v45 = vld [vmem:[%s10323_s7 + $0x48] sm:$0xf0] }
 0x3ae   : > { %v2695_v46 = vpop.f32.mrf.mxu2  ;;  %v2756_v10 = vpop.f32.mrf.mxu0 }
 0x3af   : > { %v2696_v62 = vadd.f32 %v2695_v46, %v2647_v57  ;;  %v2744_v24 = vpop.f32.mrf.mxu3  ;;  %v2757_v55 = vadd.f32 %v2756_v10, %v11358_v20  ;;  %v2805_v2 = vpop.f32.mrf.mxu1  ;;  %v8067_v57 = vor.u32 %v8847_v9, %v8064_v31  ;;  %v8879_v10 = vld [vmem:[%s10323_s7 + $0x154] sm:$0xf]  ;;  %v8059_v31 = vor.u32 %v8845_v44, %v8056_v45  ;;  %v7952_v44 = vld [vmem:[%s10306_s18 + $0x78] sm:$0xf0] }
 0x3b0   : > { %v8843_v45 = vld [vmem:[%s10323_s7 + $0x34] sm:$0xf] }
 0x3b1   : > { %v11379_v4 = vadd.f32 %v2744_v24, %v2696_v62  ;;  %v2806_v11 = vadd.f32 %v2805_v2, %v2757_v55  ;;  %3517 = vmatmul.bf16.vlgmr.msra.gmra.mxu0 %v11370_v13  ;;  %v8192_v55 = vld [vmem:[%s10323_s7 + $0x158] sm:$0xf0] }
 0x3b2   : > { %3566 = vmatmul.bf16.vlgmr.msra.gmra.mxu1 %v11374_v26  ;;  %3707 = vmatpush.bf16.msrb.mxu0 %v8067_v57 }
 0x3b3   : > { %3615 = vmatmul.bf16.vlgmr.msra.gmra.mxu2 %v11372_v1 }
 0x3b4   : > { %3664 = vmatmul.bf16.vlgmr.msra.gmra.mxu3 %v11377_v52 }
 0x3b6   : > { %v2854_v53 = vpop.f32.mrf.mxu2  ;;  %v2758_v38 = vpop.f32.mrf.mxu0  ;;  %3708 = vmatpush.bf16.msrb.mxu0 %v8059_v31 }
 0x3b7   : > { %v2855_v17 = vadd.f32 %v2854_v53, %v2806_v11  ;;  %v2903_v51 = vpop.f32.mrf.mxu3  ;;  %v2759_v56 = vadd.f32 %v2758_v38, %v11358_v20  ;;  %v2807_v50 = vpop.f32.mrf.mxu1  ;;  %v8195_v11 = vor.u32 %v8879_v10, %v8192_v55  ;;  %v8877_v10 = vld [vmem:[%s10323_s7 + $0x144] sm:$0xf]  ;;  %v8184_v55 = vld [vmem:[%s10323_s7 + $0x148] sm:$0xf0] }
 0x3b9   : > { %v2904_v58 = vadd.f32 %v2903_v51, %v2855_v17  ;;  %v2808_v30 = vadd.f32 %v2807_v50, %v2759_v56  ;;  %3805 = vmatpush.bf16.msrb.mxu2 %v8195_v11  ;;  %v7926_v50 = vld [vmem:[%s10306_s18 + $0x40] sm:$0xf]  ;;  %v8187_v11 = vor.u32 %v8877_v10, %v8184_v55 }
 0x3bb   : > { %v2943_v43 = vpack.c.bf16 %v2904_v58, %v11225_v60 }
 0x3bd   : > { %v3997_v46 = vunpack.c.l.b16 %v2943_v43  ;;  %v4744_v6 = vunpack.c.h.b16 %v2943_v43  ;;  %v8752_v43 = vld [vmem:[%s10306_s18 + $0x54] sm:$0xf0]  ;;  %3806 = vmatpush.bf16.msrb.mxu2 %v8187_v11 }
 0x3be   : > { %v2856_v32 = vpop.f32.mrf.mxu2  ;;  %v2761_v33 = vpop.f32.mrf.mxu0 }
 0x3bf   : > { %v2857_v37 = vadd.f32 %v2856_v32, %v2808_v30  ;;  %v2905_v22 = vpop.f32.mrf.mxu3  ;;  %v2762_v60 = vadd.f32 %v2761_v33, %v11358_v20  ;;  %v2810_v3 = vpop.f32.mrf.mxu1  ;;  %v8751_v30 = vld [vmem:[%s10306_s18 + $0x4c] sm:$0xf0]  ;;  %v11435_v33 = vor.u32 %v8749_v34, %v7928_v8  ;;  %v8756_v34 = vld [vmem:[%s10306_s18 + $0x74] sm:$0xf0]  ;;  %v8753_v8 = vld [vmem:[%s10306_s18 + $0x64] sm:$0xf] }
 0x3c0   : > { %v11431_v9 = vor.u32 %v8751_v30, %v7926_v50 }
 0x3c1   : > { %v2906_v15 = vadd.f32 %v2905_v22, %v2857_v37  ;;  %v2811_v39 = vadd.f32 %v2810_v3, %v2762_v60  ;;  %3522 = vmatmul.bf16.gmra.mxu0 %v11399_v54  ;;  %v11433_v22 = vor.u32 %v8752_v43, %v7934_v25  ;;  %v11438_v3 = vor.u32 %v8750_v36, %v7936_v12  ;;  %v8755_v25 = vld [vmem:[%s10306_s18 + $0x6c] sm:$0xf0]  ;;  %v7950_v43 = vld [vmem:[%s10306_s18 + $0x68] sm:$0xf]  ;;  %v7944_v36 = vld [vmem:[%s10306_s18 + $0x70] sm:$0xf0] }
 0x3c2   : > { %3571 = vmatmul.bf16.gmra.mxu1 %v11403_v49  ;;  %v8754_v12 = vld [vmem:[%s10306_s18 + $0x6c] sm:$0xf] }
 0x3c3   : > { %v2944_v0 = vpack.c.bf16 %v2906_v15, %v11230_v23  ;;  %3620 = vmatmul.bf16.gmra.mxu2 %v11401_v27 }
 0x3c4   : > { %3669 = vmatmul.bf16.gmra.mxu3 %v11406_v40 }
 0x3c5   : > { %v3998_v62 = vunpack.c.l.b16 %v2944_v0  ;;  %v4745_v24 = vunpack.c.h.b16 %v2944_v0 }
 0x3c6   : > { %v2859_v2 = vpop.f32.mrf.mxu2  ;;  %v2763_v59 = vpop.f32.mrf.mxu0 }
 0x3c7   : > { %v2860_v23 = vadd.f32 %v2859_v2, %v2811_v39  ;;  %v2908_v29 = vpop.f32.mrf.mxu3  ;;  %v11415_v53 = vpack.c.b16 %v3998_v62, %v3997_v46  ;;  %v11417_v63 = vpack.c.b16 %v4745_v24, %v4744_v6  ;;  %v2764_v17 = vadd.f32 %v2763_v59, %v11358_v20  ;;  %v2812_v51 = vpop.f32.mrf.mxu1 }
 0x3c9   : > { %v2909_v38 = vadd.f32 %v2908_v29, %v2860_v23  ;;  %v2813_v56 = vadd.f32 %v2812_v51, %v2764_v17 }
 0x3cb   : > { %v2945_v58 = vpack.c.bf16 %v2909_v38, %v11239_v19 }
 0x3cd   : > { %v3999_v46 = vunpack.c.l.b16 %v2945_v58  ;;  %v4746_v6 = vunpack.c.h.b16 %v2945_v58  ;;  %v7942_v58 = vld [vmem:[%s10306_s18 + $0x60] sm:$0xf] }
 0x3ce   : > { %v2861_v47 = vpop.f32.mrf.mxu2  ;;  %v2766_v37 = vpop.f32.mrf.mxu0 }
 0x3cf   : > { %v2862_v32 = vadd.f32 %v2861_v47, %v2813_v56  ;;  %v2910_v57 = vpop.f32.mrf.mxu3  ;;  %v2767_v19 = vadd.f32 %v2766_v37, %v11358_v20  ;;  %v2815_v60 = vpop.f32.mrf.mxu1  ;;  %v8048_v47 = vld [vmem:[%s10323_s7 + $0x38] sm:$0xf0] }
 0x3d1   : > { %v2911_v15 = vadd.f32 %v2910_v57, %v2862_v32  ;;  %v2816_v39 = vadd.f32 %v2815_v60, %v2767_v19  ;;  %3527 = vmatmul.bf16.gmra.mxu0 %v11431_v9  ;;  %v11463_v32 = vor.u32 %v8755_v25, %v7942_v58  ;;  %v8051_v57 = vor.u32 %v8843_v45, %v8048_v47  ;;  %v8760_v45 = vld [vmem:[%s10306_s18 + $0x94] sm:$0xf0]  ;;  %v8757_v47 = vld [vmem:[%s10306_s18 + $0x84] sm:$0xf] }
 0x3d2   : > { %3576 = vmatmul.bf16.gmra.mxu1 %v11435_v33 }
 0x3d3   : > { %v2946_v0 = vpack.c.bf16 %v2911_v15, %v11244_v61  ;;  %3625 = vmatmul.bf16.gmra.mxu2 %v11433_v22  ;;  %v11465_v15 = vor.u32 %v8756_v34, %v7950_v43  ;;  %3709 = vmatpush.bf16.msrb.mxu0 %v8051_v57  ;;  %v8758_v57 = vld [vmem:[%s10306_s18 + $0x8c] sm:$0xf] }
 0x3d4   : > { %3674 = vmatmul.bf16.gmra.mxu3 %v11438_v3 }
 0x3d5   : > { %v4000_v62 = vunpack.c.l.b16 %v2946_v0  ;;  %v4747_v24 = vunpack.c.h.b16 %v2946_v0 }
 0x3d6   : > { %v2864_v2 = vpop.f32.mrf.mxu2  ;;  %v2768_v29 = vpop.f32.mrf.mxu0 }
 0x3d7   : > { %v2865_v61 = vadd.f32 %v2864_v2, %v2816_v39  ;;  %v2913_v23 = vpop.f32.mrf.mxu3  ;;  %v11447_v59 = vpack.c.b16 %v4000_v62, %v3999_v46  ;;  %v11449_v17 = vpack.c.b16 %v4747_v24, %v4746_v6  ;;  %v2769_v51 = vadd.f32 %v2768_v29, %v11358_v20  ;;  %v2817_v38 = vpop.f32.mrf.mxu1 }
 0x3d8   : > { %v11467_v39 = vor.u32 %v8753_v8, %v7944_v36  ;;  %v11470_v46 = vor.u32 %v8754_v12, %v7952_v44  ;;  %v7958_v8 = vld [vmem:[%s10306_s18 + $0x80] sm:$0xf]  ;;  %v8759_v12 = vld [vmem:[%s10306_s18 + $0x8c] sm:$0xf0]  ;;  %v7966_v44 = vld [vmem:[%s10306_s18 + $0x88] sm:$0xf] }
 0x3d9   : > { %v2914_v56 = vadd.f32 %v2913_v23, %v2865_v61  ;;  %v2818_v50 = vadd.f32 %v2817_v38, %v2769_v51  ;;  %v8875_v61 = vld [vmem:[%s10323_s7 + $0x134] sm:$0xf]  ;;  %v8176_v23 = vld [vmem:[%s10323_s7 + $0x138] sm:$0xf0] }
 0x3da   : > { %v8179_v51 = vor.u32 %v8875_v61, %v8176_v23 }
 0x3db   : > { %v2947_v30 = vpack.c.bf16 %v2914_v56, %v11253_v48 }
 0x3dc   : > { %3807 = vmatpush.bf16.msrb.mxu2 %v8179_v51 }
 0x3dd   : > { %v4001_v10 = vunpack.c.l.b16 %v2947_v30  ;;  %v4748_v55 = vunpack.c.h.b16 %v2947_v30 }
 0x3de   : > { %v2866_v31 = vpop.f32.mrf.mxu2  ;;  %v2771_v60 = vpop.f32.mrf.mxu0 }
 0x3df   : > { %v2867_v37 = vadd.f32 %v2866_v31, %v2818_v50  ;;  %v2915_v19 = vpop.f32.mrf.mxu3  ;;  %v2772_v48 = vadd.f32 %v2771_v60, %v11358_v20  ;;  %v2820_v0 = vpop.f32.mrf.mxu1  ;;  %v7960_v31 = vld [vmem:[%s10306_s18 + $0x90] sm:$0xf0]  ;;  %v8040_v60 = vld [vmem:[%s10323_s7 + $0x28] sm:$0xf0] }
 0x3e1   : > { %v2916_v6 = vadd.f32 %v2915_v19, %v2867_v37  ;;  %v2821_v62 = vadd.f32 %v2820_v0, %v2772_v48  ;;  %3532 = vmatmul.bf16.gmra.mxu0 %v11463_v32  ;;  %v7968_v37 = vld [vmem:[%s10306_s18 + $0x98] sm:$0xf0]  ;;  %v8841_v19 = vld [vmem:[%s10323_s7 + $0x24] sm:$0xf]  ;;  %v11495_v0 = vor.u32 %v8759_v12, %v7958_v8 }
 0x3e2   : > { %3581 = vmatmul.bf16.gmra.mxu1 %v11467_v39  ;;  %v11502_v61 = vor.u32 %v8758_v57, %v7968_v37 }
 0x3e3   : > { %v2948_v24 = vpack.c.bf16 %v2916_v6, %v11258_v21  ;;  %3630 = vmatmul.bf16.gmra.mxu2 %v11465_v15  ;;  %v8043_v6 = vor.u32 %v8841_v19, %v8040_v60  ;;  %v8865_v60 = vld [vmem:[%s10323_s7 + $0xe4] sm:$0xf] }
 0x3e4   : > { %3679 = vmatmul.bf16.gmra.mxu3 %v11470_v46  ;;  %13556 = vst [vmem:[#allocation55_spill] sm:$0xff] %v11502_v61 }
 0x3e5   : > { %v4002_v2 = vunpack.c.l.b16 %v2948_v24  ;;  %v4749_v11 = vunpack.c.h.b16 %v2948_v24  ;;  %3710 = vmatpush.bf16.msrb.mxu0 %v8043_v6 }
 0x3e6   : > { %v2869_v29 = vpop.f32.mrf.mxu2  ;;  %v2773_v56 = vpop.f32.mrf.mxu0 }
 0x3e7   : > { %v2870_v21 = vadd.f32 %v2869_v29, %v2821_v62  ;;  %v2918_v38 = vpop.f32.mrf.mxu3  ;;  %v11479_v50 = vpack.c.b16 %v4002_v2, %v4001_v10  ;;  %v11481_v58 = vpack.c.b16 %v4749_v11, %v4748_v55  ;;  %v2774_v30 = vadd.f32 %v2773_v56, %v11358_v20  ;;  %v2822_v25 = vpop.f32.mrf.mxu1 }
 0x3e8   : > { %v11497_v55 = vor.u32 %v8760_v45, %v7966_v44  ;;  %v8873_v44 = vld [vmem:[%s10323_s7 + $0x124] sm:$0xf] }
 0x3e9   : > { %v2919_v43 = vadd.f32 %v2918_v38, %v2870_v21  ;;  %v2823_v34 = vadd.f32 %v2822_v25, %v2774_v30  ;;  %v8867_v21 = vld [vmem:[%s10323_s7 + $0xf4] sm:$0xf]  ;;  %v8144_v38 = vld [vmem:[%s10323_s7 + $0xf8] sm:$0xf0] }
 0x3ea   : > { %v8147_v30 = vor.u32 %v8867_v21, %v8144_v38  ;;  %v8899_v25 = vld [vmem:[%s10323_s7 + $0x1f4] sm:$0xf] }
 0x3eb   : > { %v2949_v36 = vpack.c.bf16 %v2919_v43, %v11267_v14  ;;  %v11499_v14 = vor.u32 %v8757_v47, %v7960_v31  ;;  %v8272_v43 = vld [vmem:[%s10323_s7 + $0x1f8] sm:$0xf0] }
 0x3ec   : > { %v8275_v45 = vor.u32 %v8899_v25, %v8272_v43  ;;  %3754 = vmatpush.bf16.msrb.mxu1 %v8147_v30  ;;  %v8764_v30 = vld [vmem:[%s10306_s18 + $0xb4] sm:$0xf0]  ;;  %v8761_v25 = vld [vmem:[%s10306_s18 + $0xa4] sm:$0xf] }
 0x3ed   : > { %13555 = vst [vmem:[#allocation54_spill] sm:$0xff] %v11499_v14  ;;  %v4003_v56 = vunpack.c.l.b16 %v2949_v36 }
 0x3ee   : > { %v2871_v48 = vpop.f32.mrf.mxu2  ;;  %v2776_v10 = vpop.f32.mrf.mxu0  ;;  %3852 = vmatpush.bf16.msrb.mxu3 %v8275_v45 }
 0x3ef   : > { %v2872_v62 = vadd.f32 %v2871_v48, %v2823_v34  ;;  %v2920_v24 = vpop.f32.mrf.mxu3  ;;  %v2777_v2 = vadd.f32 %v2776_v10, %v11358_v20  ;;  %v2825_v11 = vpop.f32.mrf.mxu1  ;;  %v4750_v34 = vunpack.c.h.b16 %v2949_v36  ;;  %v8136_v48 = vld [vmem:[%s10323_s7 + $0xe8] sm:$0xf0]  ;;  %v8897_v36 = vld [vmem:[%s10323_s7 + $0x1e4] sm:$0xf] }
 0x3f1   : > { %v2921_v23 = vadd.f32 %v2920_v24, %v2872_v62  ;;  %v2826_v29 = vadd.f32 %v2825_v11, %v2777_v2  ;;  %3537 = vmatmul.bf16.gmra.mxu0 %v11495_v0  ;;  %v8139_v2 = vor.u32 %v8865_v60, %v8136_v48  ;;  %v8264_v11 = vld [vmem:[%s10323_s7 + $0x1e8] sm:$0xf0] }
 0x3f2   : > { %3586 = vmatmul.bf16.gmra.mxu1 %v11499_v14  ;;  %v8267_v21 = vor.u32 %v8897_v36, %v8264_v11 }
 0x3f3   : > { %v2950_v51 = vpack.c.bf16 %v2921_v23, %v11272_v41  ;;  %3635 = vmatmul.bf16.gmra.mxu2 %v11497_v55  ;;  %v8168_v41 = vld [vmem:[%s10323_s7 + $0x128] sm:$0xf0]  ;;  %3755 = vmatpush.bf16.msrb.mxu1 %v8139_v2 }
 0x3f4   : > { %3684 = vmatmul.bf16.gmra.mxu3 %v11502_v61  ;;  %v8171_v31 = vor.u32 %v8873_v44, %v8168_v41  ;;  %v7976_v44 = vld [vmem:[%s10306_s18 + $0xb0] sm:$0xf0]  ;;  %v8762_v41 = vld [vmem:[%s10306_s18 + $0xac] sm:$0xf]  ;;  %v8152_v61 = vld [vmem:[%s10323_s7 + $0x108] sm:$0xf0] }
 0x3f5   : > { %v4004_v8 = vunpack.c.l.b16 %v2950_v51  ;;  %v4751_v12 = vunpack.c.h.b16 %v2950_v51  ;;  %v8763_v51 = vld [vmem:[%s10306_s18 + $0xac] sm:$0xf0]  ;;  %3853 = vmatpush.bf16.msrb.mxu3 %v8267_v21  ;;  %v11545_v11 = vor.u32 %v8761_v25, %v7976_v44  ;;  %v8859_v25 = vld [vmem:[%s10323_s7 + $0xb4] sm:$0xf]  ;;  %v8112_v44 = vld [vmem:[%s10323_s7 + $0xb8] sm:$0xf0] }
 0x3f6   : > { %v2874_v47 = vpop.f32.mrf.mxu2  ;;  %v2778_v19 = vpop.f32.mrf.mxu0  ;;  %3808 = vmatpush.bf16.msrb.mxu2 %v8171_v31  ;;  %v7984_v31 = vld [vmem:[%s10306_s18 + $0xb8] sm:$0xf0]  ;;  %v8120_v21 = vld [vmem:[%s10323_s7 + $0xc8] sm:$0xf0] }
 0x3f7   : > { %v2875_v57 = vadd.f32 %v2874_v47, %v2826_v29  ;;  %v2923_v37 = vpop.f32.mrf.mxu3  ;;  %v11518_v6 = vpack.c.b16 %v4004_v8, %v4003_v56  ;;  %v11520_v62 = vpack.c.b16 %v4751_v12, %v4750_v34  ;;  %v2779_v24 = vadd.f32 %v2778_v19, %v11358_v20  ;;  %v2827_v10 = vpop.f32.mrf.mxu1  ;;  %v7974_v29 = vld [vmem:[%s10306_s18 + $0xa0] sm:$0xf]  ;;  %v7982_v56 = vld [vmem:[%s10306_s18 + $0xa8] sm:$0xf]  ;;  %v8863_v34 = vld [vmem:[%s10323_s7 + $0xd4] sm:$0xf] }
 0x3f8   : > { %v8128_v8 = vld [vmem:[%s10323_s7 + $0xd8] sm:$0xf0]  ;;  %v8895_v12 = vld [vmem:[%s10323_s7 + $0x1d4] sm:$0xf]  ;;  %v11541_v48 = vor.u32 %v8763_v51, %v7974_v29  ;;  %v11543_v2 = vor.u32 %v8764_v30, %v7982_v56  ;;  %13559 = vst [vmem:[#allocation58_spill] sm:$0xff] %v11545_v11 }
 0x3f9   : > { %v2924_v23 = vadd.f32 %v2923_v37, %v2875_v57  ;;  %v2828_v38 = vadd.f32 %v2827_v10, %v2779_v24  ;;  %v8131_v45 = vor.u32 %v8863_v34, %v8128_v8  ;;  %v8256_v47 = vld [vmem:[%s10323_s7 + $0x1d8] sm:$0xf0]  ;;  %v8839_v57 = vld [vmem:[%s10323_s7 + $0x14] sm:$0xf]  ;;  %v8893_v34 = vld [vmem:[%s10323_s7 + $0x1c4] sm:$0xf] }
 0x3fa   : > { %v8032_v37 = vld [vmem:[%s10323_s7 + $0x18] sm:$0xf0]  ;;  %v8259_v19 = vor.u32 %v8895_v12, %v8256_v47  ;;  %13557 = vst [vmem:[#allocation56_spill] sm:$0xff] %v11541_v48  ;;  %v11550_v12 = vor.u32 %v8762_v41, %v7984_v31  ;;  %v8248_v51 = vld [vmem:[%s10323_s7 + $0x1c8] sm:$0xf0]  ;;  %v8115_v47 = vor.u32 %v8859_v25, %v8112_v44 }
 0x3fb   : > { %v11530_v43 = vpack.c.bf16 %v2924_v23, %v11289_v18  ;;  %v8035_v18 = vor.u32 %v8839_v57, %v8032_v37  ;;  %3756 = vmatpush.bf16.msrb.mxu1 %v8131_v45  ;;  %13558 = vst [vmem:[#allocation57_spill] sm:$0xff] %v11543_v2  ;;  %v8861_v23 = vld [vmem:[%s10323_s7 + $0xc4] sm:$0xf]  ;;  %v8251_v45 = vor.u32 %v8893_v34, %v8248_v51  ;;  %v8891_v31 = vld [vmem:[%s10323_s7 + $0x1b4] sm:$0xf] }
 0x3fc   : > { %3854 = vmatpush.bf16.msrb.mxu3 %v8259_v19  ;;  %13560 = vst [vmem:[#allocation59_spill] sm:$0xff] %v11550_v12  ;;  %v8123_v29 = vor.u32 %v8861_v23, %v8120_v21  ;;  %v8240_v57 = vld [vmem:[%s10323_s7 + $0x1b8] sm:$0xf0]  ;;  %v8104_v51 = vld [vmem:[%s10323_s7 + $0xa8] sm:$0xf0] }
 0x3fd   : > { %3711 = vmatpush.bf16.msrb.mxu0 %v8035_v18  ;;  %v4005_v41 = vunpack.c.l.b16 %v11530_v43  ;;  %v8160_v18 = vld [vmem:[%s10323_s7 + $0x118] sm:$0xf0] }
 0x3fe   : > { %v2876_v60 = vpop.f32.mrf.mxu2  ;;  %v2781_v10 = vpop.f32.mrf.mxu0 }
 0x3ff   : > { %v2877_v36 = vadd.f32 %v2876_v60, %v2828_v38  ;;  %v2925_v24 = vpop.f32.mrf.mxu3  ;;  %v2830_v8 = vpop.f32.mrf.mxu1  ;;  %3757 = vmatpush.bf16.msrb.mxu1 %v8123_v29  ;;  %v2782_v30 = vadd.f32 %v2781_v10, %v11358_v20  ;;  %v8871_v60 = vld [vmem:[%s10323_s7 + $0x114] sm:$0xf]  ;;  %v8857_v29 = vld [vmem:[%s10323_s7 + $0xa4] sm:$0xf] }
 0x400   : > { %3855 = vmatpush.bf16.msrb.mxu3 %v8251_v45  ;;  %v8163_v10 = vor.u32 %v8871_v60, %v8160_v18  ;;  %v8107_v25 = vor.u32 %v8857_v29, %v8104_v51  ;;  %v8855_v60 = vld [vmem:[%s10323_s7 + $0x94] sm:$0xf]  ;;  %v8096_v18 = vld [vmem:[%s10323_s7 + $0x98] sm:$0xf0] }
 0x401   : > { %v2926_v38 = vadd.f32 %v2925_v24, %v2877_v36  ;;  %3542 = vmatmul.bf16.gmra.mxu0 %v11541_v48  ;;  %v8243_v36 = vor.u32 %v8891_v31, %v8240_v57  ;;  %v2831_v23 = vadd.f32 %v2830_v8, %v2782_v30  ;;  %v8232_v8 = vld [vmem:[%s10323_s7 + $0x1a8] sm:$0xf0]  ;;  %v7998_v57 = vld [vmem:[%s10306_s18 + $0xc8] sm:$0xf]  ;;  %v8224_v29 = vld [vmem:[%s10323_s7 + $0x198] sm:$0xf0] }
 0x402   : > { %3591 = vmatmul.bf16.gmra.mxu1 %v11545_v11  ;;  %3809 = vmatpush.bf16.msrb.mxu2 %v8163_v10  ;;  %v8767_v31 = vld [vmem:[%s10306_s18 + $0xcc] sm:$0xf0]  ;;  %v8887_v10 = vld [vmem:[%s10323_s7 + $0x194] sm:$0xf]  ;;  %v8869_v11 = vld [vmem:[%s10323_s7 + $0x104] sm:$0xf] }
 0x403   : > { %v2952_v56 = vpack.c.bf16 %v2926_v38, %v11302_v7  ;;  %3640 = vmatmul.bf16.gmra.mxu2 %v11543_v2  ;;  %v4752_v7 = vunpack.c.h.b16 %v11530_v43  ;;  %3758 = vmatpush.bf16.msrb.mxu1 %v8115_v47  ;;  %v8889_v43 = vld [vmem:[%s10323_s7 + $0x1a4] sm:$0xf]  ;;  %v7990_v47 = vld [vmem:[%s10306_s18 + $0xc0] sm:$0xf] }
 0x404   : > { %3689 = vmatmul.bf16.gmra.mxu3 %v11550_v12  ;;  %v11591_v48 = vor.u32 %v8767_v31, %v7990_v47  ;;  %v8885_v31 = vld [vmem:[%s10323_s7 + $0x184] sm:$0xf] }
 0x405   : > { %v4006_v37 = vunpack.c.l.b16 %v2952_v56  ;;  %v4753_v19 = vunpack.c.h.b16 %v2952_v56  ;;  %3856 = vmatpush.bf16.msrb.mxu3 %v8243_v36  ;;  %v8837_v36 = vld [vmem:[%s10323_s7 + $0x4] sm:$0xf] }
 0x406   : > { %v2879_v24 = vpop.f32.mrf.mxu2  ;;  %v2783_v34 = vpop.f32.mrf.mxu0 }
 0x407   : > { %v2928_v21 = vpop.f32.mrf.mxu3  ;;  %v11570_v38 = vpack.c.b16 %v4006_v37, %v4005_v41  ;;  %v11572_v45 = vpack.c.b16 %v4753_v19, %v4752_v7  ;;  %v2832_v56 = vpop.f32.mrf.mxu1  ;;  %v2880_v30 = vadd.f32 %v2879_v24, %v2831_v23  ;;  %v2784_v44 = vadd.f32 %v2783_v34, %v11358_v20  ;;  %v8768_v7 = vld [vmem:[%s10306_s18 + $0xd4] sm:$0xf0]  ;;  %v8765_v37 = vld [vmem:[%s10306_s18 + $0xc4] sm:$0xf]  ;;  %v7992_v19 = vld [vmem:[%s10306_s18 + $0xd0] sm:$0xf0]  ;;  %3759 = vmatpush.bf16.msrb.mxu1 %v8107_v25 }
 0x408   : > { %v8235_v41 = vor.u32 %v8889_v43, %v8232_v8  ;;  %v8766_v24 = vld [vmem:[%s10306_s18 + $0xcc] sm:$0xf]  ;;  %v8000_v23 = vld [vmem:[%s10306_s18 + $0xd8] sm:$0xf0]  ;;  %v8099_v34 = vor.u32 %v8855_v60, %v8096_v18  ;;  %v8024_v43 = vld [vmem:[%s10323_s7 + $0x8] sm:$0xf0]  ;;  %v8227_v8 = vor.u32 %v8887_v10, %v8224_v29 }
 0x409   : > { %v2929_v51 = vadd.f32 %v2928_v21, %v2880_v30  ;;  %v2833_v12 = vadd.f32 %v2832_v56, %v2784_v44  ;;  %v8027_v25 = vor.u32 %v8837_v36, %v8024_v43  ;;  %v11594_v21 = vor.u32 %v8768_v7, %v7998_v57  ;;  %v8853_v44 = vld [vmem:[%s10323_s7 + $0x84] sm:$0xf]  ;;  %v8216_v36 = vld [vmem:[%s10323_s7 + $0x188] sm:$0xf0] }
 0x40a   : > { %3857 = vmatpush.bf16.msrb.mxu3 %v8235_v41  ;;  %v11596_v56 = vor.u32 %v8765_v37, %v7992_v19  ;;  %v8155_v30 = vor.u32 %v8869_v11, %v8152_v61  ;;  %v8088_v41 = vld [vmem:[%s10323_s7 + $0x88] sm:$0xf0]  ;;  %v11600_v29 = vor.u32 %v8766_v24, %v8000_v23 }
 0x40b   : > { %3760 = vmatpush.bf16.msrb.mxu1 %v8099_v34  ;;  %3712 = vmatpush.bf16.msrb.mxu0 %v8027_v25  ;;  %v8091_v47 = vor.u32 %v8853_v44, %v8088_v41  ;;  %v2953_v34 = vpack.c.bf16 %v2929_v51, %v11319_v35  ;;  %v8772_v44 = vld [vmem:[%s10306_s18 + $0xf4] sm:$0xf0]  ;;  %v8769_v41 = vld [vmem:[%s10306_s18 + $0xe4] sm:$0xf] }
 0x40c   : > { %3810 = vmatpush.bf16.msrb.mxu2 %v8155_v30  ;;  %v8014_v30 = vld [vmem:[%s10306_s18 + $0xe8] sm:$0xf] }
 0x40d   : > { %v4007_v35 = vunpack.c.l.b16 %v2953_v34 }
 0x40e   : > { %v2881_v2 = vpop.f32.mrf.mxu2  ;;  %v2786_v18 = vpop.f32.mrf.mxu0  ;;  %3858 = vmatpush.bf16.msrb.mxu3 %v8227_v8 }
 0x40f   : > { %v2882_v14 = vadd.f32 %v2881_v2, %v2833_v12  ;;  %v2930_v60 = vpop.f32.mrf.mxu3  ;;  %v2835_v10 = vpop.f32.mrf.mxu1  ;;  %v8219_v2 = vor.u32 %v8885_v31, %v8216_v36  ;;  %3761 = vmatpush.bf16.msrb.mxu1 %v8091_v47  ;;  %v2787_v11 = vadd.f32 %v2786_v18, %v11358_v20  ;;  %v8771_v18 = vld [vmem:[%s10306_s18 + $0xec] sm:$0xf0]  ;;  %v8008_v47 = vld [vmem:[%s10306_s18 + $0xf0] sm:$0xf0]  ;;  %v8770_v36 = vld [vmem:[%s10306_s18 + $0xec] sm:$0xf] }
 0x411   : > { %v2931_v43 = vadd.f32 %v2930_v60, %v2882_v14  ;;  %3547 = vmatmul.bf16.gmra.mxu0 %v11591_v48  ;;  %v4754_v14 = vunpack.c.h.b16 %v2953_v34  ;;  %v2836_v7 = vadd.f32 %v2835_v10, %v2787_v11  ;;  %v8006_v60 = vld [vmem:[%s10306_s18 + $0xe0] sm:$0xf]  ;;  %v8016_v34 = vld [vmem:[%s10306_s18 + $0xf8] sm:$0xf0] }
 0x412   : > { %3596 = vmatmul.bf16.gmra.mxu1 %v11596_v56  ;;  %3859 = vmatpush.bf16.msrb.mxu3 %v8219_v2  ;;  %v11624_v2 = vor.u32 %v8771_v18, %v8006_v60 }
 0x413   : > { %v2954_v61 = vpack.c.bf16 %v2931_v43, %v11334_v16  ;;  %3645 = vmatmul.bf16.gmra.mxu2 %v11594_v21 }
 0x414   : > { %3694 = vmatmul.bf16.gmra.mxu3 %v11600_v29 }
 0x415   : > { %v4008_v12 = vunpack.c.l.b16 %v2954_v61  ;;  %v4755_v57 = vunpack.c.h.b16 %v2954_v61 }
 0x416   : > { %v2884_v16 = vpop.f32.mrf.mxu2  ;;  %v2788_v19 = vpop.f32.mrf.mxu0 }
 0x417   : > { %v2933_v37 = vpop.f32.mrf.mxu3  ;;  %v11611_v24 = vpack.c.b16 %v4008_v12, %v4007_v35  ;;  %v11613_v23 = vpack.c.b16 %v4755_v57, %v4754_v14  ;;  %v2837_v51 = vpop.f32.mrf.mxu1  ;;  %v2885_v8 = vadd.f32 %v2884_v16, %v2836_v7  ;;  %v2789_v25 = vadd.f32 %v2788_v19, %v11358_v20 }
 0x418   : > { %v11626_v14 = vor.u32 %v8772_v44, %v8014_v30  ;;  %v11628_v12 = vor.u32 %v8769_v41, %v8008_v47  ;;  %v11630_v16 = vor.u32 %v8770_v36, %v8016_v34  ;;  %v11642_v34 = vld [vmem:[%s689_s19] sm:$0x3] }
 0x419   : > { %v2934_v31 = vadd.f32 %v2933_v37, %v2885_v8  ;;  %v2838_v10 = vadd.f32 %v2837_v51, %v2789_v25 }
 0x41b   : > { %v2955_v7 = vpack.c.bf16 %v2934_v31, %v11341_v5 }
 0x41d   : > { %v4009_v8 = vunpack.c.l.b16 %v2955_v7  ;;  %v4756_v25 = vunpack.c.h.b16 %v2955_v7 }
 0x41e   : > { %v2886_v43 = vpop.f32.mrf.mxu2  ;;  %v2791_v35 = vpop.f32.mrf.mxu0 }
 0x41f   : > { %v2887_v61 = vadd.f32 %v2886_v43, %v2838_v10  ;;  %v2935_v11 = vpop.f32.mrf.mxu3  ;;  %v2840_v57 = vpop.f32.mrf.mxu1  ;;  %v2792_v51 = vadd.f32 %v2791_v35, %v11358_v20  ;;  %v11645_v43 = vperm.slane %v11642_v34, 0 }
 0x421   : > { %v2936_v19 = vadd.f32 %v2935_v11, %v2887_v61  ;;  %3552 = vmatmul.bf16.gmra.mxu0 %v11624_v2  ;;  %v2841_v5 = vadd.f32 %v2840_v57, %v2792_v51 }
 0x422   : > { %3601 = vmatmul.bf16.gmra.mxu1 %v11628_v12 }
 0x423   : > { %v2956_v37 = vpack.c.bf16 %v2936_v19, %v11346_v42  ;;  %3650 = vmatmul.bf16.gmra.mxu2 %v11626_v14 }
 0x424   : > { %3699 = vmatmul.bf16.gmra.mxu3 %v11630_v16 }
 0x425   : > { %v4010_v60 = vunpack.c.l.b16 %v2956_v37  ;;  %v4757_v18 = vunpack.c.h.b16 %v2956_v37 }
 0x426   : > { %v2889_v30 = vpop.f32.mrf.mxu2  ;;  %v2793_v41 = vpop.f32.mrf.mxu0 }
 0x427   : > { %v2938_v44 = vpop.f32.mrf.mxu3  ;;  %v4019_v47 = vpack.c.b16 %v4010_v60, %v4009_v8  ;;  %v4766_v31 = vpack.c.b16 %v4757_v18, %v4756_v25  ;;  %v2842_v42 = vpop.f32.mrf.mxu1  ;;  %v2890_v10 = vadd.f32 %v2889_v30, %v2841_v5  ;;  %v2794_v36 = vadd.f32 %v2793_v41, %v11358_v20 }
 0x429   : > { %v2939_v61 = vadd.f32 %v2938_v44, %v2890_v10  ;;  %v2843_v11 = vadd.f32 %v2842_v42, %v2794_v36 }
 0x42b   : > { %v2957_v8 = vpack.c.bf16 %v2939_v61, %v11355_v28 }
 0x42d   : > { %v4011_v18 = vunpack.c.l.b16 %v2957_v8  ;;  %v4758_v30 = vunpack.c.h.b16 %v2957_v8 }
 0x42e   : > { %v2891_v35 = vpop.f32.mrf.mxu2  ;;  %v3518_v57 = vpop.f32.mrf.mxu0 }
 0x42f   : > { %v2892_v7 = vadd.f32 %v2891_v35, %v2843_v11  ;;  %v2940_v19 = vpop.f32.mrf.mxu3  ;;  %v3519_v37 = vadd.f32 %v3518_v57, %v11645_v43  ;;  %v3567_v51 = vpop.f32.mrf.mxu1 }
 0x431   : > { %v2941_v25 = vadd.f32 %v2940_v19, %v2892_v7  ;;  %v3568_v60 = vadd.f32 %v3567_v51, %v3519_v37  ;;  %3713 = vmatmul.bf16.vlgmr.msrb.gmra.mxu0 %v11370_v13 }
 0x432   : > { %3762 = vmatmul.bf16.vlgmr.msrb.gmra.mxu1 %v11374_v26 }
 0x433   : > { %v2958_v20 = vpack.c.bf16 %v2941_v25, %v11379_v4  ;;  %3811 = vmatmul.bf16.vlgmr.msrb.gmra.mxu2 %v11372_v1 }
 0x434   : > { %3860 = vmatmul.bf16.vlgmr.msrb.gmra.mxu3 %v11377_v52 }
 0x435   : > { %v4012_v5 = vunpack.c.l.b16 %v2958_v20  ;;  %v4759_v44 = vunpack.c.h.b16 %v2958_v20 }
 0x436   : > { %v3616_v41 = vpop.f32.mrf.mxu2  ;;  %v3520_v10 = vpop.f32.mrf.mxu0 }
 0x437   : > { %v3617_v42 = vadd.f32 %v3616_v41, %v3568_v60  ;;  %v3665_v28 = vpop.f32.mrf.mxu3  ;;  %v4020_v36 = vpack.c.b16 %v4012_v5, %v4011_v18  ;;  %v4767_v61 = vpack.c.b16 %v4759_v44, %v4758_v30  ;;  %v3521_v13 = vadd.f32 %v3520_v10, %v11645_v43  ;;  %v3569_v11 = vpop.f32.mrf.mxu1 }
 0x439   : > { %v11655_v4 = vadd.f32 %v3665_v28, %v3617_v42  ;;  %4029 = vmatpush.bf16.xpose.msra.mxu0 %v4020_v36  ;;  %4776 = vmatpush.bf16.xpose.msra.mxu2 %v4767_v61  ;;  %v3570_v1 = vadd.f32 %v3569_v11, %v3521_v13 }
 0x43e   : > { %v3618_v26 = vpop.f32.mrf.mxu2  ;;  %v3523_v35 = vpop.f32.mrf.mxu0 }
 0x43f   : > { %v3619_v52 = vadd.f32 %v3618_v26, %v3570_v1  ;;  %v3667_v7 = vpop.f32.mrf.mxu3  ;;  %v3524_v19 = vadd.f32 %v3523_v35, %v11645_v43  ;;  %v3572_v57 = vpop.f32.mrf.mxu1 }
 0x441   : > { %v11658_v37 = vadd.f32 %v3667_v7, %v3619_v52  ;;  %4030 = vmatpush.bf16.xpose.msra.mxu0 %v4019_v47  ;;  %4777 = vmatpush.bf16.xpose.msra.mxu2 %v4766_v31  ;;  %v3573_v51 = vadd.f32 %v3572_v57, %v3524_v19 }
 0x442   : > { %3718 = vmatmul.bf16.gmra.mxu0 %v11399_v54  ;;  %3767 = vmatmul.bf16.gmra.mxu1 %v11403_v49 }
 0x443   : > { %3816 = vmatmul.bf16.gmra.mxu2 %v11401_v27 }
 0x444   : > { %3865 = vmatmul.bf16.gmra.mxu3 %v11406_v40 }
 0x446   : > { %v3621_v8 = vpop.f32.mrf.mxu2  ;;  %v3525_v60 = vpop.f32.mrf.mxu0 }
 0x447   : > { %v3622_v25 = vadd.f32 %v3621_v8, %v3573_v51  ;;  %v3670_v20 = vpop.f32.mrf.mxu3  ;;  %v3526_v18 = vadd.f32 %v3525_v60, %v11645_v43  ;;  %v3574_v30 = vpop.f32.mrf.mxu1 }
 0x449   : > { %v11665_v5 = vadd.f32 %v3670_v20, %v3622_v25  ;;  %4031 = vmatpush.bf16.xpose.msra.mxu0 %v11611_v24  ;;  %4778 = vmatpush.bf16.xpose.msra.mxu2 %v11613_v23  ;;  %v3575_v54 = vadd.f32 %v3574_v30, %v3526_v18 }
 0x44e   : > { %v3623_v47 = vpop.f32.mrf.mxu2  ;;  %v3528_v31 = vpop.f32.mrf.mxu0 }
 0x44f   : > { %v3624_v27 = vadd.f32 %v3623_v47, %v3575_v54  ;;  %v3672_v49 = vpop.f32.mrf.mxu3  ;;  %v3529_v40 = vadd.f32 %v3528_v31, %v11645_v43  ;;  %v3577_v44 = vpop.f32.mrf.mxu1 }
 0x451   : > { %v11670_v41 = vadd.f32 %v3672_v49, %v3624_v27  ;;  %4032 = vmatpush.bf16.xpose.msra.mxu0 %v11570_v38  ;;  %4779 = vmatpush.bf16.xpose.msra.mxu2 %v11572_v45  ;;  %v3578_v42 = vadd.f32 %v3577_v44, %v3529_v40 }
 0x452   : > { %3723 = vmatmul.bf16.gmra.mxu0 %v11431_v9  ;;  %3772 = vmatmul.bf16.gmra.mxu1 %v11435_v33 }
 0x453   : > { %3821 = vmatmul.bf16.gmra.mxu2 %v11433_v22 }
 0x454   : > { %3870 = vmatmul.bf16.gmra.mxu3 %v11438_v3 }
 0x456   : > { %v3626_v24 = vpop.f32.mrf.mxu2  ;;  %v3530_v10 = vpop.f32.mrf.mxu0 }
 0x457   : > { %v3627_v23 = vadd.f32 %v3626_v24, %v3578_v42  ;;  %v3675_v28 = vpop.f32.mrf.mxu3  ;;  %v3531_v36 = vadd.f32 %v3530_v10, %v11645_v43  ;;  %v3579_v61 = vpop.f32.mrf.mxu1  ;;  %v13563_v42 = vld [vmem:[#allocation56_spill] sm:$0xff]  ;;  %v13564_v24 = vld [vmem:[#allocation57_spill] sm:$0xff]  ;;  %v13566_v10 = vld [vmem:[#allocation59_spill] sm:$0xff] }
 0x459   : > { %v11679_v13 = vadd.f32 %v3675_v28, %v3627_v23  ;;  %4033 = vmatpush.bf16.xpose.msra.mxu0 %v11518_v6  ;;  %4780 = vmatpush.bf16.xpose.msra.mxu2 %v11520_v62  ;;  %v3580_v9 = vadd.f32 %v3579_v61, %v3531_v36  ;;  %v13565_v23 = vld [vmem:[#allocation58_spill] sm:$0xff] }
 0x45e   : > { %v3628_v38 = vpop.f32.mrf.mxu2  ;;  %v3533_v45 = vpop.f32.mrf.mxu0 }
 0x45f   : > { %v3629_v22 = vadd.f32 %v3628_v38, %v3580_v9  ;;  %v3677_v33 = vpop.f32.mrf.mxu3  ;;  %v3534_v3 = vadd.f32 %v3533_v45, %v11645_v43  ;;  %v3582_v11 = vpop.f32.mrf.mxu1 }
 0x461   : > { %v11684_v1 = vadd.f32 %v3677_v33, %v3629_v22  ;;  %4034 = vmatpush.bf16.xpose.msra.mxu0 %v11479_v50  ;;  %4781 = vmatpush.bf16.xpose.msra.mxu2 %v11481_v58  ;;  %v3583_v26 = vadd.f32 %v3582_v11, %v3534_v3 }
 0x462   : > { %3728 = vmatmul.bf16.gmra.mxu0 %v11463_v32  ;;  %3777 = vmatmul.bf16.gmra.mxu1 %v11467_v39 }
 0x463   : > { %3826 = vmatmul.bf16.gmra.mxu2 %v11465_v15 }
 0x464   : > { %3875 = vmatmul.bf16.gmra.mxu3 %v11470_v46 }
 0x466   : > { %v3631_v6 = vpop.f32.mrf.mxu2  ;;  %v3535_v52 = vpop.f32.mrf.mxu0 }
 0x467   : > { %v3632_v62 = vadd.f32 %v3631_v6, %v3583_v26  ;;  %v3680_v35 = vpop.f32.mrf.mxu3  ;;  %v3536_v7 = vadd.f32 %v3535_v52, %v11645_v43  ;;  %v3584_v19 = vpop.f32.mrf.mxu1 }
 0x469   : > { %v11693_v57 = vadd.f32 %v3680_v35, %v3632_v62  ;;  %4035 = vmatpush.bf16.xpose.msra.mxu0 %v11447_v59  ;;  %4782 = vmatpush.bf16.xpose.msra.mxu2 %v11449_v17  ;;  %v3585_v32 = vadd.f32 %v3584_v19, %v3536_v7  ;;  %v13561_v59 = vld [vmem:[#allocation54_spill] sm:$0xff]  ;;  %v13562_v17 = vld [vmem:[#allocation55_spill] sm:$0xff] }
 0x46e   : > { %v3633_v50 = vpop.f32.mrf.mxu2  ;;  %v3538_v58 = vpop.f32.mrf.mxu0 }
 0x46f   : > { %v3634_v15 = vadd.f32 %v3633_v50, %v3585_v32  ;;  %v3682_v39 = vpop.f32.mrf.mxu3  ;;  %v3539_v46 = vadd.f32 %v3538_v58, %v11645_v43  ;;  %v3587_v51 = vpop.f32.mrf.mxu1 }
 0x471   : > { %v11698_v8 = vadd.f32 %v3682_v39, %v3634_v15  ;;  %4036 = vmatpush.bf16.xpose.msra.mxu0 %v11415_v53  ;;  %4783 = vmatpush.bf16.xpose.msra.mxu2 %v11417_v63  ;;  %v3588_v25 = vadd.f32 %v3587_v51, %v3539_v46 }
 0x472   : > { %3733 = vmatmul.bf16.gmra.mxu0 %v11495_v0  ;;  %3782 = vmatmul.bf16.gmra.mxu1 %v13561_v59 }
 0x473   : > { %3831 = vmatmul.bf16.gmra.mxu2 %v11497_v55 }
 0x474   : > { %3880 = vmatmul.bf16.gmra.mxu3 %v13562_v17 }
 0x476   : > { %v3636_v60 = vpop.f32.mrf.mxu2  ;;  %v3540_v18 = vpop.f32.mrf.mxu0 }
 0x477   : > { %v3637_v20 = vadd.f32 %v3636_v60, %v3588_v25  ;;  %v3685_v30 = vpop.f32.mrf.mxu3  ;;  %v3589_v54 = vpop.f32.mrf.mxu1  ;;  %v3541_v47 = vadd.f32 %v3540_v18, %v11645_v43 }
 0x479   : > { %v11707_v27 = vadd.f32 %v3685_v30, %v3637_v20  ;;  %v3590_v53 = vadd.f32 %v3589_v54, %v3541_v47 }
 0x47e   : > { %v3638_v63 = vpop.f32.mrf.mxu2  ;;  %v3543_v0 = vpop.f32.mrf.mxu0 }
 0x47f   : > { %v11709_v31 = vadd.f32 %v3638_v63, %v3590_v53  ;;  %v11711_v49 = vpop.f32.mrf.mxu3  ;;  %v3544_v55 = vadd.f32 %v3543_v0, %v11645_v43  ;;  %v3592_v40 = vpop.f32.mrf.mxu1  ;;  %v8278_v53 = vld [vmem:[#allocation2] sm:$0xf]  ;;  %v8901_v63 = vld [vmem:[#allocation2 + $0x4] sm:$0xf0]  ;;  %v11746_v0 = vperm.slane %v11642_v34, 1 }
 0x481   : > { %v3593_v44 = vadd.f32 %v3592_v40, %v3544_v55  ;;  %v8279_v40 = vor.u32 %v8901_v63, %v8278_v53 }
 0x482   : > { %3738 = vmatmul.bf16.gmra.mxu0 %v13563_v42  ;;  %3787 = vmatmul.bf16.gmra.mxu1 %v13565_v23 }
 0x483   : > { %3836 = vmatmul.bf16.gmra.mxu2 %v13564_v24 }
 0x484   : > { %3885 = vmatmul.bf16.gmra.mxu3 %v13566_v10 }
 0x486   : > { %v3641_v28 = vpop.f32.mrf.mxu2  ;;  %v3545_v61 = vpop.f32.mrf.mxu0 }
 0x487   : > { %v3642_v36 = vadd.f32 %v3641_v28, %v3593_v44  ;;  %v3690_v9 = vpop.f32.mrf.mxu3  ;;  %v3594_v38 = vpop.f32.mrf.mxu1  ;;  %v3546_v22 = vadd.f32 %v3545_v61, %v11645_v43 }
 0x489   : > { %v11719_v45 = vadd.f32 %v3690_v9, %v3642_v36  ;;  %v3595_v33 = vadd.f32 %v3594_v38, %v3546_v22 }
 0x48e   : > { %v3643_v3 = vpop.f32.mrf.mxu2  ;;  %v3548_v26 = vpop.f32.mrf.mxu0 }
 0x48f   : > { %v11721_v11 = vadd.f32 %v3643_v3, %v3595_v33  ;;  %v11723_v6 = vpop.f32.mrf.mxu3  ;;  %v3549_v62 = vadd.f32 %v3548_v26, %v11645_v43  ;;  %v3597_v52 = vpop.f32.mrf.mxu1  ;;  %v8282_v3 = vld [vmem:[#allocation2 + $0x10] sm:$0xf]  ;;  %v8902_v26 = vld [vmem:[#allocation2 + $0x14] sm:$0xf0] }
 0x491   : > { %v3598_v35 = vadd.f32 %v3597_v52, %v3549_v62  ;;  %v8314_v62 = vld [vmem:[#allocation2 + $0x14] sm:$0xf]  ;;  %v8910_v52 = vld [vmem:[#allocation2 + $0x18] sm:$0xf0] }
 0x492   : > { %3743 = vmatmul.bf16.gmra.mxu0 %v11591_v48  ;;  %3792 = vmatmul.bf16.gmra.mxu1 %v11596_v56 }
 0x493   : > { %3841 = vmatmul.bf16.gmra.mxu2 %v11594_v21 }
 0x494   : > { %3890 = vmatmul.bf16.gmra.mxu3 %v11600_v29 }
 0x496   : > { %v3646_v7 = vpop.f32.mrf.mxu2  ;;  %v3550_v32 = vpop.f32.mrf.mxu0 }
 0x497   : > { %v3647_v19 = vadd.f32 %v3646_v7, %v3598_v35  ;;  %v3695_v50 = vpop.f32.mrf.mxu3  ;;  %v3599_v15 = vpop.f32.mrf.mxu1  ;;  %v3551_v58 = vadd.f32 %v3550_v32, %v11645_v43 }
 0x499   : > { %v11731_v39 = vadd.f32 %v3695_v50, %v3647_v19  ;;  %v3600_v46 = vadd.f32 %v3599_v15, %v3551_v58  ;;  %v8283_v19 = vor.u32 %v8902_v26, %v8282_v3  ;;  %v8315_v58 = vor.u32 %v8910_v52, %v8314_v62 }
 0x49e   : > { %v3648_v51 = vpop.f32.mrf.mxu2  ;;  %v3553_v48 = vpop.f32.mrf.mxu0 }
 0x49f   : > { %v11733_v25 = vadd.f32 %v3648_v51, %v3600_v46  ;;  %v11735_v59 = vpop.f32.mrf.mxu3  ;;  %v3554_v21 = vadd.f32 %v3553_v48, %v11645_v43  ;;  %v3602_v56 = vpop.f32.mrf.mxu1 }
 0x4a1   : > { %v3603_v29 = vadd.f32 %v3602_v56, %v3554_v21 }
 0x4a2   : > { %3748 = vmatmul.bf16.gmra.mxu0 %v11624_v2  ;;  %3797 = vmatmul.bf16.gmra.mxu1 %v11628_v12  ;;  %v8310_v2 = vld [vmem:[#allocation2 + $0x4] sm:$0xf] }
 0x4a3   : > { %3846 = vmatmul.bf16.gmra.mxu2 %v11626_v14  ;;  %v8909_v14 = vld [vmem:[#allocation2 + $0x8] sm:$0xf0] }
 0x4a4   : > { %3895 = vmatmul.bf16.gmra.mxu3 %v11630_v16  ;;  %v8311_v24 = vor.u32 %v8909_v14, %v8310_v2 }
 0x4a6   : > { %v3651_v17 = vpop.f32.mrf.mxu2  ;;  %v3555_v20 = vpop.f32.mrf.mxu0 }
 0x4a7   : > { %v3652_v60 = vadd.f32 %v3651_v17, %v3603_v29  ;;  %v3700_v18 = vpop.f32.mrf.mxu3  ;;  %v3604_v30 = vpop.f32.mrf.mxu1  ;;  %v3556_v54 = vadd.f32 %v3555_v20, %v11645_v43 }
 0x4a9   : > { %v11743_v47 = vadd.f32 %v3700_v18, %v3652_v60  ;;  %v3605_v55 = vadd.f32 %v3604_v30, %v3556_v54 }
 0x4ae   : > { %v3653_v12 = vpop.f32.mrf.mxu2  ;;  %v3714_v42 = vpop.f32.mrf.mxu0 }
 0x4af   : > { %v11748_v16 = vadd.f32 %v3653_v12, %v3605_v55  ;;  %v11750_v44 = vpop.f32.mrf.mxu3  ;;  %v3715_v43 = vadd.f32 %v3714_v42, %v11746_v0  ;;  %v3763_v23 = vpop.f32.mrf.mxu1  ;;  %v8318_v42 = vld [vmem:[#allocation2 + $0x24] sm:$0xf] }
 0x4b1   : > { %v3764_v10 = vadd.f32 %v3763_v23, %v3715_v43 }
 0x4b2   : > { %4037 = vmatmul.bf16.vlgmr.msra.gmra.mxu0 %v8279_v40  ;;  %v8903_v40 = vld [vmem:[#allocation2 + $0x24] sm:$0xf0] }
 0x4b3   : > { %4784 = vmatmul.bf16.vlgmr.msra.gmra.mxu2 %v8311_v24  ;;  %v8911_v24 = vld [vmem:[#allocation2 + $0x28] sm:$0xf0] }
 0x4b6   : > { %v3812_v28 = vpop.f32.mrf.mxu2  ;;  %v3716_v36 = vpop.f32.mrf.mxu0 }
 0x4b7   : > { %v3813_v34 = vadd.f32 %v3812_v28, %v3764_v10  ;;  %v3861_v61 = vpop.f32.mrf.mxu3  ;;  %v3765_v9 = vpop.f32.mrf.mxu1  ;;  %v3717_v38 = vadd.f32 %v3716_v36, %v11746_v0 }
 0x4b9   : > { %v3862_v22 = vadd.f32 %v3861_v61, %v3813_v34  ;;  %v3766_v35 = vadd.f32 %v3765_v9, %v3717_v38  ;;  %v8319_v61 = vor.u32 %v8911_v24, %v8318_v42 }
 0x4bb   : > { %v3901_v33 = vpack.c.bf16 %v3862_v22, %v11655_v4 }
 0x4bd   : > { %v4551_v4 = vunpack.c.l.b16 %v3901_v33  ;;  %v5284_v29 = vunpack.c.h.b16 %v3901_v33 }
 0x4be   : > { %v3814_v7 = vpop.f32.mrf.mxu2 }
 0x4bf   : > { %v3815_v32 = vadd.f32 %v3814_v7, %v3766_v35  ;;  %v3719_v50 = vpop.f32.mrf.mxu0  ;;  %v3863_v15 = vpop.f32.mrf.mxu3 }
 0x4c0   : > { %v3720_v46 = vadd.f32 %v3719_v50, %v11746_v0  ;;  %v3768_v51 = vpop.f32.mrf.mxu1 }
 0x4c1   : > { %v3864_v48 = vadd.f32 %v3863_v15, %v3815_v32 }
 0x4c2   : > { %v3769_v21 = vadd.f32 %v3768_v51, %v3720_v46  ;;  %4042 = vmatmul.bf16.gmra.mxu0 %v8283_v19 }
 0x4c3   : > { %v3902_v56 = vpack.c.bf16 %v3864_v48, %v11658_v37  ;;  %4789 = vmatmul.bf16.gmra.mxu2 %v8315_v58  ;;  %v8286_v37 = vld [vmem:[#allocation2 + $0x20] sm:$0xf] }
 0x4c4   : > { %v8287_v10 = vor.u32 %v8903_v40, %v8286_v37 }
 0x4c5   : > { %v4552_v17 = vunpack.c.l.b16 %v3902_v56  ;;  %v5285_v60 = vunpack.c.h.b16 %v3902_v56  ;;  %v8322_v56 = vld [vmem:[#allocation2 + $0x34] sm:$0xf] }
 0x4c6   : > { %v3817_v20 = vpop.f32.mrf.mxu2 }
 0x4c7   : > { %v3818_v18 = vadd.f32 %v3817_v20, %v3769_v21  ;;  %v3721_v30 = vpop.f32.mrf.mxu0  ;;  %v3866_v54 = vpop.f32.mrf.mxu3  ;;  %v11757_v53 = vpack.c.b16 %v4552_v17, %v4551_v4  ;;  %v11759_v63 = vpack.c.b16 %v5285_v60, %v5284_v29  ;;  %v8904_v21 = vld [vmem:[#allocation2 + $0x34] sm:$0xf0]  ;;  %v8912_v4 = vld [vmem:[#allocation2 + $0x38] sm:$0xf0] }
 0x4c8   : > { %v3770_v2 = vpop.f32.mrf.mxu1  ;;  %v3722_v14 = vadd.f32 %v3721_v30, %v11746_v0 }
 0x4c9   : > { %v3867_v55 = vadd.f32 %v3866_v54, %v3818_v18  ;;  %v8323_v54 = vor.u32 %v8912_v4, %v8322_v56 }
 0x4ca   : > { %v3771_v43 = vadd.f32 %v3770_v2, %v3722_v14 }
 0x4cb   : > { %v3903_v12 = vpack.c.bf16 %v3867_v55, %v11665_v5 }
 0x4cd   : > { %v4553_v5 = vunpack.c.l.b16 %v3903_v12  ;;  %v5286_v26 = vunpack.c.h.b16 %v3903_v12 }
 0x4ce   : > { %v3819_v23 = vpop.f32.mrf.mxu2 }
 0x4cf   : > { %v3820_v28 = vadd.f32 %v3819_v23, %v3771_v43  ;;  %v3724_v34 = vpop.f32.mrf.mxu0  ;;  %v3868_v36 = vpop.f32.mrf.mxu3 }
 0x4d0   : > { %v3725_v9 = vadd.f32 %v3724_v34, %v11746_v0  ;;  %v3773_v38 = vpop.f32.mrf.mxu1 }
 0x4d1   : > { %v3869_v22 = vadd.f32 %v3868_v36, %v3820_v28 }
 0x4d2   : > { %v3774_v33 = vadd.f32 %v3773_v38, %v3725_v9  ;;  %4047 = vmatmul.bf16.gmra.mxu0 %v8287_v10 }
 0x4d3   : > { %v3904_v3 = vpack.c.bf16 %v3869_v22, %v11670_v41  ;;  %4794 = vmatmul.bf16.gmra.mxu2 %v8319_v61  ;;  %v8290_v41 = vld [vmem:[#allocation2 + $0x30] sm:$0xf] }
 0x4d4   : > { %v8291_v60 = vor.u32 %v8904_v21, %v8290_v41 }
 0x4d5   : > { %v4554_v62 = vunpack.c.l.b16 %v3904_v3  ;;  %v5287_v52 = vunpack.c.h.b16 %v3904_v3  ;;  %v8326_v3 = vld [vmem:[#allocation2 + $0x44] sm:$0xf] }
 0x4d6   : > { %v3822_v35 = vpop.f32.mrf.mxu2 }
 0x4d7   : > { %v3823_v7 = vadd.f32 %v3822_v35, %v3774_v33  ;;  %v3726_v19 = vpop.f32.mrf.mxu0  ;;  %v3871_v32 = vpop.f32.mrf.mxu3  ;;  %v11765_v50 = vpack.c.b16 %v4554_v62, %v4553_v5  ;;  %v11767_v15 = vpack.c.b16 %v5287_v52, %v5286_v26  ;;  %v8905_v33 = vld [vmem:[#allocation2 + $0x44] sm:$0xf0]  ;;  %v8913_v5 = vld [vmem:[#allocation2 + $0x48] sm:$0xf0] }
 0x4d8   : > { %v3775_v58 = vpop.f32.mrf.mxu1  ;;  %v3727_v46 = vadd.f32 %v3726_v19, %v11746_v0 }
 0x4d9   : > { %v3872_v51 = vadd.f32 %v3871_v32, %v3823_v7  ;;  %v8327_v32 = vor.u32 %v8913_v5, %v8326_v3 }
 0x4da   : > { %v3776_v29 = vadd.f32 %v3775_v58, %v3727_v46 }
 0x4db   : > { %v3905_v48 = vpack.c.bf16 %v3872_v51, %v11679_v13 }
 0x4dd   : > { %v4555_v13 = vunpack.c.l.b16 %v3905_v48  ;;  %v5288_v40 = vunpack.c.h.b16 %v3905_v48 }
 0x4de   : > { %v3824_v17 = vpop.f32.mrf.mxu2 }
 0x4df   : > { %v3825_v20 = vadd.f32 %v3824_v17, %v3776_v29  ;;  %v3729_v18 = vpop.f32.mrf.mxu0  ;;  %v3873_v30 = vpop.f32.mrf.mxu3 }
 0x4e0   : > { %v3730_v2 = vadd.f32 %v3729_v18, %v11746_v0  ;;  %v3778_v14 = vpop.f32.mrf.mxu1 }
 0x4e1   : > { %v3874_v55 = vadd.f32 %v3873_v30, %v3825_v20 }
 0x4e2   : > { %v3779_v12 = vadd.f32 %v3778_v14, %v3730_v2  ;;  %4052 = vmatmul.bf16.gmra.mxu0 %v8291_v60 }
 0x4e3   : > { %v3906_v37 = vpack.c.bf16 %v3874_v55, %v11684_v1  ;;  %4799 = vmatmul.bf16.gmra.mxu2 %v8323_v54  ;;  %v8294_v1 = vld [vmem:[#allocation2 + $0x40] sm:$0xf] }
 0x4e4   : > { %v8295_v52 = vor.u32 %v8905_v33, %v8294_v1 }
 0x4e5   : > { %v4556_v42 = vunpack.c.l.b16 %v3906_v37  ;;  %v5289_v24 = vunpack.c.h.b16 %v3906_v37  ;;  %v8330_v37 = vld [vmem:[#allocation2 + $0x54] sm:$0xf] }
 0x4e6   : > { %v3827_v43 = vpop.f32.mrf.mxu2 }
 0x4e7   : > { %v3828_v23 = vadd.f32 %v3827_v43, %v3779_v12  ;;  %v3731_v10 = vpop.f32.mrf.mxu0  ;;  %v3876_v28 = vpop.f32.mrf.mxu3  ;;  %v11773_v34 = vpack.c.b16 %v4556_v42, %v4555_v13  ;;  %v11775_v36 = vpack.c.b16 %v5289_v24, %v5288_v40  ;;  %v8906_v12 = vld [vmem:[#allocation2 + $0x54] sm:$0xf0]  ;;  %v8914_v13 = vld [vmem:[#allocation2 + $0x58] sm:$0xf0] }
 0x4e8   : > { %v3780_v61 = vpop.f32.mrf.mxu1  ;;  %v3732_v9 = vadd.f32 %v3731_v10, %v11746_v0 }
 0x4e9   : > { %v3877_v38 = vadd.f32 %v3876_v28, %v3828_v23  ;;  %v8331_v28 = vor.u32 %v8914_v13, %v8330_v37 }
 0x4ea   : > { %v3781_v26 = vadd.f32 %v3780_v61, %v3732_v9  ;;  %v3688_v9 = vadd.f32 %v11711_v49, %v11709_v31 }
 0x4eb   : > { %v3907_v22 = vpack.c.bf16 %v3877_v38, %v11693_v57 }
 0x4ed   : > { %v4557_v57 = vunpack.c.l.b16 %v3907_v22  ;;  %v5290_v21 = vunpack.c.h.b16 %v3907_v22 }
 0x4ee   : > { %v3829_v62 = vpop.f32.mrf.mxu2 }
 0x4ef   : > { %v3830_v35 = vadd.f32 %v3829_v62, %v3781_v26  ;;  %v3734_v7 = vpop.f32.mrf.mxu0  ;;  %v3878_v19 = vpop.f32.mrf.mxu3 }
 0x4f0   : > { %v3735_v58 = vadd.f32 %v3734_v7, %v11746_v0  ;;  %v3783_v46 = vpop.f32.mrf.mxu1 }
 0x4f1   : > { %v3879_v51 = vadd.f32 %v3878_v19, %v3830_v35 }
 0x4f2   : > { %v3784_v48 = vadd.f32 %v3783_v46, %v3735_v58  ;;  %4057 = vmatmul.bf16.gmra.mxu0 %v8295_v52  ;;  %v8302_v58 = vld [vmem:[#allocation2 + $0x60] sm:$0xf]  ;;  %v8907_v46 = vld [vmem:[#allocation2 + $0x64] sm:$0xf0] }
 0x4f3   : > { %v3908_v41 = vpack.c.bf16 %v3879_v51, %v11698_v8  ;;  %4804 = vmatmul.bf16.gmra.mxu2 %v8327_v32  ;;  %v8298_v8 = vld [vmem:[#allocation2 + $0x50] sm:$0xf]  ;;  %v8334_v51 = vld [vmem:[#allocation2 + $0x64] sm:$0xf] }
 0x4f4   : > { %v8299_v24 = vor.u32 %v8906_v12, %v8298_v8 }
 0x4f5   : > { %v4558_v56 = vunpack.c.l.b16 %v3908_v41  ;;  %v5291_v4 = vunpack.c.h.b16 %v3908_v41 }
 0x4f6   : > { %v3832_v29 = vpop.f32.mrf.mxu2 }
 0x4f7   : > { %v3833_v17 = vadd.f32 %v3832_v29, %v3784_v48  ;;  %v3736_v60 = vpop.f32.mrf.mxu0  ;;  %v3881_v20 = vpop.f32.mrf.mxu3  ;;  %v11781_v18 = vpack.c.b16 %v4558_v56, %v4557_v57  ;;  %v11783_v30 = vpack.c.b16 %v5291_v4, %v5290_v21  ;;  %v8915_v48 = vld [vmem:[#allocation2 + $0x68] sm:$0xf0]  ;;  %v8303_v56 = vor.u32 %v8907_v46, %v8302_v58 }
 0x4f8   : > { %v3785_v54 = vpop.f32.mrf.mxu1  ;;  %v3737_v2 = vadd.f32 %v3736_v60, %v11746_v0  ;;  %v8335_v60 = vor.u32 %v8915_v48, %v8334_v51 }
 0x4f9   : > { %v3882_v14 = vadd.f32 %v3881_v20, %v3833_v17 }
 0x4fa   : > { %v3786_v40 = vadd.f32 %v3785_v54, %v3737_v2  ;;  %v3693_v54 = vadd.f32 %v11723_v6, %v11721_v11  ;;  %v8306_v6 = vld [vmem:[#allocation2 + $0x70] sm:$0xf] }
 0x4fb   : > { %v3909_v55 = vpack.c.bf16 %v3882_v14, %v11707_v27 }
 0x4fd   : > { %v4559_v1 = vunpack.c.l.b16 %v3909_v55  ;;  %v5292_v33 = vunpack.c.h.b16 %v3909_v55 }
 0x4fe   : > { %v3834_v42 = vpop.f32.mrf.mxu2 }
 0x4ff   : > { %v3835_v43 = vadd.f32 %v3834_v42, %v3786_v40  ;;  %v3739_v23 = vpop.f32.mrf.mxu0  ;;  %v3883_v10 = vpop.f32.mrf.mxu3 }
 0x500   : > { %v3788_v61 = vpop.f32.mrf.mxu1  ;;  %v3740_v22 = vadd.f32 %v3739_v23, %v11746_v0 }
 0x501   : > { %v3884_v38 = vadd.f32 %v3883_v10, %v3835_v43 }
 0x502   : > { %4062 = vmatmul.bf16.gmra.mxu0 %v8299_v24  ;;  %v3789_v62 = vadd.f32 %v3788_v61, %v3740_v22 }
 0x503   : > { %v3910_v27 = vpack.c.bf16 %v3884_v38, %v3688_v9  ;;  %4809 = vmatmul.bf16.gmra.mxu2 %v8331_v28  ;;  %v8908_v9 = vld [vmem:[#allocation2 + $0x74] sm:$0xf0] }
 0x505   : > { %v4560_v3 = vunpack.c.l.b16 %v3910_v27  ;;  %v5293_v5 = vunpack.c.h.b16 %v3910_v27 }
 0x506   : > { %v3837_v26 = vpop.f32.mrf.mxu2 }
 0x507   : > { %v3741_v52 = vpop.f32.mrf.mxu0  ;;  %v3886_v35 = vpop.f32.mrf.mxu3  ;;  %v11790_v7 = vpack.c.b16 %v4560_v3, %v4559_v1  ;;  %v11792_v19 = vpack.c.b16 %v5293_v5, %v5292_v33  ;;  %v3838_v31 = vadd.f32 %v3837_v26, %v3789_v62  ;;  %v8307_v1 = vor.u32 %v8908_v9, %v8306_v6 }
 0x508   : > { %v3790_v32 = vpop.f32.mrf.mxu1  ;;  %v3742_v49 = vadd.f32 %v3741_v52, %v11746_v0  ;;  %v3698_v62 = vadd.f32 %v11735_v59, %v11733_v25 }
 0x509   : > { %v3887_v41 = vadd.f32 %v3886_v35, %v3838_v31 }
 0x50a   : > { %v3791_v57 = vadd.f32 %v3790_v32, %v3742_v49 }
 0x50b   : > { %v3911_v2 = vpack.c.bf16 %v3887_v41, %v11719_v45 }
 0x50d   : > { %v4561_v12 = vunpack.c.l.b16 %v3911_v2  ;;  %v5294_v37 = vunpack.c.h.b16 %v3911_v2 }
 0x50e   : > { %v3839_v21 = vpop.f32.mrf.mxu2 }
 0x50f   : > { %v3840_v4 = vadd.f32 %v3839_v21, %v3791_v57  ;;  %v3744_v29 = vpop.f32.mrf.mxu0  ;;  %v3888_v17 = vpop.f32.mrf.mxu3 }
 0x510   : > { %v3793_v20 = vpop.f32.mrf.mxu1  ;;  %v3745_v55 = vadd.f32 %v3744_v29, %v11746_v0 }
 0x511   : > { %v3889_v14 = vadd.f32 %v3888_v17, %v3840_v4 }
 0x512   : > { %4067 = vmatmul.bf16.gmra.mxu0 %v8303_v56  ;;  %v3794_v24 = vadd.f32 %v3793_v20, %v3745_v55 }
 0x513   : > { %v3912_v8 = vpack.c.bf16 %v3889_v14, %v3693_v54  ;;  %4814 = vmatmul.bf16.gmra.mxu2 %v8335_v60  ;;  %v3703_v14 = vadd.f32 %v11750_v44, %v11748_v16 }
 0x515   : > { %v4562_v13 = vunpack.c.l.b16 %v3912_v8  ;;  %v5295_v40 = vunpack.c.h.b16 %v3912_v8 }
 0x516   : > { %v3842_v42 = vpop.f32.mrf.mxu2 }
 0x517   : > { %v3746_v43 = vpop.f32.mrf.mxu0  ;;  %v3891_v23 = vpop.f32.mrf.mxu3  ;;  %v4572_v10 = vpack.c.b16 %v4562_v13, %v4561_v12  ;;  %v5305_v28 = vpack.c.b16 %v5295_v40, %v5294_v37  ;;  %v3843_v11 = vadd.f32 %v3842_v42, %v3794_v24 }
 0x518   : > { %v3795_v61 = vpop.f32.mrf.mxu1  ;;  %v3747_v45 = vadd.f32 %v3746_v43, %v11746_v0 }
 0x519   : > { %v3892_v38 = vadd.f32 %v3891_v23, %v3843_v11 }
 0x51a   : > { %v3796_v22 = vadd.f32 %v3795_v61, %v3747_v45 }
 0x51b   : > { %v3913_v52 = vpack.c.bf16 %v3892_v38, %v11731_v39 }
 0x51d   : > { %v4563_v49 = vunpack.c.l.b16 %v3913_v52  ;;  %v5296_v58 = vunpack.c.h.b16 %v3913_v52 }
 0x51e   : > { %v3844_v27 = vpop.f32.mrf.mxu2 }
 0x51f   : > { %v3845_v33 = vadd.f32 %v3844_v27, %v3796_v22  ;;  %v3749_v3 = vpop.f32.mrf.mxu0  ;;  %v3893_v5 = vpop.f32.mrf.mxu3 }
 0x520   : > { %v3798_v26 = vpop.f32.mrf.mxu1  ;;  %v3750_v32 = vadd.f32 %v3749_v3, %v11746_v0 }
 0x521   : > { %v3894_v35 = vadd.f32 %v3893_v5, %v3845_v33 }
 0x522   : > { %4072 = vmatmul.bf16.gmra.mxu0 %v8307_v1  ;;  %v3799_v41 = vadd.f32 %v3798_v26, %v3750_v32  ;;  %v9860_v26 = vmov 0  }
 0x523   : > { %v3914_v31 = vpack.c.bf16 %v3894_v35, %v3698_v62  ;;  %9191 = vset.pattern.permute.xlu2 %v9860_v26  ;;  %9190 = vset.pattern.permute.xlu1 %v9860_v26  ;;  %v4078_v35 = vld [vmem:[#allocation3] sm:$0xff] }
 0x524   : > { %9192 = vset.pattern.permute.xlu0 %v9860_v26 }
 0x525   : > { %v4564_v46 = vunpack.c.l.b16 %v3914_v31  ;;  %v5297_v51 = vunpack.c.h.b16 %v3914_v31 }
 0x526   : > { %v3847_v48 = vpop.f32.mrf.mxu2 }
 0x527   : > { %v3751_v57 = vpop.f32.mrf.mxu0  ;;  %v3896_v21 = vpop.f32.mrf.mxu3  ;;  %v4573_v56 = vpack.c.b16 %v4564_v46, %v4563_v49  ;;  %v5306_v4 = vpack.c.b16 %v5297_v51, %v5296_v58  ;;  %v3848_v29 = vadd.f32 %v3847_v48, %v3799_v41  ;;  %v11909_v58 = vld [vmem:[#allocation3 + $0x80] sm:$0xff]  ;;  %v11918_v41 = vld [vmem:[#allocation3 + $0x88] sm:$0xff] }
 0x528   : > { %v3752_v25 = vadd.f32 %v3751_v57, %v11746_v0  ;;  %v3800_v59 = vpop.f32.mrf.mxu1  ;;  %v4079_v57 = vld [vmem:[#allocation3 + $0x8] sm:$0xff] }
 0x529   : > { %v3897_v39 = vadd.f32 %v3896_v21, %v3848_v29  ;;  %v4080_v21 = vld [vmem:[#allocation3 + $0x10] sm:$0xff] }
 0x52a   : > { %v3801_v17 = vadd.f32 %v3800_v59, %v3752_v25 }
 0x52b   : > { %v3915_v55 = vpack.c.bf16 %v3897_v39, %v11743_v47 }
 0x52d   : > { %v4565_v37 = vunpack.c.l.b16 %v3915_v55  ;;  %v5298_v13 = vunpack.c.h.b16 %v3915_v55 }
 0x52e   : > { %v3849_v60 = vpop.f32.mrf.mxu2 }
 0x52f   : > { %v3850_v20 = vadd.f32 %v3849_v60, %v3801_v17  ;;  %v3898_v54 = vpop.f32.mrf.mxu3  ;;  %v11805_v2 = vpop.f32.mrf.mxu0 }
 0x530   : > { %4094 = vmax.xlane.f32.xlu0 %v11805_v2 }
 0x531   : > { %v3899_v8 = vadd.f32 %v3898_v54, %v3850_v20  ;;  %v11929_v54 = vld [vmem:[#allocation3 + $0x90] sm:$0xff] }
 0x533   : > { %v3916_v12 = vpack.c.bf16 %v3899_v8, %v3703_v14 }
 0x535   : > { %v4566_v0 = vunpack.c.l.b16 %v3916_v12  ;;  %v5299_v40 = vunpack.c.h.b16 %v3916_v12 }
 0x536   : > { %v11811_v42 = vpop.f32.mrf.mxu2 }
 0x537   : > { %v4574_v24 = vpack.c.b16 %v4566_v0, %v4565_v37  ;;  %v5307_v43 = vpack.c.b16 %v5299_v40, %v5298_v13  ;;  %v11813_v23 = vpop.f32.mrf.mxu0  ;;  %v11941_v40 = vld [vmem:[#allocation3 + $0x98] sm:$0xff] }
 0x538   : > { %4842 = vmax.xlane.f32.xlu0 %v11811_v42 }
 0x539   : > { %4583 = vmatpush.bf16.msra.mxu1 %v4574_v24  ;;  %5316 = vmatpush.bf16.msra.mxu3 %v5307_v43  ;;  %v4081_v43 = vld [vmem:[#allocation3 + $0x18] sm:$0xff] }
 0x53d   : > { %4584 = vmatpush.bf16.msra.mxu1 %v4573_v56  ;;  %5317 = vmatpush.bf16.msra.mxu3 %v5306_v4 }
 0x53e   : > { %v11816_v16 = vpop.f32.mrf.mxu2 }
 0x53f   : > { %v11818_v47 = vpop.f32.mrf.mxu0  ;;  %4844 = vmax.xlane.f32.xlu2 %v11816_v16 }
 0x540   : > { %4096 = vmax.xlane.f32.xlu0 %v11813_v23  ;;  %4098 = vmax.xlane.f32.xlu1 %v11818_v47 }
 0x541   : > { %4585 = vmatpush.bf16.msra.mxu1 %v4572_v10  ;;  %5318 = vmatpush.bf16.msra.mxu3 %v5305_v28 }
 0x545   : > { %4586 = vmatpush.bf16.msra.mxu1 %v11790_v7  ;;  %5319 = vmatpush.bf16.msra.mxu3 %v11792_v19 }
 0x546   : > { %v11825_v44 = vpop.f32.mrf.mxu2 }
 0x547   : > { %v11827_v61 = vpop.f32.mrf.mxu0 }
 0x548   : > { %4846 = vmax.xlane.f32.xlu1 %v11825_v44 }
 0x549   : > { %4587 = vmatpush.bf16.msra.mxu1 %v11781_v18  ;;  %5320 = vmatpush.bf16.msra.mxu3 %v11783_v30  ;;  %v8338_v18 = vld [vmem:[#allocation2 + $0x74] sm:$0xf]  ;;  %v8916_v30 = vld [vmem:[#allocation2 + $0x78] sm:$0xf0] }
 0x54a   : > { %v8339_v7 = vor.u32 %v8916_v30, %v8338_v18  ;;  %v4082_v18 = vld [vmem:[#allocation3 + $0x20] sm:$0xff] }
 0x54c   : > { %4819 = vmatmul.bf16.gmra.mxu2 %v8339_v7 }
 0x54d   : > { %4588 = vmatpush.bf16.msra.mxu1 %v11773_v34  ;;  %5321 = vmatpush.bf16.msra.mxu3 %v11775_v36 }
 0x54e   : > { %v11834_v10 = vpop.f32.mrf.mxu2 }
 0x54f   : > { %v11836_v28 = vpop.f32.mrf.mxu0  ;;  %4848 = vmax.xlane.f32.xlu0 %v11834_v10 }
 0x550   : > { %4100 = vmax.xlane.f32.xlu1 %v11827_v61  ;;  %4102 = vmax.xlane.f32.xlu2 %v11836_v28 }
 0x551   : > { %4589 = vmatpush.bf16.msra.mxu1 %v11765_v50  ;;  %5322 = vmatpush.bf16.msra.mxu3 %v11767_v15 }
 0x555   : > { %4590 = vmatpush.bf16.msra.mxu1 %v11757_v53  ;;  %5323 = vmatpush.bf16.msra.mxu3 %v11759_v63 }
 0x556   : > { %v11845_v34 = vpop.f32.mrf.mxu2 }
 0x557   : > { %v11847_v36 = vpop.f32.mrf.mxu0 }
 0x558   : > { %4104 = vmax.xlane.f32.xlu2 %v11847_v36  ;;  %4850 = vmax.xlane.f32.xlu1 %v11845_v34 }
 0x55e   : > { %v11851_v19 = vpop.f32.mrf.mxu2 }
 0x55f   : > { %4852 = vmax.xlane.f32.xlu0 %v11851_v19  ;;  %v11854_v50 = vpop.f32.mrf.mxu0 }
 0x560   : > { %13567 = vst [vmem:[#allocation54_spill] sm:$0xff] %v11854_v50 }
 0x566   : > { %v11856_v53 = vpop.f32.mrf.mxu2 }
 0x567   : > { %13568 = vst [vmem:[#allocation55_spill] sm:$0xff] %v11856_v53  ;;  %4106 = vmax.xlane.f32.xlu0 %v11854_v50  ;;  %v11859_v63 = vpop.f32.mrf.mxu0  ;;  %4854 = vmax.xlane.f32.xlu2 %v11856_v53 }
 0x568   : > { %4108 = vmax.xlane.f32.xlu1 %v11859_v63 }
 0x56e   : > { %v11863_v15 = vpop.f32.mrf.mxu2 }
 0x56f   : > { %13569 = vst [vmem:[#allocation56_spill] sm:$0xff] %v11863_v15  ;;  %v11865_v11 = vpop.f32.mrf.mxu0  ;;  %4856 = vmax.xlane.f32.xlu0 %v11863_v15 }
 0x570   : > { %13570 = vst [vmem:[#allocation57_spill] sm:$0xff] %v11865_v11  ;;  %4110 = vmax.xlane.f32.xlu2 %v11865_v11 }
 0x576   : > { %v11869_v45 = vpop.f32.mrf.mxu2 }
 0x577   : > { %13571 = vst [vmem:[#allocation58_spill] sm:$0xff] %v11869_v45  ;;  %v11871_v6 = vpop.f32.mrf.mxu0  ;;  %4858 = vmax.xlane.f32.xlu1 %v11869_v45 }
 0x578   : > { %13572 = vst [vmem:[#allocation59_spill] sm:$0xff] %v11871_v6  ;;  %4112 = vmax.xlane.f32.xlu0 %v11871_v6 }
 0x57e   : > { %v11875_v9 = vpop.f32.mrf.mxu2 }
 0x57f   : > { %13573 = vst [vmem:[#allocation60_spill] sm:$0xff] %v11875_v9  ;;  %v11877_v38 = vpop.f32.mrf.mxu0  ;;  %4860 = vmax.xlane.f32.xlu2 %v11875_v9 }
 0x580   : > { %13574 = vst [vmem:[#allocation61_spill] sm:$0xff] %v11877_v38  ;;  %4114 = vmax.xlane.f32.xlu1 %v11877_v38 }
 0x586   : > { %v11881_v22 = vpop.f32.mrf.mxu2 }
 0x587   : > { %13575 = vst [vmem:[#allocation62_spill] sm:$0xff] %v11881_v22  ;;  %v11883_v27 = vpop.f32.mrf.mxu0 }
 0x588   : > { %13576 = vst [vmem:[#allocation63_spill] sm:$0xff] %v11883_v27  ;;  %4116 = vmax.xlane.f32.xlu2 %v11883_v27  ;;  %4862 = vmax.xlane.f32.xlu1 %v11881_v22 }
 0x58e   : > { %v11887_v1 = vpop.f32.mrf.mxu2 }
 0x58f   : > { %13577 = vst [vmem:[#allocation64_spill] sm:$0xff] %v11887_v1  ;;  %4864 = vmax.xlane.f32.xlu0 %v11887_v1  ;;  %v11890_v33 = vpop.f32.mrf.mxu0 }
 0x590   : > { %13578 = vst [vmem:[#allocation65_spill] sm:$0xff] %v11890_v33 }
 0x596   : > { %v11892_v3 = vpop.f32.mrf.mxu2 }
 0x597   : > { %13579 = vst [vmem:[#allocation66_spill] sm:$0xff] %v11892_v3  ;;  %4118 = vmax.xlane.f32.xlu0 %v11890_v33  ;;  %v11895_v5 = vpop.f32.mrf.mxu0  ;;  %4866 = vmax.xlane.f32.xlu2 %v11892_v3  ;;  %v4091_v33 = vld [vmem:[#allocation3 + $0x68] sm:$0xff] }
 0x598   : > { %13580 = vst [vmem:[#allocation67_spill] sm:$0xff] %v11895_v5  ;;  %4120 = vmax.xlane.f32.xlu1 %v11895_v5  ;;  %v12090_v5 = vld [vmem:[#allocation3 + $0x60] sm:$0xff] }
 0x59e   : > { %v11899_v62 = vpop.f32.mrf.mxu2 }
 0x59f   : > { %13581 = vst [vmem:[#allocation68_spill] sm:$0xff] %v11899_v62  ;;  %v11901_v52 = vpop.f32.mrf.mxu0 }
 0x5a0   : > { %13582 = vst [vmem:[#allocation69_spill] sm:$0xff] %v11901_v52  ;;  %4868 = vmax.xlane.f32.xlu1 %v11899_v62  ;;  %4122 = vmax.xlane.f32.xlu2 %v11901_v52 }
 0x5a3   : > { %v4095_v32 = vpop.xlane.xlu0 %4094 }
 0x5a4   : > { %v4126_v31 = vmax.f32 %v4078_v35, %v4095_v32 }
 0x5a6   : > { %4664 = vst.msk [vmem:[#allocation3] sm:$0xff] %vm4398_vm1, %v4126_v31  ;;  %v4142_v14 = vsub.f32 %v4078_v35, %v4126_v31 }
 0x5a7   : > { %v11906_v49 = vpop.f32.mrf.mxu0 }
 0x5a8   : > { %13583 = vst [vmem:[#allocation70_spill] sm:$0xff] %v11906_v49  ;;  %4124 = vmax.xlane.f32.xlu0 %v11906_v49  ;;  %v4158_v37 = vmul.f32 1.442695, %v4142_v14 }
 0x5ab   : > { %v4843_v46 = vpop.xlane.xlu0 %4842 }
 0x5ac   : > { %v11912_v51 = vmax.f32 %v11909_v58, %v4843_v46 }
 0x5ae   : > { %5397 = vst.msk [vmem:[#allocation3 + $0x80] sm:$0xff] %vm4398_vm1, %v11912_v51 }
 0x5b2   : > { %v4845_v56 = vpop.xlane.xlu2 %4844 }
 0x5b3   : > { %v4097_v4 = vpop.xlane.xlu0 %4096  ;;  %v4099_v29 = vpop.xlane.xlu1 %4098  ;;  %v11921_v25 = vmax.f32 %v11918_v41, %v4845_v56 }
 0x5b4   : > { %v4127_v59 = vmax.f32 %v4079_v57, %v4097_v4  ;;  %v4128_v39 = vmax.f32 %v4080_v21, %v4099_v29  ;;  %v4083_v4 = vld [vmem:[#allocation3 + $0x28] sm:$0xff]  ;;  %v11957_v29 = vld [vmem:[#allocation3 + $0xa0] sm:$0xff] }
 0x5b5   : > { %5398 = vst.msk [vmem:[#allocation3 + $0x88] sm:$0xff] %vm4398_vm1, %v11921_v25 }
 0x5b6   : > { %v4143_v60 = vsub.f32 %v4079_v57, %v4127_v59  ;;  %4665 = vst.msk [vmem:[#allocation3 + $0x8] sm:$0xff] %vm4398_vm1, %v4127_v59  ;;  %v4144_v12 = vsub.f32 %v4080_v21, %v4128_v39 }
 0x5b7   : > { %4666 = vst.msk [vmem:[#allocation3 + $0x10] sm:$0xff] %vm4398_vm1, %v4128_v39 }
 0x5b8   : > { %v4160_v20 = vmul.f32 1.442695, %v4143_v60  ;;  %4197 = vperm.xlu2 %9191, %v4127_v59   ;;  %v4162_v24 = vmul.f32 1.442695, %v4144_v12  ;;  %v11970_v12 = vld [vmem:[#allocation3 + $0xa8] sm:$0xff] }
 0x5b9   : > { %4192 = vperm.xlu1 %9190, %v4126_v31  }
 0x5ba   : > { %9193 = vpow2.f32 %v4160_v20 }
 0x5bb   : > { %v4847_v55 = vpop.xlane.xlu1 %4846  ;;  %9195 = vpow2.f32 %v4158_v37 }
 0x5bc   : > { %v11932_v8 = vmax.f32 %v11929_v54, %v4847_v55  ;;  %4945 = vperm.xlu0 %9192, %v11921_v25   ;;  %9197 = vpow2.f32 %v4162_v24 }
 0x5be   : > { %5399 = vst.msk [vmem:[#allocation3 + $0x90] sm:$0xff] %vm4398_vm1, %v11932_v8 }
 0x5c0   : > { %v11939_v0 = vpop.eup %9193 }
 0x5c1   : > { %13584 = vst [vmem:[#allocation71_spill] sm:$0xff] %v11939_v0  ;;  %4940 = vperm.xlu1 %9190, %v11912_v51   ;;  %4438 = vperm.xlu2 %9191, %v11939_v0   ;;  %v11954_v21 = vpop.eup %9195  ;;  %v12092_v0 = vld [vmem:[#allocation3 + $0xe0] sm:$0xff] }
 0x5c2   : > { %v4849_v30 = vpop.xlane.xlu0 %4848  ;;  %13585 = vst [vmem:[#allocation72_spill] sm:$0xff] %v11954_v21  ;;  %v11959_v59 = vpop.eup %9197 }
 0x5c3   : > { %v4101_v7 = vpop.xlane.xlu1 %4100  ;;  %v4103_v26 = vpop.xlane.xlu2 %4102  ;;  %v11946_v35 = vmax.f32 %v11941_v40, %v4849_v30  ;;  %13586 = vst [vmem:[#allocation73_spill] sm:$0xff] %v11959_v59 }
 0x5c4   : > { %v4129_v32 = vmax.f32 %v4081_v43, %v4101_v7  ;;  %v4130_v31 = vmax.f32 %v4082_v18, %v4103_v26  ;;  %4202 = vperm.xlu0 %9192, %v4128_v39  }
 0x5c5   : > { %5400 = vst.msk [vmem:[#allocation3 + $0x98] sm:$0xff] %vm4398_vm1, %v11946_v35 }
 0x5c6   : > { %4667 = vst.msk [vmem:[#allocation3 + $0x18] sm:$0xff] %vm4398_vm1, %v4129_v32  ;;  %v4146_v57 = vsub.f32 %v4082_v18, %v4130_v31 }
 0x5c7   : > { %4668 = vst.msk [vmem:[#allocation3 + $0x20] sm:$0xff] %vm4398_vm1, %v4130_v31 }
 0x5c8   : > { %v4166_v56 = vmul.f32 1.442695, %v4146_v57  ;;  %v11984_v57 = vld [vmem:[#allocation3 + $0x30] sm:$0xff] }
 0x5c9   : > { %4433 = vperm.xlu1 %9190, %v11954_v21   ;;  %4207 = vperm.xlu2 %9191, %v4129_v32  }
 0x5ca   : > { %9199 = vpow2.f32 %v4166_v56  ;;  %v11986_v56 = vld [vmem:[#allocation3 + $0xb0] sm:$0xff] }
 0x5cb   : > { %v4105_v39 = vpop.xlane.xlu2 %4104  ;;  %v4851_v60 = vpop.xlane.xlu1 %4850 }
 0x5cc   : > { %v4131_v20 = vmax.f32 %v4083_v4, %v4105_v39  ;;  %4443 = vperm.xlu0 %9192, %v11959_v59   ;;  %v11963_v14 = vmax.f32 %v11957_v29, %v4851_v60  ;;  %v4145_v39 = vsub.f32 %v4081_v43, %v4129_v32 }
 0x5ce   : > { %4669 = vst.msk [vmem:[#allocation3 + $0x28] sm:$0xff] %vm4398_vm1, %v4131_v20  ;;  %v4147_v37 = vsub.f32 %v4083_v4, %v4131_v20  ;;  %v11989_v4 = vld [vmem:[#allocation3 + $0x38] sm:$0xff]  ;;  %v4164_v32 = vmul.f32 1.442695, %v4145_v39 }
 0x5cf   : > { %5401 = vst.msk [vmem:[#allocation3 + $0xa0] sm:$0xff] %vm4398_vm1, %v11963_v14 }
 0x5d0   : > { %v11974_v18 = vpop.eup %9199  ;;  %v4168_v26 = vmul.f32 1.442695, %v4147_v37 }
 0x5d1   : > { %4950 = vperm.xlu1 %9190, %v11932_v8   ;;  %4960 = vperm.xlu2 %9191, %v11963_v14   ;;  %13587 = vst [vmem:[#allocation74_spill] sm:$0xff] %v11974_v18 }
 0x5d2   : > { %v4853_v24 = vpop.xlane.xlu0 %4852  ;;  %9201 = vpow2.f32 %v4168_v26  ;;  %v12011_v26 = vld [vmem:[#allocation3 + $0xb8] sm:$0xff] }
 0x5d3   : > { %v11977_v30 = vmax.f32 %v11970_v12, %v4853_v24  ;;  %9203 = vpow2.f32 %v4164_v32  ;;  %v12029_v32 = vld [vmem:[#allocation3 + $0x48] sm:$0xff] }
 0x5d4   : > { %4453 = vperm.xlu0 %9192, %v11974_v18  }
 0x5d5   : > { %5402 = vst.msk [vmem:[#allocation3 + $0xa8] sm:$0xff] %vm4398_vm1, %v11977_v30 }
 0x5d9   : > { %4955 = vperm.xlu1 %9190, %v11946_v35   ;;  %4217 = vperm.xlu2 %9191, %v4131_v20   ;;  %v12009_v20 = vpop.eup %9201 }
 0x5da   : > { %v4107_v60 = vpop.xlane.xlu0 %4106  ;;  %v4855_v24 = vpop.xlane.xlu2 %4854  ;;  %13588 = vst [vmem:[#allocation75_spill] sm:$0xff] %v12009_v20 }
 0x5db   : > { %v11992_v46 = vmax.f32 %v11984_v57, %v4107_v60  ;;  %v4109_v7 = vpop.xlane.xlu1 %4108  ;;  %v11995_v17 = vmax.f32 %v11986_v56, %v4855_v24  ;;  %v12023_v48 = vpop.eup %9203 }
 0x5dc   : > { %v11998_v37 = vmax.f32 %v11989_v4, %v4109_v7  ;;  %4965 = vperm.xlu0 %9192, %v11977_v30   ;;  %v4086_v7 = vld [vmem:[#allocation3 + $0x40] sm:$0xff]  ;;  %13589 = vst [vmem:[#allocation76_spill] sm:$0xff] %v12023_v48 }
 0x5dd   : > { %4670 = vst.msk [vmem:[#allocation3 + $0x30] sm:$0xff] %vm4398_vm1, %v11992_v46 }
 0x5de   : > { %4671 = vst.msk [vmem:[#allocation3 + $0x38] sm:$0xff] %vm4398_vm1, %v11998_v37 }
 0x5df   : > { %5403 = vst.msk [vmem:[#allocation3 + $0xb0] sm:$0xff] %vm4398_vm1, %v11995_v17 }
 0x5e1   : > { %4212 = vperm.xlu1 %9190, %v4130_v31   ;;  %4458 = vperm.xlu2 %9191, %v12009_v20   ;;  %v12025_v31 = vld [vmem:[#allocation3 + $0xc0] sm:$0xff] }
 0x5e2   : > { %v4857_v60 = vpop.xlane.xlu0 %4856 }
 0x5e3   : > { %v12015_v24 = vmax.f32 %v12011_v26, %v4857_v60  ;;  %v4111_v39 = vpop.xlane.xlu2 %4110 }
 0x5e4   : > { %v12017_v43 = vmax.f32 %v4086_v7, %v4111_v39 }
 0x5e5   : > { %5404 = vst.msk [vmem:[#allocation3 + $0xb8] sm:$0xff] %vm4398_vm1, %v12015_v24 }
 0x5e6   : > { %4672 = vst.msk [vmem:[#allocation3 + $0x40] sm:$0xff] %vm4398_vm1, %v12017_v43  ;;  %v4150_v60 = vsub.f32 %v4086_v7, %v12017_v43  ;;  %v12046_v7 = vld [vmem:[#allocation3 + $0xc8] sm:$0xff] }
 0x5e9   : > { %4448 = vperm.xlu1 %9190, %v12023_v48   ;;  %4970 = vperm.xlu2 %9191, %v11995_v17   ;;  %v4174_v48 = vmul.f32 1.442695, %v4150_v60 }
 0x5ea   : > { %v4859_v39 = vpop.xlane.xlu1 %4858 }
 0x5eb   : > { %v4113_v55 = vpop.xlane.xlu0 %4112  ;;  %v12033_v13 = vmax.f32 %v12025_v31, %v4859_v39  ;;  %v12049_v39 = vld [vmem:[#allocation3 + $0x50] sm:$0xff]  ;;  %9205 = vpow2.f32 %v4174_v48  ;;  %v4089_v48 = vld [vmem:[#allocation3 + $0x58] sm:$0xff] }
 0x5ec   : > { %v12036_v20 = vmax.f32 %v12029_v32, %v4113_v55 }
 0x5ed   : > { %5405 = vst.msk [vmem:[#allocation3 + $0xc0] sm:$0xff] %vm4398_vm1, %v12033_v13 }
 0x5ee   : > { %4673 = vst.msk [vmem:[#allocation3 + $0x48] sm:$0xff] %vm4398_vm1, %v12036_v20 }
 0x5f1   : > { %4227 = vperm.xlu2 %9191, %v11998_v37   ;;  %v12063_v21 = vpop.eup %9205 }
 0x5f2   : > { %v4861_v55 = vpop.xlane.xlu2 %4860  ;;  %13590 = vst [vmem:[#allocation77_spill] sm:$0xff] %v12063_v21 }
 0x5f3   : > { %v12052_v18 = vmax.f32 %v12046_v7, %v4861_v55  ;;  %v4115_v59 = vpop.xlane.xlu1 %4114  ;;  %v12066_v55 = vld [vmem:[#allocation3 + $0xd0] sm:$0xff] }
 0x5f4   : > { %v12055_v60 = vmax.f32 %v12049_v39, %v4115_v59  ;;  %13591 = vst [vmem:[#allocation78_spill] sm:$0xff] %v12066_v55 }
 0x5f5   : > { %5406 = vst.msk [vmem:[#allocation3 + $0xc8] sm:$0xff] %vm4398_vm1, %v12052_v18 }
 0x5f6   : > { %4674 = vst.msk [vmem:[#allocation3 + $0x50] sm:$0xff] %vm4398_vm1, %v12055_v60 }
 0x5f9   : > { %4473 = vperm.xlu2 %9191, %v12063_v21   ;;  %v12079_v21 = vld [vmem:[#allocation3 + $0xd8] sm:$0xff] }
 0x5fb   : > { %v4117_v52 = vpop.xlane.xlu2 %4116  ;;  %v4863_v49 = vpop.xlane.xlu1 %4862 }
 0x5fc   : > { %v12068_v59 = vmax.f32 %v4089_v48, %v4117_v52  ;;  %v12071_v3 = vmax.f32 %v12066_v55, %v4863_v49  ;;  %v12087_v49 = vpop.f32.mrf.mxu2 }
 0x5fd   : > { %13593 = vst [vmem:[#allocation80_spill] sm:$0xff] %v12087_v49 }
 0x5fe   : > { %13592 = vst [vmem:[#allocation79_spill] sm:$0xff] %v12071_v3  ;;  %v4153_v1 = vsub.f32 %v4089_v48, %v12068_v59 }
 0x5ff   : > { %4675 = vst.msk [vmem:[#allocation3 + $0x58] sm:$0xff] %vm4398_vm1, %v12068_v59 }
 0x600   : > { %5407 = vst.msk [vmem:[#allocation3 + $0xd0] sm:$0xff] %vm4398_vm1, %v12071_v3  ;;  %v4180_v11 = vmul.f32 1.442695, %v4153_v1 }
 0x601   : > { %4985 = vperm.xlu2 %9191, %v12052_v18  }
 0x602   : > { %v4865_v62 = vpop.xlane.xlu0 %4864  ;;  %9207 = vpow2.f32 %v4180_v11 }
 0x603   : > { %v12083_v52 = vmax.f32 %v12079_v21, %v4865_v62  ;;  %v4149_v62 = vsub.f32 %v11989_v4, %v11998_v37  ;;  %v12116_v4 = vld [vmem:[#allocation3 + $0xe8] sm:$0xff] }
 0x604   : > { %13594 = vst [vmem:[#allocation81_spill] sm:$0xff] %v12116_v4  ;;  %v12118_v37 = vpop.f32.mrf.mxu2 }
 0x605   : > { %5408 = vst.msk [vmem:[#allocation3 + $0xd8] sm:$0xff] %vm4398_vm1, %v12083_v52 }
 0x606   : > { %4870 = vmax.xlane.f32.xlu0 %v12087_v49  ;;  %13595 = vst [vmem:[#allocation82_spill] sm:$0xff] %v12118_v37 }
 0x608   : > { %v12133_v11 = vpop.eup %9207 }
 0x609   : > { %4242 = vperm.xlu2 %9191, %v12055_v60   ;;  %13596 = vst [vmem:[#allocation83_spill] sm:$0xff] %v12133_v11 }
 0x60a   : > { %v4119_v22 = vpop.xlane.xlu0 %4118  ;;  %v4867_v27 = vpop.xlane.xlu2 %4866 }
 0x60b   : > { %v12099_v38 = vmax.f32 %v12090_v5, %v4119_v22  ;;  %v12102_v9 = vmax.f32 %v12092_v0, %v4867_v27  ;;  %v4121_v49 = vpop.xlane.xlu1 %4120  ;;  %v4172_v22 = vmul.f32 1.442695, %v4149_v62  ;;  %v12114_v27 = vld [vmem:[#allocation3 + $0x70] sm:$0xff] }
 0x60c   : > { %v4139_v55 = vmax.f32 %v4091_v33, %v4121_v49 }
 0x60d   : > { %4676 = vst.msk [vmem:[#allocation3 + $0x60] sm:$0xff] %vm4398_vm1, %v12099_v38  ;;  %9209 = vpow2.f32 %v4172_v22 }
 0x60e   : > { %5409 = vst.msk [vmem:[#allocation3 + $0xe0] sm:$0xff] %vm4398_vm1, %v12102_v9  ;;  %v4155_v45 = vsub.f32 %v4091_v33, %v4139_v55 }
 0x60f   : > { %4677 = vst.msk [vmem:[#allocation3 + $0x68] sm:$0xff] %vm4398_vm1, %v4139_v55 }
 0x611   : > { %4990 = vperm.xlu2 %9191, %v12071_v3  }
 0x613   : > { %4872 = vmax.xlane.f32.xlu1 %v12118_v37  ;;  %v4123_v49 = vpop.xlane.xlu2 %4122  ;;  %v4869_v1 = vpop.xlane.xlu1 %4868 }
 0x614   : > { %v12122_v48 = vmax.f32 %v12114_v27, %v4123_v49  ;;  %v12125_v62 = vmax.f32 %v12116_v4, %v4869_v1  ;;  %v12135_v22 = vpop.eup %9209  ;;  %v12138_v49 = vld [vmem:[#allocation3 + $0x78] sm:$0xff] }
 0x615   : > { %13597 = vst [vmem:[#allocation84_spill] sm:$0xff] %v12135_v22 }
 0x616   : > { %4678 = vst.msk [vmem:[#allocation3 + $0x70] sm:$0xff] %vm4398_vm1, %v12122_v48 }
 0x617   : > { %5410 = vst.msk [vmem:[#allocation3 + $0xe8] sm:$0xff] %vm4398_vm1, %v12125_v62 }
 0x618   : > { %13598 = vst [vmem:[#allocation85_spill] sm:$0xff] %v12138_v49 }
 0x619   : > { %4488 = vperm.xlu2 %9191, %v12133_v11   ;;  %v4152_v11 = vsub.f32 %v12049_v39, %v12055_v60  ;;  %v4184_v39 = vmul.f32 1.442695, %v4155_v45 }
 0x61a   : > { %4468 = vperm.xlu0 %9192, %v12135_v22   ;;  %v4148_v22 = vsub.f32 %v11984_v57, %v11992_v46 }
 0x61b   : > { %v4125_v1 = vpop.xlane.xlu0 %4124  ;;  %v4198_v3 = vpop.permute.xlu2 %4197  ;;  %v4178_v6 = vmul.f32 1.442695, %v4152_v11 }
 0x61c   : > { %v12142_v37 = vmax.f32 %v12138_v49, %v4125_v1  ;;  %v4271_v1 = vsub.f32 %v11813_v23, %v4198_v3  ;;  %v4170_v15 = vmul.f32 1.442695, %v4148_v22  ;;  %v13599_v23 = vsub.f32 %v11929_v54, %v11932_v8 }
 0x61d   : > { %9211 = vpow2.f32 %v4178_v6 }
 0x61e   : > { %4679 = vst.msk [vmem:[#allocation3 + $0x78] sm:$0xff] %vm4398_vm1, %v12142_v37  ;;  %v4288_v53 = vmul.f32 1.442695, %v4271_v1  ;;  %9213 = vpow2.f32 %v4170_v15  ;;  %v4910_v3 = vmul.f32 1.442695, %v13599_v23 }
 0x620   : > { %9215 = vpow2.f32 %v4288_v53 }
 0x621   : > { %5000 = vperm.xlu2 %9191, %v12102_v9  }
 0x622   : > { %4980 = vperm.xlu0 %9192, %v12033_v13  }
 0x623   : > { %v12156_v49 = vpop.permute.xlu2 %4438  ;;  %v12164_v6 = vpop.eup %9211 }
 0x624   : > { %13600 = vst [vmem:[#allocation86_spill] sm:$0xff] %v12164_v6 }
 0x629   : > { %4257 = vperm.xlu2 %9191, %v4139_v55  }
 0x62a   : > { %4237 = vperm.xlu0 %9192, %v12036_v20  }
 0x62b   : > { %v4193_v50 = vpop.permute.xlu1 %4192 }
 0x62c   : > { %v4270_v4 = vsub.f32 %v11805_v2, %v4193_v50  ;;  %4222 = vperm.xlu1 %9190, %v11992_v46   ;;  %v12168_v2 = vpop.eup %9213 }
 0x62d   : > { %v12172_v53 = vpop.eup %9215 }
 0x62e   : > { %v4286_v57 = vmul.f32 1.442695, %v4270_v4  ;;  %v4946_v60 = vpop.permute.xlu0 %4945 }
 0x62f   : > { %v5019_v33 = vsub.f32 %v11816_v16, %v4946_v60  ;;  %v4208_v16 = vpop.permute.xlu2 %4207 }
 0x630   : > { %9217 = vpow2.f32 %v4286_v57  ;;  %v4273_v22 = vsub.f32 %v11827_v61, %v4208_v16  ;;  %v13602_v61 = vsub.f32 %v11957_v29, %v11963_v14 }
 0x631   : > { %5005 = vperm.xlu2 %9191, %v12125_v62   ;;  %9219 = vpow2.f32 %v4184_v39  ;;  %v5036_v50 = vmul.f32 1.442695, %v5019_v33 }
 0x632   : > { %4483 = vperm.xlu0 %9192, %v12164_v6   ;;  %9221 = vpow2.f32 %v4910_v3  ;;  %v4292_v57 = vmul.f32 1.442695, %v4273_v22  ;;  %v4914_v23 = vmul.f32 1.442695, %v13602_v61  ;;  %v4419_v6 = vld [vmem:[#allocation5 + $0x50] sm:$0xff] }
 0x633   : > { %v4941_v15 = vpop.permute.xlu1 %4940  ;;  %9223 = vpow2.f32 %v5036_v50  ;;  %v13603_v50 = vsub.f32 %v12029_v32, %v12036_v20 }
 0x634   : > { %v5018_v45 = vsub.f32 %v11811_v42, %v4941_v15  ;;  %4463 = vperm.xlu1 %9190, %v12168_v2  }
 0x635   : > { %v4176_v15 = vmul.f32 1.442695, %v13603_v50 }
 0x636   : > { %v12174_v54 = vpop.eup %9217  ;;  %v5034_v8 = vmul.f32 1.442695, %v5018_v45  ;;  %v4203_v46 = vpop.permute.xlu0 %4202 }
 0x637   : > { %v4527_v55 = vpack.c.bf16 %v12172_v53, %v12174_v54  ;;  %v4272_v4 = vsub.f32 %v11818_v47, %v4203_v46  ;;  %v12179_v11 = vpop.eup %9219  ;;  %v4961_v45 = vpop.permute.xlu2 %4960 }
 0x638   : > { %13601 = vst [vmem:[#allocation87_spill] sm:$0xff] %v12179_v11  ;;  %9225 = vpow2.f32 %v5034_v8  ;;  %v12182_v42 = vpop.eup %9221 }
 0x639   : > { %4498 = vperm.xlu2 %9191, %v12179_v11   ;;  %4591 = vmatmul.bf16.vlgmr.msra.gmra.mxu1 %v4527_v55  ;;  %v4290_v1 = vmul.f32 1.442695, %v4272_v4  ;;  %v12189_v60 = vpop.eup %9223 }
 0x63a   : > { %5192 = vperm.xlu0 %9192, %v12182_v42  }
 0x63b   : > { %v12186_v39 = vpop.permute.xlu1 %4433  ;;  %9227 = vpow2.f32 %v4290_v1 }
 0x63c   : > { %4975 = vperm.xlu1 %9190, %v12015_v24   ;;  %9229 = vpow2.f32 %v4292_v57 }
 0x63d   : > { %9231 = vpow2.f32 %v4914_v23 }
 0x63e   : > { %v12191_v47 = vpop.eup %9225  ;;  %v12198_v33 = vpop.permute.xlu0 %4443  ;;  %9233 = vpow2.f32 %v4176_v15 }
 0x63f   : > { %v5276_v3 = vpack.c.bf16 %v12189_v60, %v12191_v47 }
 0x641   : > { %5324 = vmatmul.bf16.vlgmr.msra.gmra.mxu3 %v5276_v3  ;;  %v12204_v8 = vpop.eup %9227 }
 0x642   : > { %4252 = vperm.xlu0 %9192, %v12099_v38   ;;  %v12207_v29 = vpop.eup %9229 }
 0x643   : > { %v4951_v16 = vpop.permute.xlu1 %4950  ;;  %v4528_v46 = vpack.c.bf16 %v12207_v29, %v12204_v8  ;;  %v12212_v20 = vpop.eup %9231 }
 0x644   : > { %4232 = vperm.xlu1 %9190, %v12017_v43   ;;  %v5020_v14 = vsub.f32 %v11825_v44, %v4951_v16  ;;  %v12217_v55 = vpop.eup %9233  ;;  %v4218_v43 = vpop.permute.xlu2 %4217 }
 0x645   : > { %v4275_v57 = vsub.f32 %v11847_v36, %v4218_v43 }
 0x646   : > { %v12214_v32 = vpop.permute.xlu0 %4453  ;;  %v5038_v4 = vmul.f32 1.442695, %v5020_v14 }
 0x647   : > { %v4296_v61 = vmul.f32 1.442695, %v4275_v57 }
 0x648   : > { %9235 = vpow2.f32 %v5038_v4  ;;  %v13604_v4 = vsub.f32 %v11909_v58, %v11912_v51 }
 0x649   : > { %4596 = vmatmul.bf16.gmra.mxu1 %v4528_v46  ;;  %v5022_v46 = vsub.f32 %v11845_v34, %v4961_v45  ;;  %v13605_v34 = vsub.f32 %v11918_v41, %v11921_v25 }
 0x64a   : > { %5202 = vperm.xlu0 %9192, %v12212_v20  }
 0x64b   : > { %v4956_v22 = vpop.permute.xlu1 %4955  ;;  %v4908_v58 = vmul.f32 1.442695, %v13605_v34 }
 0x64c   : > { %v5021_v1 = vsub.f32 %v11834_v10, %v4956_v22  ;;  %4478 = vperm.xlu1 %9190, %v12217_v55   ;;  %v5042_v22 = vmul.f32 1.442695, %v5022_v46  ;;  %v12261_v25 = vpop.permute.xlu2 %4458 }
 0x64e   : > { %v5040_v44 = vmul.f32 1.442695, %v5021_v1  ;;  %v4966_v23 = vpop.permute.xlu0 %4965  ;;  %v12225_v15 = vpop.eup %9235 }
 0x64f   : > { %v5023_v10 = vsub.f32 %v11851_v19, %v4966_v23 }
 0x650   : > { %9237 = vpow2.f32 %v5040_v44 }
 0x651   : > { %9239 = vpow2.f32 %v4296_v61  ;;  %v13606_v61 = vsub.f32 %v12090_v5, %v12099_v38  ;;  %v13607_v38 = vsub.f32 %v11941_v40, %v11946_v35 }
 0x652   : > { %4267 = vperm.xlu0 %9192, %v12142_v37  }
 0x653   : > { %v4213_v3 = vpop.permute.xlu1 %4212  ;;  %v4182_v23 = vmul.f32 1.442695, %v13606_v61  ;;  %v4912_v5 = vmul.f32 1.442695, %v13607_v38  ;;  %v4901_v38 = vsub.f32 %v12079_v21, %v12083_v52 }
 0x654   : > { %v4274_v50 = vsub.f32 %v11836_v28, %v4213_v3  ;;  %4247 = vperm.xlu1 %9190, %v12068_v59   ;;  %v4906_v28 = vmul.f32 1.442695, %v13604_v4  ;;  %v5044_v59 = vmul.f32 1.442695, %v5023_v10  ;;  %v4840_v10 = vld [vmem:[#allocation3 + $0xf0] sm:$0xff]  ;;  %v12271_v4 = vpop.permute.xlu2 %4970 }
 0x656   : > { %v12227_v16 = vpop.eup %9237  ;;  %v4294_v14 = vmul.f32 1.442695, %v4274_v50  ;;  %v4156_v50 = vsub.f32 %v12114_v27, %v12122_v48  ;;  %v13608_v27 = vsub.f32 %v11970_v12, %v11977_v30 }
 0x657   : > { %v5277_v36 = vpack.c.bf16 %v12227_v16, %v12225_v15  ;;  %v12237_v43 = vpop.eup %9239 }
 0x658   : > { %9241 = vpow2.f32 %v4294_v14  ;;  %v4186_v14 = vmul.f32 1.442695, %v4156_v50 }
 0x659   : > { %5329 = vmatmul.bf16.gmra.mxu3 %v5277_v36  ;;  %9243 = vpow2.f32 %v4906_v28 }
 0x65a   : > { %9245 = vpow2.f32 %v5044_v59  ;;  %v4916_v59 = vmul.f32 1.442695, %v13608_v27  ;;  %v13615_v27 = vld [vmem:[#allocation81_spill] sm:$0xff] }
 0x65b   : > { %9247 = vpow2.f32 %v5042_v22  ;;  %v12275_v28 = vpop.permute.xlu1 %4448  ;;  %v4841_v22 = vld [vmem:[#allocation3 + $0xf8] sm:$0xff] }
 0x65c   : > { %4995 = vperm.xlu1 %9190, %v12083_v52   ;;  %9249 = vpow2.f32 %v4908_v58  ;;  %v4228_v58 = vpop.permute.xlu2 %4227 }
 0x65d   : > { %9251 = vpow2.f32 %v4182_v23 }
 0x65e   : > { %v12239_v19 = vpop.eup %9241  ;;  %9253 = vpow2.f32 %v4912_v5 }
 0x65f   : > { %v4529_v1 = vpack.c.bf16 %v12237_v43, %v12239_v19  ;;  %v12246_v51 = vpop.eup %9243  ;;  %9255 = vpow2.f32 %v4186_v14  ;;  %v13614_v14 = vsub.f32 %v12092_v0, %v12102_v9 }
 0x660   : > { %v12248_v45 = vpop.eup %9245  ;;  %9257 = vpow2.f32 %v4916_v59  ;;  %v13616_v59 = vsub.f32 %v13615_v27, %v12125_v62 }
 0x661   : > { %4601 = vmatmul.bf16.gmra.mxu1 %v4529_v1  ;;  %v12251_v44 = vpop.eup %9247  ;;  %v13610_v1 = vsub.f32 %v11986_v56, %v11995_v17  ;;  %v13612_v56 = vsub.f32 %v12046_v7, %v12052_v18  ;;  %v4277_v18 = vsub.f32 %v11859_v63, %v4228_v58 }
 0x662   : > { %v5278_v57 = vpack.c.bf16 %v12248_v45, %v12251_v44  ;;  %v12258_v41 = vpop.eup %9249 }
 0x663   : > { %v12263_v3 = vpop.eup %9251  ;;  %v4918_v34 = vmul.f32 1.442695, %v13610_v1  ;;  %v4924_v50 = vmul.f32 1.442695, %v13612_v56  ;;  %v4300_v0 = vmul.f32 1.442695, %v4277_v18 }
 0x664   : > { %5182 = vperm.xlu1 %9190, %v12246_v51   ;;  %v12280_v40 = vpop.eup %9253  ;;  %v12300_v17 = vpop.permute.xlu2 %4473 }
 0x665   : > { %v12282_v35 = vpop.eup %9255  ;;  %9259 = vpow2.f32 %v4918_v34  ;;  %v13617_v34 = vld [vmem:[#allocation54_spill] sm:$0xff] }
 0x666   : > { %13609 = vst [vmem:[#allocation88_spill] sm:$0xff] %v12282_v35  ;;  %v12292_v61 = vpop.eup %9257 }
 0x669   : > { %5334 = vmatmul.bf16.gmra.mxu3 %v5278_v57 }
 0x66b   : > { %v12298_v23 = vpop.eup %9259 }
 0x66c   : > { %5187 = vperm.xlu1 %9190, %v12258_v41   ;;  %v12318_v7 = vpop.permute.xlu2 %4985 }
 0x674   : > { %4493 = vperm.xlu1 %9190, %v12263_v3   ;;  %v12334_v56 = vpop.permute.xlu2 %4242 }
 0x679   : > { %v4871_v36 = vpop.xlane.xlu0 %4870 }
 0x67a   : > { %v4888_v46 = vmax.f32 %v4840_v10, %v4871_v36  ;;  %v4930_v36 = vmul.f32 1.442695, %v13614_v14  ;;  %v13621_v14 = vld [vmem:[#allocation85_spill] sm:$0xff] }
 0x67c   : > { %5411 = vst.msk [vmem:[#allocation3 + $0xf0] sm:$0xff] %vm4398_vm1, %v4888_v46  ;;  %4262 = vperm.xlu1 %9190, %v12122_v48   ;;  %5010 = vperm.xlu2 %9191, %v4888_v46   ;;  %v4897_v48 = vsub.f32 %v12011_v26, %v12015_v24  ;;  %v13611_v26 = vsub.f32 %v12025_v31, %v12033_v13  ;;  %v4928_v13 = vmul.f32 1.442695, %v4901_v38 }
 0x67d   : > { %v4904_v9 = vsub.f32 %v4840_v10, %v4888_v46 }
 0x67e   : > { %v4920_v57 = vmul.f32 1.442695, %v4897_v48  ;;  %v4922_v24 = vmul.f32 1.442695, %v13611_v26  ;;  %v4932_v48 = vmul.f32 1.442695, %v13616_v59 }
 0x67f   : > { %v4934_v63 = vmul.f32 1.442695, %v4904_v9 }
 0x680   : > { %9261 = vpow2.f32 %v4920_v57 }
 0x681   : > { %9263 = vpow2.f32 %v4922_v24 }
 0x682   : > { %9265 = vpow2.f32 %v4924_v50 }
 0x683   : > { %9267 = vpow2.f32 %v4928_v13 }
 0x684   : > { %5197 = vperm.xlu1 %9190, %v12280_v40   ;;  %4503 = vperm.xlu2 %9191, %v12282_v35   ;;  %9269 = vpow2.f32 %v4930_v36  ;;  %v13623_v36 = vld [vmem:[#allocation55_spill] sm:$0xff]  ;;  %v4416_v35 = vld [vmem:[#allocation5] sm:$0xff] }
 0x685   : > { %9271 = vpow2.f32 %v4932_v48  ;;  %v5024_v18 = vsub.f32 %v13623_v36, %v12271_v4  ;;  %v13629_v36 = vld [vmem:[#allocation57_spill] sm:$0xff] }
 0x686   : > { %v4873_v12 = vpop.xlane.xlu1 %4872  ;;  %v12308_v5 = vpop.eup %9261  ;;  %9273 = vpow2.f32 %v4300_v0 }
 0x687   : > { %v4889_v30 = vmax.f32 %v4841_v22, %v4873_v12  ;;  %13613 = vst [vmem:[#allocation89_spill] sm:$0xff] %v12308_v5  ;;  %v12311_v31 = vpop.eup %9263  ;;  %v5046_v48 = vmul.f32 1.442695, %v5024_v18 }
 0x688   : > { %v12320_v21 = vpop.eup %9265 }
 0x689   : > { %5412 = vst.msk [vmem:[#allocation3 + $0xf8] sm:$0xff] %vm4398_vm1, %v4889_v30  ;;  %5015 = vperm.xlu0 %9192, %v4889_v30   ;;  %v12329_v57 = vpop.eup %9267  ;;  %v4905_v26 = vsub.f32 %v4841_v22, %v4889_v30  ;;  %v13622_v22 = vsub.f32 %v13621_v14, %v12142_v37  ;;  %v12357_v37 = vpop.permute.xlu2 %4990 }
 0x68a   : > { %13618 = vst [vmem:[#allocation81_spill] sm:$0xff] %v12329_v57  ;;  %v12332_v24 = vpop.eup %9269 }
 0x68b   : > { %13619 = vst [vmem:[#allocation54_spill] sm:$0xff] %v12332_v24  ;;  %v4936_v10 = vmul.f32 1.442695, %v4905_v26  ;;  %v12339_v50 = vpop.eup %9271  ;;  %v4188_v30 = vmul.f32 1.442695, %v13622_v22 }
 0x68c   : > { %5207 = vperm.xlu1 %9190, %v12292_v61   ;;  %v12322_v52 = vpop.permute.xlu0 %4468  ;;  %13620 = vst [vmem:[#allocation90_spill] sm:$0xff] %v12339_v50  ;;  %v12341_v38 = vpop.eup %9273 }
 0x691   : > { %5212 = vperm.xlu0 %9192, %v12298_v23  }
 0x694   : > { %5217 = vperm.xlu1 %9190, %v12308_v5   ;;  %v4981_v62 = vpop.permute.xlu0 %4980 }
 0x699   : > { %5222 = vperm.xlu0 %9192, %v12311_v31  }
 0x69c   : > { %5227 = vperm.xlu1 %9190, %v12320_v21   ;;  %v4238_v0 = vpop.permute.xlu0 %4237 }
 0x69e   : > { %v4223_v1 = vpop.permute.xlu1 %4222 }
 0x69f   : > { %v4276_v12 = vsub.f32 %v13617_v34, %v4223_v1  ;;  %v13625_v1 = vld [vmem:[#allocation56_spill] sm:$0xff] }
 0x6a1   : > { %v4298_v58 = vmul.f32 1.442695, %v4276_v12  ;;  %5237 = vperm.xlu0 %9192, %v12329_v57  }
 0x6a3   : > { %9275 = vpow2.f32 %v4298_v58  ;;  %v13627_v58 = vld [vmem:[#allocation59_spill] sm:$0xff] }
 0x6a4   : > { %5242 = vperm.xlu1 %9190, %v12332_v24   ;;  %9277 = vpow2.f32 %v4934_v63  ;;  %v4415_v63 = vld [vmem:[#allocation5 + $0xb0] sm:$0xff]  ;;  %v4279_v26 = vsub.f32 %v13627_v58, %v4238_v0  ;;  %v13630_v0 = vld [vmem:[#allocation58_spill] sm:$0xff]  ;;  %v12376_v58 = vpop.permute.xlu0 %4483 }
 0x6a5   : > { %9279 = vpow2.f32 %v4936_v10 }
 0x6a6   : > { %v12337_v46 = vpop.permute.xlu1 %4463  ;;  %9281 = vpow2.f32 %v4188_v30  ;;  %v4304_v14 = vmul.f32 1.442695, %v4279_v26 }
 0x6a7   : > { %9283 = vpow2.f32 %v5046_v48 }
 0x6a9   : > { %v12343_v13 = vpop.eup %9275  ;;  %5247 = vperm.xlu0 %9192, %v12339_v50   ;;  %v13631_v50 = vld [vmem:[#allocation78_spill] sm:$0xff] }
 0x6aa   : > { %v4530_v27 = vpack.c.bf16 %v12341_v38, %v12343_v13  ;;  %v12353_v59 = vpop.eup %9277 }
 0x6ab   : > { %13624 = vst [vmem:[#allocation85_spill] sm:$0xff] %v12353_v59  ;;  %v12360_v4 = vpop.eup %9279 }
 0x6ac   : > { %4606 = vmatmul.bf16.gmra.mxu1 %v4530_v27  ;;  %5252 = vperm.xlu1 %9190, %v12353_v59   ;;  %13626 = vst [vmem:[#allocation55_spill] sm:$0xff] %v12360_v4  ;;  %v12364_v10 = vpop.eup %9281 }
 0x6ad   : > { %4350 = vadd.xlane.f32.xlu2 %v12174_v54  ;;  %13628 = vst [vmem:[#allocation56_spill] sm:$0xff] %v12364_v10  ;;  %v4511_v54 = vmul.f32 %v12186_v39, %v4415_v63  ;;  %v13632_v39 = vld [vmem:[#allocation79_spill] sm:$0xff] }
 0x6ae   : > { %v4976_v9 = vpop.permute.xlu1 %4975  ;;  %v13633_v63 = vsub.f32 %v13631_v50, %v13632_v39 }
 0x6af   : > { %v5025_v34 = vsub.f32 %v13625_v1, %v4976_v9  ;;  %v12369_v9 = vpop.eup %9283  ;;  %v12371_v1 = vpop.permute.xlu2 %4488 }
 0x6b0   : > { %v4926_v26 = vmul.f32 1.442695, %v13633_v63  ;;  %v4417_v63 = vld [vmem:[#allocation5 + $0xd8] sm:$0xff] }
 0x6b1   : > { %v5048_v12 = vmul.f32 1.442695, %v5025_v34  ;;  %5257 = vperm.xlu0 %9192, %v12360_v4   ;;  %v5026_v34 = vsub.f32 %v13630_v0, %v4981_v62  ;;  %v4512_v62 = vmul.f32 %v12156_v49, %v4416_v35  ;;  %v5193_v35 = vpop.permute.xlu0 %5192 }
 0x6b3   : > { %9285 = vpow2.f32 %v5048_v12 }
 0x6b4   : > { %4508 = vperm.xlu1 %9190, %v12364_v10   ;;  %9287 = vpow2.f32 %v4304_v14 }
 0x6b6   : > { %v4233_v22 = vpop.permute.xlu1 %4232  ;;  %v4592_v30 = vpop.f32.mrf.mxu1 }
 0x6b7   : > { %v4278_v18 = vsub.f32 %v13629_v36, %v4233_v22  ;;  %v4632_v27 = vadd.f32 %v4592_v30, %v4511_v54  ;;  %v13634_v22 = vld [vmem:[#allocation60_spill] sm:$0xff]  ;;  %v5050_v36 = vmul.f32 1.442695, %v5026_v34 }
 0x6b8   : > { %v5027_v30 = vsub.f32 %v13634_v22, %v12318_v7  ;;  %v13635_v7 = vld [vmem:[#allocation61_spill] sm:$0xff] }
 0x6b9   : > { %v12373_v48 = vpop.eup %9285  ;;  %v4302_v12 = vmul.f32 1.442695, %v4278_v18  ;;  %4648 = vst [vmem:[#allocation5 + $0xb0] sm:$0xff] %v4632_v27 }
 0x6ba   : > { %v5279_v54 = vpack.c.bf16 %v12373_v48, %v12369_v9  ;;  %v5052_v0 = vmul.f32 1.442695, %v5027_v30  ;;  %v12388_v39 = vpop.eup %9287 }
 0x6bb   : > { %9289 = vpow2.f32 %v4302_v12  ;;  %v4280_v12 = vsub.f32 %v13635_v7, %v12334_v56  ;;  %v13637_v56 = vld [vmem:[#allocation63_spill] sm:$0xff] }
 0x6bc   : > { %5339 = vmatmul.bf16.gmra.mxu3 %v5279_v54  ;;  %9291 = vpow2.f32 %v4926_v26  ;;  %v12394_v54 = vpop.permute.xlu2 %5000  ;;  %v4513_v26 = vmul.f32 %v12198_v33, %v4417_v63 }
 0x6bd   : > { %9293 = vpow2.f32 %v5050_v36  ;;  %v4306_v22 = vmul.f32 1.442695, %v4280_v12 }
 0x6be   : > { %v12386_v18 = vpop.permute.xlu1 %4478  ;;  %v4594_v27 = vpop.f32.mrf.mxu1  ;;  %9295 = vpow2.f32 %v5052_v0  ;;  %v4418_v0 = vld [vmem:[#allocation5 + $0x18] sm:$0xff] }
 0x6bf   : > { %v4633_v50 = vadd.f32 %v4594_v27, %v4512_v62  ;;  %9297 = vpow2.f32 %v4306_v22 }
 0x6c1   : > { %v12390_v14 = vpop.eup %9289  ;;  %4649 = vst [vmem:[#allocation5] sm:$0xff] %v4633_v50 }
 0x6c2   : > { %v4531_v49 = vpack.c.bf16 %v12388_v39, %v12390_v14  ;;  %v12398_v34 = vpop.eup %9291 }
 0x6c3   : > { %13636 = vst [vmem:[#allocation59_spill] sm:$0xff] %v12398_v34  ;;  %v12402_v36 = vpop.eup %9293 }
 0x6c4   : > { %4611 = vmatmul.bf16.gmra.mxu1 %v4531_v49  ;;  %v12405_v7 = vpop.eup %9295  ;;  %v13638_v49 = vld [vmem:[#allocation62_spill] sm:$0xff]  ;;  %v5325_v33 = vpop.f32.mrf.mxu3 }
 0x6c5   : > { %5232 = vperm.xlu2 %9191, %v12398_v34   ;;  %v5028_v4 = vsub.f32 %v13638_v49, %v12357_v37  ;;  %v5280_v63 = vpack.c.bf16 %v12405_v7, %v12402_v36  ;;  %v4258_v12 = vpop.permute.xlu2 %4257  ;;  %v4514_v34 = vmul.f32 %v12275_v28, %v4418_v0  ;;  %v12413_v22 = vpop.eup %9297  ;;  %v13640_v37 = vld [vmem:[#allocation65_spill] sm:$0xff]  ;;  %v13641_v28 = vld [vmem:[#allocation67_spill] sm:$0xff] }
 0x6c6   : > { %v4248_v30 = vpop.permute.xlu1 %4247  ;;  %v4597_v62 = vpop.f32.mrf.mxu1  ;;  %v4283_v0 = vsub.f32 %v13641_v28, %v4258_v12  ;;  %v13643_v12 = vld [vmem:[#allocation66_spill] sm:$0xff] }
 0x6c7   : > { %v4281_v27 = vsub.f32 %v13637_v56, %v4248_v30  ;;  %v4634_v50 = vadd.f32 %v4597_v62, %v4513_v26  ;;  %v4253_v30 = vpop.permute.xlu0 %4252  ;;  %v5054_v26 = vmul.f32 1.442695, %v5028_v4 }
 0x6c8   : > { %v4282_v49 = vsub.f32 %v13640_v37, %v4253_v30  ;;  %v5166_v30 = vld [vmem:[#allocation5 + $0x40] sm:$0xff] }
 0x6c9   : > { %v4308_v59 = vmul.f32 1.442695, %v4281_v27  ;;  %4650 = vst [vmem:[#allocation5 + $0xd8] sm:$0xff] %v4634_v50  ;;  %v13639_v27 = vld [vmem:[#allocation64_spill] sm:$0xff] }
 0x6cb   : > { %9299 = vpow2.f32 %v4308_v59 }
 0x6cc   : > { %5344 = vmatmul.bf16.gmra.mxu3 %v5280_v63  ;;  %9301 = vpow2.f32 %v5054_v26  ;;  %v5327_v4 = vpop.f32.mrf.mxu3  ;;  %v5164_v63 = vld [vmem:[#allocation5 + $0x38] sm:$0xff] }
 0x6ce   : > { %v4996_v62 = vpop.permute.xlu1 %4995  ;;  %v4599_v56 = vpop.f32.mrf.mxu1 }
 0x6cf   : > { %v5029_v50 = vsub.f32 %v13639_v27, %v4996_v62  ;;  %v4635_v11 = vadd.f32 %v4599_v56, %v4514_v34  ;;  %v4310_v62 = vmul.f32 1.442695, %v4282_v49  ;;  %v5006_v34 = vpop.permute.xlu2 %5005  ;;  %v4312_v27 = vmul.f32 1.442695, %v4283_v0  ;;  %v5165_v0 = vld [vmem:[#allocation5 + $0x58] sm:$0xff] }
 0x6d0   : > { %v5030_v49 = vsub.f32 %v13643_v12, %v12394_v54 }
 0x6d1   : > { %v12415_v10 = vpop.eup %9299  ;;  %v5056_v57 = vmul.f32 1.442695, %v5029_v50  ;;  %4651 = vst [vmem:[#allocation5 + $0x18] sm:$0xff] %v4635_v11  ;;  %v13642_v11 = vld [vmem:[#allocation68_spill] sm:$0xff] }
 0x6d2   : > { %v4532_v59 = vpack.c.bf16 %v12415_v10, %v12413_v22  ;;  %v12421_v24 = vpop.eup %9301  ;;  %v5031_v26 = vsub.f32 %v13642_v11, %v5006_v34  ;;  %v5058_v54 = vmul.f32 1.442695, %v5030_v49 }
 0x6d3   : > { %9303 = vpow2.f32 %v5056_v57 }
 0x6d4   : > { %4616 = vmatmul.bf16.gmra.mxu1 %v4532_v59  ;;  %9305 = vpow2.f32 %v4310_v62  ;;  %v5262_v59 = vmul.f32 %v5193_v35, %v5166_v30  ;;  %v5060_v34 = vmul.f32 1.442695, %v5031_v26  ;;  %v5203_v62 = vpop.permute.xlu0 %5202 }
 0x6d5   : > { %9307 = vpow2.f32 %v4312_v27 }
 0x6d6   : > { %v5183_v56 = vpop.permute.xlu1 %5182  ;;  %9309 = vpow2.f32 %v5060_v34 }
 0x6d7   : > { %v5260_v5 = vmul.f32 %v5183_v56, %v5164_v63  ;;  %v4515_v63 = vmul.f32 %v12214_v32, %v4419_v6  ;;  %9311 = vpow2.f32 %v5058_v54  ;;  %v13645_v54 = vld [vmem:[#allocation69_spill] sm:$0xff] }
 0x6d9   : > { %v12423_v50 = vpop.eup %9303  ;;  %v5365_v37 = vadd.f32 %v5325_v33, %v5260_v5 }
 0x6da   : > { %v5281_v57 = vpack.c.bf16 %v12423_v50, %v12421_v24  ;;  %v12433_v11 = vpop.eup %9305 }
 0x6db   : > { %5381 = vst [vmem:[#allocation5 + $0x38] sm:$0xff] %v5365_v37  ;;  %4354 = vadd.xlane.f32.xlu0 %v12204_v8  ;;  %v12435_v30 = vpop.eup %9307  ;;  %v4420_v37 = vld [vmem:[#allocation5 + $0x68] sm:$0xff] }
 0x6dc   : > { %v5330_v28 = vpop.f32.mrf.mxu3  ;;  %5349 = vmatmul.bf16.gmra.mxu3 %v5281_v57  ;;  %v4533_v6 = vpack.c.bf16 %v12435_v30, %v12433_v11  ;;  %v4516_v32 = vmul.f32 %v12261_v25, %v4420_v37  ;;  %v12444_v12 = vpop.eup %9309  ;;  %v13646_v37 = vld [vmem:[#allocation80_spill] sm:$0xff] }
 0x6dd   : > { %v5367_v5 = vadd.f32 %v5330_v28, %v5262_v59  ;;  %v5168_v59 = vld [vmem:[#allocation5 + $0xe0] sm:$0xff]  ;;  %v9312_v28 = vpop.eup %9311  ;;  %v12449_v25 = vpop.permute.xlu2 %4498 }
 0x6de   : > { %v5188_v33 = vpop.permute.xlu1 %5187  ;;  %v4602_v56 = vpop.f32.mrf.mxu1  ;;  %4352 = vadd.xlane.f32.xlu1 %v12172_v53  ;;  %v5264_v34 = vmul.f32 %v5203_v62, %v5168_v59  ;;  %v5167_v62 = vld [vmem:[#allocation5 + $0xc8] sm:$0xff] }
 0x6df   : > { %5383 = vst [vmem:[#allocation5 + $0x40] sm:$0xff] %v5367_v5  ;;  %v5261_v35 = vmul.f32 %v5188_v33, %v5165_v0  ;;  %v4636_v27 = vadd.f32 %v4602_v56, %v4515_v63  ;;  %v13644_v0 = vld [vmem:[#allocation70_spill] sm:$0xff] }
 0x6e1   : > { %v5366_v8 = vadd.f32 %v5327_v4, %v5261_v35  ;;  %4652 = vst [vmem:[#allocation5 + $0x50] sm:$0xff] %v4636_v27  ;;  %v4268_v4 = vpop.permute.xlu0 %4267 }
 0x6e2   : > { %v4285_v63 = vsub.f32 %v13644_v0, %v4268_v4 }
 0x6e3   : > { %5382 = vst [vmem:[#allocation5 + $0x58] sm:$0xff] %v5366_v8  ;;  %5105 = vadd.xlane.f32.xlu0 %v12227_v16  ;;  %v5282_v16 = vpack.c.bf16 %v12444_v12, %v9312_v28 }
 0x6e4   : > { %4621 = vmatmul.bf16.gmra.mxu1 %v4533_v6  ;;  %v5332_v53 = vpop.f32.mrf.mxu3 }
 0x6e6   : > { %v12441_v26 = vpop.permute.xlu1 %4493  ;;  %v4604_v57 = vpop.f32.mrf.mxu1  ;;  %5101 = vadd.xlane.f32.xlu1 %v12189_v60  ;;  %v4316_v60 = vmul.f32 1.442695, %v4285_v63  ;;  %v5169_v63 = vld [vmem:[#allocation5 + $0x90] sm:$0xff] }
 0x6e7   : > { %v4637_v49 = vadd.f32 %v4604_v57, %v4516_v32 }
 0x6e8   : > { %9313 = vpow2.f32 %v4316_v60 }
 0x6e9   : > { %4653 = vst [vmem:[#allocation5 + $0x68] sm:$0xff] %v4637_v49 }
 0x6eb   : > { %4362 = vadd.xlane.f32.xlu0 %v12343_v13  ;;  %v5011_v13 = vpop.permute.xlu2 %5010 }
 0x6ec   : > { %v5335_v5 = vpop.f32.mrf.mxu3  ;;  %5354 = vmatmul.bf16.gmra.mxu3 %v5282_v16  ;;  %v5032_v6 = vsub.f32 %v13646_v37, %v5011_v13 }
 0x6ed   : > { %v5369_v33 = vadd.f32 %v5335_v5, %v5264_v34 }
 0x6ee   : > { %v4263_v56 = vpop.permute.xlu1 %4262  ;;  %5099 = vadd.xlane.f32.xlu2 %v12191_v47  ;;  %4358 = vadd.xlane.f32.xlu1 %v12239_v19  ;;  %v9314_v32 = vpop.eup %9313  ;;  %v5062_v49 = vmul.f32 1.442695, %v5032_v6 }
 0x6ef   : > { %5385 = vst [vmem:[#allocation5 + $0xe0] sm:$0xff] %v5369_v33  ;;  %v4284_v35 = vsub.f32 %v13645_v54, %v4263_v56 }
 0x6f1   : > { %v4314_v27 = vmul.f32 1.442695, %v4284_v35 }
 0x6f3   : > { %9315 = vpow2.f32 %v4314_v27  ;;  %5111 = vadd.xlane.f32.xlu0 %v12369_v9  ;;  %v13647_v9 = vld [vmem:[#allocation82_spill] sm:$0xff] }
 0x6f4   : > { %9317 = vpow2.f32 %v5062_v49  ;;  %v5337_v34 = vpop.f32.mrf.mxu3  ;;  %v4424_v49 = vld [vmem:[#allocation5 + $0x88] sm:$0xff] }
 0x6f6   : > { %v5198_v8 = vpop.permute.xlu1 %5197  ;;  %5103 = vadd.xlane.f32.xlu2 %v12225_v15  ;;  %5109 = vadd.xlane.f32.xlu1 %v12248_v45 }
 0x6f7   : > { %v5263_v47 = vmul.f32 %v5198_v8, %v5167_v62  ;;  %v4423_v8 = vld [vmem:[#allocation5 + $0x80] sm:$0xff] }
 0x6f9   : > { %v9316_v19 = vpop.eup %9315  ;;  %v5368_v57 = vadd.f32 %v5332_v53, %v5263_v47 }
 0x6fa   : > { %v4534_v4 = vpack.c.bf16 %v9314_v32, %v9316_v19 }
 0x6fb   : > { %5384 = vst [vmem:[#allocation5 + $0xc8] sm:$0xff] %v5368_v57  ;;  %4368 = vadd.xlane.f32.xlu0 %v12388_v39  ;;  %v5016_v59 = vpop.permute.xlu0 %5015  ;;  %v9318_v39 = vpop.eup %9317 }
 0x6fc   : > { %v5033_v0 = vsub.f32 %v13647_v9, %v5016_v59  ;;  %4626 = vmatmul.bf16.gmra.mxu1 %v4534_v4  ;;  %v5171_v4 = vld [vmem:[#allocation5 + $0xc0] sm:$0xff] }
 0x6fe   : > { %v5064_v16 = vmul.f32 1.442695, %v5033_v0  ;;  %v5208_v15 = vpop.permute.xlu1 %5207  ;;  %4356 = vadd.xlane.f32.xlu2 %v12207_v29  ;;  %4364 = vadd.xlane.f32.xlu1 %v12341_v38  ;;  %v12470_v29 = vpop.permute.xlu2 %4503  ;;  %v4318_v38 = vld [vmem:[#allocation4] sm:$0xff]  ;;  %v4520_v0 = vmul.f32 %v12386_v18, %v4424_v49 }
 0x6ff   : > { %v5265_v45 = vmul.f32 %v5208_v15, %v5169_v63 }
 0x700   : > { %9319 = vpow2.f32 %v5064_v16 }
 0x701   : > { %v5370_v53 = vadd.f32 %v5337_v34, %v5265_v45  ;;  %v5172_v45 = vld [vmem:[#allocation5 + $0xa8] sm:$0xff] }
 0x702   : > { %v4425_v34 = vld [vmem:[#allocation5 + $0xe8] sm:$0xff] }
 0x703   : > { %5386 = vst [vmem:[#allocation5 + $0x90] sm:$0xff] %v5370_v53  ;;  %5117 = vadd.xlane.f32.xlu0 %v12405_v7  ;;  %v13649_v53 = vld [vmem:[#allocation73_spill] sm:$0xff] }
 0x706   : > { %v9320_v5 = vpop.eup %9319  ;;  %5107 = vadd.xlane.f32.xlu2 %v12251_v44  ;;  %5115 = vadd.xlane.f32.xlu1 %v12402_v36  ;;  %v5213_v44 = vpop.permute.xlu0 %5212  ;;  %v13648_v36 = vld [vmem:[#allocation72_spill] sm:$0xff] }
 0x707   : > { %v5283_v33 = vpack.c.bf16 %v9320_v5, %v9318_v39  ;;  %v4334_v7 = vmul.f32 %v13648_v36, %v4318_v38 }
 0x709   : > { %5359 = vmatmul.bf16.gmra.mxu3 %v5283_v33 }
 0x70b   : > { %4374 = vadd.xlane.f32.xlu0 %v12433_v11 }
 0x70e   : > { %4360 = vadd.xlane.f32.xlu2 %v12237_v43  ;;  %4370 = vadd.xlane.f32.xlu1 %v12413_v22  ;;  %v5218_v43 = vpop.permute.xlu1 %5217 }
 0x713   : > { %5123 = vadd.xlane.f32.xlu0 %v9312_v28 }
 0x716   : > { %5113 = vadd.xlane.f32.xlu2 %v12373_v48  ;;  %5121 = vadd.xlane.f32.xlu1 %v12423_v50  ;;  %v4421_v48 = vld [vmem:[#allocation5 + $0x30] sm:$0xff]  ;;  %v5223_v50 = vpop.permute.xlu0 %5222 }
 0x717   : > { %v4517_v22 = vmul.f32 %v12337_v46, %v4421_v48  ;;  %v5268_v33 = vmul.f32 %v5223_v50, %v5172_v45  ;;  %v4426_v50 = vld [vmem:[#allocation5 + $0xb8] sm:$0xff] }
 0x71b   : > { %4380 = vadd.xlane.f32.xlu0 %v9314_v32 }
 0x71e   : > { %4366 = vadd.xlane.f32.xlu2 %v12390_v14  ;;  %4376 = vadd.xlane.f32.xlu1 %v12435_v30  ;;  %v5228_v14 = vpop.permute.xlu1 %5227  ;;  %v4422_v30 = vld [vmem:[#allocation5 + $0x48] sm:$0xff]  ;;  %v12480_v27 = vpop.permute.xlu0 %5237 }
 0x71f   : > { %v4518_v54 = vmul.f32 %v12322_v52, %v4422_v30  ;;  %v4519_v52 = vmul.f32 %v12300_v17, %v4423_v8  ;;  %v4320_v17 = vld [vmem:[#allocation4 + $0x10] sm:$0xff] }
 0x720   : > { %v4351_v11 = vpop.xlane.xlu2 %4350  ;;  %v5173_v30 = vld [vmem:[#allocation5 + $0xd0] sm:$0xff] }
 0x721   : > { %v4382_v60 = vadd.f32 %v4351_v11, %v4334_v7  ;;  %v4521_v7 = vmul.f32 %v12376_v58, %v4425_v34  ;;  %v13650_v11 = vld [vmem:[#allocation71_spill] sm:$0xff]  ;;  %v5269_v58 = vmul.f32 %v5228_v14, %v5173_v30  ;;  %v13651_v34 = vld [vmem:[#allocation74_spill] sm:$0xff] }
 0x723   : > { %4399 = vst.msk [vmem:[#allocation4] sm:$0xff] %vm4398_vm1, %v4382_v60  ;;  %5129 = vadd.xlane.f32.xlu0 %v9320_v5  ;;  %v4319_v5 = vld [vmem:[#allocation4 + $0x8] sm:$0xff] }
 0x726   : > { %5119 = vadd.xlane.f32.xlu2 %v12421_v24  ;;  %5127 = vadd.xlane.f32.xlu1 %v9318_v39  ;;  %v12482_v62 = vpop.permute.xlu1 %5242  ;;  %v5170_v24 = vld [vmem:[#allocation5 + $0x70] sm:$0xff]  ;;  %v12484_v46 = vpop.permute.xlu0 %5247  ;;  %v4336_v39 = vmul.f32 %v13649_v53, %v4320_v17 }
 0x727   : > { %v5266_v37 = vmul.f32 %v5213_v44, %v5170_v24 }
 0x729   : > { %v4607_v28 = vpop.f32.mrf.mxu1 }
 0x72a   : > { %v4638_v56 = vadd.f32 %v4607_v28, %v4517_v22 }
 0x72c   : > { %4654 = vst [vmem:[#allocation5 + $0x30] sm:$0xff] %v4638_v56  ;;  %v5070_v56 = vld [vmem:[#allocation4 + $0x98] sm:$0xff] }
 0x72e   : > { %4372 = vadd.xlane.f32.xlu2 %v12415_v10  ;;  %v12487_v6 = vpop.permute.xlu1 %5252  ;;  %v12490_v59 = vpop.permute.xlu0 %5257 }
 0x731   : > { %v4609_v35 = vpop.f32.mrf.mxu1 }
 0x732   : > { %v4639_v13 = vadd.f32 %v4609_v35, %v4518_v54  ;;  %v5086_v54 = vmul.f32 %v12280_v40, %v5070_v56  ;;  %v5068_v35 = vld [vmem:[#allocation4 + $0x88] sm:$0xff]  ;;  %v5174_v40 = vld [vmem:[#allocation5 + $0x10] sm:$0xff] }
 0x734   : > { %4655 = vst [vmem:[#allocation5 + $0x48] sm:$0xff] %v4639_v13 }
 0x736   : > { %4378 = vadd.xlane.f32.xlu2 %v9316_v19  ;;  %v5267_v19 = vmul.f32 %v5218_v43, %v5171_v4  ;;  %v4335_v43 = vmul.f32 %v13650_v11, %v4319_v5  ;;  %v5069_v11 = vld [vmem:[#allocation4 + $0x90] sm:$0xff] }
 0x737   : > { %v5085_v30 = vmul.f32 %v12182_v42, %v5069_v11  ;;  %v4430_v11 = vld [vmem:[#allocation5 + $0x78] sm:$0xff] }
 0x73e   : > { %5125 = vadd.xlane.f32.xlu2 %v12444_v12  ;;  %v12493_v12 = vpop.permute.xlu1 %4508 }
 0x73f   : > { %v5340_v10 = vpop.f32.mrf.mxu3 }
 0x740   : > { %v5371_v47 = vadd.f32 %v5340_v10, %v5266_v37  ;;  %v4522_v37 = vmul.f32 %v12371_v1, %v4426_v50  ;;  %v5233_v10 = vpop.permute.xlu2 %5232  ;;  %v4322_v1 = vld [vmem:[#allocation4 + $0x20] sm:$0xff] }
 0x741   : > { %v4612_v32 = vpop.f32.mrf.mxu1  ;;  %v4338_v53 = vmul.f32 %v13651_v34, %v4322_v1 }
 0x742   : > { %5387 = vst [vmem:[#allocation5 + $0x70] sm:$0xff] %v5371_v47  ;;  %v4640_v57 = vadd.f32 %v4612_v32, %v4519_v52  ;;  %v5084_v47 = vmul.f32 %v12258_v41, %v5068_v35 }
 0x744   : > { %4656 = vst [vmem:[#allocation5 + $0x80] sm:$0xff] %v4640_v57 }
 0x747   : > { %v5342_v9 = vpop.f32.mrf.mxu3 }
 0x748   : > { %v5372_v63 = vadd.f32 %v5342_v9, %v5267_v19  ;;  %v4324_v19 = vld [vmem:[#allocation4 + $0x30] sm:$0xff]  ;;  %v5067_v9 = vld [vmem:[#allocation4 + $0x80] sm:$0xff] }
 0x749   : > { %v4614_v16 = vpop.f32.mrf.mxu1  ;;  %v4340_v14 = vmul.f32 %v12168_v2, %v4324_v19  ;;  %v5083_v45 = vmul.f32 %v12246_v51, %v5067_v9  ;;  %v13653_v19 = vld [vmem:[#allocation84_spill] sm:$0xff] }
 0x74a   : > { %5388 = vst [vmem:[#allocation5 + $0xc0] sm:$0xff] %v5372_v63  ;;  %v4641_v15 = vadd.f32 %v4614_v16, %v4520_v0  ;;  %v4427_v0 = vld [vmem:[#allocation5 + $0x60] sm:$0xff]  ;;  %v5270_v63 = vmul.f32 %v5233_v10, %v5174_v40  ;;  %v4325_v10 = vld [vmem:[#allocation4 + $0x38] sm:$0xff] }
 0x74b   : > { %v4341_v40 = vmul.f32 %v13653_v19, %v4325_v10  ;;  %v13658_v10 = vld [vmem:[#allocation81_spill] sm:$0xff] }
 0x74c   : > { %4657 = vst [vmem:[#allocation5 + $0x88] sm:$0xff] %v4641_v15 }
 0x74e   : > { %v4355_v38 = vpop.xlane.xlu0 %4354 }
 0x74f   : > { %v4384_v44 = vadd.f32 %v4355_v38, %v4336_v39  ;;  %v5345_v36 = vpop.f32.mrf.mxu3  ;;  %v4523_v39 = vmul.f32 %v12441_v26, %v4427_v0  ;;  %v4428_v26 = vld [vmem:[#allocation5 + $0xf0] sm:$0xff]  ;;  %v5076_v0 = vld [vmem:[#allocation4 + $0xc8] sm:$0xff] }
 0x750   : > { %v5373_v18 = vadd.f32 %v5345_v36, %v5268_v33  ;;  %v5073_v36 = vld [vmem:[#allocation4 + $0xb0] sm:$0xff] }
 0x751   : > { %4401 = vst.msk [vmem:[#allocation4 + $0x10] sm:$0xff] %vm4398_vm1, %v4384_v44  ;;  %v4353_v60 = vpop.xlane.xlu1 %4352  ;;  %v4617_v48 = vpop.f32.mrf.mxu1  ;;  %v5089_v51 = vmul.f32 %v12298_v23, %v5073_v36 }
 0x752   : > { %5389 = vst [vmem:[#allocation5 + $0xa8] sm:$0xff] %v5373_v18  ;;  %v4383_v22 = vadd.f32 %v4353_v60, %v4335_v43  ;;  %v4642_v28 = vadd.f32 %v4617_v48, %v4521_v7  ;;  %v5175_v7 = vld [vmem:[#allocation5 + $0x28] sm:$0xff] }
 0x753   : > { %v5072_v43 = vld [vmem:[#allocation4 + $0xa8] sm:$0xff]  ;;  %v5271_v60 = vmul.f32 %v12480_v27, %v5175_v7 }
 0x754   : > { %4400 = vst.msk [vmem:[#allocation4 + $0x8] sm:$0xff] %vm4398_vm1, %v4383_v22  ;;  %v5088_v50 = vmul.f32 %v12292_v61, %v5072_v43  ;;  %v4327_v27 = vld [vmem:[#allocation4 + $0x48] sm:$0xff]  ;;  %v4321_v61 = vld [vmem:[#allocation4 + $0x18] sm:$0xff] }
 0x755   : > { %4658 = vst [vmem:[#allocation5 + $0xe8] sm:$0xff] %v4642_v28  ;;  %v4343_v42 = vmul.f32 %v12217_v55, %v4327_v27  ;;  %v5078_v27 = vld [vmem:[#allocation4 + $0xd8] sm:$0xff] }
 0x756   : > { %v5106_v13 = vpop.xlane.xlu0 %5105 }
 0x757   : > { %v5134_v24 = vadd.f32 %v5106_v13, %v5086_v54  ;;  %v5347_v8 = vpop.f32.mrf.mxu3  ;;  %v4524_v54 = vmul.f32 %v12449_v25, %v4428_v26  ;;  %v13654_v26 = vld [vmem:[#allocation75_spill] sm:$0xff] }
 0x758   : > { %v5374_v52 = vadd.f32 %v5347_v8, %v5269_v58  ;;  %v5176_v8 = vld [vmem:[#allocation5 + $0xa0] sm:$0xff] }
 0x759   : > { %5150 = vst.msk [vmem:[#allocation4 + $0x98] sm:$0xff] %vm4398_vm1, %v5134_v24  ;;  %v5102_v32 = vpop.xlane.xlu1 %5101  ;;  %v4619_v57 = vpop.f32.mrf.mxu1  ;;  %v5272_v25 = vmul.f32 %v12482_v62, %v5176_v8  ;;  %v5092_v62 = vmul.f32 %v12320_v21, %v5076_v0 }
 0x75a   : > { %5390 = vst [vmem:[#allocation5 + $0xd0] sm:$0xff] %v5374_v52  ;;  %v5132_v4 = vadd.f32 %v5102_v32, %v5084_v47  ;;  %v4643_v49 = vadd.f32 %v4619_v57, %v4522_v37 }
 0x75c   : > { %5148 = vst.msk [vmem:[#allocation4 + $0x88] sm:$0xff] %vm4398_vm1, %v5132_v4  ;;  %v13652_v4 = vld [vmem:[#allocation76_spill] sm:$0xff] }
 0x75d   : > { %4659 = vst [vmem:[#allocation5 + $0xb8] sm:$0xff] %v4643_v49  ;;  %v4337_v49 = vmul.f32 %v13652_v4, %v4321_v61  ;;  %v4333_v4 = vld [vmem:[#allocation4 + $0x78] sm:$0xff] }
 0x75e   : > { %v4363_v16 = vpop.xlane.xlu0 %4362 }
 0x75f   : > { %v4388_v41 = vadd.f32 %v4363_v16, %v4340_v14  ;;  %v5350_v15 = vpop.f32.mrf.mxu3  ;;  %v5071_v16 = vld [vmem:[#allocation4 + $0xa0] sm:$0xff] }
 0x760   : > { %v5375_v17 = vadd.f32 %v5350_v15, %v5270_v63  ;;  %v5177_v63 = vld [vmem:[#allocation5 + $0xf8] sm:$0xff]  ;;  %v4429_v15 = vld [vmem:[#allocation5 + $0x8] sm:$0xff] }
 0x761   : > { %4405 = vst.msk [vmem:[#allocation4 + $0x30] sm:$0xff] %vm4398_vm1, %v4388_v41  ;;  %v5100_v5 = vpop.xlane.xlu2 %5099  ;;  %v4359_v33 = vpop.xlane.xlu1 %4358  ;;  %v5075_v41 = vld [vmem:[#allocation4 + $0xc0] sm:$0xff] }
 0x762   : > { %5391 = vst [vmem:[#allocation5 + $0x10] sm:$0xff] %v5375_v17  ;;  %v5131_v2 = vadd.f32 %v5100_v5, %v5083_v45  ;;  %v4386_v38 = vadd.f32 %v4359_v33, %v4338_v53  ;;  %v4622_v44 = vpop.f32.mrf.mxu1  ;;  %v5273_v17 = vmul.f32 %v12484_v46, %v5177_v63  ;;  %v5087_v5 = vmul.f32 %v12212_v20, %v5071_v16  ;;  %v13660_v16 = vld [vmem:[#allocation77_spill] sm:$0xff] }
 0x763   : > { %v4644_v18 = vadd.f32 %v4622_v44, %v4523_v39  ;;  %v5091_v33 = vmul.f32 %v12311_v31, %v5075_v41  ;;  %v4328_v31 = vld [vmem:[#allocation4 + $0x50] sm:$0xff] }
 0x764   : > { %5147 = vst.msk [vmem:[#allocation4 + $0x80] sm:$0xff] %vm4398_vm1, %v5131_v2  ;;  %v4525_v2 = vmul.f32 %v12470_v29, %v4429_v15  ;;  %v13661_v15 = vld [vmem:[#allocation87_spill] sm:$0xff] }
 0x765   : > { %4403 = vst.msk [vmem:[#allocation4 + $0x20] sm:$0xff] %vm4398_vm1, %v4386_v38 }
 0x766   : > { %4660 = vst [vmem:[#allocation5 + $0x60] sm:$0xff] %v4644_v18  ;;  %v5112_v48 = vpop.xlane.xlu0 %5111  ;;  %v4330_v18 = vld [vmem:[#allocation4 + $0x60] sm:$0xff] }
 0x767   : > { %v5137_v22 = vadd.f32 %v5112_v48, %v5089_v51  ;;  %v5352_v28 = vpop.f32.mrf.mxu3  ;;  %v4346_v20 = vmul.f32 %v12263_v3, %v4330_v18  ;;  %v4323_v51 = vld [vmem:[#allocation4 + $0x28] sm:$0xff]  ;;  %v5079_v3 = vld [vmem:[#allocation4 + $0xe0] sm:$0xff] }
 0x768   : > { %v5376_v56 = vadd.f32 %v5352_v28, %v5271_v60  ;;  %v4339_v60 = vmul.f32 %v13654_v26, %v4323_v51  ;;  %v13655_v48 = vld [vmem:[#allocation86_spill] sm:$0xff]  ;;  %v4526_v28 = vmul.f32 %v12493_v12, %v4430_v11  ;;  %v13664_v51 = vld [vmem:[#allocation85_spill] sm:$0xff]  ;;  %v4329_v26 = vld [vmem:[#allocation4 + $0x58] sm:$0xff] }
 0x769   : > { %5153 = vst.msk [vmem:[#allocation4 + $0xb0] sm:$0xff] %vm4398_vm1, %v5137_v22  ;;  %v5104_v35 = vpop.xlane.xlu2 %5103  ;;  %v5110_v23 = vpop.xlane.xlu1 %5109  ;;  %v4344_v22 = vmul.f32 %v13655_v48, %v4328_v31 }
 0x76a   : > { %5392 = vst [vmem:[#allocation5 + $0x28] sm:$0xff] %v5376_v56  ;;  %v5133_v58 = vadd.f32 %v5104_v35, %v5085_v30  ;;  %v5136_v13 = vadd.f32 %v5110_v23, %v5088_v50  ;;  %v4624_v24 = vpop.f32.mrf.mxu1 }
 0x76b   : > { %v4645_v37 = vadd.f32 %v4624_v24, %v4524_v54  ;;  %v5074_v24 = vld [vmem:[#allocation4 + $0xb8] sm:$0xff] }
 0x76c   : > { %5149 = vst.msk [vmem:[#allocation4 + $0x90] sm:$0xff] %vm4398_vm1, %v5133_v58  ;;  %v13656_v58 = vld [vmem:[#allocation54_spill] sm:$0xff] }
 0x76d   : > { %5152 = vst.msk [vmem:[#allocation4 + $0xa8] sm:$0xff] %vm4398_vm1, %v5136_v13  ;;  %v5095_v13 = vmul.f32 %v13656_v58, %v5079_v3  ;;  %v5080_v3 = vld [vmem:[#allocation4 + $0xe8] sm:$0xff] }
 0x76e   : > { %4661 = vst [vmem:[#allocation5 + $0xf0] sm:$0xff] %v4645_v37  ;;  %v4369_v52 = vpop.xlane.xlu0 %4368  ;;  %v5178_v37 = vld [vmem:[#allocation5 + $0x20] sm:$0xff] }
 0x76f   : > { %v4391_v47 = vadd.f32 %v4369_v52, %v4343_v42  ;;  %v5355_v32 = vpop.f32.mrf.mxu3  ;;  %v13657_v42 = vld [vmem:[#allocation89_spill] sm:$0xff] }
 0x770   : > { %v5377_v57 = vadd.f32 %v5355_v32, %v5272_v25  ;;  %v5090_v61 = vmul.f32 %v13657_v42, %v5074_v24  ;;  %v5094_v25 = vmul.f32 %v13658_v10, %v5078_v27 }
 0x771   : > { %4408 = vst.msk [vmem:[#allocation4 + $0x48] sm:$0xff] %vm4398_vm1, %v4391_v47  ;;  %v4357_v14 = vpop.xlane.xlu2 %4356  ;;  %v4365_v9 = vpop.xlane.xlu1 %4364 }
 0x772   : > { %5393 = vst [vmem:[#allocation5 + $0xa0] sm:$0xff] %v5377_v57  ;;  %v4385_v1 = vadd.f32 %v4357_v14, %v4337_v49  ;;  %v4389_v55 = vadd.f32 %v4365_v9, %v4341_v40  ;;  %v5274_v49 = vmul.f32 %v12487_v6, %v5178_v37  ;;  %v13659_v14 = vld [vmem:[#allocation56_spill] sm:$0xff] }
 0x773   : > { %v4349_v9 = vmul.f32 %v13659_v14, %v4333_v4 }
 0x774   : > { %4402 = vst.msk [vmem:[#allocation4 + $0x18] sm:$0xff] %vm4398_vm1, %v4385_v1  ;;  %v4326_v1 = vld [vmem:[#allocation4 + $0x40] sm:$0xff] }
 0x775   : > { %4406 = vst.msk [vmem:[#allocation4 + $0x38] sm:$0xff] %vm4398_vm1, %v4389_v55  ;;  %v4331_v55 = vld [vmem:[#allocation4 + $0x68] sm:$0xff]  ;;  %v4342_v41 = vmul.f32 %v13660_v16, %v4326_v1 }
 0x776   : > { %v5118_v45 = vpop.xlane.xlu0 %5117 }
 0x777   : > { %v5140_v34 = vadd.f32 %v5118_v45, %v5092_v62  ;;  %v5357_v53 = vpop.f32.mrf.mxu3  ;;  %v5179_v62 = vld [vmem:[#allocation5 + $0x98] sm:$0xff] }
 0x778   : > { %v5378_v39 = vadd.f32 %v5357_v53, %v5273_v17  ;;  %v4347_v17 = vmul.f32 %v13661_v15, %v4331_v55 }
 0x779   : > { %5156 = vst.msk [vmem:[#allocation4 + $0xc8] sm:$0xff] %vm4398_vm1, %v5140_v34  ;;  %v5108_v38 = vpop.xlane.xlu2 %5107  ;;  %v5116_v44 = vpop.xlane.xlu1 %5115 }
 0x77a   : > { %5394 = vst [vmem:[#allocation5 + $0xf8] sm:$0xff] %v5378_v39  ;;  %v5135_v21 = vadd.f32 %v5108_v38, %v5087_v5  ;;  %v5139_v36 = vadd.f32 %v5116_v44, %v5091_v33  ;;  %v4627_v7 = vpop.f32.mrf.mxu1  ;;  %v5082_v39 = vld [vmem:[#allocation4 + $0xf8] sm:$0xff]  ;;  %v5275_v5 = vmul.f32 %v12490_v59, %v5179_v62  ;;  %v13662_v38 = vld [vmem:[#allocation55_spill] sm:$0xff] }
 0x77b   : > { %v4646_v46 = vadd.f32 %v4627_v7, %v4525_v2  ;;  %v5098_v44 = vmul.f32 %v13662_v38, %v5082_v39 }
 0x77c   : > { %5151 = vst.msk [vmem:[#allocation4 + $0xa0] sm:$0xff] %vm4398_vm1, %v5135_v21  ;;  %v5077_v21 = vld [vmem:[#allocation4 + $0xd0] sm:$0xff] }
 0x77d   : > { %5155 = vst.msk [vmem:[#allocation4 + $0xc0] sm:$0xff] %vm4398_vm1, %v5139_v36  ;;  %v5081_v36 = vld [vmem:[#allocation4 + $0xf0] sm:$0xff] }
 0x77e   : > { %4662 = vst [vmem:[#allocation5 + $0x8] sm:$0xff] %v4646_v46  ;;  %v4375_v29 = vpop.xlane.xlu0 %4374  ;;  %v13663_v46 = vld [vmem:[#allocation59_spill] sm:$0xff]  ;;  %v5097_v31 = vmul.f32 %v13664_v51, %v5081_v36 }
 0x77f   : > { %v4394_v43 = vadd.f32 %v4375_v29, %v4346_v20  ;;  %v5093_v20 = vmul.f32 %v13663_v46, %v5077_v21 }
 0x781   : > { %4411 = vst.msk [vmem:[#allocation4 + $0x60] sm:$0xff] %vm4398_vm1, %v4394_v43  ;;  %v4361_v56 = vpop.xlane.xlu2 %4360  ;;  %v4371_v30 = vpop.xlane.xlu1 %4370 }
 0x782   : > { %v4387_v50 = vadd.f32 %v4361_v56, %v4339_v60  ;;  %v4392_v54 = vadd.f32 %v4371_v30, %v4344_v22  ;;  %v4629_v35 = vpop.f32.mrf.mxu1  ;;  %v13665_v60 = vld [vmem:[#allocation83_spill] sm:$0xff]  ;;  %v13666_v30 = vld [vmem:[#allocation88_spill] sm:$0xff] }
 0x783   : > { %v4647_v23 = vadd.f32 %v4629_v35, %v4526_v28  ;;  %v4345_v48 = vmul.f32 %v13665_v60, %v4329_v26  ;;  %v4332_v56 = vld [vmem:[#allocation4 + $0x70] sm:$0xff] }
 0x784   : > { %4404 = vst.msk [vmem:[#allocation4 + $0x28] sm:$0xff] %vm4398_vm1, %v4387_v50  ;;  %v4348_v50 = vmul.f32 %v13666_v30, %v4332_v56 }
 0x785   : > { %4409 = vst.msk [vmem:[#allocation4 + $0x50] sm:$0xff] %vm4398_vm1, %v4392_v54 }
 0x786   : > { %4663 = vst [vmem:[#allocation5 + $0x78] sm:$0xff] %v4647_v23  ;;  %v5124_v8 = vpop.xlane.xlu0 %5123  ;;  %v13667_v23 = vld [vmem:[#allocation90_spill] sm:$0xff] }
 0x787   : > { %v5143_v12 = vadd.f32 %v5124_v8, %v5095_v13  ;;  %v5096_v58 = vmul.f32 %v13667_v23, %v5080_v3 }
 0x789   : > { %5159 = vst.msk [vmem:[#allocation4 + $0xe0] sm:$0xff] %vm4398_vm1, %v5143_v12  ;;  %v5114_v52 = vpop.xlane.xlu2 %5113  ;;  %v5122_v47 = vpop.xlane.xlu1 %5121 }
 0x78a   : > { %v5138_v32 = vadd.f32 %v5114_v52, %v5090_v61  ;;  %v5142_v57 = vadd.f32 %v5122_v47, %v5094_v25 }
 0x78c   : > { %5154 = vst.msk [vmem:[#allocation4 + $0xb8] sm:$0xff] %vm4398_vm1, %v5138_v32  ;;  %v5360_v19 = vpop.f32.mrf.mxu3 }
 0x78d   : > { %5158 = vst.msk [vmem:[#allocation4 + $0xd8] sm:$0xff] %vm4398_vm1, %v5142_v57  ;;  %v5379_v40 = vadd.f32 %v5360_v19, %v5274_v49 }
 0x78e   : > { %v4381_v0 = vpop.xlane.xlu0 %4380 }
 0x78f   : > { %5395 = vst [vmem:[#allocation5 + $0x20] sm:$0xff] %v5379_v40  ;;  %v4397_v63 = vadd.f32 %v4381_v0, %v4349_v9 }
 0x791   : > { %4414 = vst.msk [vmem:[#allocation4 + $0x78] sm:$0xff] %vm4398_vm1, %v4397_v63  ;;  %v4367_v6 = vpop.xlane.xlu2 %4366  ;;  %v4377_v45 = vpop.xlane.xlu1 %4376 }
 0x792   : > { %v4390_v34 = vadd.f32 %v4367_v6, %v4342_v41  ;;  %v4395_v53 = vadd.f32 %v4377_v45, %v4347_v17 }
 0x794   : > { %4407 = vst.msk [vmem:[#allocation4 + $0x40] sm:$0xff] %vm4398_vm1, %v4390_v34  ;;  %v5362_v33 = vpop.f32.mrf.mxu3 }
 0x795   : > { %4412 = vst.msk [vmem:[#allocation4 + $0x68] sm:$0xff] %vm4398_vm1, %v4395_v53  ;;  %v5380_v2 = vadd.f32 %v5362_v33, %v5275_v5 }
 0x796   : > { %v5130_v7 = vpop.xlane.xlu0 %5129 }
 0x797   : > { %5396 = vst [vmem:[#allocation5 + $0x98] sm:$0xff] %v5380_v2  ;;  %v5146_v18 = vadd.f32 %v5130_v7, %v5098_v44 }
 0x799   : > { %5162 = vst.msk [vmem:[#allocation4 + $0xf8] sm:$0xff] %vm4398_vm1, %v5146_v18  ;;  %v5120_v59 = vpop.xlane.xlu2 %5119  ;;  %v5128_v11 = vpop.xlane.xlu1 %5127 }
 0x79a   : > { %v5141_v29 = vadd.f32 %v5120_v59, %v5093_v20  ;;  %v5145_v43 = vadd.f32 %v5128_v11, %v5097_v31 }
 0x79c   : > { %5157 = vst.msk [vmem:[#allocation4 + $0xd0] sm:$0xff] %vm4398_vm1, %v5141_v29 }
 0x79d   : > { %5161 = vst.msk [vmem:[#allocation4 + $0xf0] sm:$0xff] %vm4398_vm1, %v5145_v43 }
 0x7a1   : > { %v4373_v22 = vpop.xlane.xlu2 %4372 }
 0x7a2   : > { %v4393_v28 = vadd.f32 %v4373_v22, %v4345_v48 }
 0x7a4   : > { %4410 = vst.msk [vmem:[#allocation4 + $0x58] sm:$0xff] %vm4398_vm1, %v4393_v28 }
 0x7a9   : > { %v4379_v54 = vpop.xlane.xlu2 %4378 }
 0x7aa   : > { %v4396_v35 = vadd.f32 %v4379_v54, %v4348_v50 }
 0x7ac   : > { %4413 = vst.msk [vmem:[#allocation4 + $0x70] sm:$0xff] %vm4398_vm1, %v4396_v35 }
 0x7b0   : > { %5416 = sbr.rel (%p8340_p4) target bundleno = 2626 (0xa42), region = 108 }
 0x7b1   : > { %v5126_v13 = vpop.xlane.xlu2 %5125 }
 0x7b2   : > { %v5144_v24 = vadd.f32 %v5126_v13, %v5096_v58 }
 0x7b4   : > { %5160 = vst.msk [vmem:[#allocation4 + $0xe8] sm:$0xff] %vm4398_vm1, %v5144_v24 }
 0x7b5   : > { %v5621_v27 = vld [vmem:[#allocation4 + $0xa0] sm:$0xff]  ;;  %v5619_v8 = vld [vmem:[#allocation4 + $0x90] sm:$0xff]  ;;  %v9861_v37 = vmov 0   ;;  %v5622_v42 = vld [vmem:[#allocation4 + $0xa8] sm:$0xff]  ;;  %s13705_s18 = sld [smem:[#allocation34_spill]] }
 0x7b6   : > { %v5617_v12 = vld [vmem:[#allocation4 + $0x80] sm:$0xff]  ;;  %9323 = vset.pattern.permute.xlu2 %v9861_v37  ;;  %9322 = vset.pattern.permute.xlu1 %v9861_v37  ;;  %9324 = vrcp.f32 %v5621_v27  ;;  %v5620_v61 = vld [vmem:[#allocation4 + $0x98] sm:$0xff]  ;;  %v5618_v10 = vld [vmem:[#allocation4 + $0x88] sm:$0xff] }
 0x7b7   : > { %9321 = vset.pattern.permute.xlu0 %v9861_v37  ;;  %9326 = vrcp.f32 %v5619_v8  ;;  %v5625_v32 = vld [vmem:[#allocation4 + $0xc0] sm:$0xff]  ;;  %v5624_v4 = vld [vmem:[#allocation4 + $0xb8] sm:$0xff]  ;;  %v5623_v19 = vld [vmem:[#allocation4 + $0xb0] sm:$0xff] }
 0x7b8   : > { %9328 = vrcp.f32 %v5617_v12  ;;  %v5628_v14 = vld [vmem:[#allocation4 + $0xd8] sm:$0xff]  ;;  %v5627_v1 = vld [vmem:[#allocation4 + $0xd0] sm:$0xff]  ;;  %v5626_v0 = vld [vmem:[#allocation4 + $0xc8] sm:$0xff] }
 0x7b9   : > { %9330 = vrcp.f32 %v5622_v42  ;;  %v5631_v62 = vld [vmem:[#allocation4 + $0xf0] sm:$0xff]  ;;  %v5629_v17 = vld [vmem:[#allocation4 + $0xe0] sm:$0xff]  ;;  %v5434_v45 = vld [vmem:[#allocation4 + $0x8] sm:$0xff] }
 0x7ba   : > { %9332 = vrcp.f32 %v5620_v61  ;;  %v5433_v53 = vld [vmem:[#allocation4] sm:$0xff]  ;;  %v5632_v5 = vld [vmem:[#allocation4 + $0xf8] sm:$0xff]  ;;  %v5435_v36 = vld [vmem:[#allocation4 + $0x10] sm:$0xff] }
 0x7bb   : > { %9334 = vrcp.f32 %v5618_v10  ;;  %v5630_v41 = vld [vmem:[#allocation4 + $0xe8] sm:$0xff]  ;;  %v5437_v2 = vld [vmem:[#allocation4 + $0x20] sm:$0xff]  ;;  %v5436_v44 = vld [vmem:[#allocation4 + $0x18] sm:$0xff]  ;;  %p8597_p10 = scmp.ne.s32.totalorder %s13705_s18, 0 }
 0x7bc   : > { %v9325_v25 = vpop.eup %9324  ;;  %9336 = vrcp.f32 %v5625_v32  ;;  %v5440_v18 = vld [vmem:[#allocation4 + $0x38] sm:$0xff]  ;;  %v5439_v20 = vld [vmem:[#allocation4 + $0x30] sm:$0xff]  ;;  %v5438_v31 = vld [vmem:[#allocation4 + $0x28] sm:$0xff]  ;;  %s13706_s3 = sld [smem:[#allocation119_spill]] (!%p8597_p10) }
 0x7bd   : > { %v9327_v52 = vpop.eup %9326  ;;  %5671 = vperm.xlu2 %9323, %v9325_v25   ;;  %9338 = vrcp.f32 %v5624_v4  ;;  %v5443_v11 = vld [vmem:[#allocation4 + $0x50] sm:$0xff]  ;;  %v5442_v43 = vld [vmem:[#allocation4 + $0x48] sm:$0xff]  ;;  %v5441_v60 = vld [vmem:[#allocation4 + $0x40] sm:$0xff] }
 0x7be   : > { %v9329_v47 = vpop.eup %9328  ;;  %5661 = vperm.xlu1 %9322, %v9327_v52   ;;  %9340 = vrcp.f32 %v5623_v19  ;;  %v5446_v22 = vld [vmem:[#allocation4 + $0x68] sm:$0xff]  ;;  %v8979_v56 = vld [vmem:[%s10338_s30 + $0x1ec] sm:$0xf0]  ;;  %v8457_v54 = vld [vmem:[%s10338_s30 + $0x1f0] sm:$0xf0] }
 0x7bf   : > { %5651 = vperm.xlu0 %9321, %v9329_v47   ;;  %v9331_v57 = vpop.eup %9330  ;;  %9342 = vrcp.f32 %v5628_v14  ;;  %v8455_v28 = vld [vmem:[%s10338_s30 + $0x1e0] sm:$0xf]  ;;  %v8977_v30 = vld [vmem:[%s10338_s30 + $0x1e4] sm:$0xf]  ;;  %v8463_v35 = vld [vmem:[%s10338_s30 + $0x1e8] sm:$0xf] }
 0x7c0   : > { %v9333_v49 = vpop.eup %9332  ;;  %9344 = vrcp.f32 %v5627_v1  ;;  %v8456_v50 = vor.u32 %v8979_v56, %v8455_v28  ;;  %v8980_v3 = vld [vmem:[%s10338_s30 + $0x1f4] sm:$0xf0]  ;;  %v8460_v13 = vor.u32 %v8977_v30, %v8457_v54  ;;  %v8978_v27 = vld [vmem:[%s10338_s30 + $0x1ec] sm:$0xf]  ;;  %v8465_v8 = vld [vmem:[%s10338_s30 + $0x1f8] sm:$0xf0] }
 0x7c1   : > { %v9335_v40 = vpop.eup %9334  ;;  %9346 = vrcp.f32 %v5626_v0  ;;  %v5445_v58 = vld [vmem:[#allocation4 + $0x60] sm:$0xff]  ;;  %v8464_v24 = vor.u32 %v8980_v3, %v8463_v35  ;;  %v5444_v37 = vld [vmem:[#allocation4 + $0x58] sm:$0xff]  ;;  %v8468_v42 = vor.u32 %v8978_v27, %v8465_v8  ;;  %v8439_v25 = vld [vmem:[%s10338_s30 + $0x1c0] sm:$0xf] }
 0x7c2   : > { %v9337_v9 = vpop.eup %9336  ;;  %9348 = vrcp.f32 %v5631_v62  ;;  %5945 = vmatpush.bf16.msra.mxu0 %v8456_v50  ;;  %5994 = vmatpush.bf16.msra.mxu1 %v8460_v13  ;;  %v5448_v10 = vld [vmem:[#allocation4 + $0x78] sm:$0xff]  ;;  %v8973_v47 = vld [vmem:[%s10338_s30 + $0x1c4] sm:$0xf]  ;;  %v5447_v32 = vld [vmem:[#allocation4 + $0x70] sm:$0xff] }
 0x7c3   : > { %v9339_v55 = vpop.eup %9338  ;;  %9350 = vrcp.f32 %v5630_v41  ;;  %6043 = vmatpush.bf16.msra.mxu2 %v8464_v24  ;;  %6092 = vmatpush.bf16.msra.mxu3 %v8468_v42  ;;  %v8975_v52 = vld [vmem:[%s10338_s30 + $0x1cc] sm:$0xf0]  ;;  %v8441_v4 = vld [vmem:[%s10338_s30 + $0x1d0] sm:$0xf0]  ;;  %v8976_v19 = vld [vmem:[%s10338_s30 + $0x1d4] sm:$0xf0] }
 0x7c4   : > { %v9341_v63 = vpop.eup %9340  ;;  %9352 = vrcp.f32 %v5629_v17  ;;  %v8444_v14 = vor.u32 %v8973_v47, %v8441_v4  ;;  %v8974_v1 = vld [vmem:[%s10338_s30 + $0x1cc] sm:$0xf]  ;;  %v8423_v0 = vld [vmem:[%s10338_s30 + $0x1a0] sm:$0xf]  ;;  %v8969_v41 = vld [vmem:[%s10338_s30 + $0x1a4] sm:$0xf] }
 0x7c5   : > { %5676 = vperm.xlu2 %9323, %v9331_v57   ;;  %v9343_v16 = vpop.eup %9342  ;;  %9354 = vrcp.f32 %v5434_v45  ;;  %v8440_v57 = vor.u32 %v8975_v52, %v8439_v25  ;;  %v8399_v30 = vld [vmem:[%s10338_s30 + $0x168] sm:$0xf]  ;;  %v8964_v50 = vld [vmem:[%s10338_s30 + $0x174] sm:$0xf0]  ;;  %v8962_v54 = vld [vmem:[%s10338_s30 + $0x16c] sm:$0xf] }
 0x7c6   : > { %5666 = vperm.xlu1 %9322, %v9333_v49   ;;  %v9345_v15 = vpop.eup %9344  ;;  %9356 = vrcp.f32 %v5433_v53  ;;  %v8447_v49 = vld [vmem:[%s10338_s30 + $0x1c8] sm:$0xf]  ;;  %5995 = vmatpush.bf16.msra.mxu1 %v8444_v14  ;;  %v8972_v53 = vld [vmem:[%s10338_s30 + $0x1b4] sm:$0xf0]  ;;  %v8400_v35 = vor.u32 %v8964_v50, %v8399_v30  ;;  %v8401_v3 = vld [vmem:[%s10338_s30 + $0x178] sm:$0xf0] }
 0x7c7   : > { %5656 = vperm.xlu0 %9321, %v9335_v40   ;;  %v9347_v6 = vpop.eup %9346  ;;  %9358 = vrcp.f32 %v5632_v5  ;;  %5946 = vmatpush.bf16.msra.mxu0 %v8440_v57  ;;  %v8959_v13 = vld [vmem:[%s10338_s30 + $0x14c] sm:$0xf0]  ;;  %v8957_v27 = vld [vmem:[%s10338_s30 + $0x144] sm:$0xf]  ;;  %v8377_v8 = vld [vmem:[%s10338_s30 + $0x150] sm:$0xf0] }
 0x7c8   : > { %v9349_v34 = vpop.eup %9348  ;;  %9360 = vrcp.f32 %v5437_v2  ;;  %v8960_v42 = vld [vmem:[%s10338_s30 + $0x154] sm:$0xf0]  ;;  %v8385_v25 = vld [vmem:[%s10338_s30 + $0x158] sm:$0xf0]  ;;  %v8359_v52 = vld [vmem:[%s10338_s30 + $0x120] sm:$0xf] }
 0x7c9   : > { %v9351_v39 = vpop.eup %9350  ;;  %9362 = vrcp.f32 %v5436_v44  ;;  %v8967_v44 = vld [vmem:[%s10338_s30 + $0x18c] sm:$0xf0]  ;;  %v8953_v4 = vld [vmem:[%s10338_s30 + $0x124] sm:$0xf]  ;;  %v8956_v14 = vld [vmem:[%s10338_s30 + $0x134] sm:$0xf0] }
 0x7ca   : > { %v9353_v33 = vpop.eup %9352  ;;  %9364 = vrcp.f32 %v5435_v36  ;;  %v8955_v47 = vld [vmem:[%s10338_s30 + $0x12c] sm:$0xf0]  ;;  %v8569_v50 = vld [vmem:[%s10338_s30 + $0xd0] sm:$0xf0] }
 0x7cb   : > { %v9355_v38 = vpop.eup %9354  ;;  %9366 = vrcp.f32 %v5440_v18  ;;  %v8415_v18 = vld [vmem:[%s10338_s30 + $0x188] sm:$0xf]  ;;  %v8360_v57 = vor.u32 %v8955_v47, %v8359_v52  ;;  %v8939_v52 = vld [vmem:[%s10338_s30 + $0xac] sm:$0xf0]  ;;  %v8937_v47 = vld [vmem:[%s10338_s30 + $0xa4] sm:$0xf] }
 0x7cc   : > { %v9357_v21 = vpop.eup %9356  ;;  %9368 = vrcp.f32 %v5439_v20 }
 0x7cd   : > { %5691 = vperm.xlu2 %9323, %v9337_v9   ;;  %v9359_v7 = vpop.eup %9358  ;;  %9370 = vrcp.f32 %v5438_v31  ;;  %v8448_v9 = vor.u32 %v8976_v19, %v8447_v49  ;;  %v8966_v31 = vld [vmem:[%s10338_s30 + $0x18c] sm:$0xf]  ;;  %v8361_v49 = vld [vmem:[%s10338_s30 + $0x130] sm:$0xf0]  ;;  %v8367_v19 = vld [vmem:[%s10338_s30 + $0x128] sm:$0xf] }
 0x7ce   : > { %5686 = vperm.xlu1 %9322, %v9339_v55   ;;  %v9361_v46 = vpop.eup %9360  ;;  %9372 = vrcp.f32 %v5443_v11  ;;  %v8449_v55 = vld [vmem:[%s10338_s30 + $0x1d8] sm:$0xf0]  ;;  %v8391_v11 = vld [vmem:[%s10338_s30 + $0x160] sm:$0xf] }
 0x7cf   : > { %5681 = vperm.xlu0 %9321, %v9341_v63   ;;  %v9363_v51 = vpop.eup %9362  ;;  %9374 = vrcp.f32 %v5442_v43  ;;  %v8452_v62 = vor.u32 %v8974_v1, %v8449_v55  ;;  %6044 = vmatpush.bf16.msra.mxu2 %v8448_v9  ;;  %v8954_v9 = vld [vmem:[%s10338_s30 + $0x12c] sm:$0xf]  ;;  %v8369_v1 = vld [vmem:[%s10338_s30 + $0x138] sm:$0xf0]  ;;  %v8368_v55 = vor.u32 %v8956_v14, %v8367_v19 }
 0x7d0   : > { %v9365_v59 = vpop.eup %9364  ;;  %9376 = vrcp.f32 %v5441_v60  ;;  %v8961_v60 = vld [vmem:[%s10338_s30 + $0x164] sm:$0xf] }
 0x7d1   : > { %v9367_v29 = vpop.eup %9366  ;;  %9378 = vrcp.f32 %v5446_v22  ;;  %6093 = vmatpush.bf16.msra.mxu3 %v8452_v62  ;;  %v8951_v62 = vld [vmem:[%s10338_s30 + $0x10c] sm:$0xf0] }
 0x7d2   : > { %v9369_v26 = vpop.eup %9368  ;;  %9380 = vrcp.f32 %v5445_v58  ;;  %v8375_v58 = vld [vmem:[%s10338_s30 + $0x140] sm:$0xf] }
 0x7d3   : > { %v9371_v48 = vpop.eup %9370  ;;  %9382 = vrcp.f32 %v5444_v37  ;;  %v8376_v24 = vor.u32 %v8959_v13, %v8375_v58  ;;  %v8383_v37 = vld [vmem:[%s10338_s30 + $0x148] sm:$0xf] }
 0x7d4   : > { %v9373_v23 = vpop.eup %9372  ;;  %9384 = vrcp.f32 %v5448_v10  ;;  %v8384_v10 = vor.u32 %v8960_v42, %v8383_v37  ;;  %v8938_v37 = vld [vmem:[%s10338_s30 + $0xac] sm:$0xf] }
 0x7d5   : > { %5706 = vperm.xlu2 %9323, %v9343_v16   ;;  %v9375_v12 = vpop.eup %9374  ;;  %v8971_v16 = vld [vmem:[%s10338_s30 + $0x1ac] sm:$0xf0]  ;;  %9386 = vrcp.f32 %v5447_v32 }
 0x7d6   : > { %5701 = vperm.xlu1 %9322, %v9345_v15   ;;  %v9377_v61 = vpop.eup %9376  ;;  %v8425_v15 = vld [vmem:[%s10338_s30 + $0x1b0] sm:$0xf0] }
 0x7d7   : > { %5696 = vperm.xlu0 %9321, %v9347_v6   ;;  %v9379_v40 = vpop.eup %9378  ;;  %v8424_v6 = vor.u32 %v8971_v16, %v8423_v0  ;;  %v8428_v45 = vor.u32 %v8969_v41, %v8425_v15  ;;  %v8372_v0 = vor.u32 %v8954_v9, %v8369_v1  ;;  %v8949_v41 = vld [vmem:[%s10338_s30 + $0x104] sm:$0xf]  ;;  %v8345_v15 = vld [vmem:[%s10338_s30 + $0x110] sm:$0xf0] }
 0x7d8   : > { %v9381_v63 = vpop.eup %9380 }
 0x7d9   : > { %v9383_v17 = vpop.eup %9382  ;;  %5947 = vmatpush.bf16.msra.mxu0 %v8424_v6  ;;  %5996 = vmatpush.bf16.msra.mxu1 %v8428_v45  ;;  %v8351_v6 = vld [vmem:[%s10338_s30 + $0x108] sm:$0xf]  ;;  %v8952_v45 = vld [vmem:[%s10338_s30 + $0x114] sm:$0xf0] }
 0x7dd   : > { %5721 = vperm.xlu2 %9323, %v9349_v34   ;;  %v8431_v34 = vld [vmem:[%s10338_s30 + $0x1a8] sm:$0xf] }
 0x7de   : > { %5716 = vperm.xlu1 %9322, %v9351_v39   ;;  %v8970_v39 = vld [vmem:[%s10338_s30 + $0x1ac] sm:$0xf]  ;;  %v8432_v5 = vor.u32 %v8972_v53, %v8431_v34  ;;  %v8352_v53 = vor.u32 %v8952_v45, %v8351_v6  ;;  %v8935_v6 = vld [vmem:[%s10338_s30 + $0x8c] sm:$0xf0]  ;;  %v8933_v45 = vld [vmem:[%s10338_s30 + $0x84] sm:$0xf] }
 0x7df   : > { %5711 = vperm.xlu0 %9321, %v9353_v33   ;;  %v8433_v33 = vld [vmem:[%s10338_s30 + $0x1b8] sm:$0xf0]  ;;  %v8950_v34 = vld [vmem:[%s10338_s30 + $0x10c] sm:$0xf] }
 0x7e0   : > { %v8436_v2 = vor.u32 %v8970_v39, %v8433_v33  ;;  %6045 = vmatpush.bf16.msra.mxu2 %v8432_v5  ;;  %v8353_v39 = vld [vmem:[%s10338_s30 + $0x118] sm:$0xf0]  ;;  %v8591_v33 = vld [vmem:[%s10338_s30 + $0xe8] sm:$0xf] }
 0x7e1   : > { %v8356_v5 = vor.u32 %v8950_v34, %v8353_v39  ;;  %v5605_v34 = vld [vmem:[#allocation5 + $0xe0] sm:$0xff] }
 0x7e2   : > { %6094 = vmatpush.bf16.msra.mxu3 %v8436_v2  ;;  %v8948_v2 = vld [vmem:[%s10338_s30 + $0xf4] sm:$0xf0] }
 0x7e5   : > { %5472 = vperm.xlu2 %9323, %v9355_v38   ;;  %v8407_v38 = vld [vmem:[%s10338_s30 + $0x180] sm:$0xf] }
 0x7e6   : > { %5467 = vperm.xlu1 %9322, %v9357_v21   ;;  %v8965_v21 = vld [vmem:[%s10338_s30 + $0x184] sm:$0xf]  ;;  %v8408_v36 = vor.u32 %v8967_v44, %v8407_v38  ;;  %v8946_v38 = vld [vmem:[%s10338_s30 + $0xec] sm:$0xf]  ;;  %v8592_v44 = vor.u32 %v8948_v2, %v8591_v33 }
 0x7e7   : > { %5726 = vperm.xlu0 %9321, %v9359_v7   ;;  %v8409_v7 = vld [vmem:[%s10338_s30 + $0x190] sm:$0xf0] }
 0x7e8   : > { %v8412_v20 = vor.u32 %v8965_v21, %v8409_v7  ;;  %5948 = vmatpush.bf16.msra.mxu0 %v8408_v36  ;;  %v8593_v21 = vld [vmem:[%s10338_s30 + $0xf8] sm:$0xf0]  ;;  %v8583_v7 = vld [vmem:[%s10338_s30 + $0xe0] sm:$0xf] }
 0x7e9   : > { %v8596_v36 = vor.u32 %v8946_v38, %v8593_v21 }
 0x7ea   : > { %5997 = vmatpush.bf16.msra.mxu1 %v8412_v20  ;;  %v8945_v20 = vld [vmem:[%s10338_s30 + $0xe4] sm:$0xf] }
 0x7ed   : > { %5487 = vperm.xlu2 %9323, %v9361_v46   ;;  %v8968_v46 = vld [vmem:[%s10338_s30 + $0x194] sm:$0xf0] }
 0x7ee   : > { %5482 = vperm.xlu1 %9322, %v9363_v51   ;;  %v8416_v51 = vor.u32 %v8968_v46, %v8415_v18  ;;  %v8947_v18 = vld [vmem:[%s10338_s30 + $0xec] sm:$0xf0] }
 0x7ef   : > { %5477 = vperm.xlu0 %9321, %v9365_v59   ;;  %v8417_v59 = vld [vmem:[%s10338_s30 + $0x198] sm:$0xf0]  ;;  %v8584_v46 = vor.u32 %v8947_v18, %v8583_v7  ;;  %v8932_v7 = vld [vmem:[%s10338_s30 + $0x74] sm:$0xf0]  ;;  %v8930_v18 = vld [vmem:[%s10338_s30 + $0x6c] sm:$0xf] }
 0x7f0   : > { %v8420_v43 = vor.u32 %v8966_v31, %v8417_v59  ;;  %6046 = vmatpush.bf16.msra.mxu2 %v8416_v51  ;;  %v8585_v51 = vld [vmem:[%s10338_s30 + $0xf0] sm:$0xf0]  ;;  %v8575_v59 = vld [vmem:[%s10338_s30 + $0xc8] sm:$0xf] }
 0x7f1   : > { %v8588_v31 = vor.u32 %v8945_v20, %v8585_v51  ;;  %v8529_v20 = vld [vmem:[%s10338_s30 + $0x78] sm:$0xf0] }
 0x7f2   : > { %6095 = vmatpush.bf16.msra.mxu3 %v8420_v43  ;;  %v8532_v51 = vor.u32 %v8930_v18, %v8529_v20  ;;  %v8917_v18 = vld [vmem:[%s10338_s30 + $0x4] sm:$0xf] }
 0x7f4   : > { %6047 = vmatpush.bf16.msra.mxu2 %v8400_v35  ;;  %v5601_v35 = vld [vmem:[#allocation5 + $0x38] sm:$0xff] }
 0x7f5   : > { %5502 = vperm.xlu2 %9323, %v9367_v29   ;;  %v9385_v29 = vpop.eup %9384 }
 0x7f6   : > { %5497 = vperm.xlu1 %9322, %v9369_v26   ;;  %v8963_v26 = vld [vmem:[%s10338_s30 + $0x16c] sm:$0xf0]  ;;  %v9387_v22 = vpop.eup %9386 }
 0x7f7   : > { %5492 = vperm.xlu0 %9321, %v9371_v48   ;;  %v8393_v48 = vld [vmem:[%s10338_s30 + $0x170] sm:$0xf0]  ;;  %v8392_v28 = vor.u32 %v8963_v26, %v8391_v11  ;;  %v8944_v11 = vld [vmem:[%s10338_s30 + $0xd4] sm:$0xf0]  ;;  %v8577_v26 = vld [vmem:[%s10338_s30 + $0xd8] sm:$0xf0] }
 0x7f8   : > { %v8396_v56 = vor.u32 %v8961_v60, %v8393_v48  ;;  %6048 = vmatpush.bf16.msra.mxu2 %v8384_v10  ;;  %v8576_v43 = vor.u32 %v8944_v11, %v8575_v59  ;;  %v8931_v59 = vld [vmem:[%s10338_s30 + $0x6c] sm:$0xf0]  ;;  %v8929_v11 = vld [vmem:[%s10338_s30 + $0x64] sm:$0xf] }
 0x7f9   : > { %5949 = vmatpush.bf16.msra.mxu0 %v8392_v28  ;;  %v8943_v28 = vld [vmem:[%s10338_s30 + $0xcc] sm:$0xf0] }
 0x7fa   : > { %5998 = vmatpush.bf16.msra.mxu1 %v8396_v56  ;;  %v8941_v56 = vld [vmem:[%s10338_s30 + $0xc4] sm:$0xf] }
 0x7fc   : > { %6049 = vmatpush.bf16.msra.mxu2 %v8368_v55 }
 0x7fd   : > { %5517 = vperm.xlu2 %9323, %v9373_v23   ;;  %v8404_v23 = vor.u32 %v8962_v54, %v8401_v3  ;;  %5950 = vmatpush.bf16.msra.mxu0 %v8376_v24  ;;  %v8572_v54 = vor.u32 %v8941_v56, %v8569_v50  ;;  %v5602_v3 = vld [vmem:[#allocation5 + $0x58] sm:$0xff] }
 0x7fe   : > { %5512 = vperm.xlu1 %9322, %v9375_v12   ;;  %v8380_v12 = vor.u32 %v8957_v27, %v8377_v8  ;;  %v8559_v8 = vld [vmem:[%s10338_s30 + $0xa8] sm:$0xf] }
 0x7ff   : > { %5507 = vperm.xlu0 %9321, %v9377_v61   ;;  %6096 = vmatpush.bf16.msra.mxu3 %v8404_v23  ;;  %v8958_v61 = vld [vmem:[%s10338_s30 + $0x14c] sm:$0xf] }
 0x800   : > { %5999 = vmatpush.bf16.msra.mxu1 %v8380_v12  ;;  %v8388_v32 = vor.u32 %v8958_v61, %v8385_v25  ;;  %6050 = vmatpush.bf16.msra.mxu2 %v8352_v53  ;;  %v8940_v12 = vld [vmem:[%s10338_s30 + $0xb4] sm:$0xf0]  ;;  %v8561_v61 = vld [vmem:[%s10338_s30 + $0xb8] sm:$0xf0]  ;;  %v8551_v25 = vld [vmem:[%s10338_s30 + $0xa0] sm:$0xf] }
 0x801   : > { %5951 = vmatpush.bf16.msra.mxu0 %v8360_v57  ;;  %v8560_v42 = vor.u32 %v8940_v12, %v8559_v8  ;;  %v8564_v10 = vor.u32 %v8938_v37, %v8561_v61  ;;  %v5604_v57 = vld [vmem:[#allocation5 + $0xc8] sm:$0xff]  ;;  %v5606_v53 = vld [vmem:[#allocation5 + $0x90] sm:$0xff]  ;;  %v8505_v37 = vld [vmem:[%s10338_s30 + $0x50] sm:$0xf0] }
 0x802   : > { %v8925_v12 = vld [vmem:[%s10338_s30 + $0x44] sm:$0xf] }
 0x803   : > { %6097 = vmatpush.bf16.msra.mxu3 %v8388_v32  ;;  %v5603_v32 = vld [vmem:[#allocation5 + $0x40] sm:$0xff]  ;;  %v5609_v61 = vld [vmem:[#allocation5 + $0xa8] sm:$0xff] }
 0x804   : > { %6399 = vmatpush.bf16.msrb.mxu2 %v8592_v44 }
 0x805   : > { %5532 = vperm.xlu2 %9323, %v9379_v40   ;;  %v8364_v40 = vor.u32 %v8953_v4, %v8361_v49  ;;  %v8552_v4 = vor.u32 %v8939_v52, %v8551_v25  ;;  %v8553_v49 = vld [vmem:[%s10338_s30 + $0xb0] sm:$0xf0] }
 0x806   : > { %5527 = vperm.xlu1 %9322, %v9381_v63   ;;  %v8343_v63 = vld [vmem:[%s10338_s30 + $0x100] sm:$0xf]  ;;  %v8556_v19 = vor.u32 %v8937_v47, %v8553_v49  ;;  %v8924_v49 = vld [vmem:[%s10338_s30 + $0x34] sm:$0xf0] }
 0x807   : > { %5522 = vperm.xlu0 %9321, %v9383_v17   ;;  %6000 = vmatpush.bf16.msra.mxu1 %v8364_v40  ;;  %v8344_v16 = vor.u32 %v8951_v62, %v8343_v63  ;;  %v8348_v17 = vor.u32 %v8949_v41, %v8345_v15  ;;  %v8936_v63 = vld [vmem:[%s10338_s30 + $0x94] sm:$0xf0]  ;;  %v8934_v62 = vld [vmem:[%s10338_s30 + $0x8c] sm:$0xf]  ;;  %v8545_v41 = vld [vmem:[%s10338_s30 + $0x98] sm:$0xf0] }
 0x808   : > { %6098 = vmatpush.bf16.msra.mxu3 %v8372_v0  ;;  %6400 = vmatpush.bf16.msrb.mxu2 %v8576_v43  ;;  %v8543_v0 = vld [vmem:[%s10338_s30 + $0x88] sm:$0xf]  ;;  %v8548_v15 = vor.u32 %v8934_v62, %v8545_v41  ;;  %v8489_v62 = vld [vmem:[%s10338_s30 + $0x30] sm:$0xf0]  ;;  %v5612_v41 = vld [vmem:[#allocation5 + $0x28] sm:$0xff] }
 0x809   : > { %5952 = vmatpush.bf16.msra.mxu0 %v8344_v16  ;;  %v8544_v16 = vor.u32 %v8936_v63, %v8543_v0  ;;  %v8921_v63 = vld [vmem:[%s10338_s30 + $0x24] sm:$0xf] }
 0x80b   : > { %6001 = vmatpush.bf16.msra.mxu1 %v8348_v17  ;;  %v8535_v17 = vld [vmem:[%s10338_s30 + $0x80] sm:$0xf] }
 0x80c   : > { %6099 = vmatpush.bf16.msra.mxu3 %v8356_v5  ;;  %6401 = vmatpush.bf16.msrb.mxu2 %v8560_v42  ;;  %v8536_v39 = vor.u32 %v8935_v6, %v8535_v17  ;;  %v8537_v5 = vld [vmem:[%s10338_s30 + $0x90] sm:$0xf0]  ;;  %v8508_v42 = vor.u32 %v8925_v12, %v8505_v37 }
 0x80d   : > { %6301 = vmatpush.bf16.msrb.mxu0 %v8584_v46  ;;  %v8540_v33 = vor.u32 %v8933_v45, %v8537_v5  ;;  %v8920_v5 = vld [vmem:[%s10338_s30 + $0x14] sm:$0xf0] }
 0x80e   : > { %5542 = vperm.xlu1 %9322, %v9385_v29   ;;  %v8942_v29 = vld [vmem:[%s10338_s30 + $0xcc] sm:$0xf] }
 0x80f   : > { %5537 = vperm.xlu0 %9321, %v9387_v22   ;;  %6350 = vmatpush.bf16.msrb.mxu1 %v8588_v31  ;;  %v8580_v48 = vor.u32 %v8942_v29, %v8577_v26  ;;  %v8567_v22 = vld [vmem:[%s10338_s30 + $0xc0] sm:$0xf]  ;;  %v5608_v29 = vld [vmem:[#allocation5 + $0xc0] sm:$0xff]  ;;  %v5607_v26 = vld [vmem:[#allocation5 + $0x70] sm:$0xff] }
 0x810   : > { %6448 = vmatpush.bf16.msrb.mxu3 %v8596_v36  ;;  %v8568_v30 = vor.u32 %v8943_v28, %v8567_v22  ;;  %6402 = vmatpush.bf16.msrb.mxu2 %v8544_v16  ;;  %v8527_v36 = vld [vmem:[%s10338_s30 + $0x68] sm:$0xf]  ;;  %v8519_v31 = vld [vmem:[%s10338_s30 + $0x60] sm:$0xf]  ;;  %v8521_v22 = vld [vmem:[%s10338_s30 + $0x70] sm:$0xf0]  ;;  %v8492_v16 = vor.u32 %v8921_v63, %v8489_v62 }
 0x811   : > { %v8528_v46 = vor.u32 %v8932_v7, %v8527_v36  ;;  %v8524_v28 = vor.u32 %v8929_v11, %v8521_v22  ;;  %v5615_v22 = vld [vmem:[#allocation5 + $0x20] sm:$0xff]  ;;  %v5422_v62 = vld [vmem:[#allocation5 + $0x68] sm:$0xff] }
 0x812   : > { %6302 = vmatpush.bf16.msrb.mxu0 %v8568_v30 }
 0x813   : > { %6351 = vmatpush.bf16.msrb.mxu1 %v8572_v54  ;;  %v8511_v54 = vld [vmem:[%s10338_s30 + $0x48] sm:$0xf] }
 0x814   : > { %6449 = vmatpush.bf16.msrb.mxu3 %v8580_v48  ;;  %6403 = vmatpush.bf16.msrb.mxu2 %v8528_v46  ;;  %v8520_v48 = vor.u32 %v8931_v59, %v8519_v31  ;;  %v8473_v46 = vld [vmem:[%s10338_s30 + $0x10] sm:$0xf0]  ;;  %v5613_v59 = vld [vmem:[#allocation5 + $0xa0] sm:$0xff] }
 0x815   : > { %v8476_v20 = vor.u32 %v8917_v18, %v8473_v46 }
 0x816   : > { %6303 = vmatpush.bf16.msrb.mxu0 %v8552_v4  ;;  %v8495_v4 = vld [vmem:[%s10338_s30 + $0x28] sm:$0xf] }
 0x817   : > { %6352 = vmatpush.bf16.msrb.mxu1 %v8556_v19  ;;  %v5672_v55 = vpop.permute.xlu2 %5671  ;;  %v8922_v19 = vld [vmem:[%s10338_s30 + $0x2c] sm:$0xf] }
 0x818   : > { %6450 = vmatpush.bf16.msrb.mxu3 %v8564_v10  ;;  %v5733_v38 = vmul.f32 %v5672_v55, %v5605_v34  ;;  %v5610_v10 = vld [vmem:[#allocation5 + $0xd0] sm:$0xff] }
 0x81a   : > { %6304 = vmatpush.bf16.msrb.mxu0 %v8536_v39  ;;  %v8479_v39 = vld [vmem:[%s10338_s30 + $0x8] sm:$0xf] }
 0x81b   : > { %6353 = vmatpush.bf16.msrb.mxu1 %v8540_v33  ;;  %v8918_v33 = vld [vmem:[%s10338_s30 + $0xc] sm:$0xf] }
 0x81c   : > { %6451 = vmatpush.bf16.msrb.mxu3 %v8548_v15  ;;  %v5611_v15 = vld [vmem:[#allocation5 + $0x10] sm:$0xff] }
 0x81e   : > { %6305 = vmatpush.bf16.msrb.mxu0 %v8520_v48 }
 0x81f   : > { %v5677_v2 = vpop.permute.xlu2 %5676  ;;  %6354 = vmatpush.bf16.msrb.mxu1 %v8524_v28 }
 0x820   : > { %v5734_v44 = vmul.f32 %v5677_v2, %v5606_v53  ;;  %6452 = vmatpush.bf16.msrb.mxu3 %v8532_v51  ;;  %v8480_v2 = vor.u32 %v8920_v5, %v8479_v39  ;;  %v5614_v51 = vld [vmem:[#allocation5 + $0xf8] sm:$0xff] }
 0x822   : > { %v5747_v21 = vpack.c.bf16 %v5734_v44, %v5733_v38  ;;  %v8481_v38 = vld [vmem:[%s10338_s30 + $0x18] sm:$0xf0]  ;;  %v8471_v44 = vld [vmem:[%s10338_s30] sm:$0xf] }
 0x823   : > { %6355 = vmatpush.bf16.msrb.mxu1 %v8508_v42  ;;  %v8484_v36 = vor.u32 %v8918_v33, %v8481_v38 }
 0x827   : > { %v5692_v52 = vpop.permute.xlu2 %5691  ;;  %6356 = vmatpush.bf16.msrb.mxu1 %v8492_v16  ;;  %v5421_v16 = vld [vmem:[#allocation5 + $0x50] sm:$0xff] }
 0x828   : > { %v5737_v47 = vmul.f32 %v5692_v52, %v5609_v61 }
 0x82b   : > { %6357 = vmatpush.bf16.msrb.mxu1 %v8476_v20 }
 0x82f   : > { %v5707_v6 = vpop.permute.xlu2 %5706 }
 0x830   : > { %v5662_v27 = vpop.permute.xlu1 %5661  ;;  %v5740_v45 = vmul.f32 %v5707_v6, %v5612_v41 }
 0x831   : > { %v5652_v60 = vpop.permute.xlu0 %5651  ;;  %v5731_v14 = vmul.f32 %v5662_v27, %v5603_v32 }
 0x832   : > { %v5729_v58 = vmul.f32 %v5652_v60, %v5601_v35  ;;  %v8928_v35 = vld [vmem:[%s10338_s30 + $0x54] sm:$0xf0] }
 0x838   : > { %v5667_v40 = vpop.permute.xlu1 %5666 }
 0x839   : > { %v5657_v23 = vpop.permute.xlu0 %5656  ;;  %v5732_v9 = vmul.f32 %v5667_v40, %v5604_v57  ;;  %v8496_v40 = vor.u32 %v8924_v49, %v8495_v4 }
 0x83a   : > { %v5730_v13 = vmul.f32 %v5657_v23, %v5602_v3  ;;  %v8926_v3 = vld [vmem:[%s10338_s30 + $0x4c] sm:$0xf]  ;;  %v8512_v23 = vor.u32 %v8928_v35, %v8511_v54 }
 0x83b   : > { %v5746_v1 = vpack.c.bf16 %v5732_v9, %v5731_v14  ;;  %v8497_v14 = vld [vmem:[%s10338_s30 + $0x38] sm:$0xf0]  ;;  %v8487_v9 = vld [vmem:[%s10338_s30 + $0x20] sm:$0xf]  ;;  %v5417_v35 = vld [vmem:[#allocation5 + $0xb0] sm:$0xff] }
 0x83c   : > { %v5745_v24 = vpack.c.bf16 %v5730_v13, %v5729_v58  ;;  %v8513_v58 = vld [vmem:[%s10338_s30 + $0x58] sm:$0xf0]  ;;  %v8503_v13 = vld [vmem:[%s10338_s30 + $0x40] sm:$0xf]  ;;  %6404 = vmatpush.bf16.msrb.mxu2 %v8512_v23  ;;  %v8500_v55 = vor.u32 %v8922_v19, %v8497_v14 }
 0x83d   : > { %v8516_v27 = vor.u32 %v8926_v3, %v8513_v58  ;;  %v5418_v3 = vld [vmem:[#allocation5] sm:$0xff] }
 0x83e   : > { %5953 = vmatmul.bf16.vlgmr.msra.gmra.mxu0 %v5745_v24  ;;  %6002 = vmatmul.bf16.vlgmr.msra.gmra.mxu1 %v5745_v24 }
 0x83f   : > { %6051 = vmatmul.bf16.vlgmr.msra.gmra.mxu2 %v5745_v24  ;;  %6100 = vmatmul.bf16.vlgmr.msra.gmra.mxu3 %v5745_v24  ;;  %v8927_v24 = vld [vmem:[%s10338_s30 + $0x4c] sm:$0xf0] }
 0x840   : > { %v5687_v43 = vpop.permute.xlu1 %5686  ;;  %v8504_v8 = vor.u32 %v8927_v24, %v8503_v13  ;;  %6453 = vmatpush.bf16.msrb.mxu3 %v8516_v27  ;;  %6405 = vmatpush.bf16.msrb.mxu2 %v8496_v40 }
 0x841   : > { %v5682_v60 = vpop.permute.xlu0 %5681  ;;  %v5736_v56 = vmul.f32 %v5687_v43, %v5608_v29 }
 0x842   : > { %v5735_v30 = vmul.f32 %v5682_v60, %v5607_v26  ;;  %6306 = vmatpush.bf16.msrb.mxu0 %v8504_v8  ;;  %v5616_v60 = vld [vmem:[#allocation5 + $0x98] sm:$0xff] }
 0x844   : > { %v5748_v50 = vpack.c.bf16 %v5736_v56, %v5735_v30  ;;  %6454 = vmatpush.bf16.msrb.mxu3 %v8500_v55  ;;  %6406 = vmatpush.bf16.msrb.mxu2 %v8480_v2  ;;  %v5722_v56 = vpop.permute.xlu2 %5721 }
 0x845   : > { %v5743_v30 = vmul.f32 %v5722_v56, %v5615_v22  ;;  %v5425_v22 = vld [vmem:[#allocation5 + $0x80] sm:$0xff]  ;;  %v5426_v56 = vld [vmem:[#allocation5 + $0x88] sm:$0xff] }
 0x848   : > { %v5702_v17 = vpop.permute.xlu1 %5701  ;;  %6455 = vmatpush.bf16.msrb.mxu3 %v8484_v36 }
 0x849   : > { %v5697_v25 = vpop.permute.xlu0 %5696  ;;  %v5739_v34 = vmul.f32 %v5702_v17, %v5611_v15 }
 0x84a   : > { %v5738_v32 = vmul.f32 %v5697_v25, %v5610_v10  ;;  %v5419_v25 = vld [vmem:[#allocation5 + $0xd8] sm:$0xff] }
 0x84b   : > { %v5750_v53 = vpack.c.bf16 %v5740_v45, %v5739_v34 }
 0x84c   : > { %v5749_v57 = vpack.c.bf16 %v5738_v32, %v5737_v47  ;;  %v5473_v58 = vpop.permute.xlu2 %5472  ;;  %v5420_v47 = vld [vmem:[#allocation5 + $0x18] sm:$0xff] }
 0x84d   : > { %v5546_v13 = vmul.f32 %v5473_v58, %v5418_v3 }
 0x84e   : > { %5958 = vmatmul.bf16.gmra.mxu0 %v5746_v1  ;;  %6007 = vmatmul.bf16.gmra.mxu1 %v5746_v1 }
 0x84f   : > { %6056 = vmatmul.bf16.gmra.mxu2 %v5746_v1  ;;  %6105 = vmatmul.bf16.gmra.mxu3 %v5746_v1  ;;  %v8923_v1 = vld [vmem:[%s10338_s30 + $0x2c] sm:$0xf0] }
 0x850   : > { %v8488_v0 = vor.u32 %v8923_v1, %v8487_v9  ;;  %v5717_v31 = vpop.permute.xlu1 %5716 }
 0x851   : > { %v5712_v11 = vpop.permute.xlu0 %5711  ;;  %v5742_v29 = vmul.f32 %v5717_v31, %v5614_v51 }
 0x852   : > { %6307 = vmatpush.bf16.msrb.mxu0 %v8488_v0  ;;  %v5741_v43 = vmul.f32 %v5712_v11, %v5613_v59 }
 0x854   : > { %v5751_v26 = vpack.c.bf16 %v5742_v29, %v5741_v43  ;;  %v5488_v15 = vpop.permute.xlu2 %5487 }
 0x855   : > { %v5549_v17 = vmul.f32 %v5488_v15, %v5421_v16 }
 0x858   : > { %v5468_v54 = vpop.permute.xlu1 %5467 }
 0x859   : > { %v5727_v48 = vpop.permute.xlu0 %5726  ;;  %v5545_v23 = vmul.f32 %v5468_v54, %v5417_v35 }
 0x85a   : > { %v5744_v28 = vmul.f32 %v5727_v48, %v5616_v60 }
 0x85b   : > { %v5561_v8 = vpack.c.bf16 %v5546_v13, %v5545_v23 }
 0x85c   : > { %v5503_v36 = vpop.permute.xlu2 %5502 }
 0x85e   : > { %5963 = vmatmul.bf16.gmra.mxu0 %v5747_v21  ;;  %6012 = vmatmul.bf16.gmra.mxu1 %v5747_v21 }
 0x85f   : > { %6061 = vmatmul.bf16.gmra.mxu2 %v5747_v21  ;;  %6110 = vmatmul.bf16.gmra.mxu3 %v5747_v21  ;;  %v8919_v21 = vld [vmem:[%s10338_s30 + $0xc] sm:$0xf0] }
 0x860   : > { %v8472_v7 = vor.u32 %v8919_v21, %v8471_v44  ;;  %v5483_v52 = vpop.permute.xlu1 %5482  ;;  %v5423_v21 = vld [vmem:[#allocation5 + $0x30] sm:$0xff] }
 0x861   : > { %v5478_v10 = vpop.permute.xlu0 %5477 }
 0x862   : > { %6308 = vmatpush.bf16.msrb.mxu0 %v8472_v7  ;;  %v5547_v32 = vmul.f32 %v5478_v10, %v5419_v25  ;;  %v5424_v7 = vld [vmem:[#allocation5 + $0x48] sm:$0xff] }
 0x863   : > { %v5552_v46 = vmul.f32 %v5503_v36, %v5424_v7 }
 0x868   : > { %v5498_v44 = vpop.permute.xlu1 %5497 }
 0x869   : > { %v5493_v63 = vpop.permute.xlu0 %5492  ;;  %v5551_v18 = vmul.f32 %v5498_v44, %v5423_v21 }
 0x86a   : > { %v5550_v41 = vmul.f32 %v5493_v63, %v5422_v62 }
 0x86b   : > { %v5564_v11 = vpack.c.bf16 %v5552_v46, %v5551_v18  ;;  %v5429_v18 = vld [vmem:[#allocation5 + $0x60] sm:$0xff] }
 0x86c   : > { %v5563_v39 = vpack.c.bf16 %v5550_v41, %v5549_v17 }
 0x86e   : > { %5968 = vmatmul.bf16.gmra.mxu0 %v5748_v50  ;;  %6017 = vmatmul.bf16.gmra.mxu1 %v5748_v50 }
 0x86f   : > { %6066 = vmatmul.bf16.gmra.mxu2 %v5748_v50  ;;  %6115 = vmatmul.bf16.gmra.mxu3 %v5748_v50  ;;  %v5752_v50 = vpack.c.bf16 %v5744_v28, %v5743_v30 }
 0x870   : > { %v5513_v28 = vpop.permute.xlu1 %5512 }
 0x871   : > { %v5508_v48 = vpop.permute.xlu0 %5507 }
 0x872   : > { %v5553_v30 = vmul.f32 %v5508_v48, %v5425_v22 }
 0x878   : > { %v5528_v7 = vpop.permute.xlu1 %5527 }
 0x879   : > { %v5557_v48 = vmul.f32 %v5528_v7, %v5429_v18  ;;  %v5432_v7 = vld [vmem:[#allocation5 + $0x78] sm:$0xff] }
 0x87e   : > { %5973 = vmatmul.bf16.gmra.mxu0 %v5749_v57  ;;  %6022 = vmatmul.bf16.gmra.mxu1 %v5749_v57 }
 0x87f   : > { %6071 = vmatmul.bf16.gmra.mxu2 %v5749_v57  ;;  %6120 = vmatmul.bf16.gmra.mxu3 %v5749_v57  ;;  %v5548_v57 = vmul.f32 %v5483_v52, %v5420_v47  ;;  %v5523_v52 = vpop.permute.xlu0 %5522  ;;  %v5428_v47 = vld [vmem:[#allocation5 + $0xb8] sm:$0xff] }
 0x881   : > { %v5562_v14 = vpack.c.bf16 %v5548_v57, %v5547_v32  ;;  %v5518_v32 = vpop.permute.xlu2 %5517  ;;  %v5427_v57 = vld [vmem:[#allocation5 + $0xe8] sm:$0xff] }
 0x882   : > { %v5555_v63 = vmul.f32 %v5518_v32, %v5427_v57 }
 0x889   : > { %v5533_v46 = vpop.permute.xlu2 %5532 }
 0x88e   : > { %5978 = vmatmul.bf16.gmra.mxu0 %v5750_v53  ;;  %6027 = vmatmul.bf16.gmra.mxu1 %v5750_v53 }
 0x88f   : > { %6076 = vmatmul.bf16.gmra.mxu2 %v5750_v53  ;;  %6125 = vmatmul.bf16.gmra.mxu3 %v5750_v53 }
 0x89e   : > { %5983 = vmatmul.bf16.gmra.mxu0 %v5751_v26  ;;  %6032 = vmatmul.bf16.gmra.mxu1 %v5751_v26 }
 0x89f   : > { %6081 = vmatmul.bf16.gmra.mxu2 %v5751_v26  ;;  %6130 = vmatmul.bf16.gmra.mxu3 %v5751_v26 }
 0x8ae   : > { %5988 = vmatmul.bf16.gmra.mxu0 %v5752_v50  ;;  %6037 = vmatmul.bf16.gmra.mxu1 %v5752_v50 }
 0x8af   : > { %6086 = vmatmul.bf16.gmra.mxu2 %v5752_v50  ;;  %6135 = vmatmul.bf16.gmra.mxu3 %v5752_v50  ;;  %v5554_v50 = vmul.f32 %v5513_v28, %v5426_v56 }
 0x8b1   : > { %v5565_v58 = vpack.c.bf16 %v5554_v50, %v5553_v30 }
 0x8bb   : > { %v12697_v24 = vpop.f32.mrf.mxu0  ;;  %v12699_v27 = vpop.f32.mrf.mxu1 }
 0x8be   : > { %6309 = vmatmul.bf16.vlgmr.msrb.gmra.mxu0 %v5561_v8  ;;  %6358 = vmatmul.bf16.vlgmr.msrb.gmra.mxu1 %v5561_v8 }
 0x8bf   : > { %6407 = vmatmul.bf16.vlgmr.msrb.gmra.mxu2 %v5561_v8  ;;  %6456 = vmatmul.bf16.vlgmr.msrb.gmra.mxu3 %v5561_v8 }
 0x8c2   : > { %v12701_v12 = vpop.f32.mrf.mxu2  ;;  %v12703_v37 = vpop.f32.mrf.mxu3 }
 0x8c3   : > { %v12705_v42 = vpop.f32.mrf.mxu0  ;;  %v12707_v61 = vpop.f32.mrf.mxu1 }
 0x8ca   : > { %v12709_v4 = vpop.f32.mrf.mxu2  ;;  %v12711_v49 = vpop.f32.mrf.mxu3 }
 0x8cb   : > { %v12713_v19 = vpop.f32.mrf.mxu0  ;;  %v12715_v40 = vpop.f32.mrf.mxu1 }
 0x8ce   : > { %6314 = vmatmul.bf16.gmra.mxu0 %v5562_v14  ;;  %6363 = vmatmul.bf16.gmra.mxu1 %v5562_v14 }
 0x8cf   : > { %6412 = vmatmul.bf16.gmra.mxu2 %v5562_v14  ;;  %6461 = vmatmul.bf16.gmra.mxu3 %v5562_v14  ;;  %v5556_v14 = vmul.f32 %v5523_v52, %v5428_v47 }
 0x8d1   : > { %v5566_v17 = vpack.c.bf16 %v5556_v14, %v5555_v63  ;;  %v5538_v14 = vpop.permute.xlu0 %5537  ;;  %v5431_v63 = vld [vmem:[#allocation5 + $0x8] sm:$0xff] }
 0x8d2   : > { %v12717_v9 = vpop.f32.mrf.mxu2  ;;  %v12719_v1 = vpop.f32.mrf.mxu3  ;;  %v5559_v18 = vmul.f32 %v5538_v14, %v5431_v63 }
 0x8d3   : > { %v12721_v55 = vpop.f32.mrf.mxu0  ;;  %v12723_v0 = vpop.f32.mrf.mxu1 }
 0x8da   : > { %v12725_v6 = vpop.f32.mrf.mxu2  ;;  %v12727_v45 = vpop.f32.mrf.mxu3 }
 0x8db   : > { %v12729_v34 = vpop.f32.mrf.mxu0  ;;  %v12731_v53 = vpop.f32.mrf.mxu1 }
 0x8de   : > { %6319 = vmatmul.bf16.gmra.mxu0 %v5563_v39  ;;  %6368 = vmatmul.bf16.gmra.mxu1 %v5563_v39 }
 0x8df   : > { %6417 = vmatmul.bf16.gmra.mxu2 %v5563_v39  ;;  %6466 = vmatmul.bf16.gmra.mxu3 %v5563_v39 }
 0x8e2   : > { %v12733_v5 = vpop.f32.mrf.mxu2  ;;  %v12735_v33 = vpop.f32.mrf.mxu3 }
 0x8e3   : > { %v12737_v2 = vpop.f32.mrf.mxu0  ;;  %v12739_v38 = vpop.f32.mrf.mxu1 }
 0x8ea   : > { %v12741_v20 = vpop.f32.mrf.mxu2  ;;  %v12743_v51 = vpop.f32.mrf.mxu3 }
 0x8eb   : > { %v12745_v31 = vpop.f32.mrf.mxu0  ;;  %v12747_v59 = vpop.f32.mrf.mxu1 }
 0x8ee   : > { %6324 = vmatmul.bf16.gmra.mxu0 %v5564_v11  ;;  %6373 = vmatmul.bf16.gmra.mxu1 %v5564_v11 }
 0x8ef   : > { %6422 = vmatmul.bf16.gmra.mxu2 %v5564_v11  ;;  %6471 = vmatmul.bf16.gmra.mxu3 %v5564_v11  ;;  %v5430_v11 = vld [vmem:[#allocation5 + $0xf0] sm:$0xff] }
 0x8f0   : > { %v5558_v22 = vmul.f32 %v5533_v46, %v5430_v11 }
 0x8f2   : > { %v12749_v29 = vpop.f32.mrf.mxu2  ;;  %v12751_v43 = vpop.f32.mrf.mxu3 }
 0x8f3   : > { %v12753_v26 = vpop.f32.mrf.mxu0  ;;  %v12755_v60 = vpop.f32.mrf.mxu1 }
 0x8fa   : > { %v12757_v54 = vpop.f32.mrf.mxu2  ;;  %v12759_v35 = vpop.f32.mrf.mxu3 }
 0x8fb   : > { %v12761_v3 = vpop.f32.mrf.mxu0  ;;  %v12763_v23 = vpop.f32.mrf.mxu1 }
 0x8fe   : > { %6329 = vmatmul.bf16.gmra.mxu0 %v5565_v58  ;;  %6378 = vmatmul.bf16.gmra.mxu1 %v5565_v58 }
 0x8ff   : > { %6427 = vmatmul.bf16.gmra.mxu2 %v5565_v58  ;;  %6476 = vmatmul.bf16.gmra.mxu3 %v5565_v58  ;;  %v5567_v58 = vpack.c.bf16 %v5558_v22, %v5557_v48 }
 0x902   : > { %v12765_v13 = vpop.f32.mrf.mxu2  ;;  %v12767_v8 = vpop.f32.mrf.mxu3 }
 0x903   : > { %v12769_v10 = vpop.f32.mrf.mxu0  ;;  %v12771_v25 = vpop.f32.mrf.mxu1 }
 0x90a   : > { %v12773_v62 = vpop.f32.mrf.mxu2  ;;  %v12775_v16 = vpop.f32.mrf.mxu3 }
 0x90b   : > { %v12777_v41 = vpop.f32.mrf.mxu0  ;;  %v12779_v15 = vpop.f32.mrf.mxu1 }
 0x90e   : > { %6334 = vmatmul.bf16.gmra.mxu0 %v5566_v17  ;;  %6383 = vmatmul.bf16.gmra.mxu1 %v5566_v17 }
 0x90f   : > { %6432 = vmatmul.bf16.gmra.mxu2 %v5566_v17  ;;  %6481 = vmatmul.bf16.gmra.mxu3 %v5566_v17  ;;  %v5543_v17 = vpop.permute.xlu1 %5542 }
 0x910   : > { %v5560_v46 = vmul.f32 %v5543_v17, %v5432_v7 }
 0x912   : > { %v12781_v39 = vpop.f32.mrf.mxu2  ;;  %v12783_v44 = vpop.f32.mrf.mxu3 }
 0x913   : > { %v12785_v21 = vpop.f32.mrf.mxu0  ;;  %v12787_v36 = vpop.f32.mrf.mxu1 }
 0x91a   : > { %v12789_v28 = vpop.f32.mrf.mxu2  ;;  %v12791_v56 = vpop.f32.mrf.mxu3 }
 0x91b   : > { %v12793_v30 = vpop.f32.mrf.mxu0  ;;  %v12795_v50 = vpop.f32.mrf.mxu1 }
 0x91e   : > { %6339 = vmatmul.bf16.gmra.mxu0 %v5567_v58  ;;  %6388 = vmatmul.bf16.gmra.mxu1 %v5567_v58 }
 0x91f   : > { %6437 = vmatmul.bf16.gmra.mxu2 %v5567_v58  ;;  %6486 = vmatmul.bf16.gmra.mxu3 %v5567_v58 }
 0x922   : > { %v12797_v52 = vpop.f32.mrf.mxu2  ;;  %v12799_v47 = vpop.f32.mrf.mxu3 }
 0x923   : > { %13669 = vst [vmem:[#allocation91_spill] sm:$0xff] %v12797_v52  ;;  %v12801_v32 = vpop.f32.mrf.mxu0  ;;  %v12803_v57 = vpop.f32.mrf.mxu1  ;;  %v5568_v52 = vpack.c.bf16 %v5560_v46, %v5559_v18 }
 0x924   : > { %13670 = vst [vmem:[#allocation92_spill] sm:$0xff] %v12799_v47 }
 0x925   : > { %13671 = vst [vmem:[#allocation93_spill] sm:$0xff] %v12801_v32 }
 0x926   : > { %13672 = vst [vmem:[#allocation94_spill] sm:$0xff] %v12803_v57 }
 0x92a   : > { %v12805_v11 = vpop.f32.mrf.mxu2  ;;  %v12807_v48 = vpop.f32.mrf.mxu3 }
 0x92b   : > { %v12809_v22 = vpop.f32.mrf.mxu0  ;;  %v12811_v58 = vpop.f32.mrf.mxu1 }
 0x92c   : > { %13673 = vst [vmem:[#allocation95_spill] sm:$0xff] %v12809_v22 }
 0x92d   : > { %13674 = vst [vmem:[#allocation96_spill] sm:$0xff] %v12811_v58 }
 0x92e   : > { %6344 = vmatmul.bf16.gmra.mxu0 %v5568_v52  ;;  %6393 = vmatmul.bf16.gmra.mxu1 %v5568_v52 }
 0x92f   : > { %6442 = vmatmul.bf16.gmra.mxu2 %v5568_v52  ;;  %6491 = vmatmul.bf16.gmra.mxu3 %v5568_v52 }
 0x932   : > { %v12813_v57 = vpop.f32.mrf.mxu2  ;;  %v12815_v32 = vpop.f32.mrf.mxu3 }
 0x933   : > { %13675 = vst [vmem:[#allocation97_spill] sm:$0xff] %v12813_v57  ;;  %v12817_v47 = vpop.f32.mrf.mxu0  ;;  %v12819_v14 = vpop.f32.mrf.mxu1 }
 0x934   : > { %13676 = vst [vmem:[#allocation98_spill] sm:$0xff] %v12815_v32 }
 0x935   : > { %13677 = vst [vmem:[#allocation99_spill] sm:$0xff] %v12817_v47 }
 0x936   : > { %13678 = vst [vmem:[#allocation100_spill] sm:$0xff] %v12819_v14 }
 0x93a   : > { %v12821_v63 = vpop.f32.mrf.mxu2  ;;  %v12823_v17 = vpop.f32.mrf.mxu3 }
 0x93b   : > { %13679 = vst [vmem:[#allocation101_spill] sm:$0xff] %v12821_v63  ;;  %v6310_v7 = vpop.f32.mrf.mxu0  ;;  %v6359_v22 = vpop.f32.mrf.mxu1 }
 0x93c   : > { %13680 = vst [vmem:[#allocation102_spill] sm:$0xff] %v12823_v17  ;;  %v12826_v18 = vadd.f32 %v6310_v7, %v12697_v24  ;;  %v12829_v46 = vadd.f32 %v6359_v22, %v12699_v27 }
 0x942   : > { %v6408_v52 = vpop.f32.mrf.mxu2  ;;  %v6457_v57 = vpop.f32.mrf.mxu3 }
 0x943   : > { %v12832_v32 = vadd.f32 %v6408_v52, %v12701_v12  ;;  %v12835_v47 = vadd.f32 %v6457_v57, %v12703_v37  ;;  %v6312_v14 = vpop.f32.mrf.mxu0  ;;  %v6361_v63 = vpop.f32.mrf.mxu1 }
 0x944   : > { %v12838_v17 = vadd.f32 %v6312_v14, %v12705_v42  ;;  %v12841_v58 = vadd.f32 %v6361_v63, %v12707_v61 }
 0x94a   : > { %v6410_v24 = vpop.f32.mrf.mxu2  ;;  %v6459_v7 = vpop.f32.mrf.mxu3 }
 0x94b   : > { %v12844_v27 = vadd.f32 %v6410_v24, %v12709_v4  ;;  %v12847_v22 = vadd.f32 %v6459_v7, %v12711_v49  ;;  %v6315_v12 = vpop.f32.mrf.mxu0  ;;  %v6364_v52 = vpop.f32.mrf.mxu1 }
 0x94c   : > { %v12850_v37 = vadd.f32 %v6315_v12, %v12713_v19  ;;  %v12853_v57 = vadd.f32 %v6364_v52, %v12715_v40 }
 0x952   : > { %v6413_v42 = vpop.f32.mrf.mxu2  ;;  %v6462_v14 = vpop.f32.mrf.mxu3 }
 0x953   : > { %v12856_v61 = vadd.f32 %v6413_v42, %v12717_v9  ;;  %v12859_v63 = vadd.f32 %v6462_v14, %v12719_v1  ;;  %v6317_v4 = vpop.f32.mrf.mxu0  ;;  %v6366_v24 = vpop.f32.mrf.mxu1 }
 0x954   : > { %v12862_v49 = vadd.f32 %v6317_v4, %v12721_v55  ;;  %v12865_v7 = vadd.f32 %v6366_v24, %v12723_v0 }
 0x95a   : > { %v6415_v19 = vpop.f32.mrf.mxu2  ;;  %v6464_v12 = vpop.f32.mrf.mxu3 }
 0x95b   : > { %v12868_v40 = vadd.f32 %v6415_v19, %v12725_v6  ;;  %v12871_v52 = vadd.f32 %v6464_v12, %v12727_v45  ;;  %v6320_v9 = vpop.f32.mrf.mxu0  ;;  %v6369_v42 = vpop.f32.mrf.mxu1 }
 0x95c   : > { %v12874_v1 = vadd.f32 %v6320_v9, %v12729_v34  ;;  %v12877_v14 = vadd.f32 %v6369_v42, %v12731_v53 }
 0x962   : > { %v6418_v55 = vpop.f32.mrf.mxu2  ;;  %v6467_v4 = vpop.f32.mrf.mxu3 }
 0x963   : > { %v12880_v0 = vadd.f32 %v6418_v55, %v12733_v5  ;;  %v12883_v24 = vadd.f32 %v6467_v4, %v12735_v33  ;;  %v6322_v6 = vpop.f32.mrf.mxu0  ;;  %v6371_v19 = vpop.f32.mrf.mxu1 }
 0x964   : > { %v12886_v45 = vadd.f32 %v6322_v6, %v12737_v2  ;;  %v12889_v12 = vadd.f32 %v6371_v19, %v12739_v38 }
 0x96a   : > { %v6420_v34 = vpop.f32.mrf.mxu2  ;;  %v6469_v9 = vpop.f32.mrf.mxu3 }
 0x96b   : > { %v12892_v53 = vadd.f32 %v6420_v34, %v12741_v20  ;;  %v12895_v42 = vadd.f32 %v6469_v9, %v12743_v51  ;;  %v6325_v5 = vpop.f32.mrf.mxu0  ;;  %v6374_v55 = vpop.f32.mrf.mxu1 }
 0x96c   : > { %v12898_v33 = vadd.f32 %v6325_v5, %v12745_v31  ;;  %v12901_v4 = vadd.f32 %v6374_v55, %v12747_v59 }
 0x972   : > { %v6423_v2 = vpop.f32.mrf.mxu2  ;;  %v6472_v6 = vpop.f32.mrf.mxu3 }
 0x973   : > { %v12904_v38 = vadd.f32 %v6423_v2, %v12749_v29  ;;  %v12907_v19 = vadd.f32 %v6472_v6, %v12751_v43  ;;  %v6327_v20 = vpop.f32.mrf.mxu0  ;;  %v6376_v34 = vpop.f32.mrf.mxu1 }
 0x974   : > { %v12910_v51 = vadd.f32 %v6327_v20, %v12753_v26  ;;  %v12913_v9 = vadd.f32 %v6376_v34, %v12755_v60 }
 0x97a   : > { %v6425_v31 = vpop.f32.mrf.mxu2  ;;  %v6474_v5 = vpop.f32.mrf.mxu3 }
 0x97b   : > { %v12916_v59 = vadd.f32 %v6425_v31, %v12757_v54  ;;  %v12919_v55 = vadd.f32 %v6474_v5, %v12759_v35  ;;  %v6330_v29 = vpop.f32.mrf.mxu0  ;;  %v6379_v2 = vpop.f32.mrf.mxu1 }
 0x97c   : > { %v12922_v43 = vadd.f32 %v6330_v29, %v12761_v3  ;;  %v12925_v6 = vadd.f32 %v6379_v2, %v12763_v23 }
 0x982   : > { %v6428_v26 = vpop.f32.mrf.mxu2  ;;  %v6477_v20 = vpop.f32.mrf.mxu3 }
 0x983   : > { %v12928_v60 = vadd.f32 %v6428_v26, %v12765_v13  ;;  %v12931_v34 = vadd.f32 %v6477_v20, %v12767_v8  ;;  %v6332_v54 = vpop.f32.mrf.mxu0  ;;  %v6381_v31 = vpop.f32.mrf.mxu1 }
 0x984   : > { %v12934_v35 = vadd.f32 %v6332_v54, %v12769_v10  ;;  %v12937_v5 = vadd.f32 %v6381_v31, %v12771_v25 }
 0x98a   : > { %v6430_v3 = vpop.f32.mrf.mxu2  ;;  %v6479_v29 = vpop.f32.mrf.mxu3 }
 0x98b   : > { %v12940_v23 = vadd.f32 %v6430_v3, %v12773_v62  ;;  %v12943_v2 = vadd.f32 %v6479_v29, %v12775_v16  ;;  %v6335_v13 = vpop.f32.mrf.mxu0  ;;  %v6384_v26 = vpop.f32.mrf.mxu1 }
 0x98c   : > { %v12946_v8 = vadd.f32 %v6335_v13, %v12777_v41  ;;  %v12949_v20 = vadd.f32 %v6384_v26, %v12779_v15 }
 0x992   : > { %v6433_v10 = vpop.f32.mrf.mxu2  ;;  %v6482_v54 = vpop.f32.mrf.mxu3 }
 0x993   : > { %v12952_v25 = vadd.f32 %v6433_v10, %v12781_v39  ;;  %v12955_v31 = vadd.f32 %v6482_v54, %v12783_v44  ;;  %v6337_v62 = vpop.f32.mrf.mxu0  ;;  %v6386_v3 = vpop.f32.mrf.mxu1 }
 0x994   : > { %v12958_v16 = vadd.f32 %v6337_v62, %v12785_v21  ;;  %v12961_v29 = vadd.f32 %v6386_v3, %v12787_v36  ;;  %v13685_v36 = vld [vmem:[#allocation91_spill] sm:$0xff] }
 0x996   : > { %13681 = vst [vmem:[#allocation103_spill] sm:$0xff] %v12958_v16 }
 0x997   : > { %13682 = vst [vmem:[#allocation104_spill] sm:$0xff] %v12961_v29  ;;  %v13687_v29 = vld [vmem:[#allocation92_spill] sm:$0xff] }
 0x99a   : > { %v6435_v41 = vpop.f32.mrf.mxu2  ;;  %v6484_v13 = vpop.f32.mrf.mxu3 }
 0x99b   : > { %v12964_v15 = vadd.f32 %v6435_v41, %v12789_v28  ;;  %v12967_v26 = vadd.f32 %v6484_v13, %v12791_v56  ;;  %v6340_v39 = vpop.f32.mrf.mxu0  ;;  %v6389_v10 = vpop.f32.mrf.mxu1  ;;  %v13689_v56 = vld [vmem:[#allocation93_spill] sm:$0xff] }
 0x99c   : > { %v12970_v44 = vadd.f32 %v6340_v39, %v12793_v30  ;;  %v12973_v54 = vadd.f32 %v6389_v10, %v12795_v50 }
 0x99d   : > { %13683 = vst [vmem:[#allocation105_spill] sm:$0xff] %v12964_v15 }
 0x99e   : > { %13684 = vst [vmem:[#allocation106_spill] sm:$0xff] %v12967_v26  ;;  %v13691_v26 = vld [vmem:[#allocation94_spill] sm:$0xff] }
 0x9a2   : > { %v6438_v21 = vpop.f32.mrf.mxu2  ;;  %v6487_v62 = vpop.f32.mrf.mxu3 }
 0x9a3   : > { %v12976_v3 = vadd.f32 %v6438_v21, %v13685_v36  ;;  %v12979_v16 = vadd.f32 %v6487_v62, %v13687_v29  ;;  %v6342_v28 = vpop.f32.mrf.mxu0  ;;  %v6391_v41 = vpop.f32.mrf.mxu1  ;;  %v13695_v29 = vld [vmem:[#allocation95_spill] sm:$0xff] }
 0x9a4   : > { %v12982_v13 = vadd.f32 %v6342_v28, %v13689_v56  ;;  %v12985_v15 = vadd.f32 %v6391_v41, %v13691_v26  ;;  %v13699_v26 = vld [vmem:[#allocation97_spill] sm:$0xff] }
 0x9a5   : > { %13686 = vst [vmem:[#allocation91_spill] sm:$0xff] %v12976_v3 }
 0x9a6   : > { %13688 = vst [vmem:[#allocation92_spill] sm:$0xff] %v12979_v16  ;;  %v13697_v16 = vld [vmem:[#allocation96_spill] sm:$0xff] }
 0x9a7   : > { %13690 = vst [vmem:[#allocation93_spill] sm:$0xff] %v12982_v13 }
 0x9a8   : > { %13692 = vst [vmem:[#allocation94_spill] sm:$0xff] %v12985_v15  ;;  %v13700_v15 = vld [vmem:[#allocation98_spill] sm:$0xff] }
 0x9aa   : > { %v6440_v30 = vpop.f32.mrf.mxu2  ;;  %v6489_v39 = vpop.f32.mrf.mxu3 }
 0x9ab   : > { %v12988_v50 = vadd.f32 %v6440_v30, %v12805_v11  ;;  %v12991_v10 = vadd.f32 %v6489_v39, %v12807_v48  ;;  %v6345_v21 = vpop.f32.mrf.mxu0  ;;  %v6394_v36 = vpop.f32.mrf.mxu1  ;;  %v13701_v48 = vld [vmem:[#allocation99_spill] sm:$0xff] }
 0x9ac   : > { %v12994_v62 = vadd.f32 %v6345_v21, %v13695_v29  ;;  %v12997_v3 = vadd.f32 %v6394_v36, %v13697_v16  ;;  %v13703_v16 = vld [vmem:[#allocation101_spill] sm:$0xff] }
 0x9ad   : > { %13693 = vst [vmem:[#allocation107_spill] sm:$0xff] %v12988_v50 }
 0x9ae   : > { %13694 = vst [vmem:[#allocation108_spill] sm:$0xff] %v12991_v10  ;;  %v13702_v10 = vld [vmem:[#allocation100_spill] sm:$0xff] }
 0x9af   : > { %13696 = vst [vmem:[#allocation95_spill] sm:$0xff] %v12994_v62 }
 0x9b0   : > { %13698 = vst [vmem:[#allocation96_spill] sm:$0xff] %v12997_v3  ;;  %v13704_v3 = vld [vmem:[#allocation102_spill] sm:$0xff] }
 0x9b2   : > { %v6443_v28 = vpop.f32.mrf.mxu2  ;;  %v6492_v56 = vpop.f32.mrf.mxu3 }
 0x9b3   : > { %v13000_v41 = vadd.f32 %v6443_v28, %v13699_v26  ;;  %v13003_v13 = vadd.f32 %v6492_v56, %v13700_v15  ;;  %v6347_v11 = vpop.f32.mrf.mxu0  ;;  %v6396_v30 = vpop.f32.mrf.mxu1 }
 0x9b4   : > { %v13006_v39 = vadd.f32 %v6347_v11, %v13701_v48  ;;  %v13009_v50 = vadd.f32 %v6396_v30, %v13702_v10 }
 0x9b7   : > { %6500 = sbr.rel (%p8597_p10) target bundleno = 2559 (0x9ff), region = 112 }
 0x9ba   : > { %v6445_v21 = vpop.f32.mrf.mxu2  ;;  %v6494_v29 = vpop.f32.mrf.mxu3 }
 0x9bb   : > { %v13012_v36 = vadd.f32 %v6445_v21, %v13703_v16  ;;  %v13015_v62 = vadd.f32 %v6494_v29, %v13704_v3 }
 0x9bc   : > { %v6501_v15 = vld [vmem:[%s13706_s3] sm:$0xf] }
 0x9bd   : > { %v6503_v3 = vperm.slane %v6501_v15, 0  ;;  %v6504_v10 = vperm.slane %v6501_v15, 1  ;;  %v6505_v28 = vperm.slane %v6501_v15, 2  ;;  %v6506_v56 = vperm.slane %v6501_v15, 3 }
 0x9bf   : > { %6511 = vst [vmem:[%s10340_s17] sm:$0xff] %v6503_v3 }
 0x9c0   : > { %6515 = vst [vmem:[%s10340_s17 + $0x20] sm:$0xff] %v6503_v3 }
 0x9c1   : > { %6519 = vst [vmem:[%s10340_s17 + $0x40] sm:$0xff] %v6503_v3 }
 0x9c2   : > { %6523 = vst [vmem:[%s10340_s17 + $0x60] sm:$0xff] %v6503_v3 }
 0x9c3   : > { %6527 = vst [vmem:[%s10340_s17 + $0x80] sm:$0xff] %v6503_v3 }
 0x9c4   : > { %6531 = vst [vmem:[%s10340_s17 + $0xa0] sm:$0xff] %v6503_v3 }
 0x9c5   : > { %6535 = vst [vmem:[%s10340_s17 + $0xc0] sm:$0xff] %v6503_v3 }
 0x9c6   : > { %6539 = vst [vmem:[%s10340_s17 + $0xe0] sm:$0xff] %v6503_v3 }
 0x9c7   : > { %6543 = vst [vmem:[%s10340_s17 + $0x100] sm:$0xff] %v6503_v3 }
 0x9c8   : > { %6547 = vst [vmem:[%s10340_s17 + $0x120] sm:$0xff] %v6503_v3 }
 0x9c9   : > { %6551 = vst [vmem:[%s10340_s17 + $0x140] sm:$0xff] %v6503_v3 }
 0x9ca   : > { %6555 = vst [vmem:[%s10340_s17 + $0x160] sm:$0xff] %v6503_v3 }
 0x9cb   : > { %6559 = vst [vmem:[%s10340_s17 + $0x180] sm:$0xff] %v6503_v3 }
 0x9cc   : > { %6563 = vst [vmem:[%s10340_s17 + $0x1a0] sm:$0xff] %v6503_v3 }
 0x9cd   : > { %6567 = vst [vmem:[%s10340_s17 + $0x1c0] sm:$0xff] %v6503_v3 }
 0x9ce   : > { %6571 = vst [vmem:[%s10340_s17 + $0x1e0] sm:$0xff] %v6503_v3 }
 0x9cf   : > { %6512 = vst [vmem:[%s10340_s17 + $0x8] sm:$0xff] %v6504_v10 }
 0x9d0   : > { %6516 = vst [vmem:[%s10340_s17 + $0x28] sm:$0xff] %v6504_v10 }
 0x9d1   : > { %6520 = vst [vmem:[%s10340_s17 + $0x48] sm:$0xff] %v6504_v10 }
 0x9d2   : > { %6524 = vst [vmem:[%s10340_s17 + $0x68] sm:$0xff] %v6504_v10 }
 0x9d3   : > { %6528 = vst [vmem:[%s10340_s17 + $0x88] sm:$0xff] %v6504_v10 }
 0x9d4   : > { %6532 = vst [vmem:[%s10340_s17 + $0xa8] sm:$0xff] %v6504_v10 }
 0x9d5   : > { %6536 = vst [vmem:[%s10340_s17 + $0xc8] sm:$0xff] %v6504_v10 }
 0x9d6   : > { %6540 = vst [vmem:[%s10340_s17 + $0xe8] sm:$0xff] %v6504_v10 }
 0x9d7   : > { %6544 = vst [vmem:[%s10340_s17 + $0x108] sm:$0xff] %v6504_v10 }
 0x9d8   : > { %6548 = vst [vmem:[%s10340_s17 + $0x128] sm:$0xff] %v6504_v10 }
 0x9d9   : > { %6552 = vst [vmem:[%s10340_s17 + $0x148] sm:$0xff] %v6504_v10 }
 0x9da   : > { %6556 = vst [vmem:[%s10340_s17 + $0x168] sm:$0xff] %v6504_v10 }
 0x9db   : > { %6560 = vst [vmem:[%s10340_s17 + $0x188] sm:$0xff] %v6504_v10 }
 0x9dc   : > { %6564 = vst [vmem:[%s10340_s17 + $0x1a8] sm:$0xff] %v6504_v10 }
 0x9dd   : > { %6568 = vst [vmem:[%s10340_s17 + $0x1c8] sm:$0xff] %v6504_v10 }
 0x9de   : > { %6572 = vst [vmem:[%s10340_s17 + $0x1e8] sm:$0xff] %v6504_v10 }
 0x9df   : > { %6513 = vst [vmem:[%s10340_s17 + $0x10] sm:$0xff] %v6505_v28 }
 0x9e0   : > { %6517 = vst [vmem:[%s10340_s17 + $0x30] sm:$0xff] %v6505_v28 }
 0x9e1   : > { %6521 = vst [vmem:[%s10340_s17 + $0x50] sm:$0xff] %v6505_v28 }
 0x9e2   : > { %6525 = vst [vmem:[%s10340_s17 + $0x70] sm:$0xff] %v6505_v28 }
 0x9e3   : > { %6529 = vst [vmem:[%s10340_s17 + $0x90] sm:$0xff] %v6505_v28 }
 0x9e4   : > { %6533 = vst [vmem:[%s10340_s17 + $0xb0] sm:$0xff] %v6505_v28 }
 0x9e5   : > { %6537 = vst [vmem:[%s10340_s17 + $0xd0] sm:$0xff] %v6505_v28 }
 0x9e6   : > { %6541 = vst [vmem:[%s10340_s17 + $0xf0] sm:$0xff] %v6505_v28 }
 0x9e7   : > { %6545 = vst [vmem:[%s10340_s17 + $0x110] sm:$0xff] %v6505_v28 }
 0x9e8   : > { %6549 = vst [vmem:[%s10340_s17 + $0x130] sm:$0xff] %v6505_v28 }
 0x9e9   : > { %6553 = vst [vmem:[%s10340_s17 + $0x150] sm:$0xff] %v6505_v28 }
 0x9ea   : > { %6557 = vst [vmem:[%s10340_s17 + $0x170] sm:$0xff] %v6505_v28 }
 0x9eb   : > { %6561 = vst [vmem:[%s10340_s17 + $0x190] sm:$0xff] %v6505_v28 }
 0x9ec   : > { %6565 = vst [vmem:[%s10340_s17 + $0x1b0] sm:$0xff] %v6505_v28 }
 0x9ed   : > { %6569 = vst [vmem:[%s10340_s17 + $0x1d0] sm:$0xff] %v6505_v28 }
 0x9ee   : > { %6573 = vst [vmem:[%s10340_s17 + $0x1f0] sm:$0xff] %v6505_v28 }
 0x9ef   : > { %6514 = vst [vmem:[%s10340_s17 + $0x18] sm:$0xff] %v6506_v56 }
 0x9f0   : > { %6518 = vst [vmem:[%s10340_s17 + $0x38] sm:$0xff] %v6506_v56 }
 0x9f1   : > { %6522 = vst [vmem:[%s10340_s17 + $0x58] sm:$0xff] %v6506_v56 }
 0x9f2   : > { %6526 = vst [vmem:[%s10340_s17 + $0x78] sm:$0xff] %v6506_v56 }
 0x9f3   : > { %6530 = vst [vmem:[%s10340_s17 + $0x98] sm:$0xff] %v6506_v56 }
 0x9f4   : > { %6534 = vst [vmem:[%s10340_s17 + $0xb8] sm:$0xff] %v6506_v56 }
 0x9f5   : > { %6538 = vst [vmem:[%s10340_s17 + $0xd8] sm:$0xff] %v6506_v56 }
 0x9f6   : > { %6542 = vst [vmem:[%s10340_s17 + $0xf8] sm:$0xff] %v6506_v56 }
 0x9f7   : > { %6546 = vst [vmem:[%s10340_s17 + $0x118] sm:$0xff] %v6506_v56 }
 0x9f8   : > { %6550 = vst [vmem:[%s10340_s17 + $0x138] sm:$0xff] %v6506_v56 }
 0x9f9   : > { %6554 = vst [vmem:[%s10340_s17 + $0x158] sm:$0xff] %v6506_v56 }
 0x9fa   : > { %6558 = vst [vmem:[%s10340_s17 + $0x178] sm:$0xff] %v6506_v56 }
 0x9fb   : > { %6562 = vst [vmem:[%s10340_s17 + $0x198] sm:$0xff] %v6506_v56 }
 0x9fc   : > { %6566 = vst [vmem:[%s10340_s17 + $0x1b8] sm:$0xff] %v6506_v56 }
 0x9fd   : > { %6570 = vst [vmem:[%s10340_s17 + $0x1d8] sm:$0xff] %v6506_v56 }
 0x9fe   : > { %6574 = vst [vmem:[%s10340_s17 + $0x1f8] sm:$0xff] %v6506_v56 }
 0x9ff PF: > { %v6575_v26 = vld [vmem:[%s10340_s17] sm:$0xff]  ;;  %v6576_v11 = vld [vmem:[%s10340_s17 + $0x8] sm:$0xff]  ;;  %v6577_v30 = vld [vmem:[%s10340_s17 + $0x10] sm:$0xff] }
 0xa00   : > { %v6639_v48 = vadd.f32 %v6575_v26, %v12826_v18  ;;  %v6640_v21 = vadd.f32 %v6576_v11, %v12829_v46  ;;  %v6641_v29 = vadd.f32 %v6577_v30, %v12832_v32  ;;  %v6578_v16 = vld [vmem:[%s10340_s17 + $0x18] sm:$0xff]  ;;  %v6579_v15 = vld [vmem:[%s10340_s17 + $0x20] sm:$0xff]  ;;  %v6580_v3 = vld [vmem:[%s10340_s17 + $0x28] sm:$0xff] }
 0xa01   : > { %v6642_v10 = vadd.f32 %v6578_v16, %v12835_v47  ;;  %v6581_v28 = vld [vmem:[%s10340_s17 + $0x30] sm:$0xff]  ;;  %v6643_v56 = vadd.f32 %v6579_v15, %v12838_v17  ;;  %v6582_v18 = vld [vmem:[%s10340_s17 + $0x38] sm:$0xff]  ;;  %v6644_v46 = vadd.f32 %v6580_v3, %v12841_v58  ;;  %v6583_v32 = vld [vmem:[%s10340_s17 + $0x40] sm:$0xff] }
 0xa02   : > { %6703 = vst [vmem:[%s10340_s17] sm:$0xff] %v6639_v48  ;;  %v6645_v26 = vadd.f32 %v6581_v28, %v12844_v27  ;;  %v6584_v47 = vld [vmem:[%s10340_s17 + $0x48] sm:$0xff]  ;;  %v6646_v11 = vadd.f32 %v6582_v18, %v12847_v22  ;;  %v6585_v17 = vld [vmem:[%s10340_s17 + $0x50] sm:$0xff]  ;;  %v6647_v30 = vadd.f32 %v6583_v32, %v12850_v37  ;;  %v6586_v58 = vld [vmem:[%s10340_s17 + $0x58] sm:$0xff] }
 0xa03   : > { %6704 = vst [vmem:[%s10340_s17 + $0x8] sm:$0xff] %v6640_v21  ;;  %v6648_v48 = vadd.f32 %v6584_v47, %v12853_v57  ;;  %v6587_v27 = vld [vmem:[%s10340_s17 + $0x60] sm:$0xff]  ;;  %v6649_v21 = vadd.f32 %v6585_v17, %v12856_v61  ;;  %v6588_v22 = vld [vmem:[%s10340_s17 + $0x68] sm:$0xff]  ;;  %v6589_v37 = vld [vmem:[%s10340_s17 + $0x70] sm:$0xff] }
 0xa04   : > { %6705 = vst [vmem:[%s10340_s17 + $0x10] sm:$0xff] %v6641_v29  ;;  %v6650_v29 = vadd.f32 %v6586_v58, %v12859_v63  ;;  %v6651_v16 = vadd.f32 %v6587_v27, %v12862_v49  ;;  %v6590_v57 = vld [vmem:[%s10340_s17 + $0x78] sm:$0xff]  ;;  %v6652_v15 = vadd.f32 %v6588_v22, %v12865_v7  ;;  %v6591_v61 = vld [vmem:[%s10340_s17 + $0x80] sm:$0xff]  ;;  %v6653_v3 = vadd.f32 %v6589_v37, %v12868_v40  ;;  %v6592_v63 = vld [vmem:[%s10340_s17 + $0x88] sm:$0xff] }
 0xa05   : > { %6706 = vst [vmem:[%s10340_s17 + $0x18] sm:$0xff] %v6642_v10  ;;  %v6654_v10 = vadd.f32 %v6590_v57, %v12871_v52  ;;  %v6593_v49 = vld [vmem:[%s10340_s17 + $0x90] sm:$0xff]  ;;  %v6655_v28 = vadd.f32 %v6591_v61, %v12874_v1  ;;  %v6594_v7 = vld [vmem:[%s10340_s17 + $0x98] sm:$0xff]  ;;  %v6595_v40 = vld [vmem:[%s10340_s17 + $0xa0] sm:$0xff] }
 0xa06   : > { %6707 = vst [vmem:[%s10340_s17 + $0x20] sm:$0xff] %v6643_v56  ;;  %v6656_v56 = vadd.f32 %v6592_v63, %v12877_v14  ;;  %v6657_v18 = vadd.f32 %v6593_v49, %v12880_v0  ;;  %v6596_v52 = vld [vmem:[%s10340_s17 + $0xa8] sm:$0xff]  ;;  %v6597_v1 = vld [vmem:[%s10340_s17 + $0xb0] sm:$0xff]  ;;  %v6659_v32 = vadd.f32 %v6595_v40, %v12886_v45  ;;  %v6598_v14 = vld [vmem:[%s10340_s17 + $0xb8] sm:$0xff] }
 0xa07   : > { %6708 = vst [vmem:[%s10340_s17 + $0x28] sm:$0xff] %v6644_v46  ;;  %v6658_v46 = vadd.f32 %v6594_v7, %v12883_v24  ;;  %v6599_v0 = vld [vmem:[%s10340_s17 + $0xc0] sm:$0xff]  ;;  %v6661_v47 = vadd.f32 %v6597_v1, %v12892_v53  ;;  %v6600_v24 = vld [vmem:[%s10340_s17 + $0xc8] sm:$0xff]  ;;  %v6601_v45 = vld [vmem:[%s10340_s17 + $0xd0] sm:$0xff] }
 0xa08   : > { %6709 = vst [vmem:[%s10340_s17 + $0x30] sm:$0xff] %v6645_v26  ;;  %v6660_v26 = vadd.f32 %v6596_v52, %v12889_v12  ;;  %v6663_v17 = vadd.f32 %v6599_v0, %v12898_v33  ;;  %v6602_v12 = vld [vmem:[%s10340_s17 + $0xd8] sm:$0xff]  ;;  %v6603_v53 = vld [vmem:[%s10340_s17 + $0xe0] sm:$0xff]  ;;  %v6665_v58 = vadd.f32 %v6601_v45, %v12904_v38  ;;  %v6605_v33 = vld [vmem:[%s10340_s17 + $0xf0] sm:$0xff] }
 0xa09   : > { %6710 = vst [vmem:[%s10340_s17 + $0x38] sm:$0xff] %v6646_v11  ;;  %v6662_v11 = vadd.f32 %v6598_v14, %v12895_v42  ;;  %v6604_v42 = vld [vmem:[%s10340_s17 + $0xe8] sm:$0xff]  ;;  %v6667_v27 = vadd.f32 %v6603_v53, %v12910_v51  ;;  %v6607_v38 = vld [vmem:[%s10340_s17 + $0x100] sm:$0xff]  ;;  %v6669_v22 = vadd.f32 %v6605_v33, %v12916_v59  ;;  %v6609_v51 = vld [vmem:[%s10340_s17 + $0x110] sm:$0xff] }
 0xa0a   : > { %6711 = vst [vmem:[%s10340_s17 + $0x40] sm:$0xff] %v6647_v30  ;;  %v6664_v30 = vadd.f32 %v6600_v24, %v12901_v4  ;;  %v6606_v4 = vld [vmem:[%s10340_s17 + $0xf8] sm:$0xff]  ;;  %v6671_v37 = vadd.f32 %v6607_v38, %v12922_v43  ;;  %v6611_v59 = vld [vmem:[%s10340_s17 + $0x120] sm:$0xff]  ;;  %v6673_v57 = vadd.f32 %v6609_v51, %v12928_v60  ;;  %v6613_v43 = vld [vmem:[%s10340_s17 + $0x130] sm:$0xff] }
 0xa0b   : > { %6712 = vst [vmem:[%s10340_s17 + $0x48] sm:$0xff] %v6648_v48  ;;  %v6666_v48 = vadd.f32 %v6602_v12, %v12907_v19  ;;  %v6608_v19 = vld [vmem:[%s10340_s17 + $0x108] sm:$0xff]  ;;  %v6675_v61 = vadd.f32 %v6611_v59, %v12934_v35  ;;  %v6615_v60 = vld [vmem:[%s10340_s17 + $0x140] sm:$0xff]  ;;  %v6677_v63 = vadd.f32 %v6613_v43, %v12940_v23  ;;  %v6617_v35 = vld [vmem:[%s10340_s17 + $0x150] sm:$0xff] }
 0xa0c   : > { %6713 = vst [vmem:[%s10340_s17 + $0x50] sm:$0xff] %v6649_v21  ;;  %v6668_v21 = vadd.f32 %v6604_v42, %v12913_v9  ;;  %v6610_v9 = vld [vmem:[%s10340_s17 + $0x118] sm:$0xff]  ;;  %v6679_v49 = vadd.f32 %v6615_v60, %v12946_v8  ;;  %v6619_v23 = vld [vmem:[%s10340_s17 + $0x160] sm:$0xff]  ;;  %v6681_v7 = vadd.f32 %v6617_v35, %v12952_v25  ;;  %v6621_v8 = vld [vmem:[%s10340_s17 + $0x170] sm:$0xff] }
 0xa0d   : > { %6714 = vst [vmem:[%s10340_s17 + $0x58] sm:$0xff] %v6650_v29  ;;  %v6670_v29 = vadd.f32 %v6606_v4, %v12919_v55  ;;  %v6612_v55 = vld [vmem:[%s10340_s17 + $0x128] sm:$0xff]  ;;  %v13708_v52 = vld [vmem:[#allocation104_spill] sm:$0xff]  ;;  %v6623_v25 = vld [vmem:[%s10340_s17 + $0x180] sm:$0xff] }
 0xa0e   : > { %6715 = vst [vmem:[%s10340_s17 + $0x60] sm:$0xff] %v6651_v16  ;;  %v6672_v16 = vadd.f32 %v6608_v19, %v12925_v6  ;;  %v6614_v6 = vld [vmem:[%s10340_s17 + $0x138] sm:$0xff]  ;;  %v13707_v40 = vld [vmem:[#allocation103_spill] sm:$0xff]  ;;  %v13710_v14 = vld [vmem:[#allocation106_spill] sm:$0xff] }
 0xa0f   : > { %6716 = vst [vmem:[%s10340_s17 + $0x68] sm:$0xff] %v6652_v15  ;;  %v6674_v15 = vadd.f32 %v6610_v9, %v12931_v34  ;;  %v6616_v34 = vld [vmem:[%s10340_s17 + $0x148] sm:$0xff]  ;;  %v13709_v1 = vld [vmem:[#allocation105_spill] sm:$0xff]  ;;  %v6625_v0 = vld [vmem:[%s10340_s17 + $0x190] sm:$0xff] }
 0xa10   : > { %6717 = vst [vmem:[%s10340_s17 + $0x70] sm:$0xff] %v6653_v3  ;;  %v6676_v3 = vadd.f32 %v6612_v55, %v12937_v5  ;;  %v6618_v5 = vld [vmem:[%s10340_s17 + $0x158] sm:$0xff]  ;;  %v6627_v45 = vld [vmem:[%s10340_s17 + $0x1a0] sm:$0xff]  ;;  %v13712_v53 = vld [vmem:[#allocation92_spill] sm:$0xff] }
 0xa11   : > { %6718 = vst [vmem:[%s10340_s17 + $0x78] sm:$0xff] %v6654_v10  ;;  %v6678_v10 = vadd.f32 %v6614_v6, %v12943_v2  ;;  %v6620_v2 = vld [vmem:[%s10340_s17 + $0x168] sm:$0xff]  ;;  %v6626_v24 = vld [vmem:[%s10340_s17 + $0x198] sm:$0xff]  ;;  %v13714_v33 = vld [vmem:[#allocation94_spill] sm:$0xff] }
 0xa12   : > { %6719 = vst [vmem:[%s10340_s17 + $0x80] sm:$0xff] %v6655_v28  ;;  %v6680_v28 = vadd.f32 %v6616_v34, %v12949_v20  ;;  %v6622_v20 = vld [vmem:[%s10340_s17 + $0x178] sm:$0xff]  ;;  %v6631_v4 = vld [vmem:[%s10340_s17 + $0x1c0] sm:$0xff]  ;;  %v13716_v19 = vld [vmem:[#allocation108_spill] sm:$0xff] }
 0xa13   : > { %6720 = vst [vmem:[%s10340_s17 + $0x88] sm:$0xff] %v6656_v56  ;;  %v6682_v56 = vadd.f32 %v6618_v5, %v12955_v31  ;;  %v6624_v31 = vld [vmem:[%s10340_s17 + $0x188] sm:$0xff]  ;;  %v13713_v42 = vld [vmem:[#allocation93_spill] sm:$0xff]  ;;  %v6633_v51 = vld [vmem:[%s10340_s17 + $0x1d0] sm:$0xff] }
 0xa14   : > { %6721 = vst [vmem:[%s10340_s17 + $0x90] sm:$0xff] %v6657_v18  ;;  %v6683_v18 = vadd.f32 %v6619_v23, %v13707_v40  ;;  %v13718_v59 = vld [vmem:[#allocation96_spill] sm:$0xff]  ;;  %v6635_v55 = vld [vmem:[%s10340_s17 + $0x1e0] sm:$0xff]  ;;  %v6636_v43 = vld [vmem:[%s10340_s17 + $0x1e8] sm:$0xff] }
 0xa15   : > { %6722 = vst [vmem:[%s10340_s17 + $0x98] sm:$0xff] %v6658_v46  ;;  %v6684_v46 = vadd.f32 %v6620_v2, %v13708_v52  ;;  %v6637_v6 = vld [vmem:[%s10340_s17 + $0x1f0] sm:$0xff]  ;;  %v6638_v60 = vld [vmem:[%s10340_s17 + $0x1f8] sm:$0xff] }
 0xa16   : > { %6723 = vst [vmem:[%s10340_s17 + $0xa0] sm:$0xff] %v6659_v32  ;;  %v6685_v32 = vadd.f32 %v6621_v8, %v13709_v1  ;;  %v6701_v34 = vadd.f32 %v6637_v6, %v13012_v36 }
 0xa17   : > { %6724 = vst [vmem:[%s10340_s17 + $0xa8] sm:$0xff] %v6660_v26  ;;  %v6686_v26 = vadd.f32 %v6622_v20, %v13710_v14 }
 0xa18   : > { %6725 = vst [vmem:[%s10340_s17 + $0xb0] sm:$0xff] %v6661_v47  ;;  %v6687_v47 = vadd.f32 %v6623_v25, %v12970_v44  ;;  %v6629_v44 = vld [vmem:[%s10340_s17 + $0x1b0] sm:$0xff] }
 0xa19   : > { %6726 = vst [vmem:[%s10340_s17 + $0xb8] sm:$0xff] %v6662_v11  ;;  %v6688_v11 = vadd.f32 %v6624_v31, %v12973_v54  ;;  %v6630_v54 = vld [vmem:[%s10340_s17 + $0x1b8] sm:$0xff] }
 0xa1a   : > { %6727 = vst [vmem:[%s10340_s17 + $0xc0] sm:$0xff] %v6663_v17  ;;  %v13711_v17 = vld [vmem:[#allocation91_spill] sm:$0xff] }
 0xa1b   : > { %6728 = vst [vmem:[%s10340_s17 + $0xc8] sm:$0xff] %v6664_v30  ;;  %v6689_v12 = vadd.f32 %v6625_v0, %v13711_v17  ;;  %v6628_v30 = vld [vmem:[%s10340_s17 + $0x1a8] sm:$0xff] }
 0xa1c   : > { %6729 = vst [vmem:[%s10340_s17 + $0xd0] sm:$0xff] %v6665_v58  ;;  %v6690_v58 = vadd.f32 %v6626_v24, %v13712_v53 }
 0xa1d   : > { %6730 = vst [vmem:[%s10340_s17 + $0xd8] sm:$0xff] %v6666_v48  ;;  %v6691_v48 = vadd.f32 %v6627_v45, %v13713_v42 }
 0xa1e   : > { %6731 = vst [vmem:[%s10340_s17 + $0xe0] sm:$0xff] %v6667_v27  ;;  %v6692_v27 = vadd.f32 %v6628_v30, %v13714_v33 }
 0xa1f   : > { %6732 = vst [vmem:[%s10340_s17 + $0xe8] sm:$0xff] %v6668_v21  ;;  %v13715_v21 = vld [vmem:[#allocation107_spill] sm:$0xff] }
 0xa20   : > { %6733 = vst [vmem:[%s10340_s17 + $0xf0] sm:$0xff] %v6669_v22  ;;  %v6693_v38 = vadd.f32 %v6629_v44, %v13715_v21  ;;  %v6632_v22 = vld [vmem:[%s10340_s17 + $0x1c8] sm:$0xff] }
 0xa21   : > { %6734 = vst [vmem:[%s10340_s17 + $0xf8] sm:$0xff] %v6670_v29  ;;  %v6694_v29 = vadd.f32 %v6630_v54, %v13716_v19 }
 0xa22   : > { %6735 = vst [vmem:[%s10340_s17 + $0x100] sm:$0xff] %v6671_v37  ;;  %v13717_v37 = vld [vmem:[#allocation95_spill] sm:$0xff] }
 0xa23   : > { %6736 = vst [vmem:[%s10340_s17 + $0x108] sm:$0xff] %v6672_v16  ;;  %v6695_v9 = vadd.f32 %v6631_v4, %v13717_v37  ;;  %v6634_v16 = vld [vmem:[%s10340_s17 + $0x1d8] sm:$0xff] }
 0xa24   : > { %6737 = vst [vmem:[%s10340_s17 + $0x110] sm:$0xff] %v6673_v57  ;;  %v6696_v57 = vadd.f32 %v6632_v22, %v13718_v59 }
 0xa25   : > { %6738 = vst [vmem:[%s10340_s17 + $0x118] sm:$0xff] %v6674_v15  ;;  %v6697_v15 = vadd.f32 %v6633_v51, %v13000_v41  ;;  %v6702_v41 = vadd.f32 %v6638_v60, %v13015_v62 }
 0xa26   : > { %6739 = vst [vmem:[%s10340_s17 + $0x120] sm:$0xff] %v6675_v61  ;;  %v6698_v61 = vadd.f32 %v6634_v16, %v13003_v13 }
 0xa27   : > { %6740 = vst [vmem:[%s10340_s17 + $0x128] sm:$0xff] %v6676_v3  ;;  %v6699_v3 = vadd.f32 %v6635_v55, %v13006_v39 }
 0xa28   : > { %6741 = vst [vmem:[%s10340_s17 + $0x130] sm:$0xff] %v6677_v63  ;;  %v6700_v63 = vadd.f32 %v6636_v43, %v13009_v50 }
 0xa29   : > { %6742 = vst [vmem:[%s10340_s17 + $0x138] sm:$0xff] %v6678_v10 }
 0xa2a   : > { %6743 = vst [vmem:[%s10340_s17 + $0x140] sm:$0xff] %v6679_v49 }
 0xa2b   : > { %6744 = vst [vmem:[%s10340_s17 + $0x148] sm:$0xff] %v6680_v28 }
 0xa2c   : > { %6745 = vst [vmem:[%s10340_s17 + $0x150] sm:$0xff] %v6681_v7 }
 0xa2d   : > { %6746 = vst [vmem:[%s10340_s17 + $0x158] sm:$0xff] %v6682_v56 }
 0xa2e   : > { %6747 = vst [vmem:[%s10340_s17 + $0x160] sm:$0xff] %v6683_v18 }
 0xa2f   : > { %6748 = vst [vmem:[%s10340_s17 + $0x168] sm:$0xff] %v6684_v46 }
 0xa30   : > { %6749 = vst [vmem:[%s10340_s17 + $0x170] sm:$0xff] %v6685_v32 }
 0xa31   : > { %6750 = vst [vmem:[%s10340_s17 + $0x178] sm:$0xff] %v6686_v26 }
 0xa32   : > { %6751 = vst [vmem:[%s10340_s17 + $0x180] sm:$0xff] %v6687_v47 }
 0xa33   : > { %6752 = vst [vmem:[%s10340_s17 + $0x188] sm:$0xff] %v6688_v11 }
 0xa34   : > { %6753 = vst [vmem:[%s10340_s17 + $0x190] sm:$0xff] %v6689_v12 }
 0xa35   : > { %6754 = vst [vmem:[%s10340_s17 + $0x198] sm:$0xff] %v6690_v58 }
 0xa36   : > { %6755 = vst [vmem:[%s10340_s17 + $0x1a0] sm:$0xff] %v6691_v48 }
 0xa37   : > { %6756 = vst [vmem:[%s10340_s17 + $0x1a8] sm:$0xff] %v6692_v27 }
 0xa38   : > { %6757 = vst [vmem:[%s10340_s17 + $0x1b0] sm:$0xff] %v6693_v38 }
 0xa39   : > { %6758 = vst [vmem:[%s10340_s17 + $0x1b8] sm:$0xff] %v6694_v29 }
 0xa3a   : > { %6759 = vst [vmem:[%s10340_s17 + $0x1c0] sm:$0xff] %v6695_v9 }
 0xa3b   : > { %6760 = vst [vmem:[%s10340_s17 + $0x1c8] sm:$0xff] %v6696_v57 }
 0xa3c   : > { %6761 = vst [vmem:[%s10340_s17 + $0x1d0] sm:$0xff] %v6697_v15 }
 0xa3d   : > { %6762 = vst [vmem:[%s10340_s17 + $0x1d8] sm:$0xff] %v6698_v61 }
 0xa3e   : > { %6763 = vst [vmem:[%s10340_s17 + $0x1e0] sm:$0xff] %v6699_v3 }
 0xa3f   : > { %6764 = vst [vmem:[%s10340_s17 + $0x1e8] sm:$0xff] %v6700_v63 }
 0xa40   : > { %6765 = vst [vmem:[%s10340_s17 + $0x1f0] sm:$0xff] %v6701_v34 }
 0xa41   : > { %6766 = vst [vmem:[%s10340_s17 + $0x1f8] sm:$0xff] %v6702_v41 }
 0xa42 PF: > { %s13719_s5 = sld [smem:[#allocation35_spill]]  ;;  %s6783_s9 = sshll.u32 %s10340_s17, 4  ;;  %s6784_s9 = int_to_ptr.vmem [resolvable:$true] %s6783_s9 }
 0xa43   : > { %s13720_s16 = sld [smem:[#allocation36_spill]]  ;;  %s6768_s4 = scalar_lea.sflag [#allocation8], %s10287_s8 }
 0xa44   : > { %s13722_s11 = sld [smem:[#allocation120_spill]] }
 0xa48   : > { %s8981_s29 = sshll.u32 %s13719_s5, 6 }
 0xa49   : > { %s8601_s19 = sshll.u32 %s13720_s16, 7 }
 0xa4a   : > { %s6780_s27 = sadd.s32 %s8981_s29, %s8601_s19  ;;  %s9678_s17 = scalar_lea.hbm %s13722_s11, 2048 }
 0xa4b   : > { %s8602_s0 = sshll.u32 %s6780_s27, 3 }
 0xa4c   : > { %s6782_s21 = scalar_lea.hbm %s13722_s11, %s8602_s0 }
 0xa4d   : > { %s6785_s30 = sshll.u32 %s6782_s21, 4  ;;  %s6786_s30 = int_to_ptr.hbm [resolvable:$true] %s6785_s30 }
 0xa4e   : > { %s9672_s10 = sshra.s32 %s6786_s30, 4  ;;  %s9673_s10 = int_to_ptr.hbm [resolvable:$true] %s9672_s10 }
 0xa4f   : > { %s9674_s2 = scalar_lea.hbm %s9673_s10, 512  ;;  %p9679_p6 = scmp.lt.s32.totalorder %s9673_s10, %s13722_s11 }
 0xa50   : > { %p9675_p0 = scmp.ne.s32.totalorder %s9673_s10, %s9674_s2  ;;  %p9680_p5 = scmp.lt.s32.totalorder %s9678_s17, %s9674_s2 }
 0xa52   : > { %p9676_p2 = pnand %p9675_p0, %p10206_p12  ;;  %p9681_p9 = por %p9680_p5, %p9679_p6 }
 0xa54   : > { %p9677_p13 = pneg %p9676_p2 }
 0xa56   : > { %p9682_p1 = pnand %p9681_p9, %p9677_p13 }
 0xa58   : > { %9685 = shalt.err (!%p9682_p1)
}
 0xa59   : > { %s9862_s8 = smov 512   ;;  %s9863_s6 = smov 32  }
 0xa5a   : > { %9000 = dma.vmem_to_hbm [thread:$0]  (%p10206_p12), %s6784_s9, 8192, %s6786_s30, %s6768_s4, %s9862_s8, %s9862_s8, %s9863_s6  }
 0xa5b PF: > { %s13723_s3 = sld [smem:[#allocation31_spill]]  ;;  %p9035_p8 = scmp.ge.s32.totalorder %s9852_s15, 2 }
 0xa5d   : > { %p9031_p7 = pnand %p9035_p8, %p10213_p3 }
 0xa5f   : > { %p9032_p11 = pneg %p9031_p7 }
 0xa61   : > { %s6800_s16 = sand.u32 1, %s13723_s3  }
 0xa62   : > { %s6801_s29 = scalar_lea.sflag [#allocation8], %s6800_s16 }
 0xa63   : > { %9779 = dma.done.wait (%p9032_p11), %s6801_s29, 8192  }
 0xa64   : > { %9781 = vsyncadd (%p9032_p11), %s6801_s29, 4294959104  ;;  %s39_s15 = sadd.s32 1, %s9852_s15   ;;  %s13727_s17 = sld [smem:[#allocation28_spill]] }
 0xa65   : > { %p13299_p4 = scmp.ge.s32.totalorder %s39_s15, 18   ;;  %s13728_s18 = sld [smem:[#allocation29_spill]] }
 0xa66   : > { %s13729_s19 = sld [smem:[#allocation49_spill]]  ;;  %s13739_s21 = smov %s9804_s22 }
 0xa67   : > { %s13730_s20 = sld [smem:[#allocation30_spill]]  ;;  %s13740_s22 = smov %s10229_s24 }
 0xa68   : > { %s13731_s23 = sld [smem:[#allocation32_spill]]  ;;  %s13741_s24 = smov %s9816_s25 }
 0xa69   : > { %s13732_s7 = sld [smem:[#allocation53_spill]]  ;;  %s13743_s27 = smov %s9840_s12 }
 0xa6a   : > { %s13733_s26 = sld [smem:[#allocation37_spill]]  ;;  %s13744_s28 = smov %s9844_s13 }
 0xa6b   : > { %s13734_s30 = sld [smem:[#allocation39_spill]]  ;;  %s13745_s29 = smov %s9848_s14 }
 0xa6c   : > { %s13735_s9 = sld [smem:[#allocation46_spill]] }
 0xa6d   : > { %s13736_s0 = sld [smem:[#allocation48_spill]] }
 0xa6e   : > { %s13737_s1 = sld [smem:[#allocation50_spill]] }
 0xa6f   : > { %s13742_s25 = smov %s13732_s7 }
 0xa70   :  { %38 = sbr.rel (!%p13299_p4) target bundleno = 33 (0x21), region = 223 }
 0xa72   : > { %s13746_s12 = smov %s13735_s9 }
 0xa73   : > { %s13747_s13 = smov %s13736_s0 }
 0xa74   : > { %s13748_s14 = smov %s13737_s1 }
 0xa75   :  { %6807 = vsyncpa [#allocation7], 1 }
 0xa76   :  { %6809 = vsyncpa [#allocation7 + $0x1], 1 }
 0xa77   :  { %6810 = vsyncpa [#allocation10], 1 }
 0xa78   :  { %6812 = vsyncpa [#allocation10 + $0x1], 1 }
 0xa79   :  { %6813 = vsyncpa [#allocation13], 1 }
 0xa7a   :  { %6815 = vsyncpa [#allocation13 + $0x1], 1 }
 0xa7b   :  { %6816 = vsyncpa [#allocation16], 1 }
 0xa7c   :  { %6818 = vsyncpa [#allocation16 + $0x1], 1 }
 0xa7d   :  { %6819 = vsyncpa [#allocation19], 1 }
 0xa7e   :  { %6821 = vsyncpa [#allocation19 + $0x1], 1 }
 0xa7f   :  { %6822 = vsyncpa [#allocation8], 1 }
 0xa80   :  { %6824 = vsyncpa [#allocation8 + $0x1], 1 }

</bundles_post_ra>
